<compile_context>
chip_gen: v6e
topology: v6e:2x2x1
jax: 0.10.0
libtpu: 0.0.40
codegen_flags: <defaults>
</compile_context>

<pallas_src>
import jax
import jax.numpy as jnp
from jax import lax
from jax.experimental import pallas as pl
from jax.experimental.pallas import tpu as pltpu


def _round_up(x, m):
    return (x + m - 1) // m * m


def _build_kernel(*, kt, kh, kw, c_in, st, sh, sw, h_out, w_out, k_raw, k_pad):
    m_rows = h_out * w_out

    def kernel(x_ref, w_ref, o_ref, lhs_ref):
        # x_ref  : (T_pad, H_pad, W_pad, C_in)  bf16   one batch element
        # w_ref  : (K_pad, C_out_pad)           bf16   full weight slab
        # o_ref  : (H_out*W_out, C_out_pad)     f32    one output frame
        # lhs_ref: (H_out, W_out, K_pad)        bf16   im2col scratch
        t0 = pl.program_id(1) * st

        # Keep the zero K-padding columns exact every step (scratch persists
        # across grid iterations; no init-once pattern -> megacore safe).
        if k_pad > k_raw:
            lhs_ref[:, :, k_raw:] = jnp.zeros(
                (h_out, w_out, k_pad - k_raw), jnp.bfloat16)

        # Fused im2col: static loop over the receptive-field taps; each tap is
        # a (H_out, W_out, C_in) shifted window copied into its K-column slot.
        for it in range(kt):
            t_idx = t0 + it
            for ih in range(kh):
                hs = pl.ds(ih, h_out) if sh == 1 else pl.ds(ih, h_out, stride=sh)
                for iw in range(kw):
                    ws = pl.ds(iw, w_out) if sw == 1 else pl.ds(iw, w_out, stride=sw)
                    tap = (it * kh + ih) * kw + iw
                    lhs_ref[:, :, tap * c_in:(tap + 1) * c_in] = (
                        x_ref[t_idx, hs, ws, :])

        # One lane-dense MXU matmul per output frame, f32 accumulation.
        lhs = lhs_ref[...].reshape(m_rows, k_pad)
        o_ref[...] = jnp.dot(lhs, w_ref[...], preferred_element_type=jnp.float32)

    return kernel


def spatio_temporal_conv(x, weight, stride=(1, 1, 1), padding=(0, 0, 0)):
    """Forward of SpatioTemporalConv: a single Conv3d, bias=False.

    x:      (N, C_in, T, H, W)       float32 (PyTorch NCDHW)
    weight: (C_out, C_in, KT, KH, KW)
    returns (N, C_out, T_out, H_out, W_out) float32
    """
    st, sh, sw = stride
    pt, ph, pw = padding
    n, c_in, t, h, w = x.shape
    c_out, c_in_w, kt, kh, kw = weight.shape
    assert c_in_w == c_in

    # Channels-last, zero-pad, cast to bf16 ONCE (before any per-tap expansion).
    x_cl = jnp.transpose(x, (0, 2, 3, 4, 1))                      # (N,T,H,W,Cin)
    x_pad = jnp.pad(x_cl, ((0, 0), (pt, pt), (ph, ph), (pw, pw), (0, 0))
                    ).astype(jnp.bfloat16)
    t_pad, h_pad, w_pad = t + 2 * pt, h + 2 * ph, w + 2 * pw
    t_out = (t_pad - kt) // st + 1
    h_out = (h_pad - kh) // sh + 1
    w_out = (w_pad - kw) // sw + 1

    k_raw = kt * kh * kw * c_in
    k_pad = _round_up(k_raw, 128)
    c_out_pad = _round_up(c_out, 128)
    m_rows = h_out * w_out

    # (C_out,C_in,KT,KH,KW) -> (KT,KH,KW,C_in,C_out) -> (K_raw,C_out), zero
    # padded to (K_pad, C_out_pad): MXU operand and output stores are lane
    # dense; extra rows/cols are zeros so results stay exact.
    w_mat = jnp.transpose(weight, (2, 3, 4, 1, 0)).reshape(k_raw, c_out)
    rhs = jnp.pad(w_mat, ((0, k_pad - k_raw), (0, c_out_pad - c_out))
                  ).astype(jnp.bfloat16)

    kernel = _build_kernel(kt=kt, kh=kh, kw=kw, c_in=c_in, st=st, sh=sh, sw=sw,
                           h_out=h_out, w_out=w_out, k_raw=k_raw, k_pad=k_pad)

    flops = 2 * n * t_out * m_rows * k_pad * c_out_pad
    bytes_accessed = (x_pad.size * 2 + rhs.size * 2
                      + n * t_out * m_rows * c_out_pad * 4)

    out4 = pl.pallas_call(
        kernel,
        out_shape=jax.ShapeDtypeStruct((n, t_out, m_rows, c_out_pad),
                                       jnp.float32),
        grid_spec=pltpu.PrefetchScalarGridSpec(
            num_scalar_prefetch=0,
            grid=(n, t_out),
            in_specs=[
                # One batch element's full padded slab; block index depends
                # only on the batch axis -> DMA'd once per batch element and
                # reused for all T_out steps (no HBM im2col inflation).
                pl.BlockSpec((None, t_pad, h_pad, w_pad, c_in),
                             lambda b, ti: (b, 0, 0, 0, 0)),
                # Small constant weight slab, VMEM resident.
                pl.BlockSpec((k_pad, c_out_pad), lambda b, ti: (0, 0)),
            ],
            out_specs=pl.BlockSpec((None, None, m_rows, c_out_pad),
                                   lambda b, ti: (b, ti, 0, 0)),
            scratch_shapes=[pltpu.VMEM((h_out, w_out, k_pad), jnp.bfloat16)],
        ),
        compiler_params=pltpu.CompilerParams(
            dimension_semantics=("parallel", "parallel"),
            vmem_limit_bytes=32 * 1024 * 1024),
        cost_estimate=pl.CostEstimate(flops=flops, transcendentals=0,
                                      bytes_accessed=bytes_accessed),
    )(x_pad, rhs)

    out = out4[:, :, :, :c_out].reshape(n, t_out, h_out, w_out, c_out)
    # back to PyTorch NCDHW
    return jnp.transpose(out, (0, 4, 1, 2, 3)).astype(x.dtype)


if __name__ == "__main__":
    key = jax.random.PRNGKey(0)
    kx, kw_key = jax.random.split(key)

    # small shapes consistent with a video conv: N=2, C_in=4, T=8, H=W=16
    N, C_IN, T, H, W = 2, 4, 8, 16, 16
    C_OUT, K = 8, 3
    STRIDE = (1, 1, 1)
    PADDING = (1, 1, 1)

    x = jax.random.normal(kx, (N, C_IN, T, H, W), dtype=jnp.float32)

    # deterministic in-script init (kaiming-style scale), bias=False as in module
    fan_in = C_IN * K * K * K
    weight = jax.random.normal(kw_key, (C_OUT, C_IN, K, K, K), dtype=jnp.float32) \
        / jnp.sqrt(jnp.float32(fan_in))

    out = spatio_temporal_conv(x, weight, stride=STRIDE, padding=PADDING)
    out = jax.block_until_ready(out)

    pad_pairs = [(PADDING[0], PADDING[0]), (PADDING[1], PADDING[1]),
                 (PADDING[2], PADDING[2])]
    dn = ("NCDHW", "OIDHW", "NCDHW")

    # Strict check: reference computed from the same bf16-rounded operands
    # (tests the fused im2col / weight-layout / matmul logic exactly).
    xq = x.astype(jnp.bfloat16).astype(jnp.float32)
    wq = weight.astype(jnp.bfloat16).astype(jnp.float32)
    ref_q = lax.conv_general_dilated(
        xq, wq, window_strides=STRIDE, padding=pad_pairs,
        dimension_numbers=dn, precision=lax.Precision.HIGHEST,
        preferred_element_type=jnp.float32)
    assert out.shape == ref_q.shape, (out.shape, ref_q.shape)
    assert jnp.allclose(out, ref_q, atol=1e-3, rtol=1e-3), \
        float(jnp.max(jnp.abs(out - ref_q)))

    # Loose check against the full-precision f32 reference (bf16 inputs with
    # f32 accumulation -> small quantization error only).
    ref_f32 = lax.conv_general_dilated(
        x, weight, window_strides=STRIDE, padding=pad_pairs,
        dimension_numbers=dn, precision=lax.Precision.HIGHEST,
        preferred_element_type=jnp.float32)
    assert jnp.allclose(out, ref_f32, atol=7.5e-2, rtol=7.5e-2), \
        float(jnp.max(jnp.abs(out - ref_f32)))

    print("KERNEL_OK")
</pallas_src>

<mosaic_0001>
module attributes {stable_mosaic.version = 11 : i64} {
  func.func @kernel(%arg0: i32, %arg1: i32, %arg2: memref<1x10x18x18x4xbf16, #tpu.memory_space<vmem>>, %arg3: memref<128x128xbf16, #tpu.memory_space<vmem>>, %arg4: memref<1x1x256x128xf32, #tpu.memory_space<vmem>>, %arg5: memref<16x16x128xbf16, #tpu.memory_space<vmem>>) attributes {dimension_semantics = [#tpu.dimension_semantics<parallel>, #tpu.dimension_semantics<parallel>], iteration_bounds = array<i64: 2, 8>, scalar_prefetch = 0 : i64, scratch_operands = 1 : i64, tpu.core_type = #tpu.core_type<tc>, window_params = [{transform_indices = @transform_0, window_bounds = array<i64: 1, 10, 18, 18, 4>}, {pipeline_mode = #tpu.pipeline_mode<synchronous>, transform_indices = @transform_1, window_bounds = array<i64: 128, 128>}, {transform_indices = @transform_2, window_bounds = array<i64: 1, 1, 256, 128>}]} {
    %c1_i32 = arith.constant 1 : i32
    %0 = arith.muli %arg1, %c1_i32 : i32
    %cst = arith.constant 0.000000e+00 : bf16
    %1 = vector.broadcast %cst : bf16 to vector<16x16x20xbf16>
    %c0 = arith.constant 0 : index
    %c0_0 = arith.constant 0 : index
    %c108 = arith.constant 108 : index
    %2 = vector.load %arg5[%c0, %c0_0, %c108] : memref<16x16x128xbf16, #tpu.memory_space<vmem>>, vector<16x16x20xbf16>
    tpu.vector_store %arg5[%c0, %c0_0, %c108], %1 {strides = array<i32>} : memref<16x16x128xbf16, #tpu.memory_space<vmem>>, vector<16x16x20xbf16>,
    %c0_i32 = arith.constant 0 : i32
    %3 = arith.addi %0, %c0_i32 : i32
    %c0_1 = arith.constant 0 : index
    %4 = arith.index_cast %3 : i32 to index
    %c0_2 = arith.constant 0 : index
    %c0_3 = arith.constant 0 : index
    %c0_4 = arith.constant 0 : index
    %5 = vector.load %arg2[%c0_1, %4, %c0_2, %c0_3, %c0_4] : memref<1x10x18x18x4xbf16, #tpu.memory_space<vmem>>, vector<1x1x16x16x4xbf16>
    %6 = vector.shape_cast %5 : vector<1x1x16x16x4xbf16> to vector<16x16x4xbf16>
    %c0_5 = arith.constant 0 : index
    %c0_6 = arith.constant 0 : index
    %c0_7 = arith.constant 0 : index
    %7 = vector.load %arg5[%c0_5, %c0_6, %c0_7] : memref<16x16x128xbf16, #tpu.memory_space<vmem>>, vector<16x16x4xbf16>
    tpu.vector_store %arg5[%c0_5, %c0_6, %c0_7], %6 {strides = array<i32>} : memref<16x16x128xbf16, #tpu.memory_space<vmem>>, vector<16x16x4xbf16>,
    %c0_8 = arith.constant 0 : index
    %8 = arith.index_cast %3 : i32 to index
    %c0_9 = arith.constant 0 : index
    %c1 = arith.constant 1 : index
    %c0_10 = arith.constant 0 : index
    %9 = vector.load %arg2[%c0_8, %8, %c0_9, %c1, %c0_10] : memref<1x10x18x18x4xbf16, #tpu.memory_space<vmem>>, vector<1x1x16x16x4xbf16>
    %10 = vector.shape_cast %9 : vector<1x1x16x16x4xbf16> to vector<16x16x4xbf16>
    %c0_11 = arith.constant 0 : index
    %c0_12 = arith.constant 0 : index
    %c4 = arith.constant 4 : index
    %11 = vector.load %arg5[%c0_11, %c0_12, %c4] : memref<16x16x128xbf16, #tpu.memory_space<vmem>>, vector<16x16x4xbf16>
    tpu.vector_store %arg5[%c0_11, %c0_12, %c4], %10 {strides = array<i32>} : memref<16x16x128xbf16, #tpu.memory_space<vmem>>, vector<16x16x4xbf16>,
    %c0_13 = arith.constant 0 : index
    %12 = arith.index_cast %3 : i32 to index
    %c0_14 = arith.constant 0 : index
    %c2 = arith.constant 2 : index
    %c0_15 = arith.constant 0 : index
    %13 = vector.load %arg2[%c0_13, %12, %c0_14, %c2, %c0_15] : memref<1x10x18x18x4xbf16, #tpu.memory_space<vmem>>, vector<1x1x16x16x4xbf16>
    %14 = vector.shape_cast %13 : vector<1x1x16x16x4xbf16> to vector<16x16x4xbf16>
    %c0_16 = arith.constant 0 : index
    %c0_17 = arith.constant 0 : index
    %c8 = arith.constant 8 : index
    %15 = vector.load %arg5[%c0_16, %c0_17, %c8] : memref<16x16x128xbf16, #tpu.memory_space<vmem>>, vector<16x16x4xbf16>
    tpu.vector_store %arg5[%c0_16, %c0_17, %c8], %14 {strides = array<i32>} : memref<16x16x128xbf16, #tpu.memory_space<vmem>>, vector<16x16x4xbf16>,
    %c0_18 = arith.constant 0 : index
    %16 = arith.index_cast %3 : i32 to index
    %c1_19 = arith.constant 1 : index
    %c0_20 = arith.constant 0 : index
    %c0_21 = arith.constant 0 : index
    %17 = vector.load %arg2[%c0_18, %16, %c1_19, %c0_20, %c0_21] : memref<1x10x18x18x4xbf16, #tpu.memory_space<vmem>>, vector<1x1x16x16x4xbf16>
    %18 = vector.shape_cast %17 : vector<1x1x16x16x4xbf16> to vector<16x16x4xbf16>
    %c0_22 = arith.constant 0 : index
    %c0_23 = arith.constant 0 : index
    %c12 = arith.constant 12 : index
    %19 = vector.load %arg5[%c0_22, %c0_23, %c12] : memref<16x16x128xbf16, #tpu.memory_space<vmem>>, vector<16x16x4xbf16>
    tpu.vector_store %arg5[%c0_22, %c0_23, %c12], %18 {strides = array<i32>} : memref<16x16x128xbf16, #tpu.memory_space<vmem>>, vector<16x16x4xbf16>,
    %c0_24 = arith.constant 0 : index
    %20 = arith.index_cast %3 : i32 to index
    %c1_25 = arith.constant 1 : index
    %c1_26 = arith.constant 1 : index
    %c0_27 = arith.constant 0 : index
    %21 = vector.load %arg2[%c0_24, %20, %c1_25, %c1_26, %c0_27] : memref<1x10x18x18x4xbf16, #tpu.memory_space<vmem>>, vector<1x1x16x16x4xbf16>
    %22 = vector.shape_cast %21 : vector<1x1x16x16x4xbf16> to vector<16x16x4xbf16>
    %c0_28 = arith.constant 0 : index
    %c0_29 = arith.constant 0 : index
    %c16 = arith.constant 16 : index
    %23 = vector.load %arg5[%c0_28, %c0_29, %c16] : memref<16x16x128xbf16, #tpu.memory_space<vmem>>, vector<16x16x4xbf16>
    tpu.vector_store %arg5[%c0_28, %c0_29, %c16], %22 {strides = array<i32>} : memref<16x16x128xbf16, #tpu.memory_space<vmem>>, vector<16x16x4xbf16>,
    %c0_30 = arith.constant 0 : index
    %24 = arith.index_cast %3 : i32 to index
    %c1_31 = arith.constant 1 : index
    %c2_32 = arith.constant 2 : index
    %c0_33 = arith.constant 0 : index
    %25 = vector.load %arg2[%c0_30, %24, %c1_31, %c2_32, %c0_33] : memref<1x10x18x18x4xbf16, #tpu.memory_space<vmem>>, vector<1x1x16x16x4xbf16>
    %26 = vector.shape_cast %25 : vector<1x1x16x16x4xbf16> to vector<16x16x4xbf16>
    %c0_34 = arith.constant 0 : index
    %c0_35 = arith.constant 0 : index
    %c20 = arith.constant 20 : index
    %27 = vector.load %arg5[%c0_34, %c0_35, %c20] : memref<16x16x128xbf16, #tpu.memory_space<vmem>>, vector<16x16x4xbf16>
    tpu.vector_store %arg5[%c0_34, %c0_35, %c20], %26 {strides = array<i32>} : memref<16x16x128xbf16, #tpu.memory_space<vmem>>, vector<16x16x4xbf16>,
    %c0_36 = arith.constant 0 : index
    %28 = arith.index_cast %3 : i32 to index
    %c2_37 = arith.constant 2 : index
    %c0_38 = arith.constant 0 : index
    %c0_39 = arith.constant 0 : index
    %29 = vector.load %arg2[%c0_36, %28, %c2_37, %c0_38, %c0_39] : memref<1x10x18x18x4xbf16, #tpu.memory_space<vmem>>, vector<1x1x16x16x4xbf16>
    %30 = vector.shape_cast %29 : vector<1x1x16x16x4xbf16> to vector<16x16x4xbf16>
    %c0_40 = arith.constant 0 : index
    %c0_41 = arith.constant 0 : index
    %c24 = arith.constant 24 : index
    %31 = vector.load %arg5[%c0_40, %c0_41, %c24] : memref<16x16x128xbf16, #tpu.memory_space<vmem>>, vector<16x16x4xbf16>
    tpu.vector_store %arg5[%c0_40, %c0_41, %c24], %30 {strides = array<i32>} : memref<16x16x128xbf16, #tpu.memory_space<vmem>>, vector<16x16x4xbf16>,
    %c0_42 = arith.constant 0 : index
    %32 = arith.index_cast %3 : i32 to index
    %c2_43 = arith.constant 2 : index
    %c1_44 = arith.constant 1 : index
    %c0_45 = arith.constant 0 : index
    %33 = vector.load %arg2[%c0_42, %32, %c2_43, %c1_44, %c0_45] : memref<1x10x18x18x4xbf16, #tpu.memory_space<vmem>>, vector<1x1x16x16x4xbf16>
    %34 = vector.shape_cast %33 : vector<1x1x16x16x4xbf16> to vector<16x16x4xbf16>
    %c0_46 = arith.constant 0 : index
    %c0_47 = arith.constant 0 : index
    %c28 = arith.constant 28 : index
    %35 = vector.load %arg5[%c0_46, %c0_47, %c28] : memref<16x16x128xbf16, #tpu.memory_space<vmem>>, vector<16x16x4xbf16>
    tpu.vector_store %arg5[%c0_46, %c0_47, %c28], %34 {strides = array<i32>} : memref<16x16x128xbf16, #tpu.memory_space<vmem>>, vector<16x16x4xbf16>,
    %c0_48 = arith.constant 0 : index
    %36 = arith.index_cast %3 : i32 to index
    %c2_49 = arith.constant 2 : index
    %c2_50 = arith.constant 2 : index
    %c0_51 = arith.constant 0 : index
    %37 = vector.load %arg2[%c0_48, %36, %c2_49, %c2_50, %c0_51] : memref<1x10x18x18x4xbf16, #tpu.memory_space<vmem>>, vector<1x1x16x16x4xbf16>
    %38 = vector.shape_cast %37 : vector<1x1x16x16x4xbf16> to vector<16x16x4xbf16>
    %c0_52 = arith.constant 0 : index
    %c0_53 = arith.constant 0 : index
    %c32 = arith.constant 32 : index
    %39 = vector.load %arg5[%c0_52, %c0_53, %c32] : memref<16x16x128xbf16, #tpu.memory_space<vmem>>, vector<16x16x4xbf16>
    tpu.vector_store %arg5[%c0_52, %c0_53, %c32], %38 {strides = array<i32>} : memref<16x16x128xbf16, #tpu.memory_space<vmem>>, vector<16x16x4xbf16>,
    %c1_i32_54 = arith.constant 1 : i32
    %40 = arith.addi %0, %c1_i32_54 : i32
    %c0_55 = arith.constant 0 : index
    %41 = arith.index_cast %40 : i32 to index
    %c0_56 = arith.constant 0 : index
    %c0_57 = arith.constant 0 : index
    %c0_58 = arith.constant 0 : index
    %42 = vector.load %arg2[%c0_55, %41, %c0_56, %c0_57, %c0_58] : memref<1x10x18x18x4xbf16, #tpu.memory_space<vmem>>, vector<1x1x16x16x4xbf16>
    %43 = vector.shape_cast %42 : vector<1x1x16x16x4xbf16> to vector<16x16x4xbf16>
    %c0_59 = arith.constant 0 : index
    %c0_60 = arith.constant 0 : index
    %c36 = arith.constant 36 : index
    %44 = vector.load %arg5[%c0_59, %c0_60, %c36] : memref<16x16x128xbf16, #tpu.memory_space<vmem>>, vector<16x16x4xbf16>
    tpu.vector_store %arg5[%c0_59, %c0_60, %c36], %43 {strides = array<i32>} : memref<16x16x128xbf16, #tpu.memory_space<vmem>>, vector<16x16x4xbf16>,
    %c0_61 = arith.constant 0 : index
    %45 = arith.index_cast %40 : i32 to index
    %c0_62 = arith.constant 0 : index
    %c1_63 = arith.constant 1 : index
    %c0_64 = arith.constant 0 : index
    %46 = vector.load %arg2[%c0_61, %45, %c0_62, %c1_63, %c0_64] : memref<1x10x18x18x4xbf16, #tpu.memory_space<vmem>>, vector<1x1x16x16x4xbf16>
    %47 = vector.shape_cast %46 : vector<1x1x16x16x4xbf16> to vector<16x16x4xbf16>
    %c0_65 = arith.constant 0 : index
    %c0_66 = arith.constant 0 : index
    %c40 = arith.constant 40 : index
    %48 = vector.load %arg5[%c0_65, %c0_66, %c40] : memref<16x16x128xbf16, #tpu.memory_space<vmem>>, vector<16x16x4xbf16>
    tpu.vector_store %arg5[%c0_65, %c0_66, %c40], %47 {strides = array<i32>} : memref<16x16x128xbf16, #tpu.memory_space<vmem>>, vector<16x16x4xbf16>,
    %c0_67 = arith.constant 0 : index
    %49 = arith.index_cast %40 : i32 to index
    %c0_68 = arith.constant 0 : index
    %c2_69 = arith.constant 2 : index
    %c0_70 = arith.constant 0 : index
    %50 = vector.load %arg2[%c0_67, %49, %c0_68, %c2_69, %c0_70] : memref<1x10x18x18x4xbf16, #tpu.memory_space<vmem>>, vector<1x1x16x16x4xbf16>
    %51 = vector.shape_cast %50 : vector<1x1x16x16x4xbf16> to vector<16x16x4xbf16>
    %c0_71 = arith.constant 0 : index
    %c0_72 = arith.constant 0 : index
    %c44 = arith.constant 44 : index
    %52 = vector.load %arg5[%c0_71, %c0_72, %c44] : memref<16x16x128xbf16, #tpu.memory_space<vmem>>, vector<16x16x4xbf16>
    tpu.vector_store %arg5[%c0_71, %c0_72, %c44], %51 {strides = array<i32>} : memref<16x16x128xbf16, #tpu.memory_space<vmem>>, vector<16x16x4xbf16>,
    %c0_73 = arith.constant 0 : index
    %53 = arith.index_cast %40 : i32 to index
    %c1_74 = arith.constant 1 : index
    %c0_75 = arith.constant 0 : index
    %c0_76 = arith.constant 0 : index
    %54 = vector.load %arg2[%c0_73, %53, %c1_74, %c0_75, %c0_76] : memref<1x10x18x18x4xbf16, #tpu.memory_space<vmem>>, vector<1x1x16x16x4xbf16>
    %55 = vector.shape_cast %54 : vector<1x1x16x16x4xbf16> to vector<16x16x4xbf16>
    %c0_77 = arith.constant 0 : index
    %c0_78 = arith.constant 0 : index
    %c48 = arith.constant 48 : index
    %56 = vector.load %arg5[%c0_77, %c0_78, %c48] : memref<16x16x128xbf16, #tpu.memory_space<vmem>>, vector<16x16x4xbf16>
    tpu.vector_store %arg5[%c0_77, %c0_78, %c48], %55 {strides = array<i32>} : memref<16x16x128xbf16, #tpu.memory_space<vmem>>, vector<16x16x4xbf16>,
    %c0_79 = arith.constant 0 : index
    %57 = arith.index_cast %40 : i32 to index
    %c1_80 = arith.constant 1 : index
    %c1_81 = arith.constant 1 : index
    %c0_82 = arith.constant 0 : index
    %58 = vector.load %arg2[%c0_79, %57, %c1_80, %c1_81, %c0_82] : memref<1x10x18x18x4xbf16, #tpu.memory_space<vmem>>, vector<1x1x16x16x4xbf16>
    %59 = vector.shape_cast %58 : vector<1x1x16x16x4xbf16> to vector<16x16x4xbf16>
    %c0_83 = arith.constant 0 : index
    %c0_84 = arith.constant 0 : index
    %c52 = arith.constant 52 : index
    %60 = vector.load %arg5[%c0_83, %c0_84, %c52] : memref<16x16x128xbf16, #tpu.memory_space<vmem>>, vector<16x16x4xbf16>
    tpu.vector_store %arg5[%c0_83, %c0_84, %c52], %59 {strides = array<i32>} : memref<16x16x128xbf16, #tpu.memory_space<vmem>>, vector<16x16x4xbf16>,
    %c0_85 = arith.constant 0 : index
    %61 = arith.index_cast %40 : i32 to index
    %c1_86 = arith.constant 1 : index
    %c2_87 = arith.constant 2 : index
    %c0_88 = arith.constant 0 : index
    %62 = vector.load %arg2[%c0_85, %61, %c1_86, %c2_87, %c0_88] : memref<1x10x18x18x4xbf16, #tpu.memory_space<vmem>>, vector<1x1x16x16x4xbf16>
    %63 = vector.shape_cast %62 : vector<1x1x16x16x4xbf16> to vector<16x16x4xbf16>
    %c0_89 = arith.constant 0 : index
    %c0_90 = arith.constant 0 : index
    %c56 = arith.constant 56 : index
    %64 = vector.load %arg5[%c0_89, %c0_90, %c56] : memref<16x16x128xbf16, #tpu.memory_space<vmem>>, vector<16x16x4xbf16>
    tpu.vector_store %arg5[%c0_89, %c0_90, %c56], %63 {strides = array<i32>} : memref<16x16x128xbf16, #tpu.memory_space<vmem>>, vector<16x16x4xbf16>,
    %c0_91 = arith.constant 0 : index
    %65 = arith.index_cast %40 : i32 to index
    %c2_92 = arith.constant 2 : index
    %c0_93 = arith.constant 0 : index
    %c0_94 = arith.constant 0 : index
    %66 = vector.load %arg2[%c0_91, %65, %c2_92, %c0_93, %c0_94] : memref<1x10x18x18x4xbf16, #tpu.memory_space<vmem>>, vector<1x1x16x16x4xbf16>
    %67 = vector.shape_cast %66 : vector<1x1x16x16x4xbf16> to vector<16x16x4xbf16>
    %c0_95 = arith.constant 0 : index
    %c0_96 = arith.constant 0 : index
    %c60 = arith.constant 60 : index
    %68 = vector.load %arg5[%c0_95, %c0_96, %c60] : memref<16x16x128xbf16, #tpu.memory_space<vmem>>, vector<16x16x4xbf16>
    tpu.vector_store %arg5[%c0_95, %c0_96, %c60], %67 {strides = array<i32>} : memref<16x16x128xbf16, #tpu.memory_space<vmem>>, vector<16x16x4xbf16>,
    %c0_97 = arith.constant 0 : index
    %69 = arith.index_cast %40 : i32 to index
    %c2_98 = arith.constant 2 : index
    %c1_99 = arith.constant 1 : index
    %c0_100 = arith.constant 0 : index
    %70 = vector.load %arg2[%c0_97, %69, %c2_98, %c1_99, %c0_100] : memref<1x10x18x18x4xbf16, #tpu.memory_space<vmem>>, vector<1x1x16x16x4xbf16>
    %71 = vector.shape_cast %70 : vector<1x1x16x16x4xbf16> to vector<16x16x4xbf16>
    %c0_101 = arith.constant 0 : index
    %c0_102 = arith.constant 0 : index
    %c64 = arith.constant 64 : index
    %72 = vector.load %arg5[%c0_101, %c0_102, %c64] : memref<16x16x128xbf16, #tpu.memory_space<vmem>>, vector<16x16x4xbf16>
    tpu.vector_store %arg5[%c0_101, %c0_102, %c64], %71 {strides = array<i32>} : memref<16x16x128xbf16, #tpu.memory_space<vmem>>, vector<16x16x4xbf16>,
    %c0_103 = arith.constant 0 : index
    %73 = arith.index_cast %40 : i32 to index
    %c2_104 = arith.constant 2 : index
    %c2_105 = arith.constant 2 : index
    %c0_106 = arith.constant 0 : index
    %74 = vector.load %arg2[%c0_103, %73, %c2_104, %c2_105, %c0_106] : memref<1x10x18x18x4xbf16, #tpu.memory_space<vmem>>, vector<1x1x16x16x4xbf16>
    %75 = vector.shape_cast %74 : vector<1x1x16x16x4xbf16> to vector<16x16x4xbf16>
    %c0_107 = arith.constant 0 : index
    %c0_108 = arith.constant 0 : index
    %c68 = arith.constant 68 : index
    %76 = vector.load %arg5[%c0_107, %c0_108, %c68] : memref<16x16x128xbf16, #tpu.memory_space<vmem>>, vector<16x16x4xbf16>
    tpu.vector_store %arg5[%c0_107, %c0_108, %c68], %75 {strides = array<i32>} : memref<16x16x128xbf16, #tpu.memory_space<vmem>>, vector<16x16x4xbf16>,
    %c2_i32 = arith.constant 2 : i32
    %77 = arith.addi %0, %c2_i32 : i32
    %c0_109 = arith.constant 0 : index
    %78 = arith.index_cast %77 : i32 to index
    %c0_110 = arith.constant 0 : index
    %c0_111 = arith.constant 0 : index
    %c0_112 = arith.constant 0 : index
    %79 = vector.load %arg2[%c0_109, %78, %c0_110, %c0_111, %c0_112] : memref<1x10x18x18x4xbf16, #tpu.memory_space<vmem>>, vector<1x1x16x16x4xbf16>
    %80 = vector.shape_cast %79 : vector<1x1x16x16x4xbf16> to vector<16x16x4xbf16>
    %c0_113 = arith.constant 0 : index
    %c0_114 = arith.constant 0 : index
    %c72 = arith.constant 72 : index
    %81 = vector.load %arg5[%c0_113, %c0_114, %c72] : memref<16x16x128xbf16, #tpu.memory_space<vmem>>, vector<16x16x4xbf16>
    tpu.vector_store %arg5[%c0_113, %c0_114, %c72], %80 {strides = array<i32>} : memref<16x16x128xbf16, #tpu.memory_space<vmem>>, vector<16x16x4xbf16>,
    %c0_115 = arith.constant 0 : index
    %82 = arith.index_cast %77 : i32 to index
    %c0_116 = arith.constant 0 : index
    %c1_117 = arith.constant 1 : index
    %c0_118 = arith.constant 0 : index
    %83 = vector.load %arg2[%c0_115, %82, %c0_116, %c1_117, %c0_118] : memref<1x10x18x18x4xbf16, #tpu.memory_space<vmem>>, vector<1x1x16x16x4xbf16>
    %84 = vector.shape_cast %83 : vector<1x1x16x16x4xbf16> to vector<16x16x4xbf16>
    %c0_119 = arith.constant 0 : index
    %c0_120 = arith.constant 0 : index
    %c76 = arith.constant 76 : index
    %85 = vector.load %arg5[%c0_119, %c0_120, %c76] : memref<16x16x128xbf16, #tpu.memory_space<vmem>>, vector<16x16x4xbf16>
    tpu.vector_store %arg5[%c0_119, %c0_120, %c76], %84 {strides = array<i32>} : memref<16x16x128xbf16, #tpu.memory_space<vmem>>, vector<16x16x4xbf16>,
    %c0_121 = arith.constant 0 : index
    %86 = arith.index_cast %77 : i32 to index
    %c0_122 = arith.constant 0 : index
    %c2_123 = arith.constant 2 : index
    %c0_124 = arith.constant 0 : index
    %87 = vector.load %arg2[%c0_121, %86, %c0_122, %c2_123, %c0_124] : memref<1x10x18x18x4xbf16, #tpu.memory_space<vmem>>, vector<1x1x16x16x4xbf16>
    %88 = vector.shape_cast %87 : vector<1x1x16x16x4xbf16> to vector<16x16x4xbf16>
    %c0_125 = arith.constant 0 : index
    %c0_126 = arith.constant 0 : index
    %c80 = arith.constant 80 : index
    %89 = vector.load %arg5[%c0_125, %c0_126, %c80] : memref<16x16x128xbf16, #tpu.memory_space<vmem>>, vector<16x16x4xbf16>
    tpu.vector_store %arg5[%c0_125, %c0_126, %c80], %88 {strides = array<i32>} : memref<16x16x128xbf16, #tpu.memory_space<vmem>>, vector<16x16x4xbf16>,
    %c0_127 = arith.constant 0 : index
    %90 = arith.index_cast %77 : i32 to index
    %c1_128 = arith.constant 1 : index
    %c0_129 = arith.constant 0 : index
    %c0_130 = arith.constant 0 : index
    %91 = vector.load %arg2[%c0_127, %90, %c1_128, %c0_129, %c0_130] : memref<1x10x18x18x4xbf16, #tpu.memory_space<vmem>>, vector<1x1x16x16x4xbf16>
    %92 = vector.shape_cast %91 : vector<1x1x16x16x4xbf16> to vector<16x16x4xbf16>
    %c0_131 = arith.constant 0 : index
    %c0_132 = arith.constant 0 : index
    %c84 = arith.constant 84 : index
    %93 = vector.load %arg5[%c0_131, %c0_132, %c84] : memref<16x16x128xbf16, #tpu.memory_space<vmem>>, vector<16x16x4xbf16>
    tpu.vector_store %arg5[%c0_131, %c0_132, %c84], %92 {strides = array<i32>} : memref<16x16x128xbf16, #tpu.memory_space<vmem>>, vector<16x16x4xbf16>,
    %c0_133 = arith.constant 0 : index
    %94 = arith.index_cast %77 : i32 to index
    %c1_134 = arith.constant 1 : index
    %c1_135 = arith.constant 1 : index
    %c0_136 = arith.constant 0 : index
    %95 = vector.load %arg2[%c0_133, %94, %c1_134, %c1_135, %c0_136] : memref<1x10x18x18x4xbf16, #tpu.memory_space<vmem>>, vector<1x1x16x16x4xbf16>
    %96 = vector.shape_cast %95 : vector<1x1x16x16x4xbf16> to vector<16x16x4xbf16>
    %c0_137 = arith.constant 0 : index
    %c0_138 = arith.constant 0 : index
    %c88 = arith.constant 88 : index
    %97 = vector.load %arg5[%c0_137, %c0_138, %c88] : memref<16x16x128xbf16, #tpu.memory_space<vmem>>, vector<16x16x4xbf16>
    tpu.vector_store %arg5[%c0_137, %c0_138, %c88], %96 {strides = array<i32>} : memref<16x16x128xbf16, #tpu.memory_space<vmem>>, vector<16x16x4xbf16>,
    %c0_139 = arith.constant 0 : index
    %98 = arith.index_cast %77 : i32 to index
    %c1_140 = arith.constant 1 : index
    %c2_141 = arith.constant 2 : index
    %c0_142 = arith.constant 0 : index
    %99 = vector.load %arg2[%c0_139, %98, %c1_140, %c2_141, %c0_142] : memref<1x10x18x18x4xbf16, #tpu.memory_space<vmem>>, vector<1x1x16x16x4xbf16>
    %100 = vector.shape_cast %99 : vector<1x1x16x16x4xbf16> to vector<16x16x4xbf16>
    %c0_143 = arith.constant 0 : index
    %c0_144 = arith.constant 0 : index
    %c92 = arith.constant 92 : index
    %101 = vector.load %arg5[%c0_143, %c0_144, %c92] : memref<16x16x128xbf16, #tpu.memory_space<vmem>>, vector<16x16x4xbf16>
    tpu.vector_store %arg5[%c0_143, %c0_144, %c92], %100 {strides = array<i32>} : memref<16x16x128xbf16, #tpu.memory_space<vmem>>, vector<16x16x4xbf16>,
    %c0_145 = arith.constant 0 : index
    %102 = arith.index_cast %77 : i32 to index
    %c2_146 = arith.constant 2 : index
    %c0_147 = arith.constant 0 : index
    %c0_148 = arith.constant 0 : index
    %103 = vector.load %arg2[%c0_145, %102, %c2_146, %c0_147, %c0_148] : memref<1x10x18x18x4xbf16, #tpu.memory_space<vmem>>, vector<1x1x16x16x4xbf16>
    %104 = vector.shape_cast %103 : vector<1x1x16x16x4xbf16> to vector<16x16x4xbf16>
    %c0_149 = arith.constant 0 : index
    %c0_150 = arith.constant 0 : index
    %c96 = arith.constant 96 : index
    %105 = vector.load %arg5[%c0_149, %c0_150, %c96] : memref<16x16x128xbf16, #tpu.memory_space<vmem>>, vector<16x16x4xbf16>
    tpu.vector_store %arg5[%c0_149, %c0_150, %c96], %104 {strides = array<i32>} : memref<16x16x128xbf16, #tpu.memory_space<vmem>>, vector<16x16x4xbf16>,
    %c0_151 = arith.constant 0 : index
    %106 = arith.index_cast %77 : i32 to index
    %c2_152 = arith.constant 2 : index
    %c1_153 = arith.constant 1 : index
    %c0_154 = arith.constant 0 : index
    %107 = vector.load %arg2[%c0_151, %106, %c2_152, %c1_153, %c0_154] : memref<1x10x18x18x4xbf16, #tpu.memory_space<vmem>>, vector<1x1x16x16x4xbf16>
    %108 = vector.shape_cast %107 : vector<1x1x16x16x4xbf16> to vector<16x16x4xbf16>
    %c0_155 = arith.constant 0 : index
    %c0_156 = arith.constant 0 : index
    %c100 = arith.constant 100 : index
    %109 = vector.load %arg5[%c0_155, %c0_156, %c100] : memref<16x16x128xbf16, #tpu.memory_space<vmem>>, vector<16x16x4xbf16>
    tpu.vector_store %arg5[%c0_155, %c0_156, %c100], %108 {strides = array<i32>} : memref<16x16x128xbf16, #tpu.memory_space<vmem>>, vector<16x16x4xbf16>,
    %c0_157 = arith.constant 0 : index
    %110 = arith.index_cast %77 : i32 to index
    %c2_158 = arith.constant 2 : index
    %c2_159 = arith.constant 2 : index
    %c0_160 = arith.constant 0 : index
    %111 = vector.load %arg2[%c0_157, %110, %c2_158, %c2_159, %c0_160] : memref<1x10x18x18x4xbf16, #tpu.memory_space<vmem>>, vector<1x1x16x16x4xbf16>
    %112 = vector.shape_cast %111 : vector<1x1x16x16x4xbf16> to vector<16x16x4xbf16>
    %c0_161 = arith.constant 0 : index
    %c0_162 = arith.constant 0 : index
    %c104 = arith.constant 104 : index
    %113 = vector.load %arg5[%c0_161, %c0_162, %c104] : memref<16x16x128xbf16, #tpu.memory_space<vmem>>, vector<16x16x4xbf16>
    tpu.vector_store %arg5[%c0_161, %c0_162, %c104], %112 {strides = array<i32>} : memref<16x16x128xbf16, #tpu.memory_space<vmem>>, vector<16x16x4xbf16>,
    %c0_163 = arith.constant 0 : index
    %c0_164 = arith.constant 0 : index
    %c0_165 = arith.constant 0 : index
    %114 = vector.load %arg5[%c0_163, %c0_164, %c0_165] : memref<16x16x128xbf16, #tpu.memory_space<vmem>>, vector<16x16x128xbf16>
    %115 = vector.shape_cast %114 : vector<16x16x128xbf16> to vector<256x128xbf16>
    %c0_166 = arith.constant 0 : index
    %c0_167 = arith.constant 0 : index
    %116 = vector.load %arg3[%c0_166, %c0_167] : memref<128x128xbf16, #tpu.memory_space<vmem>>, vector<128x128xbf16>
    %cst_168 = arith.constant dense<0.000000e+00> : vector<256x128xf32>
    %117 = tpu.matmul %115, %116, %cst_168 {dimension_numbers = #tpu.dot_dimension_numbers<[1], [0], [0], [1], [0, 0, 1, 1], [], []>} : vector<256x128xbf16>, vector<128x128xbf16>, vector<256x128xf32> -> vector<256x128xf32>
    %c0_169 = arith.constant 0 : index
    %c0_170 = arith.constant 0 : index
    %c0_171 = arith.constant 0 : index
    %c0_172 = arith.constant 0 : index
    %118 = vector.load %arg4[%c0_169, %c0_170, %c0_171, %c0_172] : memref<1x1x256x128xf32, #tpu.memory_space<vmem>>, vector<1x1x256x128xf32>
    %119 = vector.shape_cast %118 : vector<1x1x256x128xf32> to vector<256x128xf32>
    %120 = vector.shape_cast %117 : vector<256x128xf32> to vector<1x1x256x128xf32>
    tpu.vector_store %arg4[%c0_169, %c0_170, %c0_171, %c0_172], %120 {strides = array<i32>} : memref<1x1x256x128xf32, #tpu.memory_space<vmem>>, vector<1x1x256x128xf32>,
    return
  }
  func.func @transform_0(%arg0: i32, %arg1: i32) -> (i32, i32, i32, i32, i32) {
    %c0_i32 = arith.constant 0 : i32
    %c0_i32_0 = arith.constant 0 : i32
    %c0_i32_1 = arith.constant 0 : i32
    %c0_i32_2 = arith.constant 0 : i32
    %c0_i32_3 = arith.constant 0 : i32
    return %arg0, %c0_i32, %c0_i32_0, %c0_i32_1, %c0_i32_2 : i32, i32, i32, i32, i32
  }
  func.func @transform_1(%arg0: i32, %arg1: i32) -> (i32, i32) {
    %c0_i32 = arith.constant 0 : i32
    %c0_i32_0 = arith.constant 0 : i32
    %c0_i32_1 = arith.constant 0 : i32
    return %c0_i32, %c0_i32_0 : i32, i32
  }
  func.func @transform_2(%arg0: i32, %arg1: i32) -> (i32, i32, i32, i32) {
    %c0_i32 = arith.constant 0 : i32
    %c0_i32_0 = arith.constant 0 : i32
    %c0_i32_1 = arith.constant 0 : i32
    return %arg0, %arg1, %c0_i32, %c0_i32_0 : i32, i32, i32, i32
  }
}

</mosaic_0001>

<bundles_post_ra>
// kernel: tpu_custom_call.1
= control target key start
LH: loop header
LB: loop body
LE: loop exit
PB: predicated region body
PF: predicated region fallthrough
CT: control target
= control target key end

     0   :  { %7 = vsyncpa [#allocation4], 0  ;;  %s16883_s0 = inlined_call_operand.vmem [shape: bf16[2,10,18,18,4], index: 0, kind: input, shape index: {}]   ;;  %s16884_s1 = inlined_call_operand.vmem [shape: bf16[128,128], index: 1, kind: input, shape index: {}]   ;;  %s16885_s2 = inlined_call_operand.hbm [shape: f32[2,8,256,128], index: 2, kind: output, shape index: {}]  }
   0x1   :  { %9 = vsyncpa [#allocation4 + $0x1], 0  ;;  %s11988_s9 = smov 0   ;;  %s11990_s10 = smov 0  }
   0x2   :  { %s11992_s11 = smov 0   ;;  %s11994_s12 = smov 0  }
   0x3   :  { %s11996_s13 = smov 0   ;;  %s11998_s14 = smov 0  }
   0x4   :  { %s12000_s15 = smov 0   ;;  %s12002_s16 = smov 0  }
   0x5 LB: > { %s10425_s17 = sadd.s32 4294967295, %s11942_s16   ;;  %s10426_s18 = sadd.s32 4294967294, %s11942_s16   ;;  %s11942_s16 = sphi %s12002_s16, %s15_s16   ;;  %s11938_s15 = sphi %s12000_s15, %s16898_s15   ;;  %s11934_s14 = sphi %s11998_s14, %s16897_s14   ;;  %s11930_s13 = sphi %s11996_s13, %s16896_s13   ;;  %s11926_s12 = sphi %s11994_s12, %s16895_s12   ;;  %s11922_s11 = sphi %s11992_s11, %s16894_s11   ;;  %s11918_s10 = sphi %s11990_s10, %s16893_s10   ;;  %s11914_s9 = sphi %s11988_s9, %s16892_s9  }
   0x6   : > { %s24_s19 = sadd.s32 1, %s11934_s14  ;;  %s27_s20 = sadd.s32 1, %s11938_s15 }
   0x7   : > { %p25_p0 = scmp.ge.s32.totalorder %s24_s19, 8  ;;  %p93_p1 = scmp.ne.s32.totalorder %s11922_s11, %s11918_s10 }
   0x8   : > { %p94_p2 = scmp.eq.s32.totalorder %s10425_s17, 15  ;;  %p99_p5 = scmp.ne.s32.totalorder %s11918_s10, %s11914_s9 }
   0x9   : > { %s16900_s19 = smov (%p25_p0, %s24_s19), 0  ;;  %s16902_s20 = smov (!%p25_p0, %s27_s20), %s11938_s15 }
   0xa   : > { %s79_s21 = ssub.s32 %s11934_s14, %s16900_s19  ;;  %p12039_p3 = por %p94_p2, %p93_p1 }
   0xb   : > { %p29_p4 = scmp.ge.s32.totalorder %s16902_s20, 2  ;;  %p100_p6 = scmp.eq.s32.totalorder %s10426_s18, 15 }
   0xc   : > { %p10429_p7 = scmp.ge.s32.totalorder %s11942_s16, 1  ;;  %p129_p9 = scmp.lt.s32.totalorder %s11942_s16, 17 }
   0xd   : > { %s16904_s20 = smov (%p29_p4, %s16902_s20), 0  ;;  %p12048_p8 = por %p100_p6, %p99_p5 }
   0xe   : > { %s78_s24 = ssub.s32 %s11938_s15, %s16904_s20  ;;  %s83_s25 = sadd.s32 1, %s11922_s11 }
   0xf   : > { %s80_s26 = sor.u32 %s79_s21, %s78_s24  ;;  %p130_p10 = pnand %p10429_p7, %p129_p9 }
  0x10   : > { %p81_p11 = scmp.eq.s32.totalorder %s80_s26, 0  ;;  %p151_p12 = scmp.lt.s32.totalorder (!%p130_p10), %s11930_s13, 1 }
  0x11   : > { %133 = sbr.rel (%p130_p10) target bundleno = 2043 (0x7fb), region = 28  ;;  %s11945_s7 = smov (!%p130_p10), 4  }
  0x12   : > { %s12057_s27 = scalar_select %p81_p11, %s11922_s11, %s83_s25  }
  0x13   : > { %s11637_s28 = smul.u32 (!%p130_p10), 216, %s11926_s12  ;;  %s11946_s8 = smov (!%p130_p10), 8  }
  0x14   : > { %s11947_s17 = smov (!%p130_p10), 12   ;;  %s11948_s18 = smov (!%p130_p10), 16  }
  0x15   : > { %s11949_s21 = smov (!%p130_p10), 20   ;;  %s11950_s24 = smov (!%p130_p10), 24  }
  0x16   : > { %s12062_s29 = scalar_select %p151_p12, %s11930_s13, 1  ;;  %vm306_vm0 = vsmask.f32 3328  ;;  %vm307_vm1 = vsmask.f32 7440  ;;  %vm157_vm2 = vcmask 1044320  }
  0x17   : > { %v11944_v0 = vmov 0   ;;  %vm12115_vm3 = vmor %vm306_vm0, %vm307_vm1  ;;  %vm225_vm4 = vcmask 27648   ;;  %vm918_vm5 = vcmask 1042432   ;;  %vm919_vm6 = vcmask 1046532   ;;  %s11951_s25 = smov 28   ;;  %s11952_s26 = smov 32  }
  0x18   : > { %s11726_s30 = smul.u32 2160, %s12062_s29  ;;  %160 = vst.msk [vmem:[#allocation2 + $0x8] sm:$0xf] %vm157_vm2, %v11944_v0  ;;  %158 = vst.msk [vmem:[#allocation2] sm:$0xf] %vm157_vm2, %v11944_v0  ;;  %vm789_vm8 = vcmask 60448  }
  0x19   : > { %159 = vst.msk [vmem:[#allocation2 + $0x4] sm:$0xf] %vm157_vm2, %v11944_v0  ;;  %161 = vst.msk [vmem:[#allocation2 + $0xc] sm:$0xf] %vm157_vm2, %v11944_v0  ;;  %vm1129_vm9 = vcmask 93248   ;;  %vm1325_vm10 = vcmask 126048  }
  0x1a   : > { %162 = vst.msk [vmem:[#allocation2 + $0x10] sm:$0xf] %vm157_vm2, %v11944_v0  ;;  %163 = vst.msk [vmem:[#allocation2 + $0x14] sm:$0xf] %vm157_vm2, %v11944_v0  ;;  %s155_s5 = scalar_lea.vmem %s16883_s0, %s11726_s30  ;;  %vm1886_vm11 = vcmask 158848   ;;  %vm2223_vm12 = vcmask 191648  }
  0x1b   : > { %164 = vst.msk [vmem:[#allocation2 + $0x18] sm:$0xf] %vm157_vm2, %v11944_v0  ;;  %165 = vst.msk [vmem:[#allocation2 + $0x1c] sm:$0xf] %vm157_vm2, %v11944_v0  ;;  %s12104_s6 = scalar_lea.vmem %s155_s5, %s11637_s28  ;;  %vm2419_vm13 = vcmask 224448   ;;  %vm2980_vm14 = vcmask 257248  }
  0x1c   : > { %166 = vst.msk [vmem:[#allocation2 + $0x20] sm:$0xf] %vm157_vm2, %v11944_v0  ;;  %167 = vst.msk [vmem:[#allocation2 + $0x24] sm:$0xf] %vm157_vm2, %v11944_v0  ;;  %v261_v1 = vld [vmem:[%s12104_s6 + $0xc] sm:$0xf] }
  0x1d   : > { %168 = vst.msk [vmem:[#allocation2 + $0x28] sm:$0xf] %vm157_vm2, %v11944_v0  ;;  %169 = vst.msk [vmem:[#allocation2 + $0x2c] sm:$0xf] %vm157_vm2, %v11944_v0  ;;  %v262_v2 = vld [vmem:[%s12104_s6 + $0x10] sm:$0xf] }
  0x1e   : > { %170 = vst.msk [vmem:[#allocation2 + $0x30] sm:$0xf] %vm157_vm2, %v11944_v0  ;;  %171 = vst.msk [vmem:[#allocation2 + $0x34] sm:$0xf] %vm157_vm2, %v11944_v0  ;;  %v258_v3 = vld [vmem:[%s12104_s6] sm:$0xf] }
  0x1f   : > { %172 = vst.msk [vmem:[#allocation2 + $0x38] sm:$0xf] %vm157_vm2, %v11944_v0  ;;  %173 = vst.msk [vmem:[#allocation2 + $0x3c] sm:$0xf] %vm157_vm2, %v11944_v0  ;;  %v334_v4 = vshrl.u32 %v261_v1, 16  ;;  %v337_v5 = vshll.u32 %v261_v1, 16 }
  0x20   : > { %174 = vst.msk [vmem:[#allocation2 + $0x40] sm:$0xf] %vm157_vm2, %v11944_v0  ;;  %175 = vst.msk [vmem:[#allocation2 + $0x44] sm:$0xf] %vm157_vm2, %v11944_v0  ;;  %v343_v6 = vshll.u32 %v262_v2, 16  ;;  %v347_v7 = vshrl.u32 %v262_v2, 16 }
  0x21   : > { %176 = vst.msk [vmem:[#allocation2 + $0x48] sm:$0xf] %vm157_vm2, %v11944_v0  ;;  %177 = vst.msk [vmem:[#allocation2 + $0x4c] sm:$0xf] %vm157_vm2, %v11944_v0  ;;  %v259_v8 = vld [vmem:[%s12104_s6 + $0x4] sm:$0xf] }
  0x22   : > { %178 = vst.msk [vmem:[#allocation2 + $0x50] sm:$0xf] %vm157_vm2, %v11944_v0  ;;  %179 = vst.msk [vmem:[#allocation2 + $0x54] sm:$0xf] %vm157_vm2, %v11944_v0  ;;  %v310_v9 = vshrl.u32 %v258_v3, 16  ;;  %v313_v10 = vshll.u32 %v258_v3, 16 }
  0x23   : > { %180 = vst.msk [vmem:[#allocation2 + $0x58] sm:$0xf] %vm157_vm2, %v11944_v0  ;;  %181 = vst.msk [vmem:[#allocation2 + $0x5c] sm:$0xf] %vm157_vm2, %v11944_v0  ;;  %v319_v11 = vshll.u32 %v259_v8, 16  ;;  %v323_v12 = vshrl.u32 %v259_v8, 16 }
  0x24   : > { %182 = vst.msk [vmem:[#allocation2 + $0x60] sm:$0xf] %vm157_vm2, %v11944_v0  ;;  %183 = vst.msk [vmem:[#allocation2 + $0x64] sm:$0xf] %vm157_vm2, %v11944_v0  ;;  %v263_v13 = vld [vmem:[%s12104_s6 + $0x14] sm:$0x1] }
  0x25   : > { %184 = vst.msk [vmem:[#allocation2 + $0x68] sm:$0xf] %vm157_vm2, %v11944_v0  ;;  %185 = vst.msk [vmem:[#allocation2 + $0x6c] sm:$0xf] %vm157_vm2, %v11944_v0  ;;  %v336_v14 = vrot.slane %v334_v4, 4  ;;  %v339_v15 = vrot.slane %v337_v5, 5 }
  0x26   : > { %186 = vst.msk [vmem:[#allocation2 + $0x70] sm:$0xf] %vm157_vm2, %v11944_v0  ;;  %187 = vst.msk [vmem:[#allocation2 + $0x74] sm:$0xf] %vm157_vm2, %v11944_v0  ;;  %v345_v16 = vrot.slane %v343_v6, 5  ;;  %v349_v17 = vrot.slane %v347_v7, 4 }
  0x27   : > { %188 = vst.msk [vmem:[#allocation2 + $0x78] sm:$0xf] %vm157_vm2, %v11944_v0  ;;  %189 = vst.msk [vmem:[#allocation2 + $0x7c] sm:$0xf] %vm157_vm2, %v11944_v0  ;;  %v260_v18 = vld [vmem:[%s12104_s6 + $0x8] sm:$0x1]  ;;  %v340_v24 = vor.u32 %v339_v15, %v336_v14 }
  0x28   : > { %v312_v19 = vrot.slane %v310_v9, 4  ;;  %v315_v20 = vrot.slane %v313_v10, 5  ;;  %v321_v21 = vrot.slane %v319_v11, 5  ;;  %v325_v22 = vrot.slane %v323_v12, 4  ;;  %v265_v23 = vld [vmem:[%s12104_s6 + $0x1c] sm:$0xf]  ;;  %vm12259_vm7 = vmor %vm918_vm5, %vm919_vm6 }
  0x29   : > { %v350_v25 = vor.u32 %v349_v17, %v345_v16  ;;  %v353_v26 = vshll.u32 %v263_v13, 16  ;;  %v329_v27 = vshll.u32 %v260_v18, 16  ;;  %v266_v31 = vld [vmem:[%s12104_s6 + $0x20] sm:$0x1]  ;;  %v367_v32 = vshll.u32 %v265_v23, 16  ;;  %s11953_s28 = smov 36  }
  0x2a   : > { %v316_v29 = vor.u32 %v315_v20, %v312_v19  ;;  %v326_v30 = vor.u32 %v325_v22, %v321_v21  ;;  %v371_v33 = vshrl.u32 %v265_v23, 16  ;;  %v264_v34 = vld [vmem:[%s12104_s6 + $0x18] sm:$0xf]  ;;  %v341_v35 = vrot.slane %v340_v24, 4  ;;  %v268_v43 = vld [vmem:[%s12104_s6 + $0x28] sm:$0xf] }
  0x2b   : > { %v351_v36 = vrot.slane %v350_v25, 4  ;;  %v355_v37 = vrot.slane %v353_v26, 5  ;;  %v331_v38 = vrot.slane %v329_v27, 5  ;;  %v369_v41 = vrot.slane %v367_v32, 5  ;;  %v269_v48 = vld [vmem:[%s12104_s6 + $0x2c] sm:$0x1] }
  0x2c   : > { %v317_v39 = vrot.slane %v316_v29, 4  ;;  %v327_v40 = vrot.slane %v326_v30, 4  ;;  %v373_v42 = vrot.slane %v371_v33, 4  ;;  %v346_v44 = vsel %vm12115_vm3, %v341_v35, %v345_v16  ;;  %v267_v49 = vld [vmem:[%s12104_s6 + $0x24] sm:$0xf]  ;;  %s11954_s29 = smov 40  }
  0x2d   : > { %v356_v45 = vsel %vm12115_vm3, %v351_v36, %v355_v37  ;;  %v377_v46 = vshll.u32 %v266_v31, 16  ;;  %v358_v47 = vshrl.u32 %v264_v34, 16  ;;  %697 = vrot.lane.b32.xlu1 %v346_v44, %s11945_s7  ;;  %v361_v53 = vshll.u32 %v264_v34, 16  ;;  %v271_v54 = vld [vmem:[%s12104_s6 + $0x34] sm:$0xf]  ;;  %s11955_s30 = smov 44  }
  0x2e   : > { %v322_v50 = vsel %vm12115_vm3, %v317_v39, %v321_v21  ;;  %v332_v51 = vsel %vm12115_vm3, %v327_v40, %v331_v38  ;;  %v374_v52 = vor.u32 %v373_v42, %v369_v41  ;;  %v391_v57 = vshll.u32 %v268_v43, 16  ;;  %v272_v63 = vld [vmem:[%s12104_s6 + $0x38] sm:$0x1]  ;;  %v270_v4 = vld [vmem:[%s12104_s6 + $0x30] sm:$0xf]  ;;  %s11956_s3 = smov 48  }
  0x2f   : > { %693 = vrot.lane.b32.xlu0 %v322_v50, %s11945_s7  ;;  %v379_v55 = vrot.slane %v377_v46, 5  ;;  %v360_v56 = vrot.slane %v358_v47, 4  ;;  %v395_v58 = vshrl.u32 %v268_v43, 16  ;;  %v363_v60 = vrot.slane %v361_v53, 5  ;;  %v274_v9 = vld [vmem:[%s12104_s6 + $0x40] sm:$0xf] }
  0x30   : > { %v375_v59 = vrot.slane %v374_v52, 4  ;;  %v401_v61 = vshll.u32 %v269_v48, 16  ;;  %v382_v62 = vshrl.u32 %v267_v49, 16  ;;  %v393_v0 = vrot.slane %v391_v57, 5  ;;  %v275_v18 = vld [vmem:[%s12104_s6 + $0x44] sm:$0x1] }
  0x31   : > { %v397_v1 = vrot.slane %v395_v58, 4  ;;  %v385_v2 = vshll.u32 %v267_v49, 16  ;;  %v415_v3 = vshll.u32 %v271_v54, 16  ;;  %699 = vrot.lane.b32.xlu1 %v356_v45, %s11945_s7  ;;  %v364_v6 = vor.u32 %v363_v60, %v360_v56  ;;  %v273_v23 = vld [vmem:[%s12104_s6 + $0x3c] sm:$0xf]  ;;  %s11957_s4 = smov 52  }
  0x32   : > { %v380_v5 = vsel %vm12115_vm3, %v375_v59, %v379_v55  ;;  %v403_v7 = vrot.slane %v401_v61, 5  ;;  %v384_v8 = vrot.slane %v382_v62, 4  ;;  %v419_v13 = vshrl.u32 %v271_v54, 16  ;;  %v277_v29 = vld [vmem:[%s12104_s6 + $0x4c] sm:$0xf]  ;;  %s11958_s5 = smov 56  }
  0x33   : > { %695 = vrot.lane.b32.xlu0 %v332_v51, %s11945_s7  ;;  %v398_v10 = vor.u32 %v397_v1, %v393_v0  ;;  %v387_v11 = vrot.slane %v385_v2, 5  ;;  %v417_v12 = vrot.slane %v415_v3, 5  ;;  %v365_v14 = vrot.slane %v364_v6, 4  ;;  %v278_v38 = vld [vmem:[%s12104_s6 + $0x50] sm:$0x1] }
  0x34   : > { %v425_v15 = vshll.u32 %v272_v63, 16  ;;  %v406_v16 = vshrl.u32 %v270_v4, 16  ;;  %v409_v17 = vshll.u32 %v270_v4, 16  ;;  %v421_v21 = vrot.slane %v419_v13, 4  ;;  %v276_v43 = vld [vmem:[%s12104_s6 + $0x48] sm:$0xf] }
  0x35   : > { %v399_v19 = vrot.slane %v398_v10, 4  ;;  %v388_v20 = vor.u32 %v387_v11, %v384_v8  ;;  %v439_v22 = vshll.u32 %v274_v9, 16  ;;  %703 = vrot.lane.b32.xlu1 %v380_v5, %s11945_s7  ;;  %v370_v24 = vsel %vm12115_vm3, %v365_v14, %v369_v41  ;;  %v280_v48 = vld [vmem:[%s12104_s6 + $0x58] sm:$0xf]  ;;  %v281_v57 = vld [vmem:[%s12104_s6 + $0x5c] sm:$0x1] }
  0x36   : > { %v427_v25 = vrot.slane %v425_v15, 5  ;;  %v408_v26 = vrot.slane %v406_v16, 4  ;;  %v411_v27 = vrot.slane %v409_v17, 5  ;;  %v422_v32 = vor.u32 %v421_v21, %v417_v12  ;;  %v279_v62 = vld [vmem:[%s12104_s6 + $0x54] sm:$0xf] }
  0x37   : > { %701 = vrot.lane.b32.xlu0 %v370_v24, %s11945_s7  ;;  %v404_v30 = vsel %vm12115_vm3, %v399_v19, %v403_v7  ;;  %v389_v31 = vrot.slane %v388_v20, 4  ;;  %v441_v33 = vrot.slane %v439_v22, 5  ;;  %v443_v35 = vshrl.u32 %v274_v9, 16  ;;  %v283_v7 = vld [vmem:[%s12104_s6 + $0x64] sm:$0xf] }
  0x38   : > { %v412_v34 = vor.u32 %v411_v27, %v408_v26  ;;  %v449_v36 = vshll.u32 %v275_v18, 16  ;;  %v430_v37 = vshrl.u32 %v273_v23, 16  ;;  %v423_v40 = vrot.slane %v422_v32, 4  ;;  %v284_v16 = vld [vmem:[%s12104_s6 + $0x68] sm:$0x1] }
  0x39   : > { %v394_v39 = vsel %vm12115_vm3, %v389_v31, %v393_v0  ;;  %v433_v41 = vshll.u32 %v273_v23, 16  ;;  %v463_v42 = vshll.u32 %v277_v29, 16  ;;  %707 = vrot.lane.b32.xlu1 %v404_v30, %s11945_s7  ;;  %v445_v45 = vrot.slane %v443_v35, 4  ;;  %v282_v17 = vld [vmem:[%s12104_s6 + $0x60] sm:$0xf] }
  0x3a   : > { %v413_v44 = vrot.slane %v412_v34, 4  ;;  %v451_v46 = vrot.slane %v449_v36, 5  ;;  %v432_v47 = vrot.slane %v430_v37, 4  ;;  %v428_v49 = vsel %vm12115_vm3, %v423_v40, %v427_v25  ;;  %v286_v26 = vld [vmem:[%s12104_s6 + $0x70] sm:$0xf] }
  0x3b   : > { %705 = vrot.lane.b32.xlu0 %v394_v39, %s11945_s7  ;;  %v435_v50 = vrot.slane %v433_v41, 5  ;;  %v465_v51 = vrot.slane %v463_v42, 5  ;;  %v467_v52 = vshrl.u32 %v277_v29, 16  ;;  %v446_v54 = vor.u32 %v445_v45, %v441_v33  ;;  %v287_v36 = vld [vmem:[%s12104_s6 + $0x74] sm:$0x1] }
  0x3c   : > { %v418_v53 = vsel %vm12115_vm3, %v413_v44, %v417_v12  ;;  %v473_v55 = vshll.u32 %v278_v38, 16  ;;  %v454_v56 = vshrl.u32 %v276_v43, 16  ;;  %v457_v60 = vshll.u32 %v276_v43, 16  ;;  %v285_v37 = vld [vmem:[%s12104_s6 + $0x6c] sm:$0xf] }
  0x3d   : > { %v436_v58 = vor.u32 %v435_v50, %v432_v47  ;;  %v469_v59 = vrot.slane %v467_v52, 4  ;;  %v487_v61 = vshll.u32 %v280_v48, 16  ;;  %711 = vrot.lane.b32.xlu1 %v428_v49, %s11945_s7  ;;  %v447_v63 = vrot.slane %v446_v54, 4 }
  0x3e   : > { %v475_v0 = vrot.slane %v473_v55, 5  ;;  %v456_v1 = vrot.slane %v454_v56, 4  ;;  %v491_v2 = vshrl.u32 %v280_v48, 16  ;;  %v459_v5 = vrot.slane %v457_v60, 5  ;;  %v290_v55 = vld [vmem:[%s12104_s6 + $0x80] sm:$0x1] }
  0x3f   : > { %709 = vrot.lane.b32.xlu0 %v418_v53, %s11945_s7  ;;  %v437_v3 = vrot.slane %v436_v58, 4  ;;  %v470_v4 = vor.u32 %v469_v59, %v465_v51  ;;  %v489_v6 = vrot.slane %v487_v61, 5  ;;  %v452_v8 = vsel %vm12115_vm3, %v447_v63, %v451_v46  ;;  %v289_v46 = vld [vmem:[%s12104_s6 + $0x7c] sm:$0xf]  ;;  %v288_v56 = vld [vmem:[%s12104_s6 + $0x78] sm:$0xf] }
  0x40   : > { %v493_v9 = vrot.slane %v491_v2, 4  ;;  %v497_v10 = vshll.u32 %v281_v57, 16  ;;  %v478_v11 = vshrl.u32 %v279_v62, 16  ;;  %v460_v14 = vor.u32 %v459_v5, %v456_v1  ;;  %v292_v1 = vld [vmem:[%s12104_s6 + $0x88] sm:$0xf] }
  0x41   : > { %v442_v12 = vsel %vm12115_vm3, %v437_v3, %v441_v33  ;;  %v471_v13 = vrot.slane %v470_v4, 4  ;;  %v481_v15 = vshll.u32 %v279_v62, 16  ;;  %715 = vrot.lane.b32.xlu1 %v452_v8, %s11945_s7  ;;  %v511_v21 = vshll.u32 %v283_v7, 16 }
  0x42   : > { %v494_v18 = vor.u32 %v493_v9, %v489_v6  ;;  %v499_v19 = vrot.slane %v497_v10, 5  ;;  %v480_v20 = vrot.slane %v478_v11, 4  ;;  %v461_v23 = vrot.slane %v460_v14, 4  ;;  %v291_v11 = vld [vmem:[%s12104_s6 + $0x84] sm:$0xf] }
  0x43   : > { %713 = vrot.lane.b32.xlu0 %v442_v12, %s11945_s7  ;;  %v476_v22 = vsel %vm12115_vm3, %v471_v13, %v475_v0  ;;  %v483_v24 = vrot.slane %v481_v15, 5  ;;  %v515_v25 = vshrl.u32 %v283_v7, 16  ;;  %v513_v29 = vrot.slane %v511_v21, 5 }
  0x44   : > { %v495_v27 = vrot.slane %v494_v18, 4  ;;  %v521_v30 = vshll.u32 %v284_v16, 16  ;;  %v502_v31 = vshrl.u32 %v282_v17, 16  ;;  %v466_v32 = vsel %vm12115_vm3, %v461_v23, %v465_v51 }
  0x45   : > { %v484_v33 = vor.u32 %v483_v24, %v480_v20  ;;  %v517_v34 = vrot.slane %v515_v25, 4  ;;  %v505_v35 = vshll.u32 %v282_v17, 16  ;;  %719 = vrot.lane.b32.xlu1 %v476_v22, %s11945_s7  ;;  %v535_v41 = vshll.u32 %v286_v26, 16  ;;  %v295_v20 = vld [vmem:[%s12104_s6 + $0x94] sm:$0xf] }
  0x46   : > { %v500_v38 = vsel %vm12115_vm3, %v495_v27, %v499_v19  ;;  %v523_v39 = vrot.slane %v521_v30, 5  ;;  %v504_v40 = vrot.slane %v502_v31, 4  ;;  %v539_v45 = vshrl.u32 %v286_v26, 16  ;;  %v296_v25 = vld [vmem:[%s12104_s6 + $0x98] sm:$0x1] }
  0x47   : > { %717 = vrot.lane.b32.xlu0 %v466_v32, %s11945_s7  ;;  %v485_v42 = vrot.slane %v484_v33, 4  ;;  %v518_v43 = vor.u32 %v517_v34, %v513_v29  ;;  %v507_v44 = vrot.slane %v505_v35, 5  ;;  %v537_v47 = vrot.slane %v535_v41, 5  ;;  %v294_v31 = vld [vmem:[%s12104_s6 + $0x90] sm:$0xf] }
  0x48   : > { %v545_v48 = vshll.u32 %v287_v36, 16  ;;  %v526_v49 = vshrl.u32 %v285_v37, 16  ;;  %v529_v50 = vshll.u32 %v285_v37, 16  ;;  %v541_v54 = vrot.slane %v539_v45, 4 }
  0x49   : > { %v490_v51 = vsel %vm12115_vm3, %v485_v42, %v489_v6  ;;  %v519_v52 = vrot.slane %v518_v43, 4  ;;  %v508_v53 = vor.u32 %v507_v44, %v504_v40  ;;  %723 = vrot.lane.b32.xlu1 %v500_v38, %s11945_s7  ;;  %v559_v60 = vshll.u32 %v289_v46, 16  ;;  %v293_v6 = vld [vmem:[%s12104_s6 + $0x8c] sm:$0x1]  ;;  %v298_v40 = vld [vmem:[%s12104_s6 + $0xa0] sm:$0xf] }
  0x4a   : > { %v547_v57 = vrot.slane %v545_v48, 5  ;;  %v528_v58 = vrot.slane %v526_v49, 4  ;;  %v531_v59 = vrot.slane %v529_v50, 5  ;;  %v542_v63 = vor.u32 %v541_v54, %v537_v47  ;;  %v299_v49 = vld [vmem:[%s12104_s6 + $0xa4] sm:$0x1] }
  0x4b   : > { %721 = vrot.lane.b32.xlu0 %v490_v51, %s11945_s7  ;;  %v524_v61 = vsel %vm12115_vm3, %v519_v52, %v523_v39  ;;  %v509_v62 = vrot.slane %v508_v53, 4  ;;  %v563_v0 = vshrl.u32 %v289_v46, 16  ;;  %v561_v3 = vrot.slane %v559_v60, 5  ;;  %v297_v50 = vld [vmem:[%s12104_s6 + $0x9c] sm:$0xf] }
  0x4c   : > { %v532_v2 = vor.u32 %v531_v59, %v528_v58  ;;  %v569_v4 = vshll.u32 %v290_v55, 16  ;;  %v550_v5 = vshrl.u32 %v288_v56, 16  ;;  %v543_v8 = vrot.slane %v542_v63, 4  ;;  %v301_v59 = vld [vmem:[%s12104_s6 + $0xac] sm:$0xf] }
  0x4d   : > { %v514_v7 = vsel %vm12115_vm3, %v509_v62, %v513_v29  ;;  %v565_v9 = vrot.slane %v563_v0, 4  ;;  %v553_v10 = vshll.u32 %v288_v56, 16  ;;  %727 = vrot.lane.b32.xlu1 %v524_v61, %s11945_s7  ;;  %v583_v15 = vshll.u32 %v292_v1, 16 }
  0x4e   : > { %v533_v12 = vrot.slane %v532_v2, 4  ;;  %v571_v13 = vrot.slane %v569_v4, 5  ;;  %v552_v14 = vrot.slane %v550_v5, 4  ;;  %v548_v16 = vsel %vm12115_vm3, %v543_v8, %v547_v57  ;;  %v302_v4 = vld [vmem:[%s12104_s6 + $0xb0] sm:$0x1] }
  0x4f   : > { %725 = vrot.lane.b32.xlu0 %v514_v7, %s11945_s7  ;;  %v566_v17 = vor.u32 %v565_v9, %v561_v3  ;;  %v555_v18 = vrot.slane %v553_v10, 5  ;;  %v587_v19 = vshrl.u32 %v292_v1, 16  ;;  %v585_v22 = vrot.slane %v583_v15, 5  ;;  %v300_v5 = vld [vmem:[%s12104_s6 + $0xa8] sm:$0xf] }
  0x50   : > { %v538_v21 = vsel %vm12115_vm3, %v533_v12, %v537_v47  ;;  %v593_v23 = vshll.u32 %v293_v6, 16  ;;  %v574_v24 = vshrl.u32 %v291_v11, 16  ;;  %v577_v30 = vshll.u32 %v291_v11, 16 }
  0x51   : > { %v567_v26 = vrot.slane %v566_v17, 4  ;;  %v556_v27 = vor.u32 %v555_v18, %v552_v14  ;;  %v589_v29 = vrot.slane %v587_v19, 4  ;;  %731 = vrot.lane.b32.xlu1 %v548_v16, %s11945_s7  ;;  %v607_v34 = vshll.u32 %v295_v20, 16  ;;  %v304_v14 = vld [vmem:[%s12104_s6 + $0xb8] sm:$0xf] }
  0x52   : > { %v595_v32 = vrot.slane %v593_v23, 5  ;;  %v576_v33 = vrot.slane %v574_v24, 4  ;;  %v611_v35 = vshrl.u32 %v295_v20, 16  ;;  %v579_v39 = vrot.slane %v577_v30, 5  ;;  %v305_v23 = vld [vmem:[%s12104_s6 + $0xbc] sm:$0x1] }
  0x53   : > { %729 = vrot.lane.b32.xlu0 %v538_v21, %s11945_s7  ;;  %v572_v36 = vsel %vm12115_vm3, %v567_v26, %v571_v13  ;;  %v557_v37 = vrot.slane %v556_v27, 4  ;;  %v590_v38 = vor.u32 %v589_v29, %v585_v22  ;;  %v609_v41 = vrot.slane %v607_v34, 5  ;;  %v303_v24 = vld [vmem:[%s12104_s6 + $0xb4] sm:$0xf] }
  0x54   : > { %v613_v42 = vrot.slane %v611_v35, 4  ;;  %v617_v43 = vshll.u32 %v296_v25, 16  ;;  %v598_v44 = vshrl.u32 %v294_v31, 16  ;;  %v580_v47 = vor.u32 %v579_v39, %v576_v33 }
  0x55   : > { %v562_v45 = vsel %vm12115_vm3, %v557_v37, %v561_v3  ;;  %v591_v46 = vrot.slane %v590_v38, 4  ;;  %v601_v48 = vshll.u32 %v294_v31, 16  ;;  %735 = vrot.lane.b32.xlu1 %v572_v36, %s11945_s7  ;;  %v631_v54 = vshll.u32 %v298_v40, 16  ;;  %v823_v38 = vld [vmem:[%s12104_s6 + $0x4] sm:$0xf] }
  0x56   : > { %v614_v51 = vor.u32 %v613_v42, %v609_v41  ;;  %v619_v52 = vrot.slane %v617_v43, 5  ;;  %v600_v53 = vrot.slane %v598_v44, 4  ;;  %v581_v56 = vrot.slane %v580_v47, 4 }
  0x57   : > { %733 = vrot.lane.b32.xlu0 %v562_v45, %s11945_s7  ;;  %v596_v55 = vsel %vm12115_vm3, %v591_v46, %v595_v32  ;;  %v603_v57 = vrot.slane %v601_v48, 5  ;;  %v635_v58 = vshrl.u32 %v298_v40, 16  ;;  %v633_v61 = vrot.slane %v631_v54, 5 }
  0x58   : > { %v615_v60 = vrot.slane %v614_v51, 4  ;;  %v641_v62 = vshll.u32 %v299_v49, 16  ;;  %v622_v63 = vshrl.u32 %v297_v50, 16  ;;  %v586_v0 = vsel %vm12115_vm3, %v581_v56, %v585_v22  ;;  %v824_v49 = vld [vmem:[%s12104_s6 + $0x8] sm:$0x1] }
  0x59   : > { %v604_v1 = vor.u32 %v603_v57, %v600_v53  ;;  %v637_v2 = vrot.slane %v635_v58, 4  ;;  %v625_v3 = vshll.u32 %v297_v50, 16  ;;  %739 = vrot.lane.b32.xlu1 %v596_v55, %s11945_s7  ;;  %v655_v9 = vshll.u32 %v301_v59, 16  ;;  %v822_v55 = vld [vmem:[%s12104_s6] sm:$0xe] }
  0x5a   : > { %v620_v6 = vsel %vm12115_vm3, %v615_v60, %v619_v52  ;;  %v643_v7 = vrot.slane %v641_v62, 5  ;;  %v624_v8 = vrot.slane %v622_v63, 4  ;;  %v659_v13 = vshrl.u32 %v301_v59, 16  ;;  %v826_v52 = vld [vmem:[%s12104_s6 + $0x10] sm:$0xf] }
  0x5b   : > { %737 = vrot.lane.b32.xlu0 %v586_v0, %s11945_s7  ;;  %v605_v10 = vrot.slane %v604_v1, 4  ;;  %v638_v11 = vor.u32 %v637_v2, %v633_v61  ;;  %v627_v12 = vrot.slane %v625_v3, 5  ;;  %v657_v15 = vrot.slane %v655_v9, 5  ;;  %v195_v57 = vld [vmem:[%s12104_s6 + $0xc] sm:$0xf] }
  0x5c   : > { %v665_v16 = vshll.u32 %v302_v4, 16  ;;  %v646_v17 = vshrl.u32 %v300_v5, 16  ;;  %v649_v18 = vshll.u32 %v300_v5, 16  ;;  %v661_v22 = vrot.slane %v659_v13, 4  ;;  %228 = vst.msk [vmem:[#allocation2 + $0x8] sm:$0xf] %vm225_vm4, %v195_v57 }
  0x5d   : > { %v610_v19 = vsel %vm12115_vm3, %v605_v10, %v609_v41  ;;  %v639_v20 = vrot.slane %v638_v11, 4  ;;  %v628_v21 = vor.u32 %v627_v12, %v624_v8  ;;  %743 = vrot.lane.b32.xlu1 %v620_v6, %s11945_s7  ;;  %v679_v29 = vshll.u32 %v304_v14, 16  ;;  %v193_v62 = vld [vmem:[%s12104_s6] sm:$0xf]  ;;  %v827_v1 = vld [vmem:[%s12104_s6 + $0x14] sm:$0x1] }
  0x5e   : > { %v667_v25 = vrot.slane %v665_v16, 5  ;;  %v648_v26 = vrot.slane %v646_v17, 4  ;;  %v651_v27 = vrot.slane %v649_v18, 5  ;;  %v662_v32 = vor.u32 %v661_v22, %v657_v15  ;;  %v829_v2 = vld [vmem:[%s12104_s6 + $0x1c] sm:$0xf] }
  0x5f   : > { %741 = vrot.lane.b32.xlu0 %v610_v19, %s11945_s7  ;;  %v644_v30 = vsel %vm12115_vm3, %v639_v20, %v643_v7  ;;  %v629_v31 = vrot.slane %v628_v21, 4  ;;  %v683_v33 = vshrl.u32 %v304_v14, 16  ;;  %v681_v35 = vrot.slane %v679_v29, 5  ;;  %226 = vst.msk [vmem:[#allocation2] sm:$0xf] %vm225_vm4, %v193_v62 }
  0x60   : > { %v652_v34 = vor.u32 %v651_v27, %v648_v26  ;;  %v689_v36 = vshll.u32 %v305_v23, 16  ;;  %v670_v37 = vshrl.u32 %v303_v24, 16  ;;  %v663_v40 = vrot.slane %v662_v32, 4  ;;  %v825_v4 = vld [vmem:[%s12104_s6 + $0xc] sm:$0xe] }
  0x61   : > { %v634_v39 = vsel %vm12115_vm3, %v629_v31, %v633_v61  ;;  %v685_v41 = vrot.slane %v683_v33, 4  ;;  %v673_v42 = vshll.u32 %v303_v24, 16  ;;  %747 = vrot.lane.b32.xlu1 %v644_v30, %s11945_s7  ;;  %v923_v50 = vrot.slane %v823_v38, 5  ;;  %v196_v5 = vld [vmem:[%s12104_s6 + $0x10] sm:$0xf] }
  0x62   : > { %v653_v43 = vrot.slane %v652_v34, 4  ;;  %v691_v44 = vrot.slane %v689_v36, 5  ;;  %v672_v45 = vrot.slane %v670_v37, 4  ;;  %v668_v46 = vsel %vm12115_vm3, %v663_v40, %v667_v25  ;;  %v194_v6 = vld [vmem:[%s12104_s6 + $0x4] sm:$0xf] }
  0x63   : > { %745 = vrot.lane.b32.xlu0 %v634_v39, %s11945_s7  ;;  %v686_v47 = vor.u32 %v685_v41, %v681_v35  ;;  %v675_v48 = vrot.slane %v673_v42, 5  ;;  %v926_v56 = vrot.slane %v824_v49, 5  ;;  %v925_v60 = vrot.slane %v923_v50, 4  ;;  %229 = vst.msk [vmem:[#allocation2 + $0xc] sm:$0xf] %vm225_vm4, %v196_v5 }
  0x64   : > { %v658_v51 = vsel %vm12115_vm3, %v653_v43, %v657_v15  ;;  %v930_v61 = vrot.slane %v826_v52, 5  ;;  %v10433_v0 = vrot.slane %v822_v55, 9  ;;  %v933_v9 = vrot.slane %v827_v1, 5  ;;  %227 = vst.msk [vmem:[#allocation2 + $0x4] sm:$0xf] %vm225_vm4, %v194_v6 }
  0x65   : > { %v687_v53 = vrot.slane %v686_v47, 4  ;;  %v676_v54 = vor.u32 %v675_v48, %v672_v45  ;;  %751 = vrot.lane.b32.xlu1 %v668_v46, %s11945_s7  ;;  %v927_v7 = vsel %vm12259_vm7, %v925_v60, %v926_v56  ;;  %v937_v10 = vrot.slane %v829_v2, 5  ;;  %v830_v13 = vld [vmem:[%s12104_s6 + $0x20] sm:$0x1]  ;;  %v832_v14 = vld [vmem:[%s12104_s6 + $0x28] sm:$0xf] }
  0x66   : > { %v932_v8 = vrot.slane %v930_v61, 4  ;;  %v924_v11 = vsel %vm12259_vm7, %v10433_v0, %v923_v50  ;;  %v10434_v12 = vrot.slane %v825_v4, 9  ;;  %v828_v15 = vld [vmem:[%s12104_s6 + $0x18] sm:$0xe]  ;;  %v198_v16 = vld [vmem:[%s12104_s6 + $0x1c] sm:$0xf] }
  0x67   : > { %749 = vrot.lane.b32.xlu0 %v658_v51, %s11945_s7  ;;  %v692_v58 = vsel %vm12115_vm3, %v687_v53, %v691_v44  ;;  %v677_v59 = vrot.slane %v676_v54, 4  ;;  %231 = vst.msk [vmem:[#allocation2 + $0x14] sm:$0xf] %vm225_vm4, %v198_v16  ;;  %v197_v17 = vld [vmem:[%s12104_s6 + $0x18] sm:$0xf]  ;;  %v939_v19 = vrot.slane %v937_v10, 4 }
  0x68   : > { %v934_v18 = vsel %vm12259_vm7, %v932_v8, %v933_v9  ;;  %v940_v20 = vrot.slane %v830_v13, 5  ;;  %v944_v21 = vrot.slane %v832_v14, 5  ;;  %230 = vst.msk [vmem:[#allocation2 + $0x10] sm:$0xf] %vm225_vm4, %v197_v17  ;;  %v931_v22 = vsel %vm12259_vm7, %v10434_v12, %v930_v61  ;;  %v833_v24 = vld [vmem:[%s12104_s6 + $0x2c] sm:$0x1] }
  0x69   : > { %v682_v3 = vsel %vm12115_vm3, %v677_v59, %v681_v35  ;;  %755 = vrot.lane.b32.xlu1 %v692_v58, %s11945_s7  ;;  %v10435_v23 = vrot.slane %v828_v15, 9  ;;  %v835_v25 = vld [vmem:[%s12104_s6 + $0x34] sm:$0xf]  ;;  %v831_v26 = vld [vmem:[%s12104_s6 + $0x24] sm:$0xe]  ;;  %v947_v32 = vrot.slane %v833_v24, 5 }
  0x6a   : > { %v200_v27 = vld [vmem:[%s12104_s6 + $0x28] sm:$0xf]  ;;  %v199_v29 = vld [vmem:[%s12104_s6 + $0x24] sm:$0xf]  ;;  %v941_v30 = vsel %vm12259_vm7, %v939_v19, %v940_v20  ;;  %v946_v31 = vrot.slane %v944_v21, 4  ;;  %v951_v34 = vrot.slane %v835_v25, 5 }
  0x6b   : > { %753 = vrot.lane.b32.xlu0 %v682_v3, %s11945_s7  ;;  %233 = vst.msk [vmem:[#allocation2 + $0x1c] sm:$0xf] %vm225_vm4, %v200_v27  ;;  %v836_v33 = vld [vmem:[%s12104_s6 + $0x38] sm:$0x1]  ;;  %232 = vst.msk [vmem:[#allocation2 + $0x18] sm:$0xf] %vm225_vm4, %v199_v29  ;;  %v938_v35 = vsel %vm12259_vm7, %v10435_v23, %v937_v10 }
  0x6c   : > { %v10436_v36 = vrot.slane %v831_v26, 9  ;;  %v838_v37 = vld [vmem:[%s12104_s6 + $0x40] sm:$0xf]  ;;  %v202_v38 = vld [vmem:[%s12104_s6 + $0x34] sm:$0xf]  ;;  %v948_v42 = vsel %vm12259_vm7, %v946_v31, %v947_v32  ;;  %v953_v43 = vrot.slane %v951_v34, 4 }
  0x6d   : > { %1035 = vrot.lane.b32.xlu1 %v927_v7, %s11946_s8  ;;  %v834_v39 = vld [vmem:[%s12104_s6 + $0x30] sm:$0xe]  ;;  %235 = vst.msk [vmem:[#allocation2 + $0x24] sm:$0xf] %vm225_vm4, %v202_v38  ;;  %v839_v41 = vld [vmem:[%s12104_s6 + $0x44] sm:$0x1] }
  0x6e   : > { %v201_v40 = vld [vmem:[%s12104_s6 + $0x30] sm:$0xf]  ;;  %v954_v44 = vrot.slane %v836_v33, 5  ;;  %v958_v45 = vrot.slane %v838_v37, 5  ;;  %v204_v46 = vld [vmem:[%s12104_s6 + $0x40] sm:$0xf]  ;;  %v945_v47 = vsel %vm12259_vm7, %v10436_v36, %v944_v21 }
  0x6f   : > { %1033 = vrot.lane.b32.xlu0 %v924_v11, %s11946_s8  ;;  %234 = vst.msk [vmem:[#allocation2 + $0x20] sm:$0xf] %vm225_vm4, %v201_v40  ;;  %v10437_v48 = vrot.slane %v834_v39, 9  ;;  %v841_v49 = vld [vmem:[%s12104_s6 + $0x4c] sm:$0xf]  ;;  %v961_v56 = vrot.slane %v839_v41, 5 }
  0x70   : > { %237 = vst.msk [vmem:[#allocation2 + $0x2c] sm:$0xf] %vm225_vm4, %v204_v46  ;;  %v203_v50 = vld [vmem:[%s12104_s6 + $0x3c] sm:$0xf]  ;;  %v842_v52 = vld [vmem:[%s12104_s6 + $0x50] sm:$0x1]  ;;  %v955_v54 = vsel %vm12259_vm7, %v953_v43, %v954_v44 }
  0x71   : > { %1039 = vrot.lane.b32.xlu1 %v934_v18, %s11946_s8  ;;  %v837_v51 = vld [vmem:[%s12104_s6 + $0x3c] sm:$0xe]  ;;  %236 = vst.msk [vmem:[#allocation2 + $0x28] sm:$0xf] %vm225_vm4, %v203_v50  ;;  %v206_v53 = vld [vmem:[%s12104_s6 + $0x4c] sm:$0xf]  ;;  %v952_v59 = vsel %vm12259_vm7, %v10437_v48, %v951_v34 }
  0x72   : > { %v960_v55 = vrot.slane %v958_v45, 4  ;;  %v965_v57 = vrot.slane %v841_v49, 5  ;;  %239 = vst.msk [vmem:[#allocation2 + $0x34] sm:$0xf] %vm225_vm4, %v206_v53  ;;  %v205_v58 = vld [vmem:[%s12104_s6 + $0x48] sm:$0xf] }
  0x73   : > { %1037 = vrot.lane.b32.xlu0 %v931_v22, %s11946_s8  ;;  %v10438_v60 = vrot.slane %v837_v51, 9  ;;  %v12336_v61 = vld [vmem:[%s12104_s6 + $0x58] sm:$0xf]  ;;  %238 = vst.msk [vmem:[#allocation2 + $0x30] sm:$0xf] %vm225_vm4, %v205_v58  ;;  %v968_v3 = vrot.slane %v842_v52, 5 }
  0x74   : > { %v208_v62 = vld [vmem:[%s12104_s6 + $0x58] sm:$0xf]  ;;  %v840_v0 = vld [vmem:[%s12104_s6 + $0x48] sm:$0xe]  ;;  %v845_v1 = vld [vmem:[%s12104_s6 + $0x5c] sm:$0x1]  ;;  %v962_v6 = vsel %vm12259_vm7, %v960_v55, %v961_v56 }
  0x75   : > { %1043 = vrot.lane.b32.xlu1 %v941_v30, %s11946_s8  ;;  %241 = vst.msk [vmem:[#allocation2 + $0x3c] sm:$0xf] %vm225_vm4, %v208_v62  ;;  %v207_v2 = vld [vmem:[%s12104_s6 + $0x54] sm:$0xf]  ;;  %v210_v4 = vld [vmem:[%s12104_s6 + $0x64] sm:$0xf]  ;;  %v959_v11 = vsel %vm12259_vm7, %v10438_v60, %v958_v45 }
  0x76   : > { %240 = vst.msk [vmem:[#allocation2 + $0x38] sm:$0xf] %vm225_vm4, %v207_v2  ;;  %v209_v5 = vld [vmem:[%s12104_s6 + $0x60] sm:$0xf]  ;;  %v967_v7 = vrot.slane %v965_v57, 4  ;;  %v972_v8 = vrot.slane %v12336_v61, 5 }
  0x77   : > { %1041 = vrot.lane.b32.xlu0 %v938_v35, %s11946_s8  ;;  %243 = vst.msk [vmem:[#allocation2 + $0x44] sm:$0xf] %vm225_vm4, %v210_v4  ;;  %242 = vst.msk [vmem:[#allocation2 + $0x40] sm:$0xf] %vm225_vm4, %v209_v5  ;;  %v212_v9 = vld [vmem:[%s12104_s6 + $0x70] sm:$0xf] }
  0x78   : > { %v211_v10 = vld [vmem:[%s12104_s6 + $0x6c] sm:$0xf]  ;;  %v10439_v12 = vrot.slane %v840_v0, 9  ;;  %v847_v13 = vld [vmem:[%s12104_s6 + $0x64] sm:$0xf]  ;;  %v975_v18 = vrot.slane %v845_v1, 5  ;;  %v969_v21 = vsel %vm12259_vm7, %v967_v7, %v968_v3 }
  0x79   : > { %1047 = vrot.lane.b32.xlu1 %v948_v42, %s11946_s8  ;;  %245 = vst.msk [vmem:[#allocation2 + $0x4c] sm:$0xf] %vm225_vm4, %v212_v9  ;;  %244 = vst.msk [vmem:[#allocation2 + $0x48] sm:$0xf] %vm225_vm4, %v211_v10  ;;  %v214_v14 = vld [vmem:[%s12104_s6 + $0x7c] sm:$0xf] }
  0x7a   : > { %v843_v15 = vld [vmem:[%s12104_s6 + $0x54] sm:$0xe]  ;;  %v848_v16 = vld [vmem:[%s12104_s6 + $0x68] sm:$0x1]  ;;  %247 = vst.msk [vmem:[#allocation2 + $0x54] sm:$0xf] %vm225_vm4, %v214_v14  ;;  %v966_v26 = vsel %vm12259_vm7, %v10439_v12, %v965_v57 }
  0x7b   : > { %1045 = vrot.lane.b32.xlu0 %v945_v47, %s11946_s8  ;;  %v213_v17 = vld [vmem:[%s12104_s6 + $0x78] sm:$0xf]  ;;  %v216_v19 = vld [vmem:[%s12104_s6 + $0x88] sm:$0xf]  ;;  %v215_v20 = vld [vmem:[%s12104_s6 + $0x84] sm:$0xf] }
  0x7c   : > { %246 = vst.msk [vmem:[#allocation2 + $0x50] sm:$0xf] %vm225_vm4, %v213_v17  ;;  %v974_v22 = vrot.slane %v972_v8, 4  ;;  %v979_v23 = vrot.slane %v847_v13, 5  ;;  %249 = vst.msk [vmem:[#allocation2 + $0x5c] sm:$0xf] %vm225_vm4, %v216_v19 }
  0x7d   : > { %1051 = vrot.lane.b32.xlu1 %v955_v54, %s11946_s8  ;;  %248 = vst.msk [vmem:[#allocation2 + $0x58] sm:$0xf] %vm225_vm4, %v215_v20  ;;  %v218_v24 = vld [vmem:[%s12104_s6 + $0x94] sm:$0xf]  ;;  %v217_v25 = vld [vmem:[%s12104_s6 + $0x90] sm:$0xf] }
  0x7e   : > { %v10440_v27 = vrot.slane %v843_v15, 9  ;;  %v850_v29 = vld [vmem:[%s12104_s6 + $0x70] sm:$0xf]  ;;  %251 = vst.msk [vmem:[#allocation2 + $0x64] sm:$0xf] %vm225_vm4, %v218_v24  ;;  %v982_v33 = vrot.slane %v848_v16, 5  ;;  %v976_v36 = vsel %vm12259_vm7, %v974_v22, %v975_v18 }
  0x7f   : > { %1049 = vrot.lane.b32.xlu0 %v952_v59, %s11946_s8  ;;  %250 = vst.msk [vmem:[#allocation2 + $0x60] sm:$0xf] %vm225_vm4, %v217_v25  ;;  %v220_v30 = vld [vmem:[%s12104_s6 + $0xa0] sm:$0xf]  ;;  %v219_v32 = vld [vmem:[%s12104_s6 + $0x9c] sm:$0xf] }
  0x80   : > { %v846_v31 = vld [vmem:[%s12104_s6 + $0x60] sm:$0xe]  ;;  %253 = vst.msk [vmem:[#allocation2 + $0x6c] sm:$0xf] %vm225_vm4, %v220_v30  ;;  %252 = vst.msk [vmem:[#allocation2 + $0x68] sm:$0xf] %vm225_vm4, %v219_v32  ;;  %v973_v41 = vsel %vm12259_vm7, %v10440_v27, %v972_v8 }
  0x81   : > { %1055 = vrot.lane.b32.xlu1 %v962_v6, %s11946_s8  ;;  %v222_v34 = vld [vmem:[%s12104_s6 + $0xac] sm:$0xf]  ;;  %v221_v35 = vld [vmem:[%s12104_s6 + $0xa8] sm:$0xf]  ;;  %v981_v37 = vrot.slane %v979_v23, 4  ;;  %v986_v38 = vrot.slane %v850_v29, 5 }
  0x82   : > { %255 = vst.msk [vmem:[#allocation2 + $0x74] sm:$0xf] %vm225_vm4, %v222_v34  ;;  %254 = vst.msk [vmem:[#allocation2 + $0x70] sm:$0xf] %vm225_vm4, %v221_v35  ;;  %v224_v39 = vld [vmem:[%s12104_s6 + $0xb8] sm:$0xf] }
  0x83   : > { %1053 = vrot.lane.b32.xlu0 %v959_v11, %s11946_s8  ;;  %v223_v40 = vld [vmem:[%s12104_s6 + $0xb4] sm:$0xf]  ;;  %v10441_v42 = vrot.slane %v846_v31, 9  ;;  %v853_v44 = vld [vmem:[%s12104_s6 + $0x7c] sm:$0xf]  ;;  %v983_v46 = vsel %vm12259_vm7, %v981_v37, %v982_v33  ;;  %v988_v47 = vrot.slane %v986_v38, 4 }
  0x84   : > { %v851_v43 = vld [vmem:[%s12104_s6 + $0x74] sm:$0x1]  ;;  %257 = vst.msk [vmem:[#allocation2 + $0x7c] sm:$0xf] %vm225_vm4, %v224_v39  ;;  %256 = vst.msk [vmem:[#allocation2 + $0x78] sm:$0xf] %vm225_vm4, %v223_v40 }
  0x85   : > { %1059 = vrot.lane.b32.xlu1 %v969_v21, %s11946_s8  ;;  %v849_v45 = vld [vmem:[%s12104_s6 + $0x6c] sm:$0xe]  ;;  %v989_v48 = vrot.slane %v851_v43, 5  ;;  %v993_v49 = vrot.slane %v853_v44, 5  ;;  %v980_v50 = vsel %vm12259_vm7, %v10441_v42, %v979_v23  ;;  %v854_v52 = vld [vmem:[%s12104_s6 + $0x80] sm:$0x1] }
  0x86   : > { %v10442_v51 = vrot.slane %v849_v45, 9  ;;  %v856_v53 = vld [vmem:[%s12104_s6 + $0x88] sm:$0xf]  ;;  %v852_v54 = vld [vmem:[%s12104_s6 + $0x78] sm:$0xe]  ;;  %v996_v57 = vrot.slane %v854_v52, 5 }
  0x87   : > { %1057 = vrot.lane.b32.xlu0 %v966_v26, %s11946_s8  ;;  %v990_v55 = vsel %vm12259_vm7, %v988_v47, %v989_v48  ;;  %v995_v56 = vrot.slane %v993_v49, 4  ;;  %v1000_v58 = vrot.slane %v856_v53, 5  ;;  %v10443_v60 = vrot.slane %v852_v54, 9  ;;  %v857_v61 = vld [vmem:[%s12104_s6 + $0x8c] sm:$0x1]  ;;  %s11959_s7 = smov 60  }
  0x88   : > { %v987_v59 = vsel %vm12259_vm7, %v10442_v51, %v986_v38  ;;  %v859_v62 = vld [vmem:[%s12104_s6 + $0x94] sm:$0xf]  ;;  %v855_v0 = vld [vmem:[%s12104_s6 + $0x84] sm:$0xe]  ;;  %v1003_v3 = vrot.slane %v857_v61, 5  ;;  %vm3317_vm15 = vcmask 290048  }
  0x89   : > { %1063 = vrot.lane.b32.xlu1 %v976_v36, %s11946_s8  ;;  %v997_v1 = vsel %vm12259_vm7, %v995_v56, %v996_v57  ;;  %v1002_v2 = vrot.slane %v1000_v58, 4  ;;  %v1007_v4 = vrot.slane %v859_v62, 5  ;;  %v994_v5 = vsel %vm12259_vm7, %v10443_v60, %v993_v49  ;;  %v860_v7 = vld [vmem:[%s12104_s6 + $0x98] sm:$0x1]  ;;  %v862_v8 = vld [vmem:[%s12104_s6 + $0xa0] sm:$0xf] }
  0x8a   : > { %v10444_v6 = vrot.slane %v855_v0, 9  ;;  %v858_v9 = vld [vmem:[%s12104_s6 + $0x90] sm:$0xe]  ;;  %v1010_v12 = vrot.slane %v860_v7, 5  ;;  %v1014_v13 = vrot.slane %v862_v8, 5  ;;  %vm3514_vm0 = vcmask 322848  }
  0x8b   : > { %1061 = vrot.lane.b32.xlu0 %v973_v41, %s11946_s8  ;;  %v1004_v10 = vsel %vm12259_vm7, %v1002_v2, %v1003_v3  ;;  %v1009_v11 = vrot.slane %v1007_v4, 4  ;;  %v10445_v15 = vrot.slane %v858_v9, 9  ;;  %v863_v16 = vld [vmem:[%s12104_s6 + $0xa4] sm:$0x1]  ;;  %v865_v17 = vld [vmem:[%s12104_s6 + $0xac] sm:$0xf] }
  0x8c   : > { %v1001_v14 = vsel %vm12259_vm7, %v10444_v6, %v1000_v58  ;;  %v861_v18 = vld [vmem:[%s12104_s6 + $0x9c] sm:$0xe]  ;;  %v1016_v20 = vrot.slane %v1014_v13, 4  ;;  %v1017_v21 = vrot.slane %v863_v16, 5  ;;  %v1021_v22 = vrot.slane %v865_v17, 5 }
  0x8d   : > { %1067 = vrot.lane.b32.xlu1 %v983_v46, %s11946_s8  ;;  %v1011_v19 = vsel %vm12259_vm7, %v1009_v11, %v1010_v12  ;;  %v1008_v23 = vsel %vm12259_vm7, %v10445_v15, %v1007_v4  ;;  %v10446_v24 = vrot.slane %v861_v18, 9  ;;  %v866_v25 = vld [vmem:[%s12104_s6 + $0xb0] sm:$0x1]  ;;  %v868_v26 = vld [vmem:[%s12104_s6 + $0xb8] sm:$0xf]  ;;  %vm4075_vm1 = vcmask 355648  }
  0x8e   : > { %v864_v27 = vld [vmem:[%s12104_s6 + $0xa8] sm:$0xe]  ;;  %v1018_v29 = vsel %vm12259_vm7, %v1016_v20, %v1017_v21  ;;  %v1023_v30 = vrot.slane %v1021_v22, 4  ;;  %v1024_v31 = vrot.slane %v866_v25, 5  ;;  %v1028_v32 = vrot.slane %v868_v26, 5 }
  0x8f   : > { %1065 = vrot.lane.b32.xlu0 %v980_v50, %s11946_s8  ;;  %v1015_v34 = vsel %vm12259_vm7, %v10446_v24, %v1014_v13  ;;  %v10447_v35 = vrot.slane %v864_v27, 9  ;;  %v869_v36 = vld [vmem:[%s12104_s6 + $0xbc] sm:$0x1]  ;;  %v867_v38 = vld [vmem:[%s12104_s6 + $0xb4] sm:$0xe]  ;;  %vm4412_vm2 = vcmask 388448  }
  0x90   : > { %v1025_v39 = vsel %vm12259_vm7, %v1023_v30, %v1024_v31  ;;  %v1030_v40 = vrot.slane %v1028_v32, 4  ;;  %v1031_v41 = vrot.slane %v869_v36, 5  ;;  %v10448_v44 = vrot.slane %v867_v38, 9  ;;  %v10451_v50 = vld [vmem:[%s12104_s6 + $0x10] sm:$0xf] }
  0x91   : > { %1071 = vrot.lane.b32.xlu1 %v990_v55, %s11946_s8  ;;  %v1022_v43 = vsel %vm12259_vm7, %v10447_v35, %v1021_v22  ;;  %v10450_v52 = vld [vmem:[%s12104_s6 + $0xc] sm:$0xf]  ;;  %v10453_v54 = vld [vmem:[%s12104_s6 + $0x1c] sm:$0xf]  ;;  %v10452_v56 = vld [vmem:[%s12104_s6 + $0x18] sm:$0xf] }
  0x92   : > { %v1032_v46 = vsel %vm12259_vm7, %v1030_v40, %v1031_v41  ;;  %v1029_v48 = vsel %vm12259_vm7, %v10448_v44, %v1028_v32  ;;  %v10455_v58 = vld [vmem:[%s12104_s6 + $0x28] sm:$0xf]  ;;  %v10454_v60 = vld [vmem:[%s12104_s6 + $0x24] sm:$0xf]  ;;  %v10457_v62 = vld [vmem:[%s12104_s6 + $0x34] sm:$0xf] }
  0x93   : > { %1069 = vrot.lane.b32.xlu0 %v987_v59, %s11946_s8  ;;  %v10459_v3 = vld [vmem:[%s12104_s6 + $0x40] sm:$0xf]  ;;  %v10461_v7 = vld [vmem:[%s12104_s6 + $0x4c] sm:$0xf]  ;;  %v10460_v9 = vld [vmem:[%s12104_s6 + $0x48] sm:$0xf] }
  0x94   : > { %v10463_v11 = vld [vmem:[%s12104_s6 + $0x58] sm:$0xf]  ;;  %v10462_v13 = vld [vmem:[%s12104_s6 + $0x54] sm:$0xf]  ;;  %v10465_v15 = vld [vmem:[%s12104_s6 + $0x64] sm:$0xf] }
  0x95   : > { %1075 = vrot.lane.b32.xlu1 %v997_v1, %s11946_s8  ;;  %v10456_v1 = vld [vmem:[%s12104_s6 + $0x30] sm:$0xf]  ;;  %v10464_v17 = vld [vmem:[%s12104_s6 + $0x60] sm:$0xf]  ;;  %v10466_v21 = vld [vmem:[%s12104_s6 + $0x6c] sm:$0xf] }
  0x96   : > { %v10468_v25 = vld [vmem:[%s12104_s6 + $0x78] sm:$0xf]  ;;  %v10471_v27 = vld [vmem:[%s12104_s6 + $0x88] sm:$0xf]  ;;  %v10470_v30 = vld [vmem:[%s12104_s6 + $0x84] sm:$0xf] }
  0x97   : > { %1073 = vrot.lane.b32.xlu0 %v994_v5, %s11946_s8  ;;  %v10458_v5 = vld [vmem:[%s12104_s6 + $0x3c] sm:$0xf]  ;;  %v10483_v32 = vld [vmem:[%s12104_s6 + $0x10] sm:$0xf]  ;;  %v10485_v38 = vld [vmem:[%s12104_s6 + $0x18] sm:$0xf] }
  0x98   : > { %v10486_v35 = vld [vmem:[%s12104_s6 + $0x1c] sm:$0xf]  ;;  %v1416_v40 = vshll.u32 %v10483_v32, 16  ;;  %v1420_v41 = vshrl.u32 %v10483_v32, 16  ;;  %vm4608_vm4 = vcmask 421248   ;;  %vm5169_vm5 = vcmask 454048  }
  0x99   : > { %1079 = vrot.lane.b32.xlu1 %v1004_v10, %s11946_s8  ;;  %v1440_v44 = vshll.u32 %v10486_v35, 16  ;;  %vm5506_vm6 = vcmask 486848  }
  0x9b   : > { %1077 = vrot.lane.b32.xlu0 %v1001_v14, %s11946_s8 }
  0x9d   : > { %1083 = vrot.lane.b32.xlu1 %v1011_v19, %s11946_s8  ;;  %v10467_v19 = vld [vmem:[%s12104_s6 + $0x70] sm:$0xf] }
  0x9f   : > { %1081 = vrot.lane.b32.xlu0 %v1008_v23, %s11946_s8  ;;  %v698_v33 = vpop.permute.xlu1 %697  ;;  %v10469_v23 = vld [vmem:[%s12104_s6 + $0x7c] sm:$0xf] }
  0xa0   : > { %792 = vst.msk [vmem:[#allocation2 + $0x8] sm:$0xf] %vm789_vm8, %v698_v33  ;;  %v10482_v33 = vld [vmem:[%s12104_s6 + $0xc] sm:$0xf] }
  0xa1   : > { %v694_v37 = vpop.permute.xlu0 %693  ;;  %1087 = vrot.lane.b32.xlu1 %v1018_v29, %s11946_s8 }
  0xa2   : > { %790 = vst.msk [vmem:[#allocation2] sm:$0xf] %vm789_vm8, %v694_v37  ;;  %v10472_v37 = vld [vmem:[%s12104_s6 + $0x90] sm:$0xf] }
  0xa3   : > { %1085 = vrot.lane.b32.xlu0 %v1015_v34, %s11946_s8  ;;  %v700_v42 = vpop.permute.xlu1 %699  ;;  %v10473_v34 = vld [vmem:[%s12104_s6 + $0x94] sm:$0xf] }
  0xa4   : > { %793 = vst.msk [vmem:[#allocation2 + $0xc] sm:$0xf] %vm789_vm8, %v700_v42  ;;  %v1407_v42 = vshrl.u32 %v10482_v33, 16 }
  0xa5   : > { %v696_v45 = vpop.permute.xlu0 %695  ;;  %1091 = vrot.lane.b32.xlu1 %v1025_v39, %s11946_s8 }
  0xa6   : > { %791 = vst.msk [vmem:[#allocation2 + $0x4] sm:$0xf] %vm789_vm8, %v696_v45  ;;  %v1444_v45 = vshrl.u32 %v10486_v35, 16 }
  0xa7   : > { %1089 = vrot.lane.b32.xlu0 %v1022_v43, %s11946_s8  ;;  %v704_v47 = vpop.permute.xlu1 %703  ;;  %v1410_v43 = vshll.u32 %v10482_v33, 16 }
  0xa8   : > { %795 = vst.msk [vmem:[#allocation2 + $0x14] sm:$0xf] %vm789_vm8, %v704_v47  ;;  %v1431_v47 = vshrl.u32 %v10485_v38, 16 }
  0xa9   : > { %v702_v49 = vpop.permute.xlu0 %701  ;;  %1095 = vrot.lane.b32.xlu1 %v1032_v46, %s11946_s8  ;;  %v10475_v46 = vld [vmem:[%s12104_s6 + $0xa0] sm:$0xf] }
  0xaa   : > { %794 = vst.msk [vmem:[#allocation2 + $0x10] sm:$0xf] %vm789_vm8, %v702_v49  ;;  %v10489_v49 = vld [vmem:[%s12104_s6 + $0x28] sm:$0xf] }
  0xab   : > { %1093 = vrot.lane.b32.xlu0 %v1029_v48, %s11946_s8  ;;  %v708_v51 = vpop.permute.xlu1 %707  ;;  %v1434_v48 = vshll.u32 %v10485_v38, 16  ;;  %v10480_v38 = vld [vmem:[%s12104_s6 + $0xc0] sm:$0xf] }
  0xac   : > { %797 = vst.msk [vmem:[#allocation2 + $0x1c] sm:$0xf] %vm789_vm8, %v708_v51  ;;  %v10474_v51 = vld [vmem:[%s12104_s6 + $0x9c] sm:$0xf] }
  0xad   : > { %v706_v53 = vpop.permute.xlu0 %705  ;;  %1231 = vrot.lane.b32.xlu1 %v10451_v50, %s11947_s17 }
  0xae   : > { %796 = vst.msk [vmem:[#allocation2 + $0x18] sm:$0xf] %vm789_vm8, %v706_v53 }
  0xaf   : > { %1229 = vrot.lane.b32.xlu0 %v10450_v52, %s11947_s17  ;;  %v712_v55 = vpop.permute.xlu1 %711  ;;  %v10488_v52 = vld [vmem:[%s12104_s6 + $0x24] sm:$0xf] }
  0xb0   : > { %799 = vst.msk [vmem:[#allocation2 + $0x24] sm:$0xf] %vm789_vm8, %v712_v55  ;;  %v12559_v55 = vrot.slane %v1416_v40, 5 }
  0xb1   : > { %v710_v57 = vpop.permute.xlu0 %709  ;;  %1235 = vrot.lane.b32.xlu1 %v10453_v54, %s11947_s17  ;;  %v10484_v54 = vld [vmem:[%s12104_s6 + $0x14] sm:$0x1] }
  0xb2   : > { %798 = vst.msk [vmem:[#allocation2 + $0x20] sm:$0xf] %vm789_vm8, %v710_v57  ;;  %v1409_v57 = vrot.slane %v1407_v42, 4 }
  0xb3   : > { %1233 = vrot.lane.b32.xlu0 %v10452_v56, %s11947_s17  ;;  %v716_v59 = vpop.permute.xlu1 %715  ;;  %v1422_v56 = vrot.slane %v1420_v41, 4 }
  0xb4   : > { %801 = vst.msk [vmem:[#allocation2 + $0x2c] sm:$0xf] %vm789_vm8, %v716_v59  ;;  %v10487_v59 = vld [vmem:[%s12104_s6 + $0x20] sm:$0x1] }
  0xb5   : > { %v714_v61 = vpop.permute.xlu0 %713  ;;  %1239 = vrot.lane.b32.xlu1 %v10455_v58, %s11947_s17  ;;  %v1412_v58 = vrot.slane %v1410_v43, 5 }
  0xb6   : > { %800 = vst.msk [vmem:[#allocation2 + $0x28] sm:$0xf] %vm789_vm8, %v714_v61  ;;  %v1446_v61 = vrot.slane %v1444_v45, 4  ;;  %v10493_v45 = vld [vmem:[%s12104_s6 + $0x38] sm:$0x1] }
  0xb7   : > { %1237 = vrot.lane.b32.xlu0 %v10454_v60, %s11947_s17  ;;  %v720_v0 = vpop.permute.xlu1 %719  ;;  %v12564_v60 = vrot.slane %v1440_v44, 5 }
  0xb8   : > { %803 = vst.msk [vmem:[#allocation2 + $0x34] sm:$0xf] %vm789_vm8, %v720_v0  ;;  %v10477_v0 = vld [vmem:[%s12104_s6 + $0xac] sm:$0xf] }
  0xb9   : > { %v718_v2 = vpop.permute.xlu0 %717  ;;  %1243 = vrot.lane.b32.xlu1 %v10457_v62, %s11947_s17  ;;  %v1464_v62 = vshll.u32 %v10489_v49, 16 }
  0xba   : > { %802 = vst.msk [vmem:[#allocation2 + $0x30] sm:$0xf] %vm789_vm8, %v718_v2  ;;  %v1436_v2 = vrot.slane %v1434_v48, 5 }
  0xbb   : > { %1241 = vrot.lane.b32.xlu0 %v10456_v1, %s11947_s17  ;;  %v724_v4 = vpop.permute.xlu1 %723  ;;  %v1433_v1 = vrot.slane %v1431_v47, 4 }
  0xbc   : > { %805 = vst.msk [vmem:[#allocation2 + $0x3c] sm:$0xf] %vm789_vm8, %v724_v4  ;;  %v1455_v4 = vshrl.u32 %v10488_v52, 16 }
  0xbd   : > { %v722_v6 = vpop.permute.xlu0 %721  ;;  %1247 = vrot.lane.b32.xlu1 %v10459_v3, %s11947_s17  ;;  %v1468_v3 = vshrl.u32 %v10489_v49, 16 }
  0xbe   : > { %804 = vst.msk [vmem:[#allocation2 + $0x38] sm:$0xf] %vm789_vm8, %v722_v6  ;;  %v10476_v6 = vld [vmem:[%s12104_s6 + $0xa8] sm:$0xf] }
  0xbf   : > { %1245 = vrot.lane.b32.xlu0 %v10458_v5, %s11947_s17  ;;  %v728_v8 = vpop.permute.xlu1 %727 }
  0xc0   : > { %807 = vst.msk [vmem:[#allocation2 + $0x44] sm:$0xf] %vm789_vm8, %v728_v8 }
  0xc1   : > { %v726_v10 = vpop.permute.xlu0 %725  ;;  %1251 = vrot.lane.b32.xlu1 %v10461_v7, %s11947_s17  ;;  %v1458_v7 = vshll.u32 %v10488_v52, 16 }
  0xc2   : > { %806 = vst.msk [vmem:[#allocation2 + $0x40] sm:$0xf] %vm789_vm8, %v726_v10  ;;  %v1450_v10 = vshll.u32 %v10487_v59, 16 }
  0xc3   : > { %1249 = vrot.lane.b32.xlu0 %v10460_v9, %s11947_s17  ;;  %v732_v12 = vpop.permute.xlu1 %731  ;;  %v1426_v9 = vshll.u32 %v10484_v54, 16 }
  0xc4   : > { %809 = vst.msk [vmem:[#allocation2 + $0x4c] sm:$0xf] %vm789_vm8, %v732_v12  ;;  %v10491_v12 = vld [vmem:[%s12104_s6 + $0x30] sm:$0xf]  ;;  %v12584_v32 = vrot.slane %v1450_v10, 5 }
  0xc5   : > { %v730_v14 = vpop.permute.xlu0 %729  ;;  %1255 = vrot.lane.b32.xlu1 %v10463_v11, %s11947_s17  ;;  %v10492_v11 = vld [vmem:[%s12104_s6 + $0x34] sm:$0xf]  ;;  %v1482_v33 = vshll.u32 %v10491_v12, 16 }
  0xc6   : > { %808 = vst.msk [vmem:[#allocation2 + $0x48] sm:$0xf] %vm789_vm8, %v730_v14  ;;  %v1423_v14 = vor.u32 %v1422_v56, %v12559_v55 }
  0xc7   : > { %1253 = vrot.lane.b32.xlu0 %v10462_v13, %s11947_s17  ;;  %v736_v16 = vpop.permute.xlu1 %735  ;;  %v10479_v13 = vld [vmem:[%s12104_s6 + $0xb8] sm:$0xf] }
  0xc8   : > { %811 = vst.msk [vmem:[#allocation2 + $0x54] sm:$0xf] %vm789_vm8, %v736_v16  ;;  %v1447_v16 = vor.u32 %v1446_v61, %v12564_v60  ;;  %v1498_v61 = vshll.u32 %v10493_v45, 16 }
  0xc9   : > { %v734_v18 = vpop.permute.xlu0 %733  ;;  %1259 = vrot.lane.b32.xlu1 %v10465_v15, %s11947_s17  ;;  %v1413_v15 = vor.u32 %v1412_v58, %v1409_v57 }
  0xca   : > { %810 = vst.msk [vmem:[#allocation2 + $0x50] sm:$0xf] %vm789_vm8, %v734_v18  ;;  %v1437_v18 = vor.u32 %v1436_v2, %v1433_v1 }
  0xcb   : > { %1257 = vrot.lane.b32.xlu0 %v10464_v17, %s11947_s17  ;;  %v740_v20 = vpop.permute.xlu1 %739  ;;  %v10478_v17 = vld [vmem:[%s12104_s6 + $0xb4] sm:$0xf]  ;;  %v1414_v35 = vrot.slane %v1413_v15, 4 }
  0xcc   : > { %813 = vst.msk [vmem:[#allocation2 + $0x5c] sm:$0xf] %vm789_vm8, %v740_v20  ;;  %v1470_v20 = vrot.slane %v1468_v3, 4  ;;  %v12594_v40 = vrot.slane %v1437_v18, 4 }
  0xcd   : > { %v738_v22 = vpop.permute.xlu0 %737  ;;  %1263 = vrot.lane.b32.xlu1 %v10467_v19, %s11947_s17  ;;  %v12579_v19 = vrot.slane %v1464_v62, 5  ;;  %v1419_v57 = vsel %vm12115_vm3, %v1414_v35, %v12559_v55  ;;  %v10498_v62 = vld [vmem:[%s12104_s6 + $0x4c] sm:$0xf]  ;;  %v10499_v35 = vld [vmem:[%s12104_s6 + $0x50] sm:$0x1] }
  0xce   : > { %812 = vst.msk [vmem:[#allocation2 + $0x58] sm:$0xf] %vm789_vm8, %v738_v22  ;;  %v1443_v2 = vsel %vm12115_vm3, %v12594_v40, %v12564_v60 }
  0xcf   : > { %1261 = vrot.lane.b32.xlu0 %v10466_v21, %s11947_s17  ;;  %v744_v24 = vpop.permute.xlu1 %743  ;;  %v1457_v21 = vrot.slane %v1455_v4, 4  ;;  %v1471_v41 = vor.u32 %v1470_v20, %v12579_v19 }
  0xd0   : > { %815 = vst.msk [vmem:[#allocation2 + $0x64] sm:$0xf] %vm789_vm8, %v744_v24  ;;  %v1460_v24 = vrot.slane %v1458_v7, 5 }
  0xd1   : > { %v742_v26 = vpop.permute.xlu0 %741  ;;  %1267 = vrot.lane.b32.xlu1 %v10469_v23, %s11947_s17  ;;  %v10490_v23 = vld [vmem:[%s12104_s6 + $0x2c] sm:$0x1]  ;;  %v12621_v3 = vrot.slane %v1471_v41, 4 }
  0xd2   : > { %814 = vst.msk [vmem:[#allocation2 + $0x60] sm:$0xf] %vm789_vm8, %v742_v26  ;;  %v1492_v26 = vshrl.u32 %v10492_v11, 16  ;;  %v1474_v42 = vshll.u32 %v10490_v23, 16  ;;  %v1461_v44 = vor.u32 %v1460_v24, %v1457_v21 }
  0xd3   : > { %1265 = vrot.lane.b32.xlu0 %v10468_v25, %s11947_s17  ;;  %v748_v29 = vpop.permute.xlu1 %747  ;;  %v1488_v25 = vshll.u32 %v10492_v11, 16 }
  0xd4   : > { %817 = vst.msk [vmem:[#allocation2 + $0x6c] sm:$0xf] %vm789_vm8, %v748_v29  ;;  %v1494_v47 = vrot.slane %v1492_v26, 4  ;;  %v12613_v59 = vrot.slane %v1474_v42, 5  ;;  %v12623_v55 = vrot.slane %v1461_v44, 4 }
  0xd5   : > { %v746_v31 = vpop.permute.xlu0 %745  ;;  %1271 = vrot.lane.b32.xlu1 %v10471_v27, %s11947_s17  ;;  %v1479_v27 = vshrl.u32 %v10491_v12, 16  ;;  %v10500_v12 = vld [vmem:[%s12104_s6 + $0x54] sm:$0xf]  ;;  %v10504_v26 = vld [vmem:[%s12104_s6 + $0x64] sm:$0xf] }
  0xd6   : > { %816 = vst.msk [vmem:[#allocation2 + $0x68] sm:$0xf] %vm789_vm8, %v746_v31  ;;  %v1428_v31 = vrot.slane %v1426_v9, 5  ;;  %v1551_v24 = vshrl.u32 %v10500_v12, 16  ;;  %v1584_v41 = vshll.u32 %v10504_v26, 16 }
  0xd7   : > { %1269 = vrot.lane.b32.xlu0 %v10470_v30, %s11947_s17  ;;  %v752_v36 = vpop.permute.xlu1 %751  ;;  %v10481_v30 = vld [vmem:[%s12104_s6 + $0xc4] sm:$0xf]  ;;  %v1481_v48 = vrot.slane %v1479_v27, 4 }
  0xd8   : > { %819 = vst.msk [vmem:[#allocation2 + $0x74] sm:$0xf] %vm789_vm8, %v752_v36  ;;  %v10495_v36 = vld [vmem:[%s12104_s6 + $0x40] sm:$0xf]  ;;  %v1553_v44 = vrot.slane %v1551_v24, 4 }
  0xd9   : > { %v750_v39 = vpop.permute.xlu0 %749  ;;  %1275 = vrot.lane.b32.xlu1 %v10473_v34, %s11947_s17  ;;  %v1424_v34 = vrot.slane %v1423_v14, 4  ;;  %v1516_v52 = vshrl.u32 %v10495_v36, 16  ;;  %v1540_v14 = vshrl.u32 %v10498_v62, 16 }
  0xda   : > { %818 = vst.msk [vmem:[#allocation2 + $0x70] sm:$0xf] %vm789_vm8, %v750_v39  ;;  %v12592_v39 = vrot.slane %v1447_v16, 4  ;;  %v12635_v16 = vrot.slane %v1498_v61, 5  ;;  %v10506_v61 = vld [vmem:[%s12104_s6 + $0x6c] sm:$0xf] }
  0xdb   : > { %1273 = vrot.lane.b32.xlu0 %v10472_v37, %s11947_s17  ;;  %v756_v50 = vpop.permute.xlu1 %755  ;;  %v10494_v37 = vld [vmem:[%s12104_s6 + $0x3c] sm:$0xf]  ;;  %v1429_v54 = vsel %vm12115_vm3, %v1424_v34, %v1428_v31  ;;  %v1518_v10 = vrot.slane %v1516_v52, 4  ;;  %v1546_v52 = vshll.u32 %v10499_v35, 16 }
  0xdc   : > { %821 = vst.msk [vmem:[#allocation2 + $0x7c] sm:$0xf] %vm789_vm8, %v756_v50  ;;  %v1484_v50 = vrot.slane %v1482_v33, 5  ;;  %v1506_v56 = vshll.u32 %v10494_v37, 16  ;;  %v1453_v58 = vsel %vm12115_vm3, %v12592_v39, %v12584_v32  ;;  %v10503_v33 = vld [vmem:[%s12104_s6 + $0x60] sm:$0xf] }
  0xdd   : > { %v754_v53 = vpop.permute.xlu0 %753  ;;  %1279 = vrot.lane.b32.xlu1 %v10475_v46, %s11947_s17  ;;  %v12598_v46 = vrot.slane %v1488_v25, 5  ;;  %v1554_v25 = vshll.u32 %v10500_v12, 16  ;;  %v1602_v12 = vshll.u32 %v10506_v61, 16 }
  0xde   : > { %820 = vst.msk [vmem:[#allocation2 + $0x78] sm:$0xf] %vm789_vm8, %v754_v53  ;;  %v1503_v53 = vshrl.u32 %v10494_v37, 16  ;;  %v1508_v60 = vrot.slane %v1506_v56, 5  ;;  %v1542_v37 = vrot.slane %v1540_v14, 4  ;;  %v1548_v14 = vrot.slane %v1546_v52, 5 }
  0xdf   : > { %1277 = vrot.lane.b32.xlu0 %v10474_v51, %s11947_s17  ;;  %v1036_v5 = vpop.permute.xlu1 %1035  ;;  %v1512_v51 = vshll.u32 %v10495_v36, 16  ;;  %v1495_v4 = vor.u32 %v1494_v47, %v12598_v46  ;;  %v1556_v45 = vrot.slane %v1554_v25, 5  ;;  %v1588_v47 = vshrl.u32 %v10504_v26, 16  ;;  %v10516_v52 = vld [vmem:[%s12104_s6 + $0x94] sm:$0xf] }
  0xe0   : > { %1131 = vst.msk [vmem:[#allocation2 + $0x4] sm:$0xf] %vm1129_vm9, %v1036_v5  ;;  %v10496_v5 = vld [vmem:[%s12104_s6 + $0x44] sm:$0x1]  ;;  %v1505_v11 = vrot.slane %v1503_v53, 4  ;;  %v1578_v53 = vshll.u32 %v10503_v33, 16 }
  0xe1   : > { %v1034_v8 = vpop.permute.xlu0 %1033  ;;  %1283 = vrot.lane.b32.xlu1 %v10477_v0, %s11947_s17  ;;  %v10497_v0 = vld [vmem:[%s12104_s6 + $0x48] sm:$0xf]  ;;  %v12629_v9 = vrot.slane %v1512_v51, 5  ;;  %v1522_v23 = vshll.u32 %v10496_v5, 16  ;;  %v1590_v5 = vrot.slane %v1588_v47, 4  ;;  %vm5702_vm8 = vcmask 519648  }
  0xe2   : > { %1130 = vst.msk [vmem:[#allocation2] sm:$0xf] %vm1129_vm9, %v1034_v8  ;;  %v1485_v8 = vor.u32 %v1484_v50, %v1481_v48  ;;  %v1527_v15 = vshrl.u32 %v10497_v0, 16  ;;  %v1509_v34 = vor.u32 %v1508_v60, %v1505_v11  ;;  %v1575_v48 = vshrl.u32 %v10503_v33, 16  ;;  %v10512_v47 = vld [vmem:[%s12104_s6 + $0x84] sm:$0xf] }
  0xe3   : > { %1281 = vrot.lane.b32.xlu0 %v10476_v6, %s11947_s17  ;;  %v1040_v22 = vpop.permute.xlu1 %1039  ;;  %v10501_v6 = vld [vmem:[%s12104_s6 + $0x58] sm:$0xf]  ;;  %v1519_v32 = vor.u32 %v1518_v10, %v12629_v9  ;;  %v1524_v51 = vrot.slane %v1522_v23, 5  ;;  %v1599_v11 = vshrl.u32 %v10506_v61, 16 }
  0xe4   : > { %1133 = vst.msk [vmem:[#allocation2 + $0xc] sm:$0xf] %vm1129_vm9, %v1040_v22  ;;  %v1560_v18 = vshll.u32 %v10501_v6, 16  ;;  %v1564_v20 = vshrl.u32 %v10501_v6, 16  ;;  %v1477_v22 = vsel %vm12115_vm3, %v12621_v3, %v12613_v59  ;;  %v1486_v31 = vrot.slane %v1485_v8, 4 }
  0xe5   : > { %v1038_v29 = vpop.permute.xlu0 %1037  ;;  %1287 = vrot.lane.b32.xlu1 %v10479_v13, %s11947_s17  ;;  %v1536_v13 = vshll.u32 %v10498_v62, 16  ;;  %v1577_v6 = vrot.slane %v1575_v48, 4  ;;  %v1580_v8 = vrot.slane %v1578_v53, 5  ;;  %v10515_v53 = vld [vmem:[%s12104_s6 + $0x90] sm:$0xf] }
  0xe6   : > { %1132 = vst.msk [vmem:[#allocation2 + $0x8] sm:$0xf] %vm1129_vm9, %v1038_v29  ;;  %v1467_v29 = vsel %vm12115_vm3, %v12623_v55, %v12579_v19  ;;  %v12655_v19 = vrot.slane %v1560_v18, 5  ;;  %v1566_v40 = vrot.slane %v1564_v20, 4  ;;  %v1491_v56 = vsel %vm12115_vm3, %v1486_v31, %v12598_v46 }
  0xe7   : > { %1285 = vrot.lane.b32.xlu0 %v10478_v17, %s11947_s17  ;;  %v1044_v43 = vpop.permute.xlu1 %1043  ;;  %v1530_v17 = vshll.u32 %v10497_v0, 16  ;;  %v12652_v36 = vrot.slane %v1536_v13, 5  ;;  %v1557_v55 = vor.u32 %v1556_v45, %v1553_v44  ;;  %v1601_v31 = vrot.slane %v1599_v11, 4  ;;  %v10519_v11 = vld [vmem:[%s12104_s6 + $0xa0] sm:$0xf] }
  0xe8   : > { %1135 = vst.msk [vmem:[#allocation2 + $0x14] sm:$0xf] %vm1129_vm9, %v1044_v43  ;;  %v10502_v43 = vld [vmem:[%s12104_s6 + $0x5c] sm:$0x1]  ;;  %v1567_v0 = vor.u32 %v1566_v40, %v12655_v19  ;;  %v10513_v40 = vld [vmem:[%s12104_s6 + $0x88] sm:$0xf] }
  0xe9   : > { %v1042_v49 = vpop.permute.xlu0 %1041  ;;  %1291 = vrot.lane.b32.xlu1 %v10481_v30, %s11947_s17  ;;  %v1496_v30 = vrot.slane %v1495_v4, 4  ;;  %v1532_v39 = vrot.slane %v1530_v17, 5  ;;  %v1543_v59 = vor.u32 %v1542_v37, %v12652_v36  ;;  %v10505_v4 = vld [vmem:[%s12104_s6 + $0x68] sm:$0x1]  ;;  %v12688_v24 = vrot.slane %v1557_v55, 4 }
  0xea   : > { %1134 = vst.msk [vmem:[#allocation2 + $0x10] sm:$0xf] %vm1129_vm9, %v1042_v49  ;;  %v1594_v20 = vshll.u32 %v10505_v4, 16  ;;  %v1568_v23 = vrot.slane %v1567_v0, 4  ;;  %v1660_v61 = vshrl.u32 %v10513_v40, 16  ;;  %v1650_v0 = vshll.u32 %v10512_v47, 16 }
  0xeb   : > { %1289 = vrot.lane.b32.xlu0 %v10480_v38, %s11947_s17  ;;  %v1048_v1 = vpop.permute.xlu1 %1047  ;;  %v1529_v38 = vrot.slane %v1527_v15, 4  ;;  %v1501_v50 = vsel %vm12115_vm3, %v1496_v30, %v12635_v16  ;;  %v10510_v15 = vld [vmem:[%s12104_s6 + $0x7c] sm:$0xf]  ;;  %v1544_v16 = vrot.slane %v1543_v59, 4  ;;  %v1680_v55 = vshll.u32 %v10516_v52, 16  ;;  %s11960_s17 = smov 64  }
  0xec   : > { %1137 = vst.msk [vmem:[#allocation2 + $0x1c] sm:$0xf] %vm1129_vm9, %v1048_v1  ;;  %v1570_v1 = vshll.u32 %v10502_v43, 16  ;;  %v1632_v33 = vshll.u32 %v10510_v15, 16  ;;  %v1596_v44 = vrot.slane %v1594_v20, 5  ;;  %v1684_v4 = vshrl.u32 %v10516_v52, 16 }
  0xed   : > { %v1046_v7 = vpop.permute.xlu0 %1045  ;;  %1792 = vrot.lane.b32.xlu1 %v1429_v54, %s11948_s18  ;;  %v10507_v54 = vld [vmem:[%s12104_s6 + $0x70] sm:$0xf]  ;;  %v1533_v62 = vor.u32 %v1532_v39, %v1529_v38  ;;  %v1549_v38 = vsel %vm12115_vm3, %v1544_v16, %v1548_v14  ;;  %v10514_v16 = vld [vmem:[%s12104_s6 + $0x8c] sm:$0x1]  ;;  %v1652_v20 = vrot.slane %v1650_v0, 5 }
  0xee   : > { %1136 = vst.msk [vmem:[#allocation2 + $0x18] sm:$0xf] %vm1129_vm9, %v1046_v7  ;;  %v1608_v46 = vshll.u32 %v10507_v54, 16  ;;  %v1612_v10 = vshrl.u32 %v10507_v54, 16  ;;  %v12685_v18 = vrot.slane %v1570_v1, 5 }
  0xef   : > { %1790 = vrot.lane.b32.xlu0 %v1419_v57, %s11948_s18  ;;  %v1052_v21 = vpop.permute.xlu1 %1051  ;;  %v1520_v57 = vrot.slane %v1519_v32, 4  ;;  %v1534_v17 = vrot.slane %v1533_v62, 4  ;;  %v1604_v32 = vrot.slane %v1602_v12, 5  ;;  %v10511_v54 = vld [vmem:[%s12104_s6 + $0x80] sm:$0x1]  ;;  %v1647_v62 = vshrl.u32 %v10512_v47, 16 }
  0xf0   : > { %1139 = vst.msk [vmem:[#allocation2 + $0x24] sm:$0xf] %vm1129_vm9, %v1052_v21  ;;  %v10509_v21 = vld [vmem:[%s12104_s6 + $0x78] sm:$0xf]  ;;  %v12691_v26 = vrot.slane %v1608_v46, 5  ;;  %v1614_v30 = vrot.slane %v1612_v10, 4 }
  0xf1   : > { %v1050_v27 = vpop.permute.xlu0 %1049  ;;  %1796 = vrot.lane.b32.xlu1 %v1453_v58, %s11948_s18  ;;  %v1510_v58 = vrot.slane %v1509_v34, 4  ;;  %v1525_v60 = vsel %vm12115_vm3, %v1520_v57, %v1524_v51  ;;  %v1636_v34 = vshrl.u32 %v10510_v15, 16  ;;  %v1623_v35 = vshrl.u32 %v10509_v21, 16  ;;  %v10518_v15 = vld [vmem:[%s12104_s6 + $0x9c] sm:$0xf] }
  0xf2   : > { %1138 = vst.msk [vmem:[#allocation2 + $0x20] sm:$0xf] %vm1129_vm9, %v1050_v27  ;;  %v1581_v27 = vor.u32 %v1580_v8, %v1577_v6  ;;  %v1626_v37 = vshll.u32 %v10509_v21, 16  ;;  %v1539_v39 = vsel %vm12115_vm3, %v1534_v17, %v12652_v36  ;;  %v1605_v51 = vor.u32 %v1604_v32, %v1601_v31 }
  0xf3   : > { %1794 = vrot.lane.b32.xlu0 %v1443_v2, %s11948_s18  ;;  %v1056_v42 = vpop.permute.xlu1 %1055  ;;  %v12672_v2 = vrot.slane %v1584_v41, 5  ;;  %v1515_v13 = vsel %vm12115_vm3, %v1510_v58, %v12629_v9  ;;  %v1638_v57 = vrot.slane %v1636_v34, 4  ;;  %v1625_v58 = vrot.slane %v1623_v35, 4 }
  0xf4   : > { %1141 = vst.msk [vmem:[#allocation2 + $0x2c] sm:$0xf] %vm1129_vm9, %v1056_v42  ;;  %v1573_v42 = vsel %vm12115_vm3, %v1568_v23, %v12685_v18  ;;  %v1582_v36 = vrot.slane %v1581_v27, 4  ;;  %v1628_v59 = vrot.slane %v1626_v37, 5  ;;  %v1642_v8 = vshll.u32 %v10511_v54, 16 }
  0xf5   : > { %v1054_v49 = vpop.permute.xlu0 %1053  ;;  %1800 = vrot.lane.b32.xlu1 %v1477_v22, %s11948_s18  ;;  %v1591_v25 = vor.u32 %v1590_v5, %v12672_v2  ;;  %v1671_v5 = vshrl.u32 %v10515_v53, 16  ;;  %v1674_v10 = vshll.u32 %v10515_v53, 16  ;;  %v1649_v18 = vrot.slane %v1647_v62, 4  ;;  %v10517_v27 = vld [vmem:[%s12104_s6 + $0x98] sm:$0x1] }
  0xf6   : > { %1140 = vst.msk [vmem:[#allocation2 + $0x28] sm:$0xf] %vm1129_vm9, %v1054_v49  ;;  %v1563_v49 = vsel %vm12115_vm3, %v12688_v24, %v12655_v19  ;;  %v1656_v19 = vshll.u32 %v10513_v40, 16  ;;  %v1629_v14 = vor.u32 %v1628_v59, %v1625_v58  ;;  %v1686_v23 = vrot.slane %v1684_v4, 4  ;;  %v10525_v4 = vld [vmem:[%s12104_s6 + $0xb8] sm:$0xf] }
  0xf7   : > { %1798 = vrot.lane.b32.xlu0 %v1467_v29, %s11948_s18  ;;  %v1060_v3 = vpop.permute.xlu1 %1059  ;;  %v10508_v29 = vld [vmem:[%s12104_s6 + $0x74] sm:$0x1]  ;;  %v1592_v43 = vrot.slane %v1591_v25, 4  ;;  %v1673_v24 = vrot.slane %v1671_v5, 4  ;;  %v1704_v25 = vshll.u32 %v10519_v11, 16  ;;  %v1695_v31 = vshrl.u32 %v10518_v15, 16 }
  0xf8   : > { %1143 = vst.msk [vmem:[#allocation2 + $0x34] sm:$0xf] %vm1129_vm9, %v1060_v3  ;;  %v1618_v45 = vshll.u32 %v10508_v29, 16  ;;  %v12735_v17 = vrot.slane %v1656_v19, 5  ;;  %v1676_v29 = vrot.slane %v1674_v10, 5  ;;  %v1698_v32 = vshll.u32 %v10518_v15, 16 }
  0xf9   : > { %v1058_v7 = vpop.permute.xlu0 %1057  ;;  %1804 = vrot.lane.b32.xlu1 %v1501_v50, %s11948_s18  ;;  %v1615_v50 = vor.u32 %v1614_v30, %v12691_v26  ;;  %v1597_v46 = vsel %vm12115_vm3, %v1592_v43, %v1596_v44  ;;  %v1708_v30 = vshrl.u32 %v10519_v11, 16  ;;  %v1644_v34 = vrot.slane %v1642_v8, 5  ;;  %v10524_v10 = vld [vmem:[%s12104_s6 + $0xb4] sm:$0xf]  ;;  %v10523_v11 = vld [vmem:[%s12104_s6 + $0xb0] sm:$0x1] }
  0xfa   : > { %1142 = vst.msk [vmem:[#allocation2 + $0x30] sm:$0xf] %vm1129_vm9, %v1058_v7  ;;  %v1620_v3 = vrot.slane %v1618_v45, 5  ;;  %v1587_v7 = vsel %vm12115_vm3, %v1582_v36, %v12672_v2  ;;  %v1662_v2 = vrot.slane %v1660_v61, 4  ;;  %v1666_v35 = vshll.u32 %v10514_v16, 16 }
  0xfb   : > { %1802 = vrot.lane.b32.xlu0 %v1491_v56, %s11948_s18  ;;  %v1064_v22 = vpop.permute.xlu1 %1063  ;;  %v12719_v56 = vrot.slane %v1632_v33, 5  ;;  %v1616_v12 = vrot.slane %v1615_v50, 4  ;;  %v1653_v44 = vor.u32 %v1652_v20, %v1649_v18  ;;  %v1690_v47 = vshll.u32 %v10517_v27, 16  ;;  %v10520_v50 = vld [vmem:[%s12104_s6 + $0xa4] sm:$0x1] }
  0xfc   : > { %1145 = vst.msk [vmem:[#allocation2 + $0x3c] sm:$0xf] %vm1129_vm9, %v1064_v22  ;;  %v12737_v22 = vrot.slane %v1680_v55, 5  ;;  %v1663_v40 = vor.u32 %v1662_v2, %v12735_v17  ;;  %v1677_v36 = vor.u32 %v1676_v29, %v1673_v24  ;;  %v1700_v52 = vrot.slane %v1698_v32, 5 }
  0xfd   : > { %v1062_v9 = vpop.permute.xlu0 %1061  ;;  %1808 = vrot.lane.b32.xlu1 %v1525_v60, %s11948_s18  ;;  %v1606_v60 = vrot.slane %v1605_v51, 4  ;;  %v1621_v33 = vsel %vm12115_vm3, %v1616_v12, %v1620_v3  ;;  %v1710_v51 = vrot.slane %v1708_v30, 4  ;;  %v1668_v61 = vrot.slane %v1666_v35, 5  ;;  %v10527_v30 = vld [vmem:[%s12104_s6 + $0xc0] sm:$0xf] }
  0xfe   : > { %1144 = vst.msk [vmem:[#allocation2 + $0x38] sm:$0xf] %vm1129_vm9, %v1062_v9  ;;  %v1687_v45 = vor.u32 %v1686_v23, %v12737_v22  ;;  %v1664_v19 = vrot.slane %v1663_v40, 4  ;;  %v1692_v3 = vrot.slane %v1690_v47, 5  ;;  %v1714_v55 = vshll.u32 %v10520_v50, 16 }
  0xff   : > { %1806 = vrot.lane.b32.xlu0 %v1515_v13, %s11948_s18  ;;  %v1068_v41 = vpop.permute.xlu1 %1067  ;;  %v1639_v13 = vor.u32 %v1638_v57, %v12719_v56  ;;  %v1611_v37 = vsel %vm12115_vm3, %v1606_v60, %v12691_v26  ;;  %v1697_v26 = vrot.slane %v1695_v31, 4  ;;  %v1752_v15 = vshll.u32 %v10525_v4, 16  ;;  %v10528_v23 = vld [vmem:[%s12104_s6 + $0xc4] sm:$0xf] }
 0x100   : > { %1147 = vst.msk [vmem:[#allocation2 + $0x44] sm:$0xf] %vm1129_vm9, %v1068_v41  ;;  %v10522_v41 = vld [vmem:[%s12104_s6 + $0xac] sm:$0xf]  ;;  %v1756_v16 = vshrl.u32 %v10525_v4, 16  ;;  %v1743_v20 = vshrl.u32 %v10524_v10, 16 }
 0x101   : > { %v1066_v48 = vpop.permute.xlu0 %1065  ;;  %1812 = vrot.lane.b32.xlu1 %v1549_v38, %s11948_s18  ;;  %v1640_v38 = vrot.slane %v1639_v13, 4  ;;  %v1728_v53 = vshll.u32 %v10522_v41, 16  ;;  %v1732_v54 = vshrl.u32 %v10522_v41, 16  ;;  %v1701_v8 = vor.u32 %v1700_v52, %v1697_v26 }
 0x102   : > { %1146 = vst.msk [vmem:[#allocation2 + $0x40] sm:$0xf] %vm1129_vm9, %v1066_v48  ;;  %v12753_v48 = vrot.slane %v1704_v25, 5  ;;  %v1716_v27 = vrot.slane %v1714_v55, 5  ;;  %v1738_v29 = vshll.u32 %v10523_v11, 16  ;;  %v12793_v35 = vrot.slane %v1752_v15, 5 }
 0x103   : > { %1810 = vrot.lane.b32.xlu0 %v1539_v39, %s11948_s18  ;;  %v1072_v1 = vpop.permute.xlu1 %1071  ;;  %v1630_v39 = vrot.slane %v1629_v14, 4  ;;  %v1645_v59 = vsel %vm12115_vm3, %v1640_v38, %v1644_v34  ;;  %v1734_v12 = vrot.slane %v1732_v54, 4  ;;  %v1669_v14 = vsel %vm12115_vm3, %v1664_v19, %v1668_v61  ;;  %v10526_v34 = vld [vmem:[%s12104_s6 + $0xbc] sm:$0x1] }
 0x104   : > { %1149 = vst.msk [vmem:[#allocation2 + $0x4c] sm:$0xf] %vm1129_vm9, %v1072_v1  ;;  %v1654_v1 = vrot.slane %v1653_v44, 4  ;;  %v1702_v31 = vrot.slane %v1701_v8, 4  ;;  %v1776_v38 = vshll.u32 %v10528_v23, 16  ;;  %v1745_v41 = vrot.slane %v1743_v20, 4 }
 0x105   : > { %v1070_v6 = vpop.permute.xlu0 %1069  ;;  %1816 = vrot.lane.b32.xlu1 %v1573_v42, %s11948_s18  ;;  %v10521_v42 = vld [vmem:[%s12104_s6 + $0xa8] sm:$0xf]  ;;  %v1635_v0 = vsel %vm12115_vm3, %v1630_v39, %v12719_v56  ;;  %v12772_v56 = vrot.slane %v1728_v53, 5  ;;  %v1780_v39 = vshrl.u32 %v10528_v23, 16  ;;  %v1770_v44 = vshll.u32 %v10527_v30, 16 }
 0x106   : > { %1148 = vst.msk [vmem:[#allocation2 + $0x48] sm:$0xf] %vm1129_vm9, %v1070_v6  ;;  %v1719_v57 = vshrl.u32 %v10521_v42, 16  ;;  %v1722_v58 = vshll.u32 %v10521_v42, 16  ;;  %v1688_v6 = vrot.slane %v1687_v45, 4  ;;  %v1659_v18 = vsel %vm12115_vm3, %v1654_v1, %v12735_v17 }
 0x107   : > { %1814 = vrot.lane.b32.xlu0 %v1563_v49, %s11948_s18  ;;  %v1076_v21 = vpop.permute.xlu1 %1075  ;;  %v1735_v32 = vor.u32 %v1734_v12, %v12772_v56  ;;  %v1707_v47 = vsel %vm12115_vm3, %v1702_v31, %v12753_v48  ;;  %v1778_v26 = vrot.slane %v1776_v38, 5  ;;  %v1782_v52 = vrot.slane %v1780_v39, 4  ;;  %v10534_v15 = vld [vmem:[%s12104_s6 + $0x1c] sm:$0xf]  ;;  %v10538_v39 = vld [vmem:[%s12104_s6 + $0x2c] sm:$0x1] }
 0x108   : > { %1151 = vst.msk [vmem:[#allocation2 + $0x54] sm:$0xf] %vm1129_vm9, %v1076_v21  ;;  %v1721_v60 = vrot.slane %v1719_v57, 4  ;;  %v1724_v13 = vrot.slane %v1722_v58, 5  ;;  %v1746_v21 = vshll.u32 %v10524_v10, 16  ;;  %v1693_v25 = vsel %vm12115_vm3, %v1688_v6, %v1692_v3 }
 0x109   : > { %v1074_v9 = vpop.permute.xlu0 %1073  ;;  %1820 = vrot.lane.b32.xlu1 %v1597_v46, %s11948_s18  ;;  %v1678_v46 = vrot.slane %v1677_v36, 4  ;;  %v1762_v36 = vshll.u32 %v10526_v34, 16  ;;  %v1736_v50 = vrot.slane %v1735_v32, 4  ;;  %v10529_v58 = vld [vmem:[%s12104_s6 + $0xc8] sm:$0x1]  ;;  %v1772_v19 = vrot.slane %v1770_v44, 5 }
 0x10a   : > { %1150 = vst.msk [vmem:[#allocation2 + $0x50] sm:$0xf] %vm1129_vm9, %v1074_v9  ;;  %v1748_v42 = vrot.slane %v1746_v21, 5  ;;  %v1783_v1 = vor.u32 %v1782_v52, %v1778_v26  ;;  %v1786_v3 = vshll.u32 %v10529_v58, 16  ;;  %v2024_v23 = vrot.slane %v10534_v15, 5 }
 0x10b   : > { %1818 = vrot.lane.b32.xlu0 %v1587_v7, %s11948_s18  ;;  %v1080_v43 = vpop.permute.xlu1 %1079  ;;  %v1711_v7 = vor.u32 %v1710_v51, %v12753_v48  ;;  %v1683_v17 = vsel %vm12115_vm3, %v1678_v46, %v12737_v22  ;;  %v1764_v48 = vrot.slane %v1762_v36, 5  ;;  %v10531_v46 = vld [vmem:[%s12104_s6 + $0x10] sm:$0xf] }
 0x10c   : > { %1153 = vst.msk [vmem:[#allocation2 + $0x5c] sm:$0xf] %vm1129_vm9, %v1080_v43  ;;  %v1767_v43 = vshrl.u32 %v10527_v30, 16  ;;  %v1749_v57 = vor.u32 %v1748_v42, %v1745_v41  ;;  %v1784_v10 = vrot.slane %v1783_v1, 4  ;;  %v1788_v11 = vrot.slane %v1786_v3, 5 }
 0x10d   : > { %v1078_v49 = vpop.permute.xlu0 %1077  ;;  %1824 = vrot.lane.b32.xlu1 %v1621_v33, %s11948_s18  ;;  %v1712_v9 = vrot.slane %v1711_v7, 4  ;;  %v1725_v33 = vor.u32 %v1724_v13, %v1721_v60  ;;  %v2026_v32 = vrot.slane %v2024_v23, 4  ;;  %v10536_v42 = vld [vmem:[%s12104_s6 + $0x24] sm:$0xe]  ;;  %v10539_v52 = vld [vmem:[%s12104_s6 + $0x30] sm:$0xe] }
 0x10e   : > { %1152 = vst.msk [vmem:[#allocation2 + $0x58] sm:$0xf] %vm1129_vm9, %v1078_v49  ;;  %v1740_v49 = vrot.slane %v1738_v29, 5  ;;  %v10537_v29 = vld [vmem:[%s12104_s6 + $0x28] sm:$0xf]  ;;  %v10580_v36 = vrot.slane %v10536_v42, 9 }
 0x10f   : > { %1822 = vrot.lane.b32.xlu0 %v1611_v37, %s11948_s18  ;;  %v1084_v62 = vpop.permute.xlu1 %1083  ;;  %v1758_v37 = vrot.slane %v1756_v16, 4  ;;  %v1717_v45 = vsel %vm12115_vm3, %v1712_v9, %v1716_v27  ;;  %v1726_v54 = vrot.slane %v1725_v33, 4  ;;  %v10535_v27 = vld [vmem:[%s12104_s6 + $0x20] sm:$0x1]  ;;  %v2031_v34 = vrot.slane %v10537_v29, 5 }
 0x110   : > { %1155 = vst.msk [vmem:[#allocation2 + $0x64] sm:$0xf] %vm1129_vm9, %v1084_v62  ;;  %v1741_v62 = vsel %vm12115_vm3, %v1736_v50, %v1740_v49  ;;  %v2027_v33 = vrot.slane %v10535_v27, 5  ;;  %v10541_v50 = vld [vmem:[%s12104_s6 + $0x38] sm:$0x1] }
 0x111   : > { %v1082_v5 = vpop.permute.xlu0 %1081  ;;  %1828 = vrot.lane.b32.xlu1 %v1645_v59, %s11948_s18  ;;  %v1759_v51 = vor.u32 %v1758_v37, %v12793_v35  ;;  %v1769_v59 = vrot.slane %v1767_v43, 4  ;;  %v1731_v4 = vsel %vm12115_vm3, %v1726_v54, %v12772_v56  ;;  %v2017_v56 = vrot.slane %v10531_v46, 5  ;;  %v10542_v1 = vld [vmem:[%s12104_s6 + $0x3c] sm:$0xe] }
 0x112   : > { %1154 = vst.msk [vmem:[#allocation2 + $0x60] sm:$0xf] %vm1129_vm9, %v1082_v5  ;;  %v1750_v5 = vrot.slane %v1749_v57, 4  ;;  %v2028_v43 = vsel %vm12259_vm7, %v2026_v32, %v2027_v33  ;;  %v2033_v44 = vrot.slane %v2031_v34, 4  ;;  %v2041_v57 = vrot.slane %v10541_v50, 5 }
 0x113   : > { %1826 = vrot.lane.b32.xlu0 %v1635_v0, %s11948_s18  ;;  %v1088_v2 = vpop.permute.xlu1 %1087  ;;  %v1760_v0 = vrot.slane %v1759_v51, 4  ;;  %v1773_v6 = vor.u32 %v1772_v19, %v1769_v59  ;;  %v2019_v20 = vrot.slane %v2017_v56, 4  ;;  %v10543_v51 = vld [vmem:[%s12104_s6 + $0x40] sm:$0xf]  ;;  %v2032_v19 = vsel %vm12259_vm7, %v10580_v36, %v2031_v34  ;;  %v10555_v32 = vld [vmem:[%s12104_s6 + $0x70] sm:$0xf] }
 0x114   : > { %1157 = vst.msk [vmem:[#allocation2 + $0x6c] sm:$0xf] %vm1129_vm9, %v1088_v2  ;;  %v1755_v60 = vsel %vm12115_vm3, %v1750_v5, %v12793_v35  ;;  %v10530_v2 = vld [vmem:[%s12104_s6 + $0xc] sm:$0xe]  ;;  %v2045_v58 = vrot.slane %v10543_v51, 5 }
 0x115   : > { %v1086_v24 = vpop.permute.xlu0 %1085  ;;  %1832 = vrot.lane.b32.xlu1 %v1669_v14, %s11948_s18  ;;  %v1765_v8 = vsel %vm12115_vm3, %v1760_v0, %v1764_v48  ;;  %v1774_v13 = vrot.slane %v1773_v6, 4  ;;  %v10532_v14 = vld [vmem:[%s12104_s6 + $0x14] sm:$0x1]  ;;  %v10578_v9 = vrot.slane %v10530_v2, 9  ;;  %v10544_v48 = vld [vmem:[%s12104_s6 + $0x44] sm:$0x1] }
 0x116   : > { %1156 = vst.msk [vmem:[#allocation2 + $0x68] sm:$0xf] %vm1129_vm9, %v1086_v24  ;;  %v2020_v21 = vrot.slane %v10532_v14, 5  ;;  %v10551_v34 = vld [vmem:[%s12104_s6 + $0x60] sm:$0xe] }
 0x117   : > { %1830 = vrot.lane.b32.xlu0 %v1659_v18, %s11948_s18  ;;  %v1092_v40 = vpop.permute.xlu1 %1091  ;;  %v1789_v18 = vsel %vm12115_vm3, %v1784_v10, %v1788_v11  ;;  %v2018_v37 = vsel %vm12259_vm7, %v10578_v9, %v2017_v56  ;;  %v10549_v10 = vld [vmem:[%s12104_s6 + $0x58] sm:$0xf]  ;;  %v10545_v56 = vld [vmem:[%s12104_s6 + $0x48] sm:$0xe]  ;;  %v10585_v42 = vrot.slane %v10551_v34, 9 }
 0x118   : > { %1159 = vst.msk [vmem:[#allocation2 + $0x74] sm:$0xf] %vm1129_vm9, %v1092_v40  ;;  %v2021_v31 = vsel %vm12259_vm7, %v2019_v20, %v2020_v21  ;;  %v10540_v40 = vld [vmem:[%s12104_s6 + $0x34] sm:$0xf]  ;;  %v2059_v14 = vrot.slane %v10549_v10, 5  ;;  %v10583_v2 = vrot.slane %v10545_v56, 9 }
 0x119   : > { %v1090_v22 = vpop.permute.xlu0 %1089  ;;  %1836 = vrot.lane.b32.xlu1 %v1693_v25, %s11948_s18  ;;  %v1779_v25 = vsel %vm12115_vm3, %v1774_v13, %v1778_v26  ;;  %v10552_v20 = vld [vmem:[%s12104_s6 + $0x64] sm:$0xf] }
 0x11a   : > { %1158 = vst.msk [vmem:[#allocation2 + $0x70] sm:$0xf] %vm1129_vm9, %v1090_v22  ;;  %v2034_v22 = vrot.slane %v10538_v39, 5  ;;  %v2066_v27 = vrot.slane %v10552_v20, 5  ;;  %v2073_v39 = vrot.slane %v10555_v32, 5 }
 0x11b   : > { %1834 = vrot.lane.b32.xlu0 %v1683_v17, %s11948_s18  ;;  %v1096_v53 = vpop.permute.xlu1 %1095  ;;  %v10533_v17 = vld [vmem:[%s12104_s6 + $0x18] sm:$0xe] }
 0x11c   : > { %1161 = vst.msk [vmem:[#allocation2 + $0x7c] sm:$0xf] %vm1129_vm9, %v1096_v53  ;;  %v10579_v38 = vrot.slane %v10533_v17, 9  ;;  %v2035_v53 = vsel %vm12259_vm7, %v2033_v44, %v2034_v22  ;;  %v10558_v44 = vld [vmem:[%s12104_s6 + $0x7c] sm:$0xf] }
 0x11d   : > { %v1094_v61 = vpop.permute.xlu0 %1093  ;;  %1840 = vrot.lane.b32.xlu1 %v1717_v45, %s11948_s18  ;;  %v2038_v45 = vrot.slane %v10540_v40, 5  ;;  %v2080_v50 = vrot.slane %v10558_v44, 5 }
 0x11e   : > { %1160 = vst.msk [vmem:[#allocation2 + $0x78] sm:$0xf] %vm1129_vm9, %v1094_v61  ;;  %v2025_v49 = vsel %vm12259_vm7, %v10579_v38, %v2024_v23  ;;  %v10581_v61 = vrot.slane %v10539_v52, 9  ;;  %v10548_v23 = vld [vmem:[%s12104_s6 + $0x54] sm:$0xe]  ;;  %vm6263_vm9 = vcmask 552448  }
 0x11f   : > { %1838 = vrot.lane.b32.xlu0 %v1707_v47, %s11948_s18  ;;  %v1232_v55 = vpop.permute.xlu1 %1231  ;;  %v2040_v54 = vrot.slane %v2038_v45, 4  ;;  %v10584_v17 = vrot.slane %v10548_v23, 9 }
 0x120   : > { %1327 = vst.msk [vmem:[#allocation2 + $0x4] sm:$0xf] %vm1325_vm10, %v1232_v55  ;;  %v2047_v55 = vrot.slane %v2045_v58, 4  ;;  %v2039_v46 = vsel %vm12259_vm7, %v10581_v61, %v2038_v45  ;;  %v10554_v45 = vld [vmem:[%s12104_s6 + $0x6c] sm:$0xe] }
 0x121   : > { %v1230_v7 = vpop.permute.xlu0 %1229  ;;  %1844 = vrot.lane.b32.xlu1 %v1741_v62, %s11948_s18  ;;  %v10546_v62 = vld [vmem:[%s12104_s6 + $0x4c] sm:$0xf]  ;;  %v2042_v3 = vsel %vm12259_vm7, %v2040_v54, %v2041_v57  ;;  %v10586_v52 = vrot.slane %v10554_v45, 9  ;;  %v10561_v54 = vld [vmem:[%s12104_s6 + $0x88] sm:$0xf] }
 0x122   : > { %1326 = vst.msk [vmem:[#allocation2] sm:$0xf] %vm1325_vm10, %v1230_v7  ;;  %v2052_v5 = vrot.slane %v10546_v62, 5  ;;  %v10582_v7 = vrot.slane %v10542_v1, 9 }
 0x123   : > { %1842 = vrot.lane.b32.xlu0 %v1731_v4, %s11948_s18  ;;  %v1236_v12 = vpop.permute.xlu1 %1235  ;;  %v2048_v4 = vrot.slane %v10544_v48, 5  ;;  %v2087_v48 = vrot.slane %v10561_v54, 5 }
 0x124   : > { %1329 = vst.msk [vmem:[#allocation2 + $0xc] sm:$0xf] %vm1325_vm10, %v1236_v12 }
 0x125   : > { %v1234_v16 = vpop.permute.xlu0 %1233  ;;  %1848 = vrot.lane.b32.xlu1 %v1765_v8, %s11948_s18  ;;  %v10547_v8 = vld [vmem:[%s12104_s6 + $0x50] sm:$0x1]  ;;  %v2049_v12 = vsel %vm12259_vm7, %v2047_v55, %v2048_v4  ;;  %v10564_v55 = vld [vmem:[%s12104_s6 + $0x94] sm:$0xf] }
 0x126   : > { %1328 = vst.msk [vmem:[#allocation2 + $0x8] sm:$0xf] %vm1325_vm10, %v1234_v16  ;;  %v2055_v13 = vrot.slane %v10547_v8, 5  ;;  %v2046_v16 = vsel %vm12259_vm7, %v10582_v7, %v2045_v58  ;;  %v10557_v58 = vld [vmem:[%s12104_s6 + $0x78] sm:$0xe]  ;;  %v2094_v8 = vrot.slane %v10564_v55, 5 }
 0x127   : > { %1846 = vrot.lane.b32.xlu0 %v1755_v60, %s11948_s18  ;;  %v1240_v24 = vpop.permute.xlu1 %1239  ;;  %v2054_v60 = vrot.slane %v2052_v5, 4  ;;  %v10587_v1 = vrot.slane %v10557_v58, 9 }
 0x128   : > { %1331 = vst.msk [vmem:[#allocation2 + $0x14] sm:$0xf] %vm1325_vm10, %v1240_v24 }
 0x129   : > { %v1238_v30 = vpop.permute.xlu0 %1237  ;;  %1852 = vrot.lane.b32.xlu1 %v1789_v18, %s11948_s18  ;;  %v10550_v18 = vld [vmem:[%s12104_s6 + $0x5c] sm:$0x1]  ;;  %v2056_v24 = vsel %vm12259_vm7, %v2054_v60, %v2055_v13  ;;  %v10567_v60 = vld [vmem:[%s12104_s6 + $0xa0] sm:$0xf] }
 0x12a   : > { %1330 = vst.msk [vmem:[#allocation2 + $0x10] sm:$0xf] %vm1325_vm10, %v1238_v30  ;;  %v2062_v9 = vrot.slane %v10550_v18, 5  ;;  %v2053_v30 = vsel %vm12259_vm7, %v10583_v2, %v2052_v5  ;;  %v10560_v5 = vld [vmem:[%s12104_s6 + $0x84] sm:$0xe]  ;;  %v2101_v18 = vrot.slane %v10567_v60, 5 }
 0x12b   : > { %1850 = vrot.lane.b32.xlu0 %v1779_v25, %s11948_s18  ;;  %v1244_v35 = vpop.permute.xlu1 %1243  ;;  %v2061_v25 = vrot.slane %v2059_v14, 4  ;;  %v10588_v56 = vrot.slane %v10560_v5, 9  ;;  %s11961_s18 = smov 68  }
 0x12c   : > { %1333 = vst.msk [vmem:[#allocation2 + $0x1c] sm:$0xf] %vm1325_vm10, %v1244_v35 }
 0x12d   : > { %v1242_v41 = vpop.permute.xlu0 %1241  ;;  %2129 = vrot.lane.b32.xlu1 %v2021_v31, %s11949_s21  ;;  %v10553_v31 = vld [vmem:[%s12104_s6 + $0x68] sm:$0x1]  ;;  %v2063_v35 = vsel %vm12259_vm7, %v2061_v25, %v2062_v9  ;;  %v10570_v25 = vld [vmem:[%s12104_s6 + $0xac] sm:$0xf] }
 0x12e   : > { %1332 = vst.msk [vmem:[#allocation2 + $0x18] sm:$0xf] %vm1325_vm10, %v1242_v41  ;;  %v2069_v38 = vrot.slane %v10553_v31, 5  ;;  %v2060_v41 = vsel %vm12259_vm7, %v10584_v17, %v2059_v14  ;;  %v10563_v14 = vld [vmem:[%s12104_s6 + $0x90] sm:$0xe]  ;;  %v2108_v31 = vrot.slane %v10570_v25, 5 }
 0x12f   : > { %2127 = vrot.lane.b32.xlu0 %v2018_v37, %s11949_s21  ;;  %v1248_v47 = vpop.permute.xlu1 %1247  ;;  %v2068_v37 = vrot.slane %v2066_v27, 4  ;;  %v10589_v23 = vrot.slane %v10563_v14, 9  ;;  %v10604_v25 = vld [vmem:[%s12104_s6 + $0x4c] sm:$0xf] }
 0x130   : > { %1335 = vst.msk [vmem:[#allocation2 + $0x24] sm:$0xf] %vm1325_vm10, %v1248_v47 }
 0x131   : > { %v1246_v26 = vpop.permute.xlu0 %1245  ;;  %2133 = vrot.lane.b32.xlu1 %v2028_v43, %s11949_s21  ;;  %v10556_v43 = vld [vmem:[%s12104_s6 + $0x74] sm:$0x1]  ;;  %v2070_v47 = vsel %vm12259_vm7, %v2068_v37, %v2069_v38  ;;  %v10573_v37 = vld [vmem:[%s12104_s6 + $0xb8] sm:$0xf] }
 0x132   : > { %1334 = vst.msk [vmem:[#allocation2 + $0x20] sm:$0xf] %vm1325_vm10, %v1246_v26  ;;  %v2076_v36 = vrot.slane %v10556_v43, 5  ;;  %v2067_v26 = vsel %vm12259_vm7, %v10585_v42, %v2066_v27  ;;  %v10566_v27 = vld [vmem:[%s12104_s6 + $0x9c] sm:$0xe]  ;;  %v2115_v43 = vrot.slane %v10573_v37, 5 }
 0x133   : > { %2131 = vrot.lane.b32.xlu0 %v2025_v49, %s11949_s21  ;;  %v1252_v59 = vpop.permute.xlu1 %1251  ;;  %v2075_v49 = vrot.slane %v2073_v39, 4  ;;  %v10590_v34 = vrot.slane %v10566_v27, 9  ;;  %v10603_v27 = vld [vmem:[%s12104_s6 + $0x48] sm:$0xf] }
 0x134   : > { %1337 = vst.msk [vmem:[#allocation2 + $0x2c] sm:$0xf] %vm1325_vm10, %v1252_v59 }
 0x135   : > { %v1250_v0 = vpop.permute.xlu0 %1249  ;;  %2137 = vrot.lane.b32.xlu1 %v2035_v53, %s11949_s21  ;;  %v10559_v53 = vld [vmem:[%s12104_s6 + $0x80] sm:$0x1]  ;;  %v2077_v59 = vsel %vm12259_vm7, %v2075_v49, %v2076_v36  ;;  %v10576_v49 = vld [vmem:[%s12104_s6 + $0xc4] sm:$0xf] }
 0x136   : > { %1336 = vst.msk [vmem:[#allocation2 + $0x28] sm:$0xf] %vm1325_vm10, %v1250_v0  ;;  %v2083_v61 = vrot.slane %v10559_v53, 5  ;;  %v2074_v0 = vsel %vm12259_vm7, %v10586_v52, %v2073_v39  ;;  %v10569_v39 = vld [vmem:[%s12104_s6 + $0xa8] sm:$0xe]  ;;  %v2122_v53 = vrot.slane %v10576_v49, 5 }
 0x137   : > { %2135 = vrot.lane.b32.xlu0 %v2032_v19, %s11949_s21  ;;  %v1256_v6 = vpop.permute.xlu1 %1255  ;;  %v2082_v19 = vrot.slane %v2080_v50, 4  ;;  %v10591_v45 = vrot.slane %v10569_v39, 9  ;;  %v10613_v49 = vld [vmem:[%s12104_s6 + $0x84] sm:$0xf] }
 0x138   : > { %1339 = vst.msk [vmem:[#allocation2 + $0x34] sm:$0xf] %vm1325_vm10, %v1256_v6 }
 0x139   : > { %v1254_v11 = vpop.permute.xlu0 %1253  ;;  %2141 = vrot.lane.b32.xlu1 %v2042_v3, %s11949_s21  ;;  %v10562_v3 = vld [vmem:[%s12104_s6 + $0x8c] sm:$0x1]  ;;  %v2084_v6 = vsel %vm12259_vm7, %v2082_v19, %v2083_v61  ;;  %v10575_v61 = vld [vmem:[%s12104_s6 + $0xc0] sm:$0xe] }
 0x13a   : > { %1338 = vst.msk [vmem:[#allocation2 + $0x30] sm:$0xf] %vm1325_vm10, %v1254_v11  ;;  %v2090_v7 = vrot.slane %v10562_v3, 5  ;;  %v2081_v11 = vsel %vm12259_vm7, %v10587_v1, %v2080_v50  ;;  %v10572_v50 = vld [vmem:[%s12104_s6 + $0xb4] sm:$0xe]  ;;  %v10593_v55 = vrot.slane %v10575_v61, 9 }
 0x13b   : > { %2139 = vrot.lane.b32.xlu0 %v2039_v46, %s11949_s21  ;;  %v1260_v15 = vpop.permute.xlu1 %1259  ;;  %v2089_v46 = vrot.slane %v2087_v48, 4  ;;  %v10592_v58 = vrot.slane %v10572_v50, 9  ;;  %v10616_v50 = vld [vmem:[%s12104_s6 + $0x94] sm:$0xf]  ;;  %v10630_v61 = vld [vmem:[%s12104_s6 + $0x24] sm:$0xf] }
 0x13c   : > { %1341 = vst.msk [vmem:[#allocation2 + $0x3c] sm:$0xf] %vm1325_vm10, %v1260_v15 }
 0x13d   : > { %v1258_v21 = vpop.permute.xlu0 %1257  ;;  %2145 = vrot.lane.b32.xlu1 %v2049_v12, %s11949_s21  ;;  %v10565_v12 = vld [vmem:[%s12104_s6 + $0x98] sm:$0x1]  ;;  %v2091_v15 = vsel %vm12259_vm7, %v2089_v46, %v2090_v7  ;;  %v2116_v3 = vsel %vm12259_vm7, %v10592_v58, %v2115_v43  ;;  %v2123_v46 = vsel %vm12259_vm7, %v10593_v55, %v2122_v53  ;;  %v10631_v58 = vld [vmem:[%s12104_s6 + $0x28] sm:$0xf] }
 0x13e   : > { %1340 = vst.msk [vmem:[#allocation2 + $0x38] sm:$0xf] %vm1325_vm10, %v1258_v21  ;;  %v2097_v2 = vrot.slane %v10565_v12, 5  ;;  %v2088_v21 = vsel %vm12259_vm7, %v10588_v56, %v2087_v48  ;;  %v10598_v12 = vld [vmem:[%s12104_s6 + $0x28] sm:$0xf]  ;;  %v2534_v55 = vshll.u32 %v10631_v58, 16 }
 0x13f   : > { %2143 = vrot.lane.b32.xlu0 %v2046_v16, %s11949_s21  ;;  %v1264_v29 = vpop.permute.xlu1 %1263  ;;  %v2096_v16 = vrot.slane %v2094_v8, 4 }
 0x140   : > { %1343 = vst.msk [vmem:[#allocation2 + $0x44] sm:$0xf] %vm1325_vm10, %v1264_v29 }
 0x141   : > { %v1262_v33 = vpop.permute.xlu0 %1261  ;;  %2149 = vrot.lane.b32.xlu1 %v2056_v24, %s11949_s21  ;;  %v10568_v24 = vld [vmem:[%s12104_s6 + $0xa4] sm:$0x1]  ;;  %v2098_v29 = vsel %vm12259_vm7, %v2096_v16, %v2097_v2  ;;  %v10599_v2 = vld [vmem:[%s12104_s6 + $0x30] sm:$0xf] }
 0x142   : > { %1342 = vst.msk [vmem:[#allocation2 + $0x40] sm:$0xf] %vm1325_vm10, %v1262_v33  ;;  %v2104_v17 = vrot.slane %v10568_v24, 5  ;;  %v2095_v33 = vsel %vm12259_vm7, %v10589_v23, %v2094_v8  ;;  %v10596_v8 = vld [vmem:[%s12104_s6 + $0x1c] sm:$0xf] }
 0x143   : > { %2147 = vrot.lane.b32.xlu0 %v2053_v30, %s11949_s21  ;;  %v1268_v40 = vpop.permute.xlu1 %1267  ;;  %v2103_v30 = vrot.slane %v2101_v18, 4  ;;  %v10601_v23 = vld [vmem:[%s12104_s6 + $0x3c] sm:$0xf] }
 0x144   : > { %1345 = vst.msk [vmem:[#allocation2 + $0x4c] sm:$0xf] %vm1325_vm10, %v1268_v40 }
 0x145   : > { %v1266_v22 = vpop.permute.xlu0 %1265  ;;  %2153 = vrot.lane.b32.xlu1 %v2063_v35, %s11949_s21  ;;  %v10571_v35 = vld [vmem:[%s12104_s6 + $0xb0] sm:$0x1]  ;;  %v2105_v40 = vsel %vm12259_vm7, %v2103_v30, %v2104_v17  ;;  %v10606_v30 = vld [vmem:[%s12104_s6 + $0x58] sm:$0xf] }
 0x146   : > { %1344 = vst.msk [vmem:[#allocation2 + $0x48] sm:$0xf] %vm1325_vm10, %v1266_v22  ;;  %v2111_v42 = vrot.slane %v10571_v35, 5  ;;  %v2102_v22 = vsel %vm12259_vm7, %v10590_v34, %v2101_v18  ;;  %v10607_v35 = vld [vmem:[%s12104_s6 + $0x60] sm:$0xf] }
 0x147   : > { %2151 = vrot.lane.b32.xlu0 %v2060_v41, %s11949_s21  ;;  %v1272_v51 = vpop.permute.xlu1 %1271  ;;  %v2110_v41 = vrot.slane %v2108_v31, 4 }
 0x148   : > { %1347 = vst.msk [vmem:[#allocation2 + $0x54] sm:$0xf] %vm1325_vm10, %v1272_v51 }
 0x149   : > { %v1270_v57 = vpop.permute.xlu0 %1269  ;;  %2157 = vrot.lane.b32.xlu1 %v2070_v47, %s11949_s21  ;;  %v10574_v47 = vld [vmem:[%s12104_s6 + $0xbc] sm:$0x1]  ;;  %v2112_v51 = vsel %vm12259_vm7, %v2110_v41, %v2111_v42 }
 0x14a   : > { %1346 = vst.msk [vmem:[#allocation2 + $0x50] sm:$0xf] %vm1325_vm10, %v1270_v57  ;;  %v2118_v52 = vrot.slane %v10574_v47, 5  ;;  %v2109_v57 = vsel %vm12259_vm7, %v10591_v45, %v2108_v31  ;;  %v10605_v31 = vld [vmem:[%s12104_s6 + $0x54] sm:$0xf] }
 0x14b   : > { %2155 = vrot.lane.b32.xlu0 %v2067_v26, %s11949_s21  ;;  %v1276_v62 = vpop.permute.xlu1 %1275  ;;  %v2117_v26 = vrot.slane %v2115_v43, 4  ;;  %v10612_v42 = vld [vmem:[%s12104_s6 + $0x7c] sm:$0xf]  ;;  %v10614_v45 = vld [vmem:[%s12104_s6 + $0x88] sm:$0xf] }
 0x14c   : > { %1349 = vst.msk [vmem:[#allocation2 + $0x5c] sm:$0xf] %vm1325_vm10, %v1276_v62  ;;  %v2124_v62 = vrot.slane %v2122_v53, 4  ;;  %v10628_v53 = vld [vmem:[%s12104_s6 + $0x1c] sm:$0xf] }
 0x14d   : > { %v1274_v4 = vpop.permute.xlu0 %1273  ;;  %2161 = vrot.lane.b32.xlu1 %v2077_v59, %s11949_s21  ;;  %v10577_v59 = vld [vmem:[%s12104_s6 + $0xc8] sm:$0x1]  ;;  %v2119_v48 = vsel %vm12259_vm7, %v2117_v26, %v2118_v52  ;;  %v10615_v26 = vld [vmem:[%s12104_s6 + $0x90] sm:$0xf] }
 0x14e   : > { %1348 = vst.msk [vmem:[#allocation2 + $0x58] sm:$0xf] %vm1325_vm10, %v1274_v4 }
 0x14f   : > { %2159 = vrot.lane.b32.xlu0 %v2074_v0, %s11949_s21  ;;  %v1280_v10 = vpop.permute.xlu1 %1279  ;;  %v2125_v0 = vrot.slane %v10577_v59, 5 }
 0x150   : > { %1351 = vst.msk [vmem:[#allocation2 + $0x64] sm:$0xf] %vm1325_vm10, %v1280_v10 }
 0x151   : > { %v1278_v13 = vpop.permute.xlu0 %1277  ;;  %2165 = vrot.lane.b32.xlu1 %v2084_v6, %s11949_s21  ;;  %v2126_v5 = vsel %vm12259_vm7, %v2124_v62, %v2125_v0  ;;  %v2510_v62 = vshll.u32 %v10628_v53, 16  ;;  %v2514_v0 = vshrl.u32 %v10628_v53, 16 }
 0x152   : > { %1350 = vst.msk [vmem:[#allocation2 + $0x60] sm:$0xf] %vm1325_vm10, %v1278_v13  ;;  %v10597_v13 = vld [vmem:[%s12104_s6 + $0x24] sm:$0xf] }
 0x153   : > { %2163 = vrot.lane.b32.xlu0 %v2081_v11, %s11949_s21  ;;  %v1284_v20 = vpop.permute.xlu1 %1283  ;;  %v10595_v11 = vld [vmem:[%s12104_s6 + $0x18] sm:$0xf] }
 0x154   : > { %1353 = vst.msk [vmem:[#allocation2 + $0x6c] sm:$0xf] %vm1325_vm10, %v1284_v20  ;;  %v10602_v20 = vld [vmem:[%s12104_s6 + $0x40] sm:$0xf] }
 0x155   : > { %v1282_v9 = vpop.permute.xlu0 %1281  ;;  %2169 = vrot.lane.b32.xlu1 %v2091_v15, %s11949_s21  ;;  %v10600_v15 = vld [vmem:[%s12104_s6 + $0x34] sm:$0xf] }
 0x156   : > { %1352 = vst.msk [vmem:[#allocation2 + $0x68] sm:$0xf] %vm1325_vm10, %v1282_v9 }
 0x157   : > { %2167 = vrot.lane.b32.xlu0 %v2088_v21, %s11949_s21  ;;  %v1288_v32 = vpop.permute.xlu1 %1287 }
 0x158   : > { %1355 = vst.msk [vmem:[#allocation2 + $0x74] sm:$0xf] %vm1325_vm10, %v1288_v32 }
 0x159   : > { %v1286_v38 = vpop.permute.xlu0 %1285  ;;  %2173 = vrot.lane.b32.xlu1 %v2098_v29, %s11949_s21 }
 0x15a   : > { %1354 = vst.msk [vmem:[#allocation2 + $0x70] sm:$0xf] %vm1325_vm10, %v1286_v38  ;;  %v10610_v38 = vld [vmem:[%s12104_s6 + $0x70] sm:$0xf] }
 0x15b   : > { %2171 = vrot.lane.b32.xlu0 %v2095_v33, %s11949_s21  ;;  %v1292_v44 = vpop.permute.xlu1 %1291  ;;  %v10608_v33 = vld [vmem:[%s12104_s6 + $0x64] sm:$0xf] }
 0x15c   : > { %1357 = vst.msk [vmem:[#allocation2 + $0x7c] sm:$0xf] %vm1325_vm10, %v1292_v44  ;;  %v10611_v44 = vld [vmem:[%s12104_s6 + $0x78] sm:$0xf] }
 0x15d   : > { %v1290_v36 = vpop.permute.xlu0 %1289  ;;  %2177 = vrot.lane.b32.xlu1 %v2105_v40, %s11949_s21  ;;  %v10609_v40 = vld [vmem:[%s12104_s6 + $0x6c] sm:$0xf] }
 0x15e   : > { %1356 = vst.msk [vmem:[#allocation2 + $0x78] sm:$0xf] %vm1325_vm10, %v1290_v36  ;;  %vm6600_vm10 = vcmask 585248  }
 0x15f   : > { %2175 = vrot.lane.b32.xlu0 %v2102_v22, %s11949_s21  ;;  %v1793_v54 = vpop.permute.xlu1 %1792 }
 0x160   : > { %1888 = vst.msk [vmem:[#allocation2 + $0x4] sm:$0xf] %vm1886_vm11, %v1793_v54  ;;  %v10627_v54 = vld [vmem:[%s12104_s6 + $0x18] sm:$0xf] }
 0x161   : > { %v1791_v19 = vpop.permute.xlu0 %1790  ;;  %2181 = vrot.lane.b32.xlu1 %v2112_v51, %s11949_s21 }
 0x162   : > { %1887 = vst.msk [vmem:[#allocation2] sm:$0xf] %vm1886_vm11, %v1791_v19  ;;  %v10617_v19 = vld [vmem:[%s12104_s6 + $0x9c] sm:$0xf] }
 0x163   : > { %2179 = vrot.lane.b32.xlu0 %v2109_v57, %s11949_s21  ;;  %v1797_v1 = vpop.permute.xlu1 %1796  ;;  %v10618_v57 = vld [vmem:[%s12104_s6 + $0xa0] sm:$0xf] }
 0x164   : > { %1890 = vst.msk [vmem:[#allocation2 + $0xc] sm:$0xf] %vm1886_vm11, %v1797_v1  ;;  %v2501_v1 = vshrl.u32 %v10627_v54, 16 }
 0x165   : > { %v1795_v4 = vpop.permute.xlu0 %1794  ;;  %2185 = vrot.lane.b32.xlu1 %v2119_v48, %s11949_s21 }
 0x166   : > { %1889 = vst.msk [vmem:[#allocation2 + $0x8] sm:$0xf] %vm1886_vm11, %v1795_v4  ;;  %v2538_v4 = vshrl.u32 %v10631_v58, 16  ;;  %v10640_v58 = vld [vmem:[%s12104_s6 + $0x4c] sm:$0xf] }
 0x167   : > { %2183 = vrot.lane.b32.xlu0 %v2116_v3, %s11949_s21  ;;  %v1801_v6 = vpop.permute.xlu1 %1800  ;;  %v2504_v3 = vshll.u32 %v10627_v54, 16 }
 0x168   : > { %1892 = vst.msk [vmem:[#allocation2 + $0x14] sm:$0xf] %vm1886_vm11, %v1801_v6  ;;  %v2525_v6 = vshrl.u32 %v10630_v61, 16 }
 0x169   : > { %v1799_v7 = vpop.permute.xlu0 %1798  ;;  %2189 = vrot.lane.b32.xlu1 %v2126_v5, %s11949_s21  ;;  %v10620_v5 = vld [vmem:[%s12104_s6 + $0xac] sm:$0xf] }
 0x16a   : > { %1891 = vst.msk [vmem:[#allocation2 + $0x10] sm:$0xf] %vm1886_vm11, %v1799_v7 }
 0x16b   : > { %2187 = vrot.lane.b32.xlu0 %v2123_v46, %s11949_s21  ;;  %v1805_v10 = vpop.permute.xlu1 %1804  ;;  %v2528_v46 = vshll.u32 %v10630_v61, 16  ;;  %s11962_s21 = smov 72  }
 0x16c   : > { %1894 = vst.msk [vmem:[#allocation2 + $0x1c] sm:$0xf] %vm1886_vm11, %v1805_v10  ;;  %v10634_v10 = vld [vmem:[%s12104_s6 + $0x34] sm:$0xf] }
 0x16d   : > { %v1803_v56 = vpop.permute.xlu0 %1802  ;;  %2325 = vrot.lane.b32.xlu1 %v10596_v8, %s11950_s24  ;;  %v10619_v8 = vld [vmem:[%s12104_s6 + $0xa8] sm:$0xf] }
 0x16e   : > { %1893 = vst.msk [vmem:[#allocation2 + $0x18] sm:$0xf] %vm1886_vm11, %v1803_v56  ;;  %v10622_v56 = vld [vmem:[%s12104_s6 + $0xb8] sm:$0xf] }
 0x16f   : > { %2323 = vrot.lane.b32.xlu0 %v10595_v11, %s11950_s24  ;;  %v1809_v60 = vpop.permute.xlu1 %1808 }
 0x170   : > { %1896 = vst.msk [vmem:[#allocation2 + $0x24] sm:$0xf] %vm1886_vm11, %v1809_v60  ;;  %v2516_v60 = vrot.slane %v2514_v0, 4 }
 0x171   : > { %v1807_v14 = vpop.permute.xlu0 %1806  ;;  %2329 = vrot.lane.b32.xlu1 %v10598_v12, %s11950_s24  ;;  %v13093_v12 = vrot.slane %v2510_v62, 5 }
 0x172   : > { %1895 = vst.msk [vmem:[#allocation2 + $0x20] sm:$0xf] %vm1886_vm11, %v1807_v14  ;;  %v2506_v14 = vrot.slane %v2504_v3, 5  ;;  %v10625_v3 = vld [vmem:[%s12104_s6 + $0xcc] sm:$0xf] }
 0x173   : > { %2327 = vrot.lane.b32.xlu0 %v10597_v13, %s11950_s24  ;;  %v1813_v16 = vpop.permute.xlu1 %1812  ;;  %v2503_v13 = vrot.slane %v2501_v1, 4 }
 0x174   : > { %1898 = vst.msk [vmem:[#allocation2 + $0x2c] sm:$0xf] %vm1886_vm11, %v1813_v16  ;;  %v10632_v16 = vld [vmem:[%s12104_s6 + $0x2c] sm:$0x1] }
 0x175   : > { %v1811_v18 = vpop.permute.xlu0 %1810  ;;  %2333 = vrot.lane.b32.xlu1 %v10600_v15, %s11950_s24  ;;  %v10629_v15 = vld [vmem:[%s12104_s6 + $0x20] sm:$0x1] }
 0x176   : > { %1897 = vst.msk [vmem:[#allocation2 + $0x28] sm:$0xf] %vm1886_vm11, %v1811_v18  ;;  %v2540_v18 = vrot.slane %v2538_v4, 4 }
 0x177   : > { %2331 = vrot.lane.b32.xlu0 %v10599_v2, %s11950_s24  ;;  %v1817_v21 = vpop.permute.xlu1 %1816  ;;  %v13099_v2 = vrot.slane %v2534_v55, 5 }
 0x178   : > { %1900 = vst.msk [vmem:[#allocation2 + $0x34] sm:$0xf] %vm1886_vm11, %v1817_v21  ;;  %v2530_v21 = vrot.slane %v2528_v46, 5 }
 0x179   : > { %v1815_v24 = vpop.permute.xlu0 %1814  ;;  %2337 = vrot.lane.b32.xlu1 %v10602_v20, %s11950_s24  ;;  %v2527_v20 = vrot.slane %v2525_v6, 4 }
 0x17a   : > { %1899 = vst.msk [vmem:[#allocation2 + $0x30] sm:$0xf] %vm1886_vm11, %v1815_v24  ;;  %v2562_v24 = vshrl.u32 %v10634_v10, 16 }
 0x17b   : > { %2335 = vrot.lane.b32.xlu0 %v10601_v23, %s11950_s24  ;;  %v1821_v9 = vpop.permute.xlu1 %1820  ;;  %v2558_v23 = vshll.u32 %v10634_v10, 16  ;;  %v2610_v10 = vshrl.u32 %v10640_v58, 16 }
 0x17c   : > { %1902 = vst.msk [vmem:[#allocation2 + $0x3c] sm:$0xf] %vm1886_vm11, %v1821_v9 }
 0x17d   : > { %v1819_v29 = vpop.permute.xlu0 %1818  ;;  %2341 = vrot.lane.b32.xlu1 %v10604_v25, %s11950_s24  ;;  %v10633_v25 = vld [vmem:[%s12104_s6 + $0x30] sm:$0xf] }
 0x17e   : > { %1901 = vst.msk [vmem:[#allocation2 + $0x38] sm:$0xf] %vm1886_vm11, %v1819_v29 }
 0x17f   : > { %2339 = vrot.lane.b32.xlu0 %v10603_v27, %s11950_s24  ;;  %v1825_v17 = vpop.permute.xlu1 %1824  ;;  %v10621_v27 = vld [vmem:[%s12104_s6 + $0xb4] sm:$0xf] }
 0x180   : > { %1904 = vst.msk [vmem:[#allocation2 + $0x44] sm:$0xf] %vm1886_vm11, %v1825_v17  ;;  %v2520_v17 = vshll.u32 %v10629_v15, 16 }
 0x181   : > { %v1823_v32 = vpop.permute.xlu0 %1822  ;;  %2345 = vrot.lane.b32.xlu1 %v10606_v30, %s11950_s24  ;;  %v2517_v30 = vor.u32 %v2516_v60, %v13093_v12 }
 0x182   : > { %1903 = vst.msk [vmem:[#allocation2 + $0x40] sm:$0xf] %vm1886_vm11, %v1823_v32  ;;  %v2544_v32 = vshll.u32 %v10632_v16, 16 }
 0x183   : > { %2343 = vrot.lane.b32.xlu0 %v10605_v31, %s11950_s24  ;;  %v1829_v34 = vpop.permute.xlu1 %1828  ;;  %v2507_v31 = vor.u32 %v2506_v14, %v2503_v13  ;;  %v10643_v14 = vld [vmem:[%s12104_s6 + $0x58] sm:$0xf] }
 0x184   : > { %1906 = vst.msk [vmem:[#allocation2 + $0x4c] sm:$0xf] %vm1886_vm11, %v1829_v34  ;;  %v10636_v34 = vld [vmem:[%s12104_s6 + $0x3c] sm:$0xf]  ;;  %v13118_v53 = vrot.slane %v2544_v32, 5 }
 0x185   : > { %v1827_v37 = vpop.permute.xlu0 %1826  ;;  %2349 = vrot.lane.b32.xlu1 %v10608_v33, %s11950_s24  ;;  %v10637_v33 = vld [vmem:[%s12104_s6 + $0x40] sm:$0xf] }
 0x186   : > { %1905 = vst.msk [vmem:[#allocation2 + $0x48] sm:$0xf] %vm1886_vm11, %v1827_v37  ;;  %v2541_v37 = vor.u32 %v2540_v18, %v13099_v2 }
 0x187   : > { %2347 = vrot.lane.b32.xlu0 %v10607_v35, %s11950_s24  ;;  %v1833_v39 = vpop.permute.xlu1 %1832  ;;  %v10624_v35 = vld [vmem:[%s12104_s6 + $0xc4] sm:$0xf] }
 0x188   : > { %1908 = vst.msk [vmem:[#allocation2 + $0x54] sm:$0xf] %vm1886_vm11, %v1833_v39  ;;  %v2531_v39 = vor.u32 %v2530_v21, %v2527_v20  ;;  %v13122_v54 = vrot.slane %v2541_v37, 4  ;;  %v10642_v21 = vld [vmem:[%s12104_s6 + $0x54] sm:$0xf] }
 0x189   : > { %v1831_v41 = vpop.permute.xlu0 %1830  ;;  %2353 = vrot.lane.b32.xlu1 %v10610_v38, %s11950_s24  ;;  %v2549_v38 = vshrl.u32 %v10633_v25, 16  ;;  %v2621_v37 = vshrl.u32 %v10642_v21, 16 }
 0x18a   : > { %1907 = vst.msk [vmem:[#allocation2 + $0x50] sm:$0xf] %vm1886_vm11, %v1831_v41  ;;  %v13114_v41 = vrot.slane %v2558_v23, 5  ;;  %v13128_v61 = vrot.slane %v2531_v39, 4  ;;  %v2547_v15 = vsel %vm12115_vm3, %v13122_v54, %v13118_v53  ;;  %v10649_v53 = vld [vmem:[%s12104_s6 + $0x70] sm:$0xf] }
 0x18b   : > { %2351 = vrot.lane.b32.xlu0 %v10609_v40, %s11950_s24  ;;  %v1837_v43 = vpop.permute.xlu1 %1836  ;;  %v10635_v40 = vld [vmem:[%s12104_s6 + $0x38] sm:$0x1]  ;;  %v2551_v62 = vrot.slane %v2549_v38, 4  ;;  %v2624_v38 = vshll.u32 %v10642_v21, 16  ;;  %v10648_v54 = vld [vmem:[%s12104_s6 + $0x6c] sm:$0xf] }
 0x18c   : > { %1910 = vst.msk [vmem:[#allocation2 + $0x5c] sm:$0xf] %vm1886_vm11, %v1837_v43  ;;  %v2552_v43 = vshll.u32 %v10633_v25, 16  ;;  %v2537_v16 = vsel %vm12115_vm3, %v13128_v61, %v13099_v2  ;;  %v2612_v2 = vrot.slane %v2610_v10, 4  ;;  %v10644_v61 = vld [vmem:[%s12104_s6 + $0x5c] sm:$0x1] }
 0x18d   : > { %v1835_v22 = vpop.permute.xlu0 %1834  ;;  %2357 = vrot.lane.b32.xlu1 %v10612_v42, %s11950_s24  ;;  %v2564_v42 = vrot.slane %v2562_v24, 4 }
 0x18e   : > { %1909 = vst.msk [vmem:[#allocation2 + $0x58] sm:$0xf] %vm1886_vm11, %v1835_v22  ;;  %v10623_v22 = vld [vmem:[%s12104_s6 + $0xc0] sm:$0xf]  ;;  %v2554_v0 = vrot.slane %v2552_v43, 5 }
 0x18f   : > { %2355 = vrot.lane.b32.xlu0 %v10611_v44, %s11950_s24  ;;  %v1841_v47 = vpop.permute.xlu1 %1840 }
 0x190   : > { %1912 = vst.msk [vmem:[#allocation2 + $0x64] sm:$0xf] %vm1886_vm11, %v1841_v47  ;;  %v2586_v47 = vshrl.u32 %v10637_v33, 16  ;;  %v2555_v20 = vor.u32 %v2554_v0, %v2551_v62 }
 0x191   : > { %v1839_v36 = vpop.permute.xlu0 %1838  ;;  %2361 = vrot.lane.b32.xlu1 %v10614_v45, %s11950_s24  ;;  %v2582_v45 = vshll.u32 %v10637_v33, 16  ;;  %v2630_v33 = vshll.u32 %v10643_v14, 16 }
 0x192   : > { %1911 = vst.msk [vmem:[#allocation2 + $0x60] sm:$0xf] %vm1886_vm11, %v1839_v36  ;;  %v2576_v36 = vshll.u32 %v10636_v34, 16  ;;  %v2588_v4 = vrot.slane %v2586_v47, 4 }
 0x193   : > { %2359 = vrot.lane.b32.xlu0 %v10613_v49, %s11950_s24  ;;  %v1845_v51 = vpop.permute.xlu1 %1844  ;;  %v2573_v49 = vshrl.u32 %v10636_v34, 16  ;;  %v13132_v55 = vrot.slane %v2582_v45, 5 }
 0x194   : > { %1914 = vst.msk [vmem:[#allocation2 + $0x6c] sm:$0xf] %vm1886_vm11, %v1845_v51  ;;  %v2518_v51 = vrot.slane %v2517_v30, 4  ;;  %v2578_v6 = vrot.slane %v2576_v36, 5 }
 0x195   : > { %v1843_v52 = vpop.permute.xlu0 %1842  ;;  %2365 = vrot.lane.b32.xlu1 %v10616_v50, %s11950_s24  ;;  %v2589_v24 = vor.u32 %v2588_v4, %v13132_v55 }
 0x196   : > { %1913 = vst.msk [vmem:[#allocation2 + $0x68] sm:$0xf] %vm1886_vm11, %v1843_v52  ;;  %v2508_v52 = vrot.slane %v2507_v31, 4 }
 0x197   : > { %2363 = vrot.lane.b32.xlu0 %v10615_v26, %s11950_s24  ;;  %v1849_v59 = vpop.permute.xlu1 %1848  ;;  %v2522_v26 = vrot.slane %v2520_v17, 5  ;;  %v10641_v17 = vld [vmem:[%s12104_s6 + $0x50] sm:$0x1]  ;;  %v2590_v45 = vrot.slane %v2589_v24, 4 }
 0x198   : > { %1916 = vst.msk [vmem:[#allocation2 + $0x74] sm:$0xf] %vm1886_vm11, %v1849_v59  ;;  %v10639_v59 = vld [vmem:[%s12104_s6 + $0x48] sm:$0xf]  ;;  %v2513_v60 = vsel %vm12115_vm3, %v2508_v52, %v13093_v12  ;;  %v13174_v52 = vrot.slane %v2630_v33, 5 }
 0x199   : > { %v1847_v48 = vpop.permute.xlu0 %1846  ;;  %2369 = vrot.lane.b32.xlu1 %v10618_v57, %s11950_s24  ;;  %v2568_v57 = vshll.u32 %v10635_v40, 16  ;;  %v2600_v13 = vshll.u32 %v10639_v59, 16 }
 0x19a   : > { %1915 = vst.msk [vmem:[#allocation2 + $0x70] sm:$0xf] %vm1886_vm11, %v1847_v48  ;;  %v2565_v48 = vor.u32 %v2564_v42, %v13114_v41 }
 0x19b   : > { %2367 = vrot.lane.b32.xlu0 %v10617_v19, %s11950_s24  ;;  %v1853_v7 = vpop.permute.xlu1 %1852  ;;  %v10626_v19 = vld [vmem:[%s12104_s6 + $0xd0] sm:$0xf]  ;;  %v13153_v18 = vrot.slane %v2568_v57, 5  ;;  %v2602_v34 = vrot.slane %v2600_v13, 5  ;;  %v10652_v13 = vld [vmem:[%s12104_s6 + $0x7c] sm:$0xf] }
 0x19c   : > { %1918 = vst.msk [vmem:[#allocation2 + $0x7c] sm:$0xf] %vm1886_vm11, %v1853_v7  ;;  %v10638_v7 = vld [vmem:[%s12104_s6 + $0x44] sm:$0x1]  ;;  %v13156_v23 = vrot.slane %v2565_v48, 4 }
 0x19d   : > { %v1851_v11 = vpop.permute.xlu0 %1850  ;;  %2373 = vrot.lane.b32.xlu1 %v10620_v5, %s11950_s24  ;;  %v2575_v5 = vrot.slane %v2573_v49, 4  ;;  %v2592_v25 = vshll.u32 %v10638_v7, 16  ;;  %v2616_v49 = vshll.u32 %v10641_v17, 16  ;;  %v2669_v7 = vshrl.u32 %v10648_v54, 16 }
 0x19e   : > { %1917 = vst.msk [vmem:[#allocation2 + $0x78] sm:$0xf] %vm1886_vm11, %v1851_v11  ;;  %v2597_v11 = vshrl.u32 %v10639_v59, 16  ;;  %v2623_v59 = vrot.slane %v2621_v37, 4  ;;  %vm6797_vm11 = vcmask 618048  }
 0x19f   : > { %2371 = vrot.lane.b32.xlu0 %v10619_v8, %s11950_s24  ;;  %v2130_v9 = vpop.permute.xlu1 %2129  ;;  %v2606_v8 = vshll.u32 %v10640_v58, 16  ;;  %v2594_v47 = vrot.slane %v2592_v25, 5 }
 0x1a0   : > { %2225 = vst.msk [vmem:[#allocation2 + $0x4] sm:$0xf] %vm2223_vm12, %v2130_v9  ;;  %v2579_v9 = vor.u32 %v2578_v6, %v2575_v5  ;;  %v2599_v32 = vrot.slane %v2597_v11, 4  ;;  %v10647_v5 = vld [vmem:[%s12104_s6 + $0x68] sm:$0x1]  ;;  %v2678_v6 = vshll.u32 %v10649_v53, 16 }
 0x1a1   : > { %v2128_v29 = vpop.permute.xlu0 %2127  ;;  %2377 = vrot.lane.b32.xlu1 %v10622_v56, %s11950_s24  ;;  %v2523_v56 = vsel %vm12115_vm3, %v2518_v51, %v2522_v26  ;;  %v13163_v31 = vrot.slane %v2606_v8, 5  ;;  %v2595_v10 = vsel %vm12115_vm3, %v2590_v45, %v2594_v47 }
 0x1a2   : > { %2224 = vst.msk [vmem:[#allocation2] sm:$0xf] %vm2223_vm12, %v2128_v29  ;;  %v10645_v29 = vld [vmem:[%s12104_s6 + $0x60] sm:$0xf]  ;;  %v2580_v51 = vrot.slane %v2579_v9, 4  ;;  %v2603_v57 = vor.u32 %v2602_v34, %v2599_v32  ;;  %v13201_v24 = vrot.slane %v2678_v6, 5 }
 0x1a3   : > { %2375 = vrot.lane.b32.xlu0 %v10621_v27, %s11950_s24  ;;  %v2134_v44 = vpop.permute.xlu1 %2133  ;;  %v10646_v27 = vld [vmem:[%s12104_s6 + $0x64] sm:$0xf]  ;;  %v2645_v42 = vshrl.u32 %v10645_v29, 16  ;;  %v2648_v43 = vshll.u32 %v10645_v29, 16  ;;  %v2613_v26 = vor.u32 %v2612_v2, %v13163_v31  ;;  %v2671_v9 = vrot.slane %v2669_v7, 4 }
 0x1a4   : > { %2227 = vst.msk [vmem:[#allocation2 + $0xc] sm:$0xf] %vm2223_vm12, %v2134_v44  ;;  %v2654_v39 = vshll.u32 %v10646_v27, 16  ;;  %v2658_v40 = vshrl.u32 %v10646_v27, 16  ;;  %v2585_v11 = vsel %vm12115_vm3, %v2580_v51, %v13132_v55  ;;  %v2664_v55 = vshll.u32 %v10647_v5, 16 }
 0x1a5   : > { %v2132_v50 = vpop.permute.xlu0 %2131  ;;  %2381 = vrot.lane.b32.xlu1 %v10624_v35, %s11950_s24  ;;  %v2634_v35 = vshrl.u32 %v10643_v14, 16  ;;  %v2647_v0 = vrot.slane %v2645_v42, 4  ;;  %v2702_v27 = vshll.u32 %v10652_v13, 16  ;;  %v2706_v2 = vshrl.u32 %v10652_v13, 16  ;;  %v10656_v13 = vld [vmem:[%s12104_s6 + $0x8c] sm:$0x1] }
 0x1a6   : > { %2226 = vst.msk [vmem:[#allocation2 + $0x8] sm:$0xf] %vm2223_vm12, %v2132_v50  ;;  %v2571_v50 = vsel %vm12115_vm3, %v13156_v23, %v13153_v18  ;;  %v13182_v48 = vrot.slane %v2654_v39, 5  ;;  %v2660_v62 = vrot.slane %v2658_v40, 4  ;;  %v10651_v18 = vld [vmem:[%s12104_s6 + $0x78] sm:$0xf] }
 0x1a7   : > { %2379 = vrot.lane.b32.xlu0 %v10623_v22, %s11950_s24  ;;  %v2138_v1 = vpop.permute.xlu1 %2137  ;;  %v2556_v22 = vrot.slane %v2555_v20, 4  ;;  %v2636_v58 = vrot.slane %v2634_v35, 4  ;;  %v2604_v20 = vrot.slane %v2603_v57, 4  ;;  %v2693_v32 = vshrl.u32 %v10651_v18, 16 }
 0x1a8   : > { %2229 = vst.msk [vmem:[#allocation2 + $0x14] sm:$0xf] %vm2223_vm12, %v2138_v1  ;;  %v2650_v1 = vrot.slane %v2648_v43, 5  ;;  %v2661_v21 = vor.u32 %v2660_v62, %v13182_v48  ;;  %v2696_v33 = vshll.u32 %v10651_v18, 16  ;;  %v13215_v42 = vrot.slane %v2664_v55, 5 }
 0x1a9   : > { %v2136_v46 = vpop.permute.xlu0 %2135  ;;  %2385 = vrot.lane.b32.xlu1 %v10626_v19, %s11950_s24  ;;  %v2626_v19 = vrot.slane %v2624_v38, 5  ;;  %v2561_v4 = vsel %vm12115_vm3, %v2556_v22, %v13114_v41  ;;  %v2614_v41 = vrot.slane %v2613_v26, 4  ;;  %v2637_v14 = vor.u32 %v2636_v58, %v13174_v52  ;;  %v10655_v43 = vld [vmem:[%s12104_s6 + $0x88] sm:$0xf] }
 0x1aa   : > { %2228 = vst.msk [vmem:[#allocation2 + $0x10] sm:$0xf] %vm2223_vm12, %v2136_v46  ;;  %v2682_v46 = vshrl.u32 %v10649_v53, 16  ;;  %v2609_v39 = vsel %vm12115_vm3, %v2604_v20, %v13163_v31  ;;  %v13213_v40 = vrot.slane %v2661_v21, 4  ;;  %v2708_v51 = vrot.slane %v2706_v2, 4 }
 0x1ab   : > { %2383 = vrot.lane.b32.xlu0 %v10625_v3, %s11950_s24  ;;  %v2142_v12 = vpop.permute.xlu1 %2141  ;;  %v2638_v34 = vrot.slane %v2637_v14, 4  ;;  %v2695_v26 = vrot.slane %v2693_v32, 4  ;;  %v2698_v53 = vrot.slane %v2696_v33, 5  ;;  %v2726_v57 = vshll.u32 %v10655_v43, 16  ;;  %s11963_s24 = smov 76  }
 0x1ac   : > { %2231 = vst.msk [vmem:[#allocation2 + $0x1c] sm:$0xf] %vm2223_vm12, %v2142_v12  ;;  %v2651_v12 = vor.u32 %v2650_v1, %v2647_v0  ;;  %v2684_v25 = vrot.slane %v2682_v46, 4  ;;  %v2730_v58 = vshrl.u32 %v10655_v43, 16  ;;  %v10658_v0 = vld [vmem:[%s12104_s6 + $0x94] sm:$0xf] }
 0x1ad   : > { %v2140_v30 = vpop.permute.xlu0 %2139  ;;  %2886 = vrot.lane.b32.xlu1 %v2523_v56, %s11951_s25  ;;  %v2618_v56 = vrot.slane %v2616_v49, 5  ;;  %v10657_v46 = vld [vmem:[%s12104_s6 + $0x90] sm:$0xf]  ;;  %v2754_v18 = vshrl.u32 %v10658_v0, 16  ;;  %v2736_v2 = vshll.u32 %v10656_v13, 16 }
 0x1ae   : > { %2230 = vst.msk [vmem:[#allocation2 + $0x18] sm:$0xf] %vm2223_vm12, %v2140_v30  ;;  %v10650_v30 = vld [vmem:[%s12104_s6 + $0x74] sm:$0x1]  ;;  %v13219_v45 = vrot.slane %v2651_v12, 4  ;;  %v2685_v47 = vor.u32 %v2684_v25, %v13201_v24  ;;  %v2741_v20 = vshrl.u32 %v10657_v46, 16 }
 0x1af   : > { %2884 = vrot.lane.b32.xlu0 %v2513_v60, %s11951_s25  ;;  %v2146_v44 = vpop.permute.xlu1 %2145  ;;  %v2672_v60 = vshll.u32 %v10648_v54, 16  ;;  %v2619_v38 = vsel %vm12115_vm3, %v2614_v41, %v2618_v56  ;;  %v2688_v49 = vshll.u32 %v10650_v30, 16  ;;  %v10653_v54 = vld [vmem:[%s12104_s6 + $0x80] sm:$0x1]  ;;  %v13251_v41 = vrot.slane %v2726_v57, 5 }
 0x1b0   : > { %2233 = vst.msk [vmem:[#allocation2 + $0x24] sm:$0xf] %vm2223_vm12, %v2146_v44  ;;  %v10654_v44 = vld [vmem:[%s12104_s6 + $0x84] sm:$0xf]  ;;  %v2686_v5 = vrot.slane %v2685_v47, 4  ;;  %v2744_v21 = vshll.u32 %v10657_v46, 16 }
 0x1b1   : > { %v2144_v36 = vpop.permute.xlu0 %2143  ;;  %2890 = vrot.lane.b32.xlu1 %v2547_v15, %s11951_s25  ;;  %v2640_v15 = vshll.u32 %v10644_v61, 16  ;;  %v2674_v17 = vrot.slane %v2672_v60, 5  ;;  %v2720_v62 = vshll.u32 %v10654_v44, 16  ;;  %v2690_v6 = vrot.slane %v2688_v49, 5  ;;  %v10661_v56 = vld [vmem:[%s12104_s6 + $0xa0] sm:$0xf] }
 0x1b2   : > { %2232 = vst.msk [vmem:[#allocation2 + $0x20] sm:$0xf] %vm2223_vm12, %v2144_v36  ;;  %v13222_v36 = vrot.slane %v2702_v27, 5  ;;  %v10660_v60 = vld [vmem:[%s12104_s6 + $0x9c] sm:$0xf]  ;;  %v2774_v12 = vshll.u32 %v10661_v56, 16 }
 0x1b3   : > { %2888 = vrot.lane.b32.xlu0 %v2537_v16, %s11951_s25  ;;  %v2150_v3 = vpop.permute.xlu1 %2149  ;;  %v2627_v16 = vor.u32 %v2626_v19, %v2623_v59  ;;  %v2642_v35 = vrot.slane %v2640_v15, 5  ;;  %v2675_v31 = vor.u32 %v2674_v17, %v2671_v9  ;;  %v2717_v59 = vshrl.u32 %v10654_v44, 16 }
 0x1b4   : > { %2235 = vst.msk [vmem:[#allocation2 + $0x2c] sm:$0xf] %vm2223_vm12, %v2150_v3  ;;  %v2667_v3 = vsel %vm12115_vm3, %v13213_v40, %v13215_v42  ;;  %v2750_v15 = vshll.u32 %v10658_v0, 16  ;;  %v2765_v25 = vshrl.u32 %v10660_v60, 16  ;;  %v2768_v9 = vshll.u32 %v10660_v60, 16 }
 0x1b5   : > { %v2148_v8 = vpop.permute.xlu0 %2147  ;;  %2894 = vrot.lane.b32.xlu1 %v2571_v50, %s11951_s25  ;;  %v2628_v37 = vrot.slane %v2627_v16, 4  ;;  %v2643_v19 = vsel %vm12115_vm3, %v2638_v34, %v2642_v35  ;;  %v2676_v7 = vrot.slane %v2675_v31, 4  ;;  %v2719_v14 = vrot.slane %v2717_v59, 4  ;;  %v10662_v31 = vld [vmem:[%s12104_s6 + $0xa4] sm:$0x1] }
 0x1b6   : > { %2234 = vst.msk [vmem:[#allocation2 + $0x28] sm:$0xf] %vm2223_vm12, %v2148_v8  ;;  %v2709_v8 = vor.u32 %v2708_v51, %v13222_v36  ;;  %v2722_v16 = vrot.slane %v2720_v62, 5  ;;  %v13263_v35 = vrot.slane %v2750_v15, 5  ;;  %v2756_v40 = vrot.slane %v2754_v18, 4 }
 0x1b7   : > { %2892 = vrot.lane.b32.xlu0 %v2561_v4, %s11951_s25  ;;  %v2154_v23 = vpop.permute.xlu1 %2153  ;;  %v2633_v61 = vsel %vm12115_vm3, %v2628_v37, %v13174_v52  ;;  %v2657_v4 = vsel %vm12115_vm3, %v13219_v45, %v13182_v48  ;;  %v2732_v48 = vrot.slane %v2730_v58, 4  ;;  %v2681_v32 = vsel %vm12115_vm3, %v2676_v7, %v13201_v24  ;;  %v10664_v37 = vld [vmem:[%s12104_s6 + $0xac] sm:$0xf] }
 0x1b8   : > { %2237 = vst.msk [vmem:[#allocation2 + $0x34] sm:$0xf] %vm2223_vm12, %v2154_v23  ;;  %v2778_v23 = vshrl.u32 %v10661_v56, 16  ;;  %v2710_v30 = vrot.slane %v2709_v8, 4  ;;  %v2743_v42 = vrot.slane %v2741_v20, 4  ;;  %v2746_v43 = vrot.slane %v2744_v21, 5 }
 0x1b9   : > { %v2152_v29 = vpop.permute.xlu0 %2151  ;;  %2898 = vrot.lane.b32.xlu1 %v2595_v10, %s11951_s25  ;;  %v2712_v10 = vshll.u32 %v10653_v54, 16  ;;  %v2733_v34 = vor.u32 %v2732_v48, %v13251_v41  ;;  %v13269_v45 = vrot.slane %v2774_v12, 5  ;;  %v2767_v47 = vrot.slane %v2765_v25, 4  ;;  %v10665_v56 = vld [vmem:[%s12104_s6 + $0xb0] sm:$0x1] }
 0x1ba   : > { %2236 = vst.msk [vmem:[#allocation2 + $0x30] sm:$0xf] %vm2223_vm12, %v2152_v29  ;;  %v2691_v29 = vsel %vm12115_vm3, %v2686_v5, %v2690_v6  ;;  %v2780_v24 = vrot.slane %v2778_v23, 4  ;;  %v2770_v49 = vrot.slane %v2768_v9, 5  ;;  %v2798_v51 = vshll.u32 %v10664_v37, 16 }
 0x1bb   : > { %2896 = vrot.lane.b32.xlu0 %v2585_v11, %s11951_s25  ;;  %v2158_v22 = vpop.permute.xlu1 %2157  ;;  %v2699_v11 = vor.u32 %v2698_v53, %v2695_v26  ;;  %v2714_v17 = vrot.slane %v2712_v10, 5  ;;  %v2802_v26 = vshrl.u32 %v10664_v37, 16  ;;  %v2738_v58 = vrot.slane %v2736_v2, 5  ;;  %v10670_v25 = vld [vmem:[%s12104_s6 + $0xc4] sm:$0xf] }
 0x1bc   : > { %2239 = vst.msk [vmem:[#allocation2 + $0x3c] sm:$0xf] %vm2223_vm12, %v2158_v22  ;;  %v10659_v22 = vld [vmem:[%s12104_s6 + $0x98] sm:$0x1]  ;;  %v2757_v0 = vor.u32 %v2756_v40, %v13263_v35  ;;  %v2747_v5 = vor.u32 %v2746_v43, %v2743_v42  ;;  %v2781_v6 = vor.u32 %v2780_v24, %v13269_v45  ;;  %v2784_v46 = vshll.u32 %v10662_v31, 16 }
 0x1bd   : > { %v2156_v50 = vpop.permute.xlu0 %2155  ;;  %2902 = vrot.lane.b32.xlu1 %v2619_v38, %s11951_s25  ;;  %v2700_v33 = vrot.slane %v2699_v11, 4  ;;  %v10663_v38 = vld [vmem:[%s12104_s6 + $0xa8] sm:$0xf]  ;;  %v2715_v54 = vsel %vm12115_vm3, %v2710_v30, %v2714_v17  ;;  %v13286_v7 = vrot.slane %v2798_v51, 5  ;;  %v2804_v8 = vrot.slane %v2802_v26, 4 }
 0x1be   : > { %2238 = vst.msk [vmem:[#allocation2 + $0x38] sm:$0xf] %vm2223_vm12, %v2156_v50  ;;  %v2789_v53 = vshrl.u32 %v10663_v38, 16  ;;  %v2792_v59 = vshll.u32 %v10663_v38, 16  ;;  %v2782_v12 = vrot.slane %v2781_v6, 4  ;;  %v2786_v23 = vrot.slane %v2784_v46, 5 }
 0x1bf   : > { %2900 = vrot.lane.b32.xlu0 %v2609_v39, %s11951_s25  ;;  %v2162_v1 = vpop.permute.xlu1 %2161  ;;  %v2723_v39 = vor.u32 %v2722_v16, %v2719_v14  ;;  %v2705_v57 = vsel %vm12115_vm3, %v2700_v33, %v13222_v36  ;;  %v2758_v16 = vrot.slane %v2757_v0, 4  ;;  %v2808_v30 = vshll.u32 %v10665_v56, 16  ;;  %v10669_v2 = vld [vmem:[%s12104_s6 + $0xc0] sm:$0xf]  ;;  %v10668_v38 = vld [vmem:[%s12104_s6 + $0xbc] sm:$0x1] }
 0x1c0   : > { %2241 = vst.msk [vmem:[#allocation2 + $0x44] sm:$0xf] %vm2223_vm12, %v2162_v1  ;;  %v2760_v1 = vshll.u32 %v10659_v22, 16  ;;  %v2791_v10 = vrot.slane %v2789_v53, 4  ;;  %v2794_v60 = vrot.slane %v2792_v59, 5  ;;  %v2850_v40 = vshrl.u32 %v10670_v25, 16 }
 0x1c1   : > { %v2160_v52 = vpop.permute.xlu0 %2159  ;;  %2906 = vrot.lane.b32.xlu1 %v2643_v19, %s11951_s25  ;;  %v10667_v19 = vld [vmem:[%s12104_s6 + $0xb8] sm:$0xf]  ;;  %v2724_v62 = vrot.slane %v2723_v39, 4  ;;  %v2846_v39 = vshll.u32 %v10670_v25, 16  ;;  %v2840_v22 = vshll.u32 %v10669_v2, 16  ;;  %v2810_v51 = vrot.slane %v2808_v30, 5 }
 0x1c2   : > { %2240 = vst.msk [vmem:[#allocation2 + $0x40] sm:$0xf] %vm2223_vm12, %v2160_v52  ;;  %v2771_v52 = vor.u32 %v2770_v49, %v2767_v47  ;;  %v2822_v11 = vshll.u32 %v10667_v19, 16  ;;  %v2826_v13 = vshrl.u32 %v10667_v19, 16  ;;  %v2762_v18 = vrot.slane %v2760_v1, 5 }
 0x1c3   : > { %2904 = vrot.lane.b32.xlu0 %v2633_v61, %s11951_s25  ;;  %v2166_v55 = vpop.permute.xlu1 %2165  ;;  %v2734_v61 = vrot.slane %v2733_v34, 4  ;;  %v2729_v21 = vsel %vm12115_vm3, %v2724_v62, %v13251_v41  ;;  %v2795_v41 = vor.u32 %v2794_v60, %v2791_v10  ;;  %v10673_v24 = vld [vmem:[%s12104_s6 + $0xd0] sm:$0xf]  ;;  %v2787_v49 = vsel %vm12115_vm3, %v2782_v12, %v2786_v23  ;;  %v10672_v26 = vld [vmem:[%s12104_s6 + $0xcc] sm:$0xf] }
 0x1c4   : > { %2243 = vst.msk [vmem:[#allocation2 + $0x4c] sm:$0xf] %vm2223_vm12, %v2166_v55  ;;  %v2748_v55 = vrot.slane %v2747_v5, 4  ;;  %v13300_v17 = vrot.slane %v2822_v11, 5  ;;  %v2763_v37 = vsel %vm12115_vm3, %v2758_v16, %v2762_v18  ;;  %v2852_v59 = vrot.slane %v2850_v40, 4 }
 0x1c5   : > { %v2164_v27 = vpop.permute.xlu0 %2163  ;;  %2910 = vrot.lane.b32.xlu1 %v2667_v3, %s11951_s25  ;;  %v10666_v3 = vld [vmem:[%s12104_s6 + $0xb4] sm:$0xf]  ;;  %v2739_v15 = vsel %vm12115_vm3, %v2734_v61, %v2738_v58  ;;  %v13324_v58 = vrot.slane %v2846_v39, 5  ;;  %v2870_v19 = vshll.u32 %v10673_v24, 16  ;;  %v10671_v62 = vld [vmem:[%s12104_s6 + $0xc8] sm:$0x1] }
 0x1c6   : > { %2242 = vst.msk [vmem:[#allocation2 + $0x48] sm:$0xf] %vm2223_vm12, %v2164_v27  ;;  %v2813_v48 = vshrl.u32 %v10666_v3, 16  ;;  %v2816_v14 = vshll.u32 %v10666_v3, 16  ;;  %v2772_v27 = vrot.slane %v2771_v52, 4  ;;  %v2753_v43 = vsel %vm12115_vm3, %v2748_v55, %v13263_v35 }
 0x1c7   : > { %2908 = vrot.lane.b32.xlu0 %v2657_v4, %s11951_s25  ;;  %v2170_v44 = vpop.permute.xlu1 %2169  ;;  %v2796_v35 = vrot.slane %v2795_v41, 4  ;;  %v2842_v1 = vrot.slane %v2840_v22, 5  ;;  %v2861_v3 = vshrl.u32 %v10672_v26, 16  ;;  %v2856_v10 = vshll.u32 %v10671_v62, 16  ;;  %v10679_v39 = vld [vmem:[%s12104_s6 + $0x28] sm:$0xf] }
 0x1c8   : > { %2245 = vst.msk [vmem:[#allocation2 + $0x54] sm:$0xf] %vm2223_vm12, %v2170_v44  ;;  %v2815_v33 = vrot.slane %v2813_v48, 4  ;;  %v2818_v34 = vrot.slane %v2816_v14, 5  ;;  %v2837_v44 = vshrl.u32 %v10669_v2, 16  ;;  %v2872_v11 = vrot.slane %v2870_v19, 5 }
 0x1c9   : > { %v2168_v50 = vpop.permute.xlu0 %2167  ;;  %2914 = vrot.lane.b32.xlu1 %v2691_v29, %s11951_s25  ;;  %v2805_v29 = vor.u32 %v2804_v8, %v13286_v7  ;;  %v2801_v46 = vsel %vm12115_vm3, %v2796_v35, %v13286_v7  ;;  %v2853_v8 = vor.u32 %v2852_v59, %v13324_v58  ;;  %v10674_v14 = vld [vmem:[%s12104_s6 + $0xd4] sm:$0x1]  ;;  %v10678_v35 = vld [vmem:[%s12104_s6 + $0x24] sm:$0xe]  ;;  %v10685_v62 = vld [vmem:[%s12104_s6 + $0x40] sm:$0xf] }
 0x1ca   : > { %2244 = vst.msk [vmem:[#allocation2 + $0x50] sm:$0xf] %vm2223_vm12, %v2168_v50  ;;  %v2777_v50 = vsel %vm12115_vm3, %v2772_v27, %v13269_v45  ;;  %v2874_v45 = vshrl.u32 %v10673_v24, 16  ;;  %v2839_v0 = vrot.slane %v2837_v44, 4  ;;  %v2880_v12 = vshll.u32 %v10674_v14, 16 }
 0x1cb   : > { %2912 = vrot.lane.b32.xlu0 %v2681_v32, %s11951_s25  ;;  %v2174_v4 = vpop.permute.xlu1 %2173  ;;  %v2828_v32 = vrot.slane %v2826_v13, 4  ;;  %v2806_v31 = vrot.slane %v2805_v29, 4  ;;  %v10676_v29 = vld [vmem:[%s12104_s6 + $0x1c] sm:$0xf]  ;;  %v3118_v24 = vrot.slane %v10679_v39, 5 }
 0x1cc   : > { %2247 = vst.msk [vmem:[#allocation2 + $0x5c] sm:$0xf] %vm2223_vm12, %v2174_v4  ;;  %v2864_v4 = vshll.u32 %v10672_v26, 16  ;;  %v2876_v56 = vrot.slane %v2874_v45, 4  ;;  %v2843_v48 = vor.u32 %v2842_v1, %v2839_v0  ;;  %v10724_v45 = vrot.slane %v10678_v35, 9 }
 0x1cd   : > { %v2172_v36 = vpop.permute.xlu0 %2171  ;;  %2918 = vrot.lane.b32.xlu1 %v2715_v54, %s11951_s25  ;;  %v2829_v53 = vor.u32 %v2828_v32, %v13300_v17  ;;  %v2832_v54 = vshll.u32 %v10668_v38, 16  ;;  %v2811_v6 = vsel %vm12115_vm3, %v2806_v31, %v2810_v51  ;;  %v3111_v32 = vrot.slane %v10676_v29, 5  ;;  %v10677_v38 = vld [vmem:[%s12104_s6 + $0x20] sm:$0x1]  ;;  %v10680_v31 = vld [vmem:[%s12104_s6 + $0x2c] sm:$0x1] }
 0x1ce   : > { %2246 = vst.msk [vmem:[#allocation2 + $0x58] sm:$0xf] %vm2223_vm12, %v2172_v36  ;;  %v2866_v16 = vrot.slane %v2864_v4, 5  ;;  %v2877_v55 = vor.u32 %v2876_v56, %v2872_v11  ;;  %v3114_v22 = vrot.slane %v10677_v38, 5  ;;  %v10682_v51 = vld [vmem:[%s12104_s6 + $0x34] sm:$0xf] }
 0x1cf   : > { %2916 = vrot.lane.b32.xlu0 %v2705_v57, %s11951_s25  ;;  %v2178_v20 = vpop.permute.xlu1 %2177  ;;  %v2819_v57 = vor.u32 %v2818_v34, %v2815_v33  ;;  %v2830_v52 = vrot.slane %v2829_v53, 4  ;;  %v2834_v36 = vrot.slane %v2832_v54, 5  ;;  %v3113_v44 = vrot.slane %v3111_v32, 4  ;;  %v10681_v1 = vld [vmem:[%s12104_s6 + $0x30] sm:$0xe] }
 0x1d0   : > { %2249 = vst.msk [vmem:[#allocation2 + $0x64] sm:$0xf] %vm2223_vm12, %v2178_v20  ;;  %v2854_v20 = vrot.slane %v2853_v8, 4  ;;  %v2878_v41 = vrot.slane %v2877_v55, 4  ;;  %v3120_v54 = vrot.slane %v3118_v24, 4 }
 0x1d1   : > { %v2176_v9 = vpop.permute.xlu0 %2175  ;;  %2922 = vrot.lane.b32.xlu1 %v2739_v15, %s11951_s25  ;;  %v2820_v13 = vrot.slane %v2819_v57, 4  ;;  %v2863_v15 = vrot.slane %v2861_v3, 4  ;;  %v2835_v7 = vsel %vm12115_vm3, %v2830_v52, %v2834_v36  ;;  %v3115_v53 = vsel %vm12259_vm7, %v3113_v44, %v3114_v22  ;;  %v10686_v8 = vld [vmem:[%s12104_s6 + $0x44] sm:$0x1]  ;;  %v10684_v56 = vld [vmem:[%s12104_s6 + $0x3c] sm:$0xe] }
 0x1d2   : > { %2248 = vst.msk [vmem:[#allocation2 + $0x60] sm:$0xf] %vm2223_vm12, %v2176_v9  ;;  %v2844_v9 = vrot.slane %v2843_v48, 4  ;;  %v3121_v57 = vrot.slane %v10680_v31, 5  ;;  %v3119_v52 = vsel %vm12259_vm7, %v10724_v45, %v3118_v24  ;;  %v10725_v36 = vrot.slane %v10681_v1, 9 }
 0x1d3   : > { %2920 = vrot.lane.b32.xlu0 %v2729_v21, %s11951_s25  ;;  %v2182_v42 = vpop.permute.xlu1 %2181  ;;  %v2858_v21 = vrot.slane %v2856_v10, 5  ;;  %v2825_v25 = vsel %vm12115_vm3, %v2820_v13, %v13300_v17  ;;  %v2867_v27 = vor.u32 %v2866_v16, %v2863_v15  ;;  %v2882_v17 = vrot.slane %v2880_v12, 5  ;;  %v10688_v10 = vld [vmem:[%s12104_s6 + $0x4c] sm:$0xf]  ;;  %v10687_v55 = vld [vmem:[%s12104_s6 + $0x48] sm:$0xe] }
 0x1d4   : > { %2251 = vst.msk [vmem:[#allocation2 + $0x6c] sm:$0xf] %vm2223_vm12, %v2182_v42  ;;  %v2849_v34 = vsel %vm12115_vm3, %v2844_v9, %v13324_v58  ;;  %v10675_v42 = vld [vmem:[%s12104_s6 + $0x18] sm:$0xe]  ;;  %v3125_v58 = vrot.slane %v10682_v51, 5  ;;  %v3122_v3 = vsel %vm12259_vm7, %v3120_v54, %v3121_v57  ;;  %v3135_v48 = vrot.slane %v10686_v8, 5 }
 0x1d5   : > { %v2180_v47 = vpop.permute.xlu0 %2179  ;;  %2926 = vrot.lane.b32.xlu1 %v2763_v37, %s11951_s25  ;;  %v2859_v2 = vsel %vm12115_vm3, %v2854_v20, %v2858_v21  ;;  %v2868_v37 = vrot.slane %v2867_v27, 4  ;;  %v3139_v14 = vrot.slane %v10688_v10, 5  ;;  %v10691_v20 = vld [vmem:[%s12104_s6 + $0x58] sm:$0xf]  ;;  %v10697_v44 = vld [vmem:[%s12104_s6 + $0x70] sm:$0xf] }
 0x1d6   : > { %2250 = vst.msk [vmem:[#allocation2 + $0x68] sm:$0xf] %vm2223_vm12, %v2180_v47  ;;  %v3127_v4 = vrot.slane %v3125_v58, 4  ;;  %v3126_v16 = vsel %vm12259_vm7, %v10725_v36, %v3125_v58  ;;  %v3146_v9 = vrot.slane %v10691_v20, 5  ;;  %v10693_v24 = vld [vmem:[%s12104_s6 + $0x60] sm:$0xe] }
 0x1d7   : > { %2924 = vrot.lane.b32.xlu0 %v2753_v43, %s11951_s25  ;;  %v2186_v61 = vpop.permute.xlu1 %2185  ;;  %v2883_v43 = vsel %vm12115_vm3, %v2878_v41, %v2882_v17  ;;  %v10694_v41 = vld [vmem:[%s12104_s6 + $0x64] sm:$0xf]  ;;  %v3160_v31 = vrot.slane %v10697_v44, 5  ;;  %v10729_v35 = vrot.slane %v10693_v24, 9  ;;  %v10700_v54 = vld [vmem:[%s12104_s6 + $0x7c] sm:$0xf] }
 0x1d8   : > { %2253 = vst.msk [vmem:[#allocation2 + $0x74] sm:$0xf] %vm2223_vm12, %v2186_v61  ;;  %v10683_v61 = vld [vmem:[%s12104_s6 + $0x38] sm:$0x1]  ;;  %v3153_v38 = vrot.slane %v10694_v41, 5 }
 0x1d9   : > { %v2184_v5 = vpop.permute.xlu0 %2183  ;;  %2930 = vrot.lane.b32.xlu1 %v2787_v49, %s11951_s25  ;;  %v2873_v49 = vsel %vm12115_vm3, %v2868_v37, %v2872_v11  ;;  %v10696_v58 = vld [vmem:[%s12104_s6 + $0x6c] sm:$0xe] }
 0x1da   : > { %2252 = vst.msk [vmem:[#allocation2 + $0x70] sm:$0xf] %vm2223_vm12, %v2184_v5  ;;  %v3128_v5 = vrot.slane %v10683_v61, 5  ;;  %v3167_v61 = vrot.slane %v10700_v54, 5  ;;  %v10730_v1 = vrot.slane %v10696_v58, 9 }
 0x1db   : > { %2928 = vrot.lane.b32.xlu0 %v2777_v50, %s11951_s25  ;;  %v2190_v60 = vpop.permute.xlu1 %2189  ;;  %v10723_v50 = vrot.slane %v10675_v42, 9 }
 0x1dc   : > { %2255 = vst.msk [vmem:[#allocation2 + $0x7c] sm:$0xf] %vm2223_vm12, %v2190_v60  ;;  %v3129_v60 = vsel %vm12259_vm7, %v3127_v4, %v3128_v5  ;;  %v10703_v4 = vld [vmem:[%s12104_s6 + $0x88] sm:$0xf] }
 0x1dd   : > { %v2188_v18 = vpop.permute.xlu0 %2187  ;;  %2934 = vrot.lane.b32.xlu1 %v2811_v6, %s11951_s25  ;;  %v3112_v19 = vsel %vm12259_vm7, %v10723_v50, %v3111_v32  ;;  %v3132_v6 = vrot.slane %v10685_v62, 5  ;;  %v10690_v32 = vld [vmem:[%s12104_s6 + $0x54] sm:$0xe]  ;;  %v3174_v8 = vrot.slane %v10703_v4, 5 }
 0x1de   : > { %2254 = vst.msk [vmem:[#allocation2 + $0x78] sm:$0xf] %vm2223_vm12, %v2188_v18  ;;  %v10726_v18 = vrot.slane %v10684_v56, 9  ;;  %v10728_v42 = vrot.slane %v10690_v32, 9  ;;  %vm7358_vm12 = vcmask 650848  }
 0x1df   : > { %2932 = vrot.lane.b32.xlu0 %v2801_v46, %s11951_s25  ;;  %v2326_v23 = vpop.permute.xlu1 %2325  ;;  %v3134_v13 = vrot.slane %v3132_v6, 4 }
 0x1e0   : > { %2421 = vst.msk [vmem:[#allocation2 + $0x4] sm:$0xf] %vm2419_vm13, %v2326_v23  ;;  %v3141_v23 = vrot.slane %v3139_v14, 4  ;;  %v3133_v29 = vsel %vm12259_vm7, %v10726_v18, %v3132_v6  ;;  %v10699_v6 = vld [vmem:[%s12104_s6 + $0x78] sm:$0xe] }
 0x1e1   : > { %v2324_v30 = vpop.permute.xlu0 %2323  ;;  %2938 = vrot.lane.b32.xlu1 %v2835_v7, %s11951_s25  ;;  %v10689_v7 = vld [vmem:[%s12104_s6 + $0x50] sm:$0x1]  ;;  %v3136_v12 = vsel %vm12259_vm7, %v3134_v13, %v3135_v48  ;;  %v10731_v56 = vrot.slane %v10699_v6, 9  ;;  %v10706_v13 = vld [vmem:[%s12104_s6 + $0x94] sm:$0xf] }
 0x1e2   : > { %2420 = vst.msk [vmem:[#allocation2] sm:$0xf] %vm2419_vm13, %v2324_v30  ;;  %v10727_v30 = vrot.slane %v10687_v55, 9 }
 0x1e3   : > { %2936 = vrot.lane.b32.xlu0 %v2825_v25, %s11951_s25  ;;  %v2330_v33 = vpop.permute.xlu1 %2329  ;;  %v3142_v25 = vrot.slane %v10689_v7, 5  ;;  %v3181_v7 = vrot.slane %v10706_v13, 5 }
 0x1e4   : > { %2423 = vst.msk [vmem:[#allocation2 + $0xc] sm:$0xf] %vm2419_vm13, %v2330_v33 }
 0x1e5   : > { %v2328_v40 = vpop.permute.xlu0 %2327  ;;  %2942 = vrot.lane.b32.xlu1 %v2859_v2, %s11951_s25  ;;  %v10692_v2 = vld [vmem:[%s12104_s6 + $0x5c] sm:$0x1]  ;;  %v3143_v33 = vsel %vm12259_vm7, %v3141_v23, %v3142_v25  ;;  %v10709_v23 = vld [vmem:[%s12104_s6 + $0xa0] sm:$0xf] }
 0x1e6   : > { %2422 = vst.msk [vmem:[#allocation2 + $0x8] sm:$0xf] %vm2419_vm13, %v2328_v40  ;;  %v3149_v37 = vrot.slane %v10692_v2, 5  ;;  %v3140_v40 = vsel %vm12259_vm7, %v10727_v30, %v3139_v14  ;;  %v10702_v14 = vld [vmem:[%s12104_s6 + $0x84] sm:$0xe]  ;;  %v3188_v2 = vrot.slane %v10709_v23, 5 }
 0x1e7   : > { %2940 = vrot.lane.b32.xlu0 %v2849_v34, %s11951_s25  ;;  %v2334_v47 = vpop.permute.xlu1 %2333  ;;  %v3148_v34 = vrot.slane %v3146_v9, 4  ;;  %v10732_v55 = vrot.slane %v10702_v14, 9 }
 0x1e8   : > { %2425 = vst.msk [vmem:[#allocation2 + $0x14] sm:$0xf] %vm2419_vm13, %v2334_v47 }
 0x1e9   : > { %v2332_v26 = vpop.permute.xlu0 %2331  ;;  %2946 = vrot.lane.b32.xlu1 %v2883_v43, %s11951_s25  ;;  %v10695_v43 = vld [vmem:[%s12104_s6 + $0x68] sm:$0x1]  ;;  %v3150_v47 = vsel %vm12259_vm7, %v3148_v34, %v3149_v37  ;;  %v10712_v34 = vld [vmem:[%s12104_s6 + $0xac] sm:$0xf] }
 0x1ea   : > { %2424 = vst.msk [vmem:[#allocation2 + $0x10] sm:$0xf] %vm2419_vm13, %v2332_v26  ;;  %v3156_v50 = vrot.slane %v10695_v43, 5  ;;  %v3147_v26 = vsel %vm12259_vm7, %v10728_v42, %v3146_v9  ;;  %v10705_v9 = vld [vmem:[%s12104_s6 + $0x90] sm:$0xe]  ;;  %v3195_v43 = vrot.slane %v10712_v34, 5 }
 0x1eb   : > { %2944 = vrot.lane.b32.xlu0 %v2873_v49, %s11951_s25  ;;  %v2338_v59 = vpop.permute.xlu1 %2337  ;;  %v3155_v49 = vrot.slane %v3153_v38, 4  ;;  %v10733_v32 = vrot.slane %v10705_v9, 9  ;;  %s11964_s25 = smov 80  }
 0x1ec   : > { %2427 = vst.msk [vmem:[#allocation2 + $0x1c] sm:$0xf] %vm2419_vm13, %v2338_v59 }
 0x1ed   : > { %v2336_v0 = vpop.permute.xlu0 %2335  ;;  %3223 = vrot.lane.b32.xlu1 %v3115_v53, %s11952_s26  ;;  %v10698_v53 = vld [vmem:[%s12104_s6 + $0x74] sm:$0x1]  ;;  %v3157_v59 = vsel %vm12259_vm7, %v3155_v49, %v3156_v50  ;;  %v10715_v49 = vld [vmem:[%s12104_s6 + $0xb8] sm:$0xf] }
 0x1ee   : > { %2426 = vst.msk [vmem:[#allocation2 + $0x18] sm:$0xf] %vm2419_vm13, %v2336_v0  ;;  %v3163_v45 = vrot.slane %v10698_v53, 5  ;;  %v3154_v0 = vsel %vm12259_vm7, %v10729_v35, %v3153_v38  ;;  %v10708_v38 = vld [vmem:[%s12104_s6 + $0x9c] sm:$0xe]  ;;  %v3202_v53 = vrot.slane %v10715_v49, 5 }
 0x1ef   : > { %3221 = vrot.lane.b32.xlu0 %v3112_v19, %s11952_s26  ;;  %v2342_v46 = vpop.permute.xlu1 %2341  ;;  %v3162_v19 = vrot.slane %v3160_v31, 4  ;;  %v10734_v24 = vrot.slane %v10708_v38, 9  ;;  %v10748_v49 = vld [vmem:[%s12104_s6 + $0x10c] sm:$0xf] }
 0x1f0   : > { %2429 = vst.msk [vmem:[#allocation2 + $0x24] sm:$0xf] %vm2419_vm13, %v2342_v46 }
 0x1f1   : > { %v2340_v11 = vpop.permute.xlu0 %2339  ;;  %3227 = vrot.lane.b32.xlu1 %v3122_v3, %s11952_s26  ;;  %v10701_v3 = vld [vmem:[%s12104_s6 + $0x80] sm:$0x1]  ;;  %v3164_v46 = vsel %vm12259_vm7, %v3162_v19, %v3163_v45  ;;  %v10718_v19 = vld [vmem:[%s12104_s6 + $0xc4] sm:$0xf] }
 0x1f2   : > { %2428 = vst.msk [vmem:[#allocation2 + $0x20] sm:$0xf] %vm2419_vm13, %v2340_v11  ;;  %v3170_v36 = vrot.slane %v10701_v3, 5  ;;  %v3161_v11 = vsel %vm12259_vm7, %v10730_v1, %v3160_v31  ;;  %v10711_v31 = vld [vmem:[%s12104_s6 + $0xa8] sm:$0xe]  ;;  %v3209_v3 = vrot.slane %v10718_v19, 5 }
 0x1f3   : > { %3225 = vrot.lane.b32.xlu0 %v3119_v52, %s11952_s26  ;;  %v2346_v15 = vpop.permute.xlu1 %2345  ;;  %v3169_v52 = vrot.slane %v3167_v61, 4  ;;  %v10735_v58 = vrot.slane %v10711_v31, 9  ;;  %v10747_v31 = vld [vmem:[%s12104_s6 + $0x108] sm:$0xf] }
 0x1f4   : > { %2431 = vst.msk [vmem:[#allocation2 + $0x2c] sm:$0xf] %vm2419_vm13, %v2346_v15 }
 0x1f5   : > { %v2344_v21 = vpop.permute.xlu0 %2343  ;;  %3231 = vrot.lane.b32.xlu1 %v3129_v60, %s11952_s26  ;;  %v10704_v60 = vld [vmem:[%s12104_s6 + $0x8c] sm:$0x1]  ;;  %v3171_v15 = vsel %vm12259_vm7, %v3169_v52, %v3170_v36  ;;  %v10721_v52 = vld [vmem:[%s12104_s6 + $0xd0] sm:$0xf] }
 0x1f6   : > { %2430 = vst.msk [vmem:[#allocation2 + $0x28] sm:$0xf] %vm2419_vm13, %v2344_v21  ;;  %v3177_v18 = vrot.slane %v10704_v60, 5  ;;  %v3168_v21 = vsel %vm12259_vm7, %v10731_v56, %v3167_v61  ;;  %v10714_v61 = vld [vmem:[%s12104_s6 + $0xb4] sm:$0xe]  ;;  %v3216_v60 = vrot.slane %v10721_v52, 5 }
 0x1f7   : > { %3229 = vrot.lane.b32.xlu0 %v3126_v16, %s11952_s26  ;;  %v2350_v27 = vpop.permute.xlu1 %2349  ;;  %v3176_v16 = vrot.slane %v3174_v8, 4  ;;  %v10736_v6 = vrot.slane %v10714_v61, 9  ;;  %v10757_v52 = vld [vmem:[%s12104_s6 + $0x144] sm:$0xf] }
 0x1f8   : > { %2433 = vst.msk [vmem:[#allocation2 + $0x34] sm:$0xf] %vm2419_vm13, %v2350_v27 }
 0x1f9   : > { %v2348_v17 = vpop.permute.xlu0 %2347  ;;  %3235 = vrot.lane.b32.xlu1 %v3136_v12, %s11952_s26  ;;  %v10707_v12 = vld [vmem:[%s12104_s6 + $0x98] sm:$0x1]  ;;  %v3178_v27 = vsel %vm12259_vm7, %v3176_v16, %v3177_v18  ;;  %v10720_v18 = vld [vmem:[%s12104_s6 + $0xcc] sm:$0xe] }
 0x1fa   : > { %2432 = vst.msk [vmem:[#allocation2 + $0x30] sm:$0xf] %vm2419_vm13, %v2348_v17  ;;  %v3184_v30 = vrot.slane %v10707_v12, 5  ;;  %v3175_v17 = vsel %vm12259_vm7, %v10732_v55, %v3174_v8  ;;  %v10717_v8 = vld [vmem:[%s12104_s6 + $0xc0] sm:$0xe]  ;;  %v10738_v23 = vrot.slane %v10720_v18, 9 }
 0x1fb   : > { %3233 = vrot.lane.b32.xlu0 %v3133_v29, %s11952_s26  ;;  %v2354_v39 = vpop.permute.xlu1 %2353  ;;  %v3183_v29 = vrot.slane %v3181_v7, 4  ;;  %v10737_v14 = vrot.slane %v10717_v8, 9  ;;  %v10760_v8 = vld [vmem:[%s12104_s6 + $0x154] sm:$0xf]  ;;  %v10774_v18 = vld [vmem:[%s12104_s6 + $0xe4] sm:$0xf] }
 0x1fc   : > { %2435 = vst.msk [vmem:[#allocation2 + $0x3c] sm:$0xf] %vm2419_vm13, %v2354_v39 }
 0x1fd   : > { %v2352_v22 = vpop.permute.xlu0 %2351  ;;  %3239 = vrot.lane.b32.xlu1 %v3143_v33, %s11952_s26  ;;  %v10710_v33 = vld [vmem:[%s12104_s6 + $0xa4] sm:$0x1]  ;;  %v3185_v39 = vsel %vm12259_vm7, %v3183_v29, %v3184_v30  ;;  %v3210_v12 = vsel %vm12259_vm7, %v10737_v14, %v3209_v3  ;;  %v3217_v29 = vsel %vm12259_vm7, %v10738_v23, %v3216_v60  ;;  %v10775_v14 = vld [vmem:[%s12104_s6 + $0xe8] sm:$0xf] }
 0x1fe   : > { %2434 = vst.msk [vmem:[#allocation2 + $0x38] sm:$0xf] %vm2419_vm13, %v2352_v22  ;;  %v3191_v42 = vrot.slane %v10710_v33, 5  ;;  %v3182_v22 = vsel %vm12259_vm7, %v10733_v32, %v3181_v7  ;;  %v10742_v33 = vld [vmem:[%s12104_s6 + $0xe8] sm:$0xf]  ;;  %v3629_v23 = vshll.u32 %v10775_v14, 16 }
 0x1ff   : > { %3237 = vrot.lane.b32.xlu0 %v3140_v40, %s11952_s26  ;;  %v2358_v51 = vpop.permute.xlu1 %2357  ;;  %v3190_v40 = vrot.slane %v3188_v2, 4 }
 0x200   : > { %2437 = vst.msk [vmem:[#allocation2 + $0x44] sm:$0xf] %vm2419_vm13, %v2358_v51 }
 0x201   : > { %v2356_v57 = vpop.permute.xlu0 %2355  ;;  %3243 = vrot.lane.b32.xlu1 %v3150_v47, %s11952_s26  ;;  %v10713_v47 = vld [vmem:[%s12104_s6 + $0xb0] sm:$0x1]  ;;  %v3192_v51 = vsel %vm12259_vm7, %v3190_v40, %v3191_v42 }
 0x202   : > { %2436 = vst.msk [vmem:[#allocation2 + $0x40] sm:$0xf] %vm2419_vm13, %v2356_v57  ;;  %v3198_v35 = vrot.slane %v10713_v47, 5  ;;  %v3189_v57 = vsel %vm12259_vm7, %v10734_v24, %v3188_v2  ;;  %v10740_v2 = vld [vmem:[%s12104_s6 + $0xdc] sm:$0xf] }
 0x203   : > { %3241 = vrot.lane.b32.xlu0 %v3147_v26, %s11952_s26  ;;  %v2362_v62 = vpop.permute.xlu1 %2361  ;;  %v3197_v26 = vrot.slane %v3195_v43, 4  ;;  %v10743_v42 = vld [vmem:[%s12104_s6 + $0xf0] sm:$0xf]  ;;  %v10745_v24 = vld [vmem:[%s12104_s6 + $0xfc] sm:$0xf] }
 0x204   : > { %2439 = vst.msk [vmem:[#allocation2 + $0x4c] sm:$0xf] %vm2419_vm13, %v2362_v62 }
 0x205   : > { %v2360_v5 = vpop.permute.xlu0 %2359  ;;  %3247 = vrot.lane.b32.xlu1 %v3157_v59, %s11952_s26  ;;  %v10716_v59 = vld [vmem:[%s12104_s6 + $0xbc] sm:$0x1]  ;;  %v3199_v62 = vsel %vm12259_vm7, %v3197_v26, %v3198_v35  ;;  %v10750_v26 = vld [vmem:[%s12104_s6 + $0x118] sm:$0xf] }
 0x206   : > { %2438 = vst.msk [vmem:[#allocation2 + $0x48] sm:$0xf] %vm2419_vm13, %v2360_v5  ;;  %v3205_v1 = vrot.slane %v10716_v59, 5  ;;  %v3196_v5 = vsel %vm12259_vm7, %v10735_v58, %v3195_v43  ;;  %v10751_v59 = vld [vmem:[%s12104_s6 + $0x120] sm:$0xf] }
 0x207   : > { %3245 = vrot.lane.b32.xlu0 %v3154_v0, %s11952_s26  ;;  %v2366_v10 = vpop.permute.xlu1 %2365  ;;  %v3204_v0 = vrot.slane %v3202_v53, 4 }
 0x208   : > { %2441 = vst.msk [vmem:[#allocation2 + $0x54] sm:$0xf] %vm2419_vm13, %v2366_v10 }
 0x209   : > { %v2364_v48 = vpop.permute.xlu0 %2363  ;;  %3251 = vrot.lane.b32.xlu1 %v3164_v46, %s11952_s26  ;;  %v10719_v46 = vld [vmem:[%s12104_s6 + $0xc8] sm:$0x1]  ;;  %v3206_v10 = vsel %vm12259_vm7, %v3204_v0, %v3205_v1  ;;  %v10756_v1 = vld [vmem:[%s12104_s6 + $0x13c] sm:$0xf] }
 0x20a   : > { %2440 = vst.msk [vmem:[#allocation2 + $0x50] sm:$0xf] %vm2419_vm13, %v2364_v48  ;;  %v3212_v56 = vrot.slane %v10719_v46, 5  ;;  %v3203_v48 = vsel %vm12259_vm7, %v10736_v6, %v3202_v53  ;;  %v10749_v53 = vld [vmem:[%s12104_s6 + $0x114] sm:$0xf] }
 0x20b   : > { %3249 = vrot.lane.b32.xlu0 %v3161_v11, %s11952_s26  ;;  %v2370_v20 = vpop.permute.xlu1 %2369  ;;  %v3211_v11 = vrot.slane %v3209_v3, 4  ;;  %v10758_v6 = vld [vmem:[%s12104_s6 + $0x148] sm:$0xf] }
 0x20c   : > { %2443 = vst.msk [vmem:[#allocation2 + $0x5c] sm:$0xf] %vm2419_vm13, %v2370_v20  ;;  %v3218_v20 = vrot.slane %v3216_v60, 4  ;;  %v10772_v60 = vld [vmem:[%s12104_s6 + $0xdc] sm:$0xf] }
 0x20d   : > { %v2368_v25 = vpop.permute.xlu0 %2367  ;;  %3255 = vrot.lane.b32.xlu1 %v3171_v15, %s11952_s26  ;;  %v10722_v15 = vld [vmem:[%s12104_s6 + $0xd4] sm:$0x1]  ;;  %v3213_v7 = vsel %vm12259_vm7, %v3211_v11, %v3212_v56  ;;  %v10759_v11 = vld [vmem:[%s12104_s6 + $0x150] sm:$0xf] }
 0x20e   : > { %2442 = vst.msk [vmem:[#allocation2 + $0x58] sm:$0xf] %vm2419_vm13, %v2368_v25 }
 0x20f   : > { %3253 = vrot.lane.b32.xlu0 %v3168_v21, %s11952_s26  ;;  %v2374_v41 = vpop.permute.xlu1 %2373  ;;  %v3219_v21 = vrot.slane %v10722_v15, 5 }
 0x210   : > { %2445 = vst.msk [vmem:[#allocation2 + $0x64] sm:$0xf] %vm2419_vm13, %v2374_v41 }
 0x211   : > { %v2372_v37 = vpop.permute.xlu0 %2371  ;;  %3259 = vrot.lane.b32.xlu1 %v3178_v27, %s11952_s26  ;;  %v3220_v9 = vsel %vm12259_vm7, %v3218_v20, %v3219_v21  ;;  %v3605_v20 = vshll.u32 %v10772_v60, 16  ;;  %v3609_v21 = vshrl.u32 %v10772_v60, 16 }
 0x212   : > { %2444 = vst.msk [vmem:[#allocation2 + $0x60] sm:$0xf] %vm2419_vm13, %v2372_v37  ;;  %v10741_v37 = vld [vmem:[%s12104_s6 + $0xe4] sm:$0xf] }
 0x213   : > { %3257 = vrot.lane.b32.xlu0 %v3175_v17, %s11952_s26  ;;  %v2378_v44 = vpop.permute.xlu1 %2377  ;;  %v10739_v17 = vld [vmem:[%s12104_s6 + $0xd8] sm:$0xf] }
 0x214   : > { %2447 = vst.msk [vmem:[#allocation2 + $0x6c] sm:$0xf] %vm2419_vm13, %v2378_v44  ;;  %v10746_v44 = vld [vmem:[%s12104_s6 + $0x100] sm:$0xf] }
 0x215   : > { %v2376_v50 = vpop.permute.xlu0 %2375  ;;  %3263 = vrot.lane.b32.xlu1 %v3185_v39, %s11952_s26  ;;  %v10744_v39 = vld [vmem:[%s12104_s6 + $0xf4] sm:$0xf] }
 0x216   : > { %2446 = vst.msk [vmem:[#allocation2 + $0x68] sm:$0xf] %vm2419_vm13, %v2376_v50 }
 0x217   : > { %3261 = vrot.lane.b32.xlu0 %v3182_v22, %s11952_s26  ;;  %v2382_v54 = vpop.permute.xlu1 %2381 }
 0x218   : > { %2449 = vst.msk [vmem:[#allocation2 + $0x74] sm:$0xf] %vm2419_vm13, %v2382_v54 }
 0x219   : > { %v2380_v45 = vpop.permute.xlu0 %2379  ;;  %3267 = vrot.lane.b32.xlu1 %v3192_v51, %s11952_s26 }
 0x21a   : > { %2448 = vst.msk [vmem:[#allocation2 + $0x70] sm:$0xf] %vm2419_vm13, %v2380_v45  ;;  %v10754_v45 = vld [vmem:[%s12104_s6 + $0x130] sm:$0xf] }
 0x21b   : > { %3265 = vrot.lane.b32.xlu0 %v3189_v57, %s11952_s26  ;;  %v2386_v4 = vpop.permute.xlu1 %2385  ;;  %v10752_v57 = vld [vmem:[%s12104_s6 + $0x124] sm:$0xf] }
 0x21c   : > { %2451 = vst.msk [vmem:[#allocation2 + $0x7c] sm:$0xf] %vm2419_vm13, %v2386_v4  ;;  %v10755_v4 = vld [vmem:[%s12104_s6 + $0x138] sm:$0xf] }
 0x21d   : > { %v2384_v36 = vpop.permute.xlu0 %2383  ;;  %3271 = vrot.lane.b32.xlu1 %v3199_v62, %s11952_s26  ;;  %v10753_v62 = vld [vmem:[%s12104_s6 + $0x12c] sm:$0xf] }
 0x21e   : > { %2450 = vst.msk [vmem:[#allocation2 + $0x78] sm:$0xf] %vm2419_vm13, %v2384_v36  ;;  %vm7695_vm13 = vcmask 683648  }
 0x21f   : > { %3269 = vrot.lane.b32.xlu0 %v3196_v5, %s11952_s26  ;;  %v2887_v13 = vpop.permute.xlu1 %2886 }
 0x220   : > { %2982 = vst.msk [vmem:[#allocation2 + $0x4] sm:$0xf] %vm2980_vm14, %v2887_v13  ;;  %v10771_v13 = vld [vmem:[%s12104_s6 + $0xd8] sm:$0xf] }
 0x221   : > { %v2885_v16 = vpop.permute.xlu0 %2884  ;;  %3275 = vrot.lane.b32.xlu1 %v3206_v10, %s11952_s26 }
 0x222   : > { %2981 = vst.msk [vmem:[#allocation2] sm:$0xf] %vm2980_vm14, %v2885_v16  ;;  %v10761_v16 = vld [vmem:[%s12104_s6 + $0x15c] sm:$0xf] }
 0x223   : > { %3273 = vrot.lane.b32.xlu0 %v3203_v48, %s11952_s26  ;;  %v2891_v55 = vpop.permute.xlu1 %2890  ;;  %v10762_v48 = vld [vmem:[%s12104_s6 + $0x160] sm:$0xf] }
 0x224   : > { %2984 = vst.msk [vmem:[#allocation2 + $0xc] sm:$0xf] %vm2980_vm14, %v2891_v55  ;;  %v3596_v55 = vshrl.u32 %v10771_v13, 16 }
 0x225   : > { %v2889_v25 = vpop.permute.xlu0 %2888  ;;  %3279 = vrot.lane.b32.xlu1 %v3213_v7, %s11952_s26 }
 0x226   : > { %2983 = vst.msk [vmem:[#allocation2 + $0x8] sm:$0xf] %vm2980_vm14, %v2889_v25  ;;  %v3633_v25 = vshrl.u32 %v10775_v14, 16  ;;  %v10784_v14 = vld [vmem:[%s12104_s6 + $0x10c] sm:$0xf] }
 0x227   : > { %3277 = vrot.lane.b32.xlu0 %v3210_v12, %s11952_s26  ;;  %v2895_v27 = vpop.permute.xlu1 %2894  ;;  %v3599_v12 = vshll.u32 %v10771_v13, 16 }
 0x228   : > { %2986 = vst.msk [vmem:[#allocation2 + $0x14] sm:$0xf] %vm2980_vm14, %v2895_v27  ;;  %v3620_v27 = vshrl.u32 %v10774_v18, 16 }
 0x229   : > { %v2893_v30 = vpop.permute.xlu0 %2892  ;;  %3283 = vrot.lane.b32.xlu1 %v3220_v9, %s11952_s26  ;;  %v10764_v9 = vld [vmem:[%s12104_s6 + $0x16c] sm:$0xf] }
 0x22a   : > { %2985 = vst.msk [vmem:[#allocation2 + $0x10] sm:$0xf] %vm2980_vm14, %v2893_v30 }
 0x22b   : > { %3281 = vrot.lane.b32.xlu0 %v3217_v29, %s11952_s26  ;;  %v2899_v41 = vpop.permute.xlu1 %2898  ;;  %v3623_v29 = vshll.u32 %v10774_v18, 16  ;;  %s11965_s26 = smov 84  }
 0x22c   : > { %2988 = vst.msk [vmem:[#allocation2 + $0x1c] sm:$0xf] %vm2980_vm14, %v2899_v41  ;;  %v10778_v41 = vld [vmem:[%s12104_s6 + $0xf4] sm:$0xf] }
 0x22d   : > { %v2897_v32 = vpop.permute.xlu0 %2896  ;;  %3420 = vrot.lane.b32.xlu1 %v10740_v2, %s11953_s28  ;;  %v10763_v2 = vld [vmem:[%s12104_s6 + $0x168] sm:$0xf] }
 0x22e   : > { %2987 = vst.msk [vmem:[#allocation2 + $0x18] sm:$0xf] %vm2980_vm14, %v2897_v32  ;;  %v10766_v32 = vld [vmem:[%s12104_s6 + $0x178] sm:$0xf] }
 0x22f   : > { %3418 = vrot.lane.b32.xlu0 %v10739_v17, %s11953_s28  ;;  %v2903_v34 = vpop.permute.xlu1 %2902 }
 0x230   : > { %2990 = vst.msk [vmem:[#allocation2 + $0x24] sm:$0xf] %vm2980_vm14, %v2903_v34  ;;  %v3611_v34 = vrot.slane %v3609_v21, 4 }
 0x231   : > { %v2901_v38 = vpop.permute.xlu0 %2900  ;;  %3424 = vrot.lane.b32.xlu1 %v10742_v33, %s11953_s28  ;;  %v13625_v33 = vrot.slane %v3605_v20, 5 }
 0x232   : > { %2989 = vst.msk [vmem:[#allocation2 + $0x20] sm:$0xf] %vm2980_vm14, %v2901_v38  ;;  %v3601_v38 = vrot.slane %v3599_v12, 5  ;;  %v10769_v12 = vld [vmem:[%s12104_s6 + $0x18c] sm:$0xf] }
 0x233   : > { %3422 = vrot.lane.b32.xlu0 %v10741_v37, %s11953_s28  ;;  %v2907_v40 = vpop.permute.xlu1 %2906  ;;  %v3598_v37 = vrot.slane %v3596_v55, 4 }
 0x234   : > { %2992 = vst.msk [vmem:[#allocation2 + $0x2c] sm:$0xf] %vm2980_vm14, %v2907_v40  ;;  %v10776_v40 = vld [vmem:[%s12104_s6 + $0xec] sm:$0x1] }
 0x235   : > { %v2905_v43 = vpop.permute.xlu0 %2904  ;;  %3428 = vrot.lane.b32.xlu1 %v10744_v39, %s11953_s28  ;;  %v10773_v39 = vld [vmem:[%s12104_s6 + $0xe0] sm:$0x1] }
 0x236   : > { %2991 = vst.msk [vmem:[#allocation2 + $0x28] sm:$0xf] %vm2980_vm14, %v2905_v43  ;;  %v3635_v43 = vrot.slane %v3633_v25, 4 }
 0x237   : > { %3426 = vrot.lane.b32.xlu0 %v10743_v42, %s11953_s28  ;;  %v2911_v22 = vpop.permute.xlu1 %2910  ;;  %v13631_v42 = vrot.slane %v3629_v23, 5 }
 0x238   : > { %2994 = vst.msk [vmem:[#allocation2 + $0x34] sm:$0xf] %vm2980_vm14, %v2911_v22  ;;  %v3625_v22 = vrot.slane %v3623_v29, 5 }
 0x239   : > { %v2909_v47 = vpop.permute.xlu0 %2908  ;;  %3432 = vrot.lane.b32.xlu1 %v10746_v44, %s11953_s28  ;;  %v3622_v44 = vrot.slane %v3620_v27, 4 }
 0x23a   : > { %2993 = vst.msk [vmem:[#allocation2 + $0x30] sm:$0xf] %vm2980_vm14, %v2909_v47  ;;  %v3657_v47 = vshrl.u32 %v10778_v41, 16 }
 0x23b   : > { %3430 = vrot.lane.b32.xlu0 %v10745_v24, %s11953_s28  ;;  %v2915_v50 = vpop.permute.xlu1 %2914  ;;  %v3653_v24 = vshll.u32 %v10778_v41, 16  ;;  %v3705_v41 = vshrl.u32 %v10784_v14, 16 }
 0x23c   : > { %2996 = vst.msk [vmem:[#allocation2 + $0x3c] sm:$0xf] %vm2980_vm14, %v2915_v50 }
 0x23d   : > { %v2913_v51 = vpop.permute.xlu0 %2912  ;;  %3436 = vrot.lane.b32.xlu1 %v10748_v49, %s11953_s28  ;;  %v10777_v49 = vld [vmem:[%s12104_s6 + $0xf0] sm:$0xf] }
 0x23e   : > { %2995 = vst.msk [vmem:[#allocation2 + $0x38] sm:$0xf] %vm2980_vm14, %v2913_v51 }
 0x23f   : > { %3434 = vrot.lane.b32.xlu0 %v10747_v31, %s11953_s28  ;;  %v2919_v35 = vpop.permute.xlu1 %2918  ;;  %v10765_v31 = vld [vmem:[%s12104_s6 + $0x174] sm:$0xf] }
 0x240   : > { %2998 = vst.msk [vmem:[#allocation2 + $0x44] sm:$0xf] %vm2980_vm14, %v2919_v35  ;;  %v3615_v35 = vshll.u32 %v10773_v39, 16 }
 0x241   : > { %v2917_v54 = vpop.permute.xlu0 %2916  ;;  %3440 = vrot.lane.b32.xlu1 %v10750_v26, %s11953_s28  ;;  %v3612_v26 = vor.u32 %v3611_v34, %v13625_v33 }
 0x242   : > { %2997 = vst.msk [vmem:[#allocation2 + $0x40] sm:$0xf] %vm2980_vm14, %v2917_v54  ;;  %v3639_v54 = vshll.u32 %v10776_v40, 16 }
 0x243   : > { %3438 = vrot.lane.b32.xlu0 %v10749_v53, %s11953_s28  ;;  %v2923_v58 = vpop.permute.xlu1 %2922  ;;  %v3602_v53 = vor.u32 %v3601_v38, %v3598_v37  ;;  %v10787_v38 = vld [vmem:[%s12104_s6 + $0x118] sm:$0xf] }
 0x244   : > { %3000 = vst.msk [vmem:[#allocation2 + $0x4c] sm:$0xf] %vm2980_vm14, %v2923_v58  ;;  %v10780_v58 = vld [vmem:[%s12104_s6 + $0xfc] sm:$0xf]  ;;  %v13650_v60 = vrot.slane %v3639_v54, 5 }
 0x245   : > { %v2921_v19 = vpop.permute.xlu0 %2920  ;;  %3444 = vrot.lane.b32.xlu1 %v10752_v57, %s11953_s28  ;;  %v10781_v57 = vld [vmem:[%s12104_s6 + $0x100] sm:$0xf] }
 0x246   : > { %2999 = vst.msk [vmem:[#allocation2 + $0x48] sm:$0xf] %vm2980_vm14, %v2921_v19  ;;  %v3636_v19 = vor.u32 %v3635_v43, %v13631_v42 }
 0x247   : > { %3442 = vrot.lane.b32.xlu0 %v10751_v59, %s11953_s28  ;;  %v2927_v61 = vpop.permute.xlu1 %2926  ;;  %v10768_v59 = vld [vmem:[%s12104_s6 + $0x184] sm:$0xf] }
 0x248   : > { %3002 = vst.msk [vmem:[#allocation2 + $0x54] sm:$0xf] %vm2980_vm14, %v2927_v61  ;;  %v3626_v61 = vor.u32 %v3625_v22, %v3622_v44  ;;  %v13654_v13 = vrot.slane %v3636_v19, 4  ;;  %v10786_v22 = vld [vmem:[%s12104_s6 + $0x114] sm:$0xf] }
 0x249   : > { %v2925_v0 = vpop.permute.xlu0 %2924  ;;  %3448 = vrot.lane.b32.xlu1 %v10754_v45, %s11953_s28  ;;  %v3644_v45 = vshrl.u32 %v10777_v49, 16  ;;  %v3716_v19 = vshrl.u32 %v10786_v22, 16 }
 0x24a   : > { %3001 = vst.msk [vmem:[#allocation2 + $0x50] sm:$0xf] %vm2980_vm14, %v2925_v0  ;;  %v13646_v0 = vrot.slane %v3653_v24, 5  ;;  %v13660_v18 = vrot.slane %v3626_v61, 4  ;;  %v3642_v39 = vsel %vm12115_vm3, %v13654_v13, %v13650_v60  ;;  %v10793_v60 = vld [vmem:[%s12104_s6 + $0x130] sm:$0xf] }
 0x24b   : > { %3446 = vrot.lane.b32.xlu0 %v10753_v62, %s11953_s28  ;;  %v2931_v3 = vpop.permute.xlu1 %2930  ;;  %v10779_v62 = vld [vmem:[%s12104_s6 + $0xf8] sm:$0x1]  ;;  %v3646_v20 = vrot.slane %v3644_v45, 4  ;;  %v3719_v45 = vshll.u32 %v10786_v22, 16  ;;  %v10792_v13 = vld [vmem:[%s12104_s6 + $0x12c] sm:$0xf] }
 0x24c   : > { %3004 = vst.msk [vmem:[#allocation2 + $0x5c] sm:$0xf] %vm2980_vm14, %v2931_v3  ;;  %v3647_v3 = vshll.u32 %v10777_v49, 16  ;;  %v3632_v40 = vsel %vm12115_vm3, %v13660_v18, %v13631_v42  ;;  %v3707_v42 = vrot.slane %v3705_v41, 4  ;;  %v10788_v18 = vld [vmem:[%s12104_s6 + $0x11c] sm:$0x1] }
 0x24d   : > { %v2929_v5 = vpop.permute.xlu0 %2928  ;;  %3452 = vrot.lane.b32.xlu1 %v10756_v1, %s11953_s28  ;;  %v3659_v1 = vrot.slane %v3657_v47, 4 }
 0x24e   : > { %3003 = vst.msk [vmem:[#allocation2 + $0x58] sm:$0xf] %vm2980_vm14, %v2929_v5  ;;  %v10767_v5 = vld [vmem:[%s12104_s6 + $0x180] sm:$0xf]  ;;  %v3649_v21 = vrot.slane %v3647_v3, 5 }
 0x24f   : > { %3450 = vrot.lane.b32.xlu0 %v10755_v4, %s11953_s28  ;;  %v2935_v46 = vpop.permute.xlu1 %2934 }
 0x250   : > { %3006 = vst.msk [vmem:[#allocation2 + $0x64] sm:$0xf] %vm2980_vm14, %v2935_v46  ;;  %v3681_v46 = vshrl.u32 %v10781_v57, 16  ;;  %v3650_v44 = vor.u32 %v3649_v21, %v3646_v20 }
 0x251   : > { %v2933_v36 = vpop.permute.xlu0 %2932  ;;  %3456 = vrot.lane.b32.xlu1 %v10758_v6, %s11953_s28  ;;  %v3677_v6 = vshll.u32 %v10781_v57, 16  ;;  %v3725_v57 = vshll.u32 %v10787_v38, 16 }
 0x252   : > { %3005 = vst.msk [vmem:[#allocation2 + $0x60] sm:$0xf] %vm2980_vm14, %v2933_v36  ;;  %v3671_v36 = vshll.u32 %v10780_v58, 16  ;;  %v3683_v25 = vrot.slane %v3681_v46, 4 }
 0x253   : > { %3454 = vrot.lane.b32.xlu0 %v10757_v52, %s11953_s28  ;;  %v2939_v10 = vpop.permute.xlu1 %2938  ;;  %v3668_v52 = vshrl.u32 %v10780_v58, 16  ;;  %v13664_v23 = vrot.slane %v3677_v6, 5 }
 0x254   : > { %3008 = vst.msk [vmem:[#allocation2 + $0x6c] sm:$0xf] %vm2980_vm14, %v2939_v10  ;;  %v3613_v10 = vrot.slane %v3612_v26, 4  ;;  %v3673_v27 = vrot.slane %v3671_v36, 5 }
 0x255   : > { %v2937_v56 = vpop.permute.xlu0 %2936  ;;  %3460 = vrot.lane.b32.xlu1 %v10760_v8, %s11953_s28  ;;  %v3684_v47 = vor.u32 %v3683_v25, %v13664_v23 }
 0x256   : > { %3007 = vst.msk [vmem:[#allocation2 + $0x68] sm:$0xf] %vm2980_vm14, %v2937_v56  ;;  %v3603_v56 = vrot.slane %v3602_v53, 4 }
 0x257   : > { %3458 = vrot.lane.b32.xlu0 %v10759_v11, %s11953_s28  ;;  %v2943_v15 = vpop.permute.xlu1 %2942  ;;  %v3617_v11 = vrot.slane %v3615_v35, 5  ;;  %v10785_v35 = vld [vmem:[%s12104_s6 + $0x110] sm:$0x1]  ;;  %v3685_v6 = vrot.slane %v3684_v47, 4 }
 0x258   : > { %3010 = vst.msk [vmem:[#allocation2 + $0x74] sm:$0xf] %vm2980_vm14, %v2943_v15  ;;  %v10783_v15 = vld [vmem:[%s12104_s6 + $0x108] sm:$0xf]  ;;  %v3608_v34 = vsel %vm12115_vm3, %v3603_v56, %v13625_v33  ;;  %v13706_v56 = vrot.slane %v3725_v57, 5 }
 0x259   : > { %v2941_v7 = vpop.permute.xlu0 %2940  ;;  %3464 = vrot.lane.b32.xlu1 %v10762_v48, %s11953_s28  ;;  %v3663_v48 = vshll.u32 %v10779_v62, 16  ;;  %v3695_v37 = vshll.u32 %v10783_v15, 16 }
 0x25a   : > { %3009 = vst.msk [vmem:[#allocation2 + $0x70] sm:$0xf] %vm2980_vm14, %v2941_v7  ;;  %v3660_v7 = vor.u32 %v3659_v1, %v13646_v0 }
 0x25b   : > { %3462 = vrot.lane.b32.xlu0 %v10761_v16, %s11953_s28  ;;  %v2947_v30 = vpop.permute.xlu1 %2946  ;;  %v10770_v16 = vld [vmem:[%s12104_s6 + $0x190] sm:$0xf]  ;;  %v13685_v43 = vrot.slane %v3663_v48, 5  ;;  %v3697_v58 = vrot.slane %v3695_v37, 5  ;;  %v10796_v37 = vld [vmem:[%s12104_s6 + $0x13c] sm:$0xf] }
 0x25c   : > { %3012 = vst.msk [vmem:[#allocation2 + $0x7c] sm:$0xf] %vm2980_vm14, %v2947_v30  ;;  %v10782_v30 = vld [vmem:[%s12104_s6 + $0x104] sm:$0x1]  ;;  %v13688_v24 = vrot.slane %v3660_v7, 4 }
 0x25d   : > { %v2945_v17 = vpop.permute.xlu0 %2944  ;;  %3468 = vrot.lane.b32.xlu1 %v10764_v9, %s11953_s28  ;;  %v3670_v9 = vrot.slane %v3668_v52, 4  ;;  %v3687_v49 = vshll.u32 %v10782_v30, 16  ;;  %v3711_v52 = vshll.u32 %v10785_v35, 16  ;;  %v3764_v30 = vshrl.u32 %v10792_v13, 16 }
 0x25e   : > { %3011 = vst.msk [vmem:[#allocation2 + $0x78] sm:$0xf] %vm2980_vm14, %v2945_v17  ;;  %v3692_v17 = vshrl.u32 %v10783_v15, 16  ;;  %v3718_v15 = vrot.slane %v3716_v19, 4  ;;  %vm7891_vm14 = vcmask 716448  }
 0x25f   : > { %3466 = vrot.lane.b32.xlu0 %v10763_v2, %s11953_s28  ;;  %v3224_v50 = vpop.permute.xlu1 %3223  ;;  %v3701_v2 = vshll.u32 %v10784_v14, 16  ;;  %v3689_v46 = vrot.slane %v3687_v49, 5 }
 0x260   : > { %3319 = vst.msk [vmem:[#allocation2 + $0x4] sm:$0xf] %vm3317_vm15, %v3224_v50  ;;  %v3674_v50 = vor.u32 %v3673_v27, %v3670_v9  ;;  %v3694_v54 = vrot.slane %v3692_v17, 4  ;;  %v10791_v9 = vld [vmem:[%s12104_s6 + $0x128] sm:$0x1]  ;;  %v3773_v27 = vshll.u32 %v10793_v60, 16 }
 0x261   : > { %v3222_v51 = vpop.permute.xlu0 %3221  ;;  %3472 = vrot.lane.b32.xlu1 %v10766_v32, %s11953_s28  ;;  %v3618_v32 = vsel %vm12115_vm3, %v3613_v10, %v3617_v11  ;;  %v13695_v53 = vrot.slane %v3701_v2, 5  ;;  %v3690_v41 = vsel %vm12115_vm3, %v3685_v6, %v3689_v46 }
 0x262   : > { %3318 = vst.msk [vmem:[#allocation2] sm:$0xf] %vm3317_vm15, %v3222_v51  ;;  %v10789_v51 = vld [vmem:[%s12104_s6 + $0x120] sm:$0xf]  ;;  %v3675_v10 = vrot.slane %v3674_v50, 4  ;;  %v3698_v48 = vor.u32 %v3697_v58, %v3694_v54  ;;  %v13733_v47 = vrot.slane %v3773_v27, 5 }
 0x263   : > { %3470 = vrot.lane.b32.xlu0 %v10765_v31, %s11953_s28  ;;  %v3228_v4 = vpop.permute.xlu1 %3227  ;;  %v10790_v31 = vld [vmem:[%s12104_s6 + $0x124] sm:$0xf]  ;;  %v3740_v1 = vshrl.u32 %v10789_v51, 16  ;;  %v3743_v3 = vshll.u32 %v10789_v51, 16  ;;  %v3708_v11 = vor.u32 %v3707_v42, %v13695_v53  ;;  %v3766_v50 = vrot.slane %v3764_v30, 4 }
 0x264   : > { %3321 = vst.msk [vmem:[#allocation2 + $0xc] sm:$0xf] %vm3317_vm15, %v3228_v4  ;;  %v3749_v61 = vshll.u32 %v10790_v31, 16  ;;  %v3753_v62 = vshrl.u32 %v10790_v31, 16  ;;  %v3680_v17 = vsel %vm12115_vm3, %v3675_v10, %v13664_v23  ;;  %v3759_v23 = vshll.u32 %v10791_v9, 16 }
 0x265   : > { %v3226_v8 = vpop.permute.xlu0 %3225  ;;  %3476 = vrot.lane.b32.xlu1 %v10768_v59, %s11953_s28  ;;  %v3729_v59 = vshrl.u32 %v10787_v38, 16  ;;  %v3742_v21 = vrot.slane %v3740_v1, 4  ;;  %v3797_v31 = vshll.u32 %v10796_v37, 16  ;;  %v3801_v42 = vshrl.u32 %v10796_v37, 16  ;;  %v10800_v37 = vld [vmem:[%s12104_s6 + $0x14c] sm:$0x1] }
 0x266   : > { %3320 = vst.msk [vmem:[#allocation2 + $0x8] sm:$0xf] %vm3317_vm15, %v3226_v8  ;;  %v3666_v8 = vsel %vm12115_vm3, %v13688_v24, %v13685_v43  ;;  %v13714_v7 = vrot.slane %v3749_v61, 5  ;;  %v3755_v20 = vrot.slane %v3753_v62, 4  ;;  %v10795_v43 = vld [vmem:[%s12104_s6 + $0x138] sm:$0xf] }
 0x267   : > { %3474 = vrot.lane.b32.xlu0 %v10767_v5, %s11953_s28  ;;  %v3232_v55 = vpop.permute.xlu1 %3231  ;;  %v3651_v5 = vrot.slane %v3650_v44, 4  ;;  %v3731_v14 = vrot.slane %v3729_v59, 4  ;;  %v3699_v44 = vrot.slane %v3698_v48, 4  ;;  %v3788_v54 = vshrl.u32 %v10795_v43, 16 }
 0x268   : > { %3323 = vst.msk [vmem:[#allocation2 + $0x14] sm:$0xf] %vm3317_vm15, %v3232_v55  ;;  %v3745_v55 = vrot.slane %v3743_v3, 5  ;;  %v3756_v22 = vor.u32 %v3755_v20, %v13714_v7  ;;  %v3791_v57 = vshll.u32 %v10795_v43, 16  ;;  %v13747_v1 = vrot.slane %v3759_v23, 5 }
 0x269   : > { %v3230_v29 = vpop.permute.xlu0 %3229  ;;  %3480 = vrot.lane.b32.xlu1 %v10770_v16, %s11953_s28  ;;  %v3721_v16 = vrot.slane %v3719_v45, 5  ;;  %v3656_v25 = vsel %vm12115_vm3, %v3651_v5, %v13646_v0  ;;  %v3709_v0 = vrot.slane %v3708_v11, 4  ;;  %v3732_v38 = vor.u32 %v3731_v14, %v13706_v56  ;;  %v10799_v3 = vld [vmem:[%s12104_s6 + $0x148] sm:$0xf] }
 0x26a   : > { %3322 = vst.msk [vmem:[#allocation2 + $0x10] sm:$0xf] %vm3317_vm15, %v3230_v29  ;;  %v3777_v29 = vshrl.u32 %v10793_v60, 16  ;;  %v3704_v61 = vsel %vm12115_vm3, %v3699_v44, %v13695_v53  ;;  %v13745_v62 = vrot.slane %v3756_v22, 4  ;;  %v3803_v10 = vrot.slane %v3801_v42, 4 }
 0x26b   : > { %3478 = vrot.lane.b32.xlu0 %v10769_v12, %s11953_s28  ;;  %v3236_v33 = vpop.permute.xlu1 %3235  ;;  %v3733_v58 = vrot.slane %v3732_v38, 4  ;;  %v3790_v11 = vrot.slane %v3788_v54, 4  ;;  %v3793_v60 = vrot.slane %v3791_v57, 5  ;;  %v3821_v48 = vshll.u32 %v10799_v3, 16  ;;  %s11966_s28 = smov 88  }
 0x26c   : > { %3325 = vst.msk [vmem:[#allocation2 + $0x1c] sm:$0xf] %vm3317_vm15, %v3236_v33  ;;  %v3746_v33 = vor.u32 %v3745_v55, %v3742_v21  ;;  %v3779_v49 = vrot.slane %v3777_v29, 4  ;;  %v3825_v14 = vshrl.u32 %v10799_v3, 16  ;;  %v10802_v21 = vld [vmem:[%s12104_s6 + $0x154] sm:$0xf] }
 0x26d   : > { %v3234_v26 = vpop.permute.xlu0 %3233  ;;  %3981 = vrot.lane.b32.xlu1 %v3618_v32, %s11954_s29  ;;  %v3713_v32 = vrot.slane %v3711_v52, 5  ;;  %v10801_v29 = vld [vmem:[%s12104_s6 + $0x150] sm:$0xf]  ;;  %v3849_v43 = vshrl.u32 %v10802_v21, 16  ;;  %v3831_v42 = vshll.u32 %v10800_v37, 16 }
 0x26e   : > { %3324 = vst.msk [vmem:[#allocation2 + $0x18] sm:$0xf] %vm3317_vm15, %v3234_v26  ;;  %v10794_v26 = vld [vmem:[%s12104_s6 + $0x134] sm:$0x1]  ;;  %v13751_v6 = vrot.slane %v3746_v33, 4  ;;  %v3780_v46 = vor.u32 %v3779_v49, %v13733_v47  ;;  %v3836_v44 = vshrl.u32 %v10801_v29, 16 }
 0x26f   : > { %3979 = vrot.lane.b32.xlu0 %v3608_v34, %s11954_s29  ;;  %v3240_v4 = vpop.permute.xlu1 %3239  ;;  %v3767_v34 = vshll.u32 %v10792_v13, 16  ;;  %v3714_v45 = vsel %vm12115_vm3, %v3709_v0, %v3713_v32  ;;  %v3783_v52 = vshll.u32 %v10794_v26, 16  ;;  %v10797_v13 = vld [vmem:[%s12104_s6 + $0x140] sm:$0x1]  ;;  %v13783_v0 = vrot.slane %v3821_v48, 5 }
 0x270   : > { %3327 = vst.msk [vmem:[#allocation2 + $0x24] sm:$0xf] %vm3317_vm15, %v3240_v4  ;;  %v10798_v4 = vld [vmem:[%s12104_s6 + $0x144] sm:$0xf]  ;;  %v3781_v9 = vrot.slane %v3780_v46, 4  ;;  %v3839_v22 = vshll.u32 %v10801_v29, 16 }
 0x271   : > { %v3238_v36 = vpop.permute.xlu0 %3237  ;;  %3985 = vrot.lane.b32.xlu1 %v3642_v39, %s11954_s29  ;;  %v3735_v39 = vshll.u32 %v10788_v18, 16  ;;  %v3769_v35 = vrot.slane %v3767_v34, 5  ;;  %v3815_v20 = vshll.u32 %v10798_v4, 16  ;;  %v3785_v27 = vrot.slane %v3783_v52, 5  ;;  %v10805_v32 = vld [vmem:[%s12104_s6 + $0x160] sm:$0xf] }
 0x272   : > { %3326 = vst.msk [vmem:[#allocation2 + $0x20] sm:$0xf] %vm3317_vm15, %v3238_v36  ;;  %v13754_v36 = vrot.slane %v3797_v31, 5  ;;  %v10804_v34 = vld [vmem:[%s12104_s6 + $0x15c] sm:$0xf]  ;;  %v3869_v33 = vshll.u32 %v10805_v32, 16 }
 0x273   : > { %3983 = vrot.lane.b32.xlu0 %v3632_v40, %s11954_s29  ;;  %v3244_v12 = vpop.permute.xlu1 %3243  ;;  %v3722_v40 = vor.u32 %v3721_v16, %v3718_v15  ;;  %v3737_v59 = vrot.slane %v3735_v39, 5  ;;  %v3770_v53 = vor.u32 %v3769_v35, %v3766_v50  ;;  %v3812_v15 = vshrl.u32 %v10798_v4, 16 }
 0x274   : > { %3329 = vst.msk [vmem:[#allocation2 + $0x2c] sm:$0xf] %vm3317_vm15, %v3244_v12  ;;  %v3762_v12 = vsel %vm12115_vm3, %v13745_v62, %v13747_v1  ;;  %v3845_v39 = vshll.u32 %v10802_v21, 16  ;;  %v3860_v49 = vshrl.u32 %v10804_v34, 16  ;;  %v3863_v50 = vshll.u32 %v10804_v34, 16 }
 0x275   : > { %v3242_v2 = vpop.permute.xlu0 %3241  ;;  %3989 = vrot.lane.b32.xlu1 %v3666_v8, %s11954_s29  ;;  %v3723_v19 = vrot.slane %v3722_v40, 4  ;;  %v3738_v16 = vsel %vm12115_vm3, %v3733_v58, %v3737_v59  ;;  %v3771_v30 = vrot.slane %v3770_v53, 4  ;;  %v3814_v38 = vrot.slane %v3812_v15, 4  ;;  %v10806_v53 = vld [vmem:[%s12104_s6 + $0x164] sm:$0x1] }
 0x276   : > { %3328 = vst.msk [vmem:[#allocation2 + $0x28] sm:$0xf] %vm3317_vm15, %v3242_v2  ;;  %v3804_v2 = vor.u32 %v3803_v10, %v13754_v36  ;;  %v3817_v40 = vrot.slane %v3815_v20, 5  ;;  %v13795_v59 = vrot.slane %v3845_v39, 5  ;;  %v3851_v62 = vrot.slane %v3849_v43, 4 }
 0x277   : > { %3987 = vrot.lane.b32.xlu0 %v3656_v25, %s11954_s29  ;;  %v3248_v24 = vpop.permute.xlu1 %3247  ;;  %v3728_v18 = vsel %vm12115_vm3, %v3723_v19, %v13706_v56  ;;  %v3752_v25 = vsel %vm12115_vm3, %v13751_v6, %v13714_v7  ;;  %v3827_v7 = vrot.slane %v3825_v14, 4  ;;  %v3776_v54 = vsel %vm12115_vm3, %v3771_v30, %v13733_v47  ;;  %v10808_v19 = vld [vmem:[%s12104_s6 + $0x16c] sm:$0xf] }
 0x278   : > { %3331 = vst.msk [vmem:[#allocation2 + $0x34] sm:$0xf] %vm3317_vm15, %v3248_v24  ;;  %v3873_v24 = vshrl.u32 %v10805_v32, 16  ;;  %v3805_v26 = vrot.slane %v3804_v2, 4  ;;  %v3838_v1 = vrot.slane %v3836_v44, 4  ;;  %v3841_v3 = vrot.slane %v3839_v22, 5 }
 0x279   : > { %v3246_v51 = vpop.permute.xlu0 %3245  ;;  %3993 = vrot.lane.b32.xlu1 %v3690_v41, %s11954_s29  ;;  %v3807_v41 = vshll.u32 %v10797_v13, 16  ;;  %v3828_v58 = vor.u32 %v3827_v7, %v13783_v0  ;;  %v13801_v6 = vrot.slane %v3869_v33, 5  ;;  %v3862_v46 = vrot.slane %v3860_v49, 4  ;;  %v10809_v32 = vld [vmem:[%s12104_s6 + $0x170] sm:$0x1] }
 0x27a   : > { %3330 = vst.msk [vmem:[#allocation2 + $0x30] sm:$0xf] %vm3317_vm15, %v3246_v51  ;;  %v3786_v51 = vsel %vm12115_vm3, %v3781_v9, %v3785_v27  ;;  %v3875_v47 = vrot.slane %v3873_v24, 4  ;;  %v3865_v52 = vrot.slane %v3863_v50, 5  ;;  %v3893_v10 = vshll.u32 %v10808_v19, 16 }
 0x27b   : > { %3991 = vrot.lane.b32.xlu0 %v3680_v17, %s11954_s29  ;;  %v3252_v5 = vpop.permute.xlu1 %3251  ;;  %v3794_v17 = vor.u32 %v3793_v60, %v3790_v11  ;;  %v3809_v35 = vrot.slane %v3807_v41, 5  ;;  %v3897_v11 = vshrl.u32 %v10808_v19, 16  ;;  %v3833_v14 = vrot.slane %v3831_v42, 5  ;;  %v10814_v49 = vld [vmem:[%s12104_s6 + $0x184] sm:$0xf] }
 0x27c   : > { %3333 = vst.msk [vmem:[#allocation2 + $0x3c] sm:$0xf] %vm3317_vm15, %v3252_v5  ;;  %v10803_v5 = vld [vmem:[%s12104_s6 + $0x158] sm:$0x1]  ;;  %v3852_v21 = vor.u32 %v3851_v62, %v13795_v59  ;;  %v3842_v9 = vor.u32 %v3841_v3, %v3838_v1  ;;  %v3876_v27 = vor.u32 %v3875_v47, %v13801_v6  ;;  %v3879_v29 = vshll.u32 %v10806_v53, 16 }
 0x27d   : > { %v3250_v8 = vpop.permute.xlu0 %3249  ;;  %3997 = vrot.lane.b32.xlu1 %v3714_v45, %s11954_s29  ;;  %v3795_v57 = vrot.slane %v3794_v17, 4  ;;  %v10807_v45 = vld [vmem:[%s12104_s6 + $0x168] sm:$0xf]  ;;  %v3810_v13 = vsel %vm12115_vm3, %v3805_v26, %v3809_v35  ;;  %v13818_v30 = vrot.slane %v3893_v10, 5  ;;  %v3899_v2 = vrot.slane %v3897_v11, 4 }
 0x27e   : > { %3332 = vst.msk [vmem:[#allocation2 + $0x38] sm:$0xf] %vm3317_vm15, %v3250_v8  ;;  %v3884_v60 = vshrl.u32 %v10807_v45, 16  ;;  %v3887_v15 = vshll.u32 %v10807_v45, 16  ;;  %v3877_v33 = vrot.slane %v3876_v27, 4  ;;  %v3881_v24 = vrot.slane %v3879_v29, 5 }
 0x27f   : > { %3995 = vrot.lane.b32.xlu0 %v3704_v61, %s11954_s29  ;;  %v3256_v55 = vpop.permute.xlu1 %3255  ;;  %v3818_v61 = vor.u32 %v3817_v40, %v3814_v38  ;;  %v3800_v48 = vsel %vm12115_vm3, %v3795_v57, %v13754_v36  ;;  %v3853_v40 = vrot.slane %v3852_v21, 4  ;;  %v3903_v26 = vshll.u32 %v10809_v32, 16  ;;  %v10813_v42 = vld [vmem:[%s12104_s6 + $0x180] sm:$0xf]  ;;  %v10812_v45 = vld [vmem:[%s12104_s6 + $0x17c] sm:$0x1] }
 0x280   : > { %3335 = vst.msk [vmem:[#allocation2 + $0x44] sm:$0xf] %vm3317_vm15, %v3256_v55  ;;  %v3855_v55 = vshll.u32 %v10803_v5, 16  ;;  %v3886_v41 = vrot.slane %v3884_v60, 4  ;;  %v3889_v34 = vrot.slane %v3887_v15, 5  ;;  %v3945_v62 = vshrl.u32 %v10814_v49, 16 }
 0x281   : > { %v3254_v56 = vpop.permute.xlu0 %3253  ;;  %4001 = vrot.lane.b32.xlu1 %v3738_v16, %s11954_s29  ;;  %v10811_v16 = vld [vmem:[%s12104_s6 + $0x178] sm:$0xf]  ;;  %v3819_v20 = vrot.slane %v3818_v61, 4  ;;  %v3941_v61 = vshll.u32 %v10814_v49, 16  ;;  %v3935_v5 = vshll.u32 %v10813_v42, 16  ;;  %v3905_v10 = vrot.slane %v3903_v26, 5 }
 0x282   : > { %3334 = vst.msk [vmem:[#allocation2 + $0x40] sm:$0xf] %vm3317_vm15, %v3254_v56  ;;  %v3866_v56 = vor.u32 %v3865_v52, %v3862_v46  ;;  %v3917_v17 = vshll.u32 %v10811_v16, 16  ;;  %v3921_v37 = vshrl.u32 %v10811_v16, 16  ;;  %v3857_v43 = vrot.slane %v3855_v55, 5 }
 0x283   : > { %3999 = vrot.lane.b32.xlu0 %v3728_v18, %s11954_s29  ;;  %v3260_v23 = vpop.permute.xlu1 %3259  ;;  %v3829_v18 = vrot.slane %v3828_v58, 4  ;;  %v3824_v22 = vsel %vm12115_vm3, %v3819_v20, %v13783_v0  ;;  %v3890_v0 = vor.u32 %v3889_v34, %v3886_v41  ;;  %v10817_v47 = vld [vmem:[%s12104_s6 + $0x190] sm:$0xf]  ;;  %v3882_v52 = vsel %vm12115_vm3, %v3877_v33, %v3881_v24  ;;  %v10816_v11 = vld [vmem:[%s12104_s6 + $0x18c] sm:$0xf] }
 0x284   : > { %3337 = vst.msk [vmem:[#allocation2 + $0x4c] sm:$0xf] %vm3317_vm15, %v3260_v23  ;;  %v3843_v23 = vrot.slane %v3842_v9, 4  ;;  %v13832_v35 = vrot.slane %v3917_v17, 5  ;;  %v3858_v19 = vsel %vm12115_vm3, %v3853_v40, %v3857_v43  ;;  %v3947_v15 = vrot.slane %v3945_v62, 4 }
 0x285   : > { %v3258_v31 = vpop.permute.xlu0 %3257  ;;  %4005 = vrot.lane.b32.xlu1 %v3762_v12, %s11954_s29  ;;  %v10810_v12 = vld [vmem:[%s12104_s6 + $0x174] sm:$0xf]  ;;  %v3834_v39 = vsel %vm12115_vm3, %v3829_v18, %v3833_v14  ;;  %v13856_v14 = vrot.slane %v3941_v61, 5  ;;  %v3965_v16 = vshll.u32 %v10817_v47, 16  ;;  %v10815_v20 = vld [vmem:[%s12104_s6 + $0x188] sm:$0x1] }
 0x286   : > { %3336 = vst.msk [vmem:[#allocation2 + $0x48] sm:$0xf] %vm3317_vm15, %v3258_v31  ;;  %v3908_v7 = vshrl.u32 %v10810_v12, 16  ;;  %v3911_v38 = vshll.u32 %v10810_v12, 16  ;;  %v3867_v31 = vrot.slane %v3866_v56, 4  ;;  %v3848_v3 = vsel %vm12115_vm3, %v3843_v23, %v13795_v59 }
 0x287   : > { %4003 = vrot.lane.b32.xlu0 %v3752_v25, %s11954_s29  ;;  %v3264_v4 = vpop.permute.xlu1 %3263  ;;  %v3891_v59 = vrot.slane %v3890_v0, 4  ;;  %v3937_v55 = vrot.slane %v3935_v5, 5  ;;  %v3956_v12 = vshrl.u32 %v10816_v11, 16  ;;  %v3951_v41 = vshll.u32 %v10815_v20, 16  ;;  %v10823_v61 = vld [vmem:[%s12104_s6 + $0xe8] sm:$0xf] }
 0x288   : > { %3339 = vst.msk [vmem:[#allocation2 + $0x54] sm:$0xf] %vm3317_vm15, %v3264_v4  ;;  %v3910_v57 = vrot.slane %v3908_v7, 4  ;;  %v3913_v58 = vrot.slane %v3911_v38, 5  ;;  %v3932_v4 = vshrl.u32 %v10813_v42, 16  ;;  %v3967_v17 = vrot.slane %v3965_v16, 5 }
 0x289   : > { %v3262_v8 = vpop.permute.xlu0 %3261  ;;  %4009 = vrot.lane.b32.xlu1 %v3786_v51, %s11954_s29  ;;  %v3900_v51 = vor.u32 %v3899_v2, %v13818_v30  ;;  %v3896_v29 = vsel %vm12115_vm3, %v3891_v59, %v13818_v30  ;;  %v3948_v2 = vor.u32 %v3947_v15, %v13856_v14  ;;  %v10818_v38 = vld [vmem:[%s12104_s6 + $0x194] sm:$0x1]  ;;  %v10822_v59 = vld [vmem:[%s12104_s6 + $0xe4] sm:$0xe]  ;;  %v10829_v20 = vld [vmem:[%s12104_s6 + $0x100] sm:$0xf] }
 0x28a   : > { %3338 = vst.msk [vmem:[#allocation2 + $0x50] sm:$0xf] %vm3317_vm15, %v3262_v8  ;;  %v3872_v8 = vsel %vm12115_vm3, %v3867_v31, %v13801_v6  ;;  %v3969_v6 = vshrl.u32 %v10817_v47, 16  ;;  %v3934_v21 = vrot.slane %v3932_v4, 4  ;;  %v3975_v33 = vshll.u32 %v10818_v38, 16 }
 0x28b   : > { %4007 = vrot.lane.b32.xlu0 %v3776_v54, %s11954_s29  ;;  %v3268_v25 = vpop.permute.xlu1 %3267  ;;  %v3923_v54 = vrot.slane %v3921_v37, 4  ;;  %v3901_v53 = vrot.slane %v3900_v51, 4  ;;  %v10820_v51 = vld [vmem:[%s12104_s6 + $0xdc] sm:$0xf]  ;;  %v4213_v47 = vrot.slane %v10823_v61, 5 }
 0x28c   : > { %3341 = vst.msk [vmem:[#allocation2 + $0x5c] sm:$0xf] %vm3317_vm15, %v3268_v25  ;;  %v3959_v25 = vshll.u32 %v10816_v11, 16  ;;  %v3971_v32 = vrot.slane %v3969_v6, 4  ;;  %v3938_v7 = vor.u32 %v3937_v55, %v3934_v21  ;;  %v10868_v6 = vrot.slane %v10822_v59, 9 }
 0x28d   : > { %v3266_v36 = vpop.permute.xlu0 %3265  ;;  %4013 = vrot.lane.b32.xlu1 %v3810_v13, %s11954_s29  ;;  %v3924_v60 = vor.u32 %v3923_v54, %v13832_v35  ;;  %v3927_v13 = vshll.u32 %v10812_v45, 16  ;;  %v3906_v27 = vsel %vm12115_vm3, %v3901_v53, %v3905_v10  ;;  %v4206_v54 = vrot.slane %v10820_v51, 5  ;;  %v10821_v45 = vld [vmem:[%s12104_s6 + $0xe0] sm:$0x1]  ;;  %v10824_v53 = vld [vmem:[%s12104_s6 + $0xec] sm:$0x1] }
 0x28e   : > { %3340 = vst.msk [vmem:[#allocation2 + $0x58] sm:$0xf] %vm3317_vm15, %v3266_v36  ;;  %v3961_v40 = vrot.slane %v3959_v25, 5  ;;  %v3972_v23 = vor.u32 %v3971_v32, %v3967_v17  ;;  %v4209_v5 = vrot.slane %v10821_v45, 5  ;;  %v10826_v10 = vld [vmem:[%s12104_s6 + $0xf4] sm:$0xf] }
 0x28f   : > { %4011 = vrot.lane.b32.xlu0 %v3800_v48, %s11954_s29  ;;  %v3272_v44 = vpop.permute.xlu1 %3271  ;;  %v3914_v48 = vor.u32 %v3913_v58, %v3910_v57  ;;  %v3925_v56 = vrot.slane %v3924_v60, 4  ;;  %v3929_v36 = vrot.slane %v3927_v13, 5  ;;  %v4208_v4 = vrot.slane %v4206_v54, 4  ;;  %v10825_v55 = vld [vmem:[%s12104_s6 + $0xf0] sm:$0xe] }
 0x290   : > { %3343 = vst.msk [vmem:[#allocation2 + $0x64] sm:$0xf] %vm3317_vm15, %v3272_v44  ;;  %v3949_v44 = vrot.slane %v3948_v2, 4  ;;  %v3973_v0 = vrot.slane %v3972_v23, 4  ;;  %v4215_v13 = vrot.slane %v4213_v47, 4 }
 0x291   : > { %v3270_v50 = vpop.permute.xlu0 %3269  ;;  %4017 = vrot.lane.b32.xlu1 %v3834_v39, %s11954_s29  ;;  %v3915_v37 = vrot.slane %v3914_v48, 4  ;;  %v3958_v39 = vrot.slane %v3956_v12, 4  ;;  %v3930_v30 = vsel %vm12115_vm3, %v3925_v56, %v3929_v36  ;;  %v4210_v60 = vsel %vm12259_vm7, %v4208_v4, %v4209_v5  ;;  %v10830_v2 = vld [vmem:[%s12104_s6 + $0x104] sm:$0x1]  ;;  %v10828_v32 = vld [vmem:[%s12104_s6 + $0xfc] sm:$0xe] }
 0x292   : > { %3342 = vst.msk [vmem:[#allocation2 + $0x60] sm:$0xf] %vm3317_vm15, %v3270_v50  ;;  %v3939_v50 = vrot.slane %v3938_v7, 4  ;;  %v4216_v48 = vrot.slane %v10824_v53, 5  ;;  %v4214_v56 = vsel %vm12259_vm7, %v10868_v6, %v4213_v47  ;;  %v10869_v36 = vrot.slane %v10825_v55, 9 }
 0x293   : > { %4015 = vrot.lane.b32.xlu0 %v3824_v22, %s11954_s29  ;;  %v3276_v1 = vpop.permute.xlu1 %3275  ;;  %v3953_v22 = vrot.slane %v3951_v41, 5  ;;  %v3920_v49 = vsel %vm12115_vm3, %v3915_v37, %v13832_v35  ;;  %v3962_v31 = vor.u32 %v3961_v40, %v3958_v39  ;;  %v3977_v35 = vrot.slane %v3975_v33, 5  ;;  %v10832_v41 = vld [vmem:[%s12104_s6 + $0x10c] sm:$0xf]  ;;  %v10831_v23 = vld [vmem:[%s12104_s6 + $0x108] sm:$0xe] }
 0x294   : > { %3345 = vst.msk [vmem:[#allocation2 + $0x6c] sm:$0xf] %vm3317_vm15, %v3276_v1  ;;  %v3944_v58 = vsel %vm12115_vm3, %v3939_v50, %v13856_v14  ;;  %v10819_v1 = vld [vmem:[%s12104_s6 + $0xd8] sm:$0xe]  ;;  %v4220_v14 = vrot.slane %v10826_v10, 5  ;;  %v4217_v12 = vsel %vm12259_vm7, %v4215_v13, %v4216_v48  ;;  %v4230_v7 = vrot.slane %v10830_v2, 5 }
 0x295   : > { %v3274_v46 = vpop.permute.xlu0 %3273  ;;  %4021 = vrot.lane.b32.xlu1 %v3858_v19, %s11954_s29  ;;  %v3954_v42 = vsel %vm12115_vm3, %v3949_v44, %v3953_v22  ;;  %v3963_v19 = vrot.slane %v3962_v31, 4  ;;  %v4234_v38 = vrot.slane %v10832_v41, 5  ;;  %v10835_v44 = vld [vmem:[%s12104_s6 + $0x118] sm:$0xf]  ;;  %v10841_v4 = vld [vmem:[%s12104_s6 + $0x130] sm:$0xf] }
 0x296   : > { %3344 = vst.msk [vmem:[#allocation2 + $0x68] sm:$0xf] %vm3317_vm15, %v3274_v46  ;;  %v4222_v25 = vrot.slane %v4220_v14, 4  ;;  %v4221_v40 = vsel %vm12259_vm7, %v10869_v36, %v4220_v14  ;;  %v4241_v50 = vrot.slane %v10835_v44, 5  ;;  %v10837_v47 = vld [vmem:[%s12104_s6 + $0x120] sm:$0xe] }
 0x297   : > { %4019 = vrot.lane.b32.xlu0 %v3848_v3, %s11954_s29  ;;  %v3280_v18 = vpop.permute.xlu1 %3279  ;;  %v3978_v3 = vsel %vm12115_vm3, %v3973_v0, %v3977_v35  ;;  %v10838_v0 = vld [vmem:[%s12104_s6 + $0x124] sm:$0xf]  ;;  %v4255_v53 = vrot.slane %v10841_v4, 5  ;;  %v10873_v59 = vrot.slane %v10837_v47, 9  ;;  %v10844_v13 = vld [vmem:[%s12104_s6 + $0x13c] sm:$0xf] }
 0x298   : > { %3347 = vst.msk [vmem:[#allocation2 + $0x74] sm:$0xf] %vm3317_vm15, %v3280_v18  ;;  %v10827_v18 = vld [vmem:[%s12104_s6 + $0xf8] sm:$0x1]  ;;  %v4248_v45 = vrot.slane %v10838_v0, 5 }
 0x299   : > { %v3278_v9 = vpop.permute.xlu0 %3277  ;;  %4025 = vrot.lane.b32.xlu1 %v3882_v52, %s11954_s29  ;;  %v3968_v52 = vsel %vm12115_vm3, %v3963_v19, %v3967_v17  ;;  %v10840_v14 = vld [vmem:[%s12104_s6 + $0x12c] sm:$0xe] }
 0x29a   : > { %3346 = vst.msk [vmem:[#allocation2 + $0x70] sm:$0xf] %vm3317_vm15, %v3278_v9  ;;  %v4223_v9 = vrot.slane %v10827_v18, 5  ;;  %v4262_v18 = vrot.slane %v10844_v13, 5  ;;  %v10874_v55 = vrot.slane %v10840_v14, 9 }
 0x29b   : > { %4023 = vrot.lane.b32.xlu0 %v3872_v8, %s11954_s29  ;;  %v3284_v34 = vpop.permute.xlu1 %3283  ;;  %v10867_v8 = vrot.slane %v10819_v1, 9 }
 0x29c   : > { %3349 = vst.msk [vmem:[#allocation2 + $0x7c] sm:$0xf] %vm3317_vm15, %v3284_v34  ;;  %v4224_v34 = vsel %vm12259_vm7, %v4222_v25, %v4223_v9  ;;  %v10847_v25 = vld [vmem:[%s12104_s6 + $0x148] sm:$0xf] }
 0x29d   : > { %v3282_v43 = vpop.permute.xlu0 %3281  ;;  %4029 = vrot.lane.b32.xlu1 %v3906_v27, %s11954_s29  ;;  %v4207_v16 = vsel %vm12259_vm7, %v10867_v8, %v4206_v54  ;;  %v4227_v27 = vrot.slane %v10829_v20, 5  ;;  %v10834_v54 = vld [vmem:[%s12104_s6 + $0x114] sm:$0xe]  ;;  %v4269_v2 = vrot.slane %v10847_v25, 5 }
 0x29e   : > { %3348 = vst.msk [vmem:[#allocation2 + $0x78] sm:$0xf] %vm3317_vm15, %v3282_v43  ;;  %v10870_v43 = vrot.slane %v10828_v32, 9  ;;  %v10872_v1 = vrot.slane %v10834_v54, 9  ;;  %vm8452_vm15 = vcmask 749248  }
 0x29f   : > { %4027 = vrot.lane.b32.xlu0 %v3896_v29, %s11954_s29  ;;  %v3421_v24 = vpop.permute.xlu1 %3420  ;;  %v4229_v37 = vrot.slane %v4227_v27, 4 }
 0x2a0   : > { %3516 = vst.msk [vmem:[#allocation2 + $0x4] sm:$0xf] %vm3514_vm0, %v3421_v24  ;;  %v4236_v24 = vrot.slane %v4234_v38, 4  ;;  %v4228_v51 = vsel %vm12259_vm7, %v10870_v43, %v4227_v27  ;;  %v10843_v27 = vld [vmem:[%s12104_s6 + $0x138] sm:$0xe] }
 0x2a1   : > { %v3419_v26 = vpop.permute.xlu0 %3418  ;;  %4033 = vrot.lane.b32.xlu1 %v3930_v30, %s11954_s29  ;;  %v10833_v30 = vld [vmem:[%s12104_s6 + $0x110] sm:$0x1]  ;;  %v4231_v33 = vsel %vm12259_vm7, %v4229_v37, %v4230_v7  ;;  %v10875_v32 = vrot.slane %v10843_v27, 9  ;;  %v10850_v37 = vld [vmem:[%s12104_s6 + $0x154] sm:$0xf] }
 0x2a2   : > { %3515 = vst.msk [vmem:[#allocation2] sm:$0xf] %vm3514_vm0, %v3419_v26  ;;  %v10871_v26 = vrot.slane %v10831_v23, 9 }
 0x2a3   : > { %4031 = vrot.lane.b32.xlu0 %v3920_v49, %s11954_s29  ;;  %v3425_v57 = vpop.permute.xlu1 %3424  ;;  %v4237_v49 = vrot.slane %v10833_v30, 5  ;;  %v4276_v30 = vrot.slane %v10850_v37, 5 }
 0x2a4   : > { %3518 = vst.msk [vmem:[#allocation2 + $0xc] sm:$0xf] %vm3514_vm0, %v3425_v57 }
 0x2a5   : > { %v3423_v62 = vpop.permute.xlu0 %3422  ;;  %4037 = vrot.lane.b32.xlu1 %v3954_v42, %s11954_s29  ;;  %v10836_v42 = vld [vmem:[%s12104_s6 + $0x11c] sm:$0x1]  ;;  %v4238_v57 = vsel %vm12259_vm7, %v4236_v24, %v4237_v49  ;;  %v10853_v24 = vld [vmem:[%s12104_s6 + $0x160] sm:$0xf] }
 0x2a6   : > { %3517 = vst.msk [vmem:[#allocation2 + $0x8] sm:$0xf] %vm3514_vm0, %v3423_v62  ;;  %v4244_v19 = vrot.slane %v10836_v42, 5  ;;  %v4235_v62 = vsel %vm12259_vm7, %v10871_v26, %v4234_v38  ;;  %v10846_v38 = vld [vmem:[%s12104_s6 + $0x144] sm:$0xe]  ;;  %v4283_v42 = vrot.slane %v10853_v24, 5 }
 0x2a7   : > { %4035 = vrot.lane.b32.xlu0 %v3944_v58, %s11954_s29  ;;  %v3429_v46 = vpop.permute.xlu1 %3428  ;;  %v4243_v58 = vrot.slane %v4241_v50, 4  ;;  %v10876_v23 = vrot.slane %v10846_v38, 9 }
 0x2a8   : > { %3520 = vst.msk [vmem:[#allocation2 + $0x14] sm:$0xf] %vm3514_vm0, %v3429_v46 }
 0x2a9   : > { %v3427_v11 = vpop.permute.xlu0 %3426  ;;  %4041 = vrot.lane.b32.xlu1 %v3978_v3, %s11954_s29  ;;  %v10839_v3 = vld [vmem:[%s12104_s6 + $0x128] sm:$0x1]  ;;  %v4245_v46 = vsel %vm12259_vm7, %v4243_v58, %v4244_v19  ;;  %v10856_v58 = vld [vmem:[%s12104_s6 + $0x16c] sm:$0xf] }
 0x2aa   : > { %3519 = vst.msk [vmem:[#allocation2 + $0x10] sm:$0xf] %vm3514_vm0, %v3427_v11  ;;  %v4251_v8 = vrot.slane %v10839_v3, 5  ;;  %v4242_v11 = vsel %vm12259_vm7, %v10872_v1, %v4241_v50  ;;  %v10849_v50 = vld [vmem:[%s12104_s6 + $0x150] sm:$0xe]  ;;  %v4290_v3 = vrot.slane %v10856_v58, 5 }
 0x2ab   : > { %4039 = vrot.lane.b32.xlu0 %v3968_v52, %s11954_s29  ;;  %v3433_v15 = vpop.permute.xlu1 %3432  ;;  %v4250_v52 = vrot.slane %v4248_v45, 4  ;;  %v10877_v54 = vrot.slane %v10849_v50, 9  ;;  %s11967_s29 = smov 92  }
 0x2ac   : > { %3522 = vst.msk [vmem:[#allocation2 + $0x1c] sm:$0xf] %vm3514_vm0, %v3433_v15 }
 0x2ad   : > { %v3431_v21 = vpop.permute.xlu0 %3430  ;;  %4318 = vrot.lane.b32.xlu1 %v4210_v60, %s11955_s30  ;;  %v10842_v60 = vld [vmem:[%s12104_s6 + $0x134] sm:$0x1]  ;;  %v4252_v15 = vsel %vm12259_vm7, %v4250_v52, %v4251_v8  ;;  %v10859_v52 = vld [vmem:[%s12104_s6 + $0x178] sm:$0xf] }
 0x2ae   : > { %3521 = vst.msk [vmem:[#allocation2 + $0x18] sm:$0xf] %vm3514_vm0, %v3431_v21  ;;  %v4258_v6 = vrot.slane %v10842_v60, 5  ;;  %v4249_v21 = vsel %vm12259_vm7, %v10873_v59, %v4248_v45  ;;  %v10852_v45 = vld [vmem:[%s12104_s6 + $0x15c] sm:$0xe]  ;;  %v4297_v60 = vrot.slane %v10859_v52, 5 }
 0x2af   : > { %4316 = vrot.lane.b32.xlu0 %v4207_v16, %s11955_s30  ;;  %v3437_v29 = vpop.permute.xlu1 %3436  ;;  %v4257_v16 = vrot.slane %v4255_v53, 4  ;;  %v10878_v47 = vrot.slane %v10852_v45, 9  ;;  %v10893_v52 = vld [vmem:[%s12104_s6 + $0x118] sm:$0xf] }
 0x2b0   : > { %3524 = vst.msk [vmem:[#allocation2 + $0x24] sm:$0xf] %vm3514_vm0, %v3437_v29 }
 0x2b1   : > { %v3435_v17 = vpop.permute.xlu0 %3434  ;;  %4322 = vrot.lane.b32.xlu1 %v4217_v12, %s11955_s30  ;;  %v10845_v12 = vld [vmem:[%s12104_s6 + $0x140] sm:$0x1]  ;;  %v4259_v29 = vsel %vm12259_vm7, %v4257_v16, %v4258_v6  ;;  %v10862_v16 = vld [vmem:[%s12104_s6 + $0x184] sm:$0xf] }
 0x2b2   : > { %3523 = vst.msk [vmem:[#allocation2 + $0x20] sm:$0xf] %vm3514_vm0, %v3435_v17  ;;  %v4265_v36 = vrot.slane %v10845_v12, 5  ;;  %v4256_v17 = vsel %vm12259_vm7, %v10874_v55, %v4255_v53  ;;  %v10855_v53 = vld [vmem:[%s12104_s6 + $0x168] sm:$0xe]  ;;  %v4304_v12 = vrot.slane %v10862_v16, 5 }
 0x2b3   : > { %4320 = vrot.lane.b32.xlu0 %v4214_v56, %s11955_s30  ;;  %v3441_v39 = vpop.permute.xlu1 %3440  ;;  %v4264_v56 = vrot.slane %v4262_v18, 4  ;;  %v10879_v14 = vrot.slane %v10855_v53, 9  ;;  %v10892_v53 = vld [vmem:[%s12104_s6 + $0x114] sm:$0xf] }
 0x2b4   : > { %3526 = vst.msk [vmem:[#allocation2 + $0x2c] sm:$0xf] %vm3514_vm0, %v3441_v39 }
 0x2b5   : > { %v3439_v22 = vpop.permute.xlu0 %3438  ;;  %4326 = vrot.lane.b32.xlu1 %v4224_v34, %s11955_s30  ;;  %v10848_v34 = vld [vmem:[%s12104_s6 + $0x14c] sm:$0x1]  ;;  %v4266_v39 = vsel %vm12259_vm7, %v4264_v56, %v4265_v36  ;;  %v10865_v56 = vld [vmem:[%s12104_s6 + $0x190] sm:$0xf] }
 0x2b6   : > { %3525 = vst.msk [vmem:[#allocation2 + $0x28] sm:$0xf] %vm3514_vm0, %v3439_v22  ;;  %v4272_v43 = vrot.slane %v10848_v34, 5  ;;  %v4263_v22 = vsel %vm12259_vm7, %v10875_v32, %v4262_v18  ;;  %v10858_v18 = vld [vmem:[%s12104_s6 + $0x174] sm:$0xe]  ;;  %v4311_v34 = vrot.slane %v10865_v56, 5 }
 0x2b7   : > { %4324 = vrot.lane.b32.xlu0 %v4221_v40, %s11955_s30  ;;  %v3445_v31 = vpop.permute.xlu1 %3444  ;;  %v4271_v40 = vrot.slane %v4269_v2, 4  ;;  %v10880_v27 = vrot.slane %v10858_v18, 9  ;;  %v10902_v56 = vld [vmem:[%s12104_s6 + $0x150] sm:$0xf] }
 0x2b8   : > { %3528 = vst.msk [vmem:[#allocation2 + $0x34] sm:$0xf] %vm3514_vm0, %v3445_v31 }
 0x2b9   : > { %v3443_v35 = vpop.permute.xlu0 %3442  ;;  %4330 = vrot.lane.b32.xlu1 %v4231_v33, %s11955_s30  ;;  %v10851_v33 = vld [vmem:[%s12104_s6 + $0x158] sm:$0x1]  ;;  %v4273_v31 = vsel %vm12259_vm7, %v4271_v40, %v4272_v43  ;;  %v10864_v43 = vld [vmem:[%s12104_s6 + $0x18c] sm:$0xe] }
 0x2ba   : > { %3527 = vst.msk [vmem:[#allocation2 + $0x30] sm:$0xf] %vm3514_vm0, %v3443_v35  ;;  %v4279_v26 = vrot.slane %v10851_v33, 5  ;;  %v4270_v35 = vsel %vm12259_vm7, %v10876_v23, %v4269_v2  ;;  %v10861_v2 = vld [vmem:[%s12104_s6 + $0x180] sm:$0xe]  ;;  %v10882_v24 = vrot.slane %v10864_v43, 9 }
 0x2bb   : > { %4328 = vrot.lane.b32.xlu0 %v4228_v51, %s11955_s30  ;;  %v3449_v61 = vpop.permute.xlu1 %3448  ;;  %v4278_v51 = vrot.slane %v4276_v30, 4  ;;  %v10881_v38 = vrot.slane %v10861_v2, 9  ;;  %v10905_v2 = vld [vmem:[%s12104_s6 + $0x160] sm:$0xf]  ;;  %v10919_v43 = vld [vmem:[%s12104_s6 + $0xf0] sm:$0xf] }
 0x2bc   : > { %3530 = vst.msk [vmem:[#allocation2 + $0x3c] sm:$0xf] %vm3514_vm0, %v3449_v61 }
 0x2bd   : > { %v3447_v5 = vpop.permute.xlu0 %3446  ;;  %4334 = vrot.lane.b32.xlu1 %v4238_v57, %s11955_s30  ;;  %v10854_v57 = vld [vmem:[%s12104_s6 + $0x164] sm:$0x1]  ;;  %v4280_v61 = vsel %vm12259_vm7, %v4278_v51, %v4279_v26  ;;  %v4305_v33 = vsel %vm12259_vm7, %v10881_v38, %v4304_v12  ;;  %v4312_v51 = vsel %vm12259_vm7, %v10882_v24, %v4311_v34  ;;  %v10920_v38 = vld [vmem:[%s12104_s6 + $0xf4] sm:$0xf] }
 0x2be   : > { %3529 = vst.msk [vmem:[#allocation2 + $0x38] sm:$0xf] %vm3514_vm0, %v3447_v5  ;;  %v4286_v1 = vrot.slane %v10854_v57, 5  ;;  %v4277_v5 = vsel %vm12259_vm7, %v10877_v54, %v4276_v30  ;;  %v10887_v57 = vld [vmem:[%s12104_s6 + $0xf4] sm:$0xf]  ;;  %v4723_v24 = vshll.u32 %v10920_v38, 16 }
 0x2bf   : > { %4332 = vrot.lane.b32.xlu0 %v4235_v62, %s11955_s30  ;;  %v3453_v10 = vpop.permute.xlu1 %3452  ;;  %v4285_v62 = vrot.slane %v4283_v42, 4 }
 0x2c0   : > { %3532 = vst.msk [vmem:[#allocation2 + $0x44] sm:$0xf] %vm3514_vm0, %v3453_v10 }
 0x2c1   : > { %v3451_v48 = vpop.permute.xlu0 %3450  ;;  %4338 = vrot.lane.b32.xlu1 %v4245_v46, %s11955_s30  ;;  %v10857_v46 = vld [vmem:[%s12104_s6 + $0x170] sm:$0x1]  ;;  %v4287_v10 = vsel %vm12259_vm7, %v4285_v62, %v4286_v1  ;;  %v10888_v1 = vld [vmem:[%s12104_s6 + $0xfc] sm:$0xf] }
 0x2c2   : > { %3531 = vst.msk [vmem:[#allocation2 + $0x40] sm:$0xf] %vm3514_vm0, %v3451_v48  ;;  %v4293_v59 = vrot.slane %v10857_v46, 5  ;;  %v4284_v48 = vsel %vm12259_vm7, %v10878_v47, %v4283_v42  ;;  %v10885_v42 = vld [vmem:[%s12104_s6 + $0xe8] sm:$0xf] }
 0x2c3   : > { %4336 = vrot.lane.b32.xlu0 %v4242_v11, %s11955_s30  ;;  %v3457_v20 = vpop.permute.xlu1 %3456  ;;  %v4292_v11 = vrot.slane %v4290_v3, 4  ;;  %v10890_v47 = vld [vmem:[%s12104_s6 + $0x108] sm:$0xf] }
 0x2c4   : > { %3534 = vst.msk [vmem:[#allocation2 + $0x4c] sm:$0xf] %vm3514_vm0, %v3457_v20 }
 0x2c5   : > { %v3455_v9 = vpop.permute.xlu0 %3454  ;;  %4342 = vrot.lane.b32.xlu1 %v4252_v15, %s11955_s30  ;;  %v10860_v15 = vld [vmem:[%s12104_s6 + $0x17c] sm:$0x1]  ;;  %v4294_v20 = vsel %vm12259_vm7, %v4292_v11, %v4293_v59  ;;  %v10895_v11 = vld [vmem:[%s12104_s6 + $0x124] sm:$0xf] }
 0x2c6   : > { %3533 = vst.msk [vmem:[#allocation2 + $0x48] sm:$0xf] %vm3514_vm0, %v3455_v9  ;;  %v4300_v55 = vrot.slane %v10860_v15, 5  ;;  %v4291_v9 = vsel %vm12259_vm7, %v10879_v14, %v4290_v3  ;;  %v10896_v15 = vld [vmem:[%s12104_s6 + $0x12c] sm:$0xf] }
 0x2c7   : > { %4340 = vrot.lane.b32.xlu0 %v4249_v21, %s11955_s30  ;;  %v3461_v41 = vpop.permute.xlu1 %3460  ;;  %v4299_v21 = vrot.slane %v4297_v60, 4 }
 0x2c8   : > { %3536 = vst.msk [vmem:[#allocation2 + $0x54] sm:$0xf] %vm3514_vm0, %v3461_v41 }
 0x2c9   : > { %v3459_v7 = vpop.permute.xlu0 %3458  ;;  %4346 = vrot.lane.b32.xlu1 %v4259_v29, %s11955_s30  ;;  %v10863_v29 = vld [vmem:[%s12104_s6 + $0x188] sm:$0x1]  ;;  %v4301_v41 = vsel %vm12259_vm7, %v4299_v21, %v4300_v55 }
 0x2ca   : > { %3535 = vst.msk [vmem:[#allocation2 + $0x50] sm:$0xf] %vm3514_vm0, %v3459_v7  ;;  %v4307_v32 = vrot.slane %v10863_v29, 5  ;;  %v4298_v7 = vsel %vm12259_vm7, %v10880_v27, %v4297_v60  ;;  %v10894_v60 = vld [vmem:[%s12104_s6 + $0x120] sm:$0xf] }
 0x2cb   : > { %4344 = vrot.lane.b32.xlu0 %v4256_v17, %s11955_s30  ;;  %v3465_v44 = vpop.permute.xlu1 %3464  ;;  %v4306_v17 = vrot.slane %v4304_v12, 4  ;;  %v10901_v55 = vld [vmem:[%s12104_s6 + $0x148] sm:$0xf]  ;;  %v10903_v27 = vld [vmem:[%s12104_s6 + $0x154] sm:$0xf] }
 0x2cc   : > { %3538 = vst.msk [vmem:[#allocation2 + $0x5c] sm:$0xf] %vm3514_vm0, %v3465_v44  ;;  %v4313_v44 = vrot.slane %v4311_v34, 4  ;;  %v10917_v34 = vld [vmem:[%s12104_s6 + $0xe8] sm:$0xf] }
 0x2cd   : > { %v3463_v49 = vpop.permute.xlu0 %3462  ;;  %4350 = vrot.lane.b32.xlu1 %v4266_v39, %s11955_s30  ;;  %v10866_v39 = vld [vmem:[%s12104_s6 + $0x194] sm:$0x1]  ;;  %v4308_v30 = vsel %vm12259_vm7, %v4306_v17, %v4307_v32  ;;  %v10904_v17 = vld [vmem:[%s12104_s6 + $0x15c] sm:$0xf] }
 0x2ce   : > { %3537 = vst.msk [vmem:[#allocation2 + $0x58] sm:$0xf] %vm3514_vm0, %v3463_v49 }
 0x2cf   : > { %4348 = vrot.lane.b32.xlu0 %v4263_v22, %s11955_s30  ;;  %v3469_v0 = vpop.permute.xlu1 %3468  ;;  %v4314_v22 = vrot.slane %v10866_v39, 5 }
 0x2d0   : > { %3540 = vst.msk [vmem:[#allocation2 + $0x64] sm:$0xf] %vm3514_vm0, %v3469_v0 }
 0x2d1   : > { %v3467_v19 = vpop.permute.xlu0 %3466  ;;  %4354 = vrot.lane.b32.xlu1 %v4273_v31, %s11955_s30  ;;  %v4315_v50 = vsel %vm12259_vm7, %v4313_v44, %v4314_v22  ;;  %v4699_v44 = vshll.u32 %v10917_v34, 16  ;;  %v4703_v22 = vshrl.u32 %v10917_v34, 16 }
 0x2d2   : > { %3539 = vst.msk [vmem:[#allocation2 + $0x60] sm:$0xf] %vm3514_vm0, %v3467_v19  ;;  %v10886_v19 = vld [vmem:[%s12104_s6 + $0xf0] sm:$0xf] }
 0x2d3   : > { %4352 = vrot.lane.b32.xlu0 %v4270_v35, %s11955_s30  ;;  %v3473_v4 = vpop.permute.xlu1 %3472  ;;  %v10884_v35 = vld [vmem:[%s12104_s6 + $0xe4] sm:$0xf] }
 0x2d4   : > { %3542 = vst.msk [vmem:[#allocation2 + $0x6c] sm:$0xf] %vm3514_vm0, %v3473_v4  ;;  %v10891_v4 = vld [vmem:[%s12104_s6 + $0x10c] sm:$0xf] }
 0x2d5   : > { %v3471_v8 = vpop.permute.xlu0 %3470  ;;  %4358 = vrot.lane.b32.xlu1 %v4280_v61, %s11955_s30  ;;  %v10889_v61 = vld [vmem:[%s12104_s6 + $0x100] sm:$0xf] }
 0x2d6   : > { %3541 = vst.msk [vmem:[#allocation2 + $0x68] sm:$0xf] %vm3514_vm0, %v3471_v8 }
 0x2d7   : > { %4356 = vrot.lane.b32.xlu0 %v4277_v5, %s11955_s30  ;;  %v3477_v13 = vpop.permute.xlu1 %3476 }
 0x2d8   : > { %3544 = vst.msk [vmem:[#allocation2 + $0x74] sm:$0xf] %vm3514_vm0, %v3477_v13 }
 0x2d9   : > { %v3475_v6 = vpop.permute.xlu0 %3474  ;;  %4362 = vrot.lane.b32.xlu1 %v4287_v10, %s11955_s30 }
 0x2da   : > { %3543 = vst.msk [vmem:[#allocation2 + $0x70] sm:$0xf] %vm3514_vm0, %v3475_v6  ;;  %v10899_v6 = vld [vmem:[%s12104_s6 + $0x13c] sm:$0xf] }
 0x2db   : > { %4360 = vrot.lane.b32.xlu0 %v4284_v48, %s11955_s30  ;;  %v3481_v25 = vpop.permute.xlu1 %3480  ;;  %v10897_v48 = vld [vmem:[%s12104_s6 + $0x130] sm:$0xf] }
 0x2dc   : > { %3546 = vst.msk [vmem:[#allocation2 + $0x7c] sm:$0xf] %vm3514_vm0, %v3481_v25  ;;  %v10900_v25 = vld [vmem:[%s12104_s6 + $0x144] sm:$0xf] }
 0x2dd   : > { %v3479_v36 = vpop.permute.xlu0 %3478  ;;  %4366 = vrot.lane.b32.xlu1 %v4294_v20, %s11955_s30  ;;  %v10898_v20 = vld [vmem:[%s12104_s6 + $0x138] sm:$0xf] }
 0x2de   : > { %3545 = vst.msk [vmem:[#allocation2 + $0x78] sm:$0xf] %vm3514_vm0, %v3479_v36  ;;  %vm8789_vm0 = vcmask 782048  }
 0x2df   : > { %4364 = vrot.lane.b32.xlu0 %v4291_v9, %s11955_s30  ;;  %v3982_v37 = vpop.permute.xlu1 %3981 }
 0x2e0   : > { %4077 = vst.msk [vmem:[#allocation2 + $0x4] sm:$0xf] %vm4075_vm1, %v3982_v37  ;;  %v10916_v37 = vld [vmem:[%s12104_s6 + $0xe4] sm:$0xf] }
 0x2e1   : > { %v3980_v40 = vpop.permute.xlu0 %3979  ;;  %4370 = vrot.lane.b32.xlu1 %v4301_v41, %s11955_s30 }
 0x2e2   : > { %4076 = vst.msk [vmem:[#allocation2] sm:$0xf] %vm4075_vm1, %v3980_v40  ;;  %v10906_v40 = vld [vmem:[%s12104_s6 + $0x168] sm:$0xf] }
 0x2e3   : > { %4368 = vrot.lane.b32.xlu0 %v4298_v7, %s11955_s30  ;;  %v3986_v23 = vpop.permute.xlu1 %3985  ;;  %v10907_v7 = vld [vmem:[%s12104_s6 + $0x16c] sm:$0xf] }
 0x2e4   : > { %4079 = vst.msk [vmem:[#allocation2 + $0xc] sm:$0xf] %vm4075_vm1, %v3986_v23  ;;  %v4690_v23 = vshrl.u32 %v10916_v37, 16 }
 0x2e5   : > { %v3984_v49 = vpop.permute.xlu0 %3983  ;;  %4374 = vrot.lane.b32.xlu1 %v4308_v30, %s11955_s30 }
 0x2e6   : > { %4078 = vst.msk [vmem:[#allocation2 + $0x8] sm:$0xf] %vm4075_vm1, %v3984_v49  ;;  %v4727_v49 = vshrl.u32 %v10920_v38, 16  ;;  %v10929_v38 = vld [vmem:[%s12104_s6 + $0x118] sm:$0xf] }
 0x2e7   : > { %4372 = vrot.lane.b32.xlu0 %v4305_v33, %s11955_s30  ;;  %v3990_v31 = vpop.permute.xlu1 %3989  ;;  %v4693_v33 = vshll.u32 %v10916_v37, 16 }
 0x2e8   : > { %4081 = vst.msk [vmem:[#allocation2 + $0x14] sm:$0xf] %vm4075_vm1, %v3990_v31  ;;  %v4714_v31 = vshrl.u32 %v10919_v43, 16 }
 0x2e9   : > { %v3988_v26 = vpop.permute.xlu0 %3987  ;;  %4378 = vrot.lane.b32.xlu1 %v4315_v50, %s11955_s30  ;;  %v10909_v50 = vld [vmem:[%s12104_s6 + $0x178] sm:$0xf] }
 0x2ea   : > { %4080 = vst.msk [vmem:[#allocation2 + $0x10] sm:$0xf] %vm4075_vm1, %v3988_v26 }
 0x2eb   : > { %4376 = vrot.lane.b32.xlu0 %v4312_v51, %s11955_s30  ;;  %v3994_v0 = vpop.permute.xlu1 %3993  ;;  %v4717_v51 = vshll.u32 %v10919_v43, 16  ;;  %s11968_s30 = smov 96  }
 0x2ec   : > { %4083 = vst.msk [vmem:[#allocation2 + $0x1c] sm:$0xf] %vm4075_vm1, %v3994_v0  ;;  %v10923_v0 = vld [vmem:[%s12104_s6 + $0x100] sm:$0xf] }
 0x2ed   : > { %v3992_v54 = vpop.permute.xlu0 %3991  ;;  %4514 = vrot.lane.b32.xlu1 %v10885_v42, %s11956_s3  ;;  %v10908_v42 = vld [vmem:[%s12104_s6 + $0x174] sm:$0xf] }
 0x2ee   : > { %4082 = vst.msk [vmem:[#allocation2 + $0x18] sm:$0xf] %vm4075_vm1, %v3992_v54  ;;  %v10911_v54 = vld [vmem:[%s12104_s6 + $0x184] sm:$0xf] }
 0x2ef   : > { %4512 = vrot.lane.b32.xlu0 %v10884_v35, %s11956_s3  ;;  %v3998_v58 = vpop.permute.xlu1 %3997 }
 0x2f0   : > { %4085 = vst.msk [vmem:[#allocation2 + $0x24] sm:$0xf] %vm4075_vm1, %v3998_v58  ;;  %v4705_v58 = vrot.slane %v4703_v22, 4 }
 0x2f1   : > { %v3996_v45 = vpop.permute.xlu0 %3995  ;;  %4518 = vrot.lane.b32.xlu1 %v10887_v57, %s11956_s3  ;;  %v14157_v57 = vrot.slane %v4699_v44, 5 }
 0x2f2   : > { %4084 = vst.msk [vmem:[#allocation2 + $0x20] sm:$0xf] %vm4075_vm1, %v3996_v45  ;;  %v4695_v45 = vrot.slane %v4693_v33, 5  ;;  %v10914_v33 = vld [vmem:[%s12104_s6 + $0x198] sm:$0xf] }
 0x2f3   : > { %4516 = vrot.lane.b32.xlu0 %v10886_v19, %s11956_s3  ;;  %v4002_v62 = vpop.permute.xlu1 %4001  ;;  %v4692_v19 = vrot.slane %v4690_v23, 4 }
 0x2f4   : > { %4087 = vst.msk [vmem:[#allocation2 + $0x2c] sm:$0xf] %vm4075_vm1, %v4002_v62  ;;  %v10921_v62 = vld [vmem:[%s12104_s6 + $0xf8] sm:$0x1] }
 0x2f5   : > { %v4000_v3 = vpop.permute.xlu0 %3999  ;;  %4522 = vrot.lane.b32.xlu1 %v10889_v61, %s11956_s3  ;;  %v10918_v61 = vld [vmem:[%s12104_s6 + $0xec] sm:$0x1] }
 0x2f6   : > { %4086 = vst.msk [vmem:[#allocation2 + $0x28] sm:$0xf] %vm4075_vm1, %v4000_v3  ;;  %v4729_v3 = vrot.slane %v4727_v49, 4 }
 0x2f7   : > { %4520 = vrot.lane.b32.xlu0 %v10888_v1, %s11956_s3  ;;  %v4006_v5 = vpop.permute.xlu1 %4005  ;;  %v14163_v1 = vrot.slane %v4723_v24, 5 }
 0x2f8   : > { %4089 = vst.msk [vmem:[#allocation2 + $0x34] sm:$0xf] %vm4075_vm1, %v4006_v5  ;;  %v4719_v5 = vrot.slane %v4717_v51, 5 }
 0x2f9   : > { %v4004_v46 = vpop.permute.xlu0 %4003  ;;  %4526 = vrot.lane.b32.xlu1 %v10891_v4, %s11956_s3  ;;  %v4716_v4 = vrot.slane %v4714_v31, 4 }
 0x2fa   : > { %4088 = vst.msk [vmem:[#allocation2 + $0x30] sm:$0xf] %vm4075_vm1, %v4004_v46  ;;  %v4751_v46 = vshrl.u32 %v10923_v0, 16 }
 0x2fb   : > { %4524 = vrot.lane.b32.xlu0 %v10890_v47, %s11956_s3  ;;  %v4010_v8 = vpop.permute.xlu1 %4009  ;;  %v4747_v47 = vshll.u32 %v10923_v0, 16  ;;  %v4799_v0 = vshrl.u32 %v10929_v38, 16 }
 0x2fc   : > { %4091 = vst.msk [vmem:[#allocation2 + $0x3c] sm:$0xf] %vm4075_vm1, %v4010_v8 }
 0x2fd   : > { %v4008_v10 = vpop.permute.xlu0 %4007  ;;  %4530 = vrot.lane.b32.xlu1 %v10893_v52, %s11956_s3  ;;  %v10922_v52 = vld [vmem:[%s12104_s6 + $0xfc] sm:$0xf] }
 0x2fe   : > { %4090 = vst.msk [vmem:[#allocation2 + $0x38] sm:$0xf] %vm4075_vm1, %v4008_v10 }
 0x2ff   : > { %4528 = vrot.lane.b32.xlu0 %v10892_v53, %s11956_s3  ;;  %v4014_v59 = vpop.permute.xlu1 %4013  ;;  %v10910_v53 = vld [vmem:[%s12104_s6 + $0x180] sm:$0xf] }
 0x300   : > { %4093 = vst.msk [vmem:[#allocation2 + $0x44] sm:$0xf] %vm4075_vm1, %v4014_v59  ;;  %v4709_v59 = vshll.u32 %v10918_v61, 16 }
 0x301   : > { %v4012_v13 = vpop.permute.xlu0 %4011  ;;  %4534 = vrot.lane.b32.xlu1 %v10895_v11, %s11956_s3  ;;  %v4706_v11 = vor.u32 %v4705_v58, %v14157_v57 }
 0x302   : > { %4092 = vst.msk [vmem:[#allocation2 + $0x40] sm:$0xf] %vm4075_vm1, %v4012_v13  ;;  %v4733_v13 = vshll.u32 %v10921_v62, 16 }
 0x303   : > { %4532 = vrot.lane.b32.xlu0 %v10894_v60, %s11956_s3  ;;  %v4018_v14 = vpop.permute.xlu1 %4017  ;;  %v4696_v60 = vor.u32 %v4695_v45, %v4692_v19  ;;  %v10932_v45 = vld [vmem:[%s12104_s6 + $0x124] sm:$0xf] }
 0x304   : > { %4095 = vst.msk [vmem:[#allocation2 + $0x4c] sm:$0xf] %vm4075_vm1, %v4018_v14  ;;  %v10925_v14 = vld [vmem:[%s12104_s6 + $0x108] sm:$0xf]  ;;  %v14182_v34 = vrot.slane %v4733_v13, 5 }
 0x305   : > { %v4016_v16 = vpop.permute.xlu0 %4015  ;;  %4538 = vrot.lane.b32.xlu1 %v10897_v48, %s11956_s3  ;;  %v10926_v48 = vld [vmem:[%s12104_s6 + $0x10c] sm:$0xf] }
 0x306   : > { %4094 = vst.msk [vmem:[#allocation2 + $0x48] sm:$0xf] %vm4075_vm1, %v4016_v16  ;;  %v4730_v16 = vor.u32 %v4729_v3, %v14163_v1 }
 0x307   : > { %4536 = vrot.lane.b32.xlu0 %v10896_v15, %s11956_s3  ;;  %v4022_v18 = vpop.permute.xlu1 %4021  ;;  %v10913_v15 = vld [vmem:[%s12104_s6 + $0x190] sm:$0xf] }
 0x308   : > { %4097 = vst.msk [vmem:[#allocation2 + $0x54] sm:$0xf] %vm4075_vm1, %v4022_v18  ;;  %v4720_v18 = vor.u32 %v4719_v5, %v4716_v4  ;;  %v14186_v37 = vrot.slane %v4730_v16, 4  ;;  %v10931_v5 = vld [vmem:[%s12104_s6 + $0x120] sm:$0xf] }
 0x309   : > { %v4020_v21 = vpop.permute.xlu0 %4019  ;;  %4542 = vrot.lane.b32.xlu1 %v10899_v6, %s11956_s3  ;;  %v4738_v6 = vshrl.u32 %v10922_v52, 16  ;;  %v4810_v16 = vshrl.u32 %v10931_v5, 16 }
 0x30a   : > { %4096 = vst.msk [vmem:[#allocation2 + $0x50] sm:$0xf] %vm4075_vm1, %v4020_v21  ;;  %v14178_v21 = vrot.slane %v4747_v47, 5  ;;  %v14192_v43 = vrot.slane %v4720_v18, 4  ;;  %v4736_v61 = vsel %vm12115_vm3, %v14186_v37, %v14182_v34  ;;  %v10938_v34 = vld [vmem:[%s12104_s6 + $0x13c] sm:$0xf] }
 0x30b   : > { %4540 = vrot.lane.b32.xlu0 %v10898_v20, %s11956_s3  ;;  %v4026_v12 = vpop.permute.xlu1 %4025  ;;  %v10924_v20 = vld [vmem:[%s12104_s6 + $0x104] sm:$0x1]  ;;  %v4740_v44 = vrot.slane %v4738_v6, 4  ;;  %v4813_v6 = vshll.u32 %v10931_v5, 16  ;;  %v10937_v37 = vld [vmem:[%s12104_s6 + $0x138] sm:$0xf] }
 0x30c   : > { %4099 = vst.msk [vmem:[#allocation2 + $0x5c] sm:$0xf] %vm4075_vm1, %v4026_v12  ;;  %v4741_v12 = vshll.u32 %v10922_v52, 16  ;;  %v4726_v62 = vsel %vm12115_vm3, %v14192_v43, %v14163_v1  ;;  %v4801_v1 = vrot.slane %v4799_v0, 4  ;;  %v10933_v43 = vld [vmem:[%s12104_s6 + $0x128] sm:$0x1] }
 0x30d   : > { %v4024_v9 = vpop.permute.xlu0 %4023  ;;  %4546 = vrot.lane.b32.xlu1 %v10901_v55, %s11956_s3  ;;  %v4753_v55 = vrot.slane %v4751_v46, 4 }
 0x30e   : > { %4098 = vst.msk [vmem:[#allocation2 + $0x58] sm:$0xf] %vm4075_vm1, %v4024_v9  ;;  %v10912_v9 = vld [vmem:[%s12104_s6 + $0x18c] sm:$0xf]  ;;  %v4743_v22 = vrot.slane %v4741_v12, 5 }
 0x30f   : > { %4544 = vrot.lane.b32.xlu0 %v10900_v25, %s11956_s3  ;;  %v4030_v29 = vpop.permute.xlu1 %4029 }
 0x310   : > { %4101 = vst.msk [vmem:[#allocation2 + $0x64] sm:$0xf] %vm4075_vm1, %v4030_v29  ;;  %v4775_v29 = vshrl.u32 %v10926_v48, 16  ;;  %v4744_v4 = vor.u32 %v4743_v22, %v4740_v44 }
 0x311   : > { %v4028_v36 = vpop.permute.xlu0 %4027  ;;  %4550 = vrot.lane.b32.xlu1 %v10903_v27, %s11956_s3  ;;  %v4771_v27 = vshll.u32 %v10926_v48, 16  ;;  %v4819_v48 = vshll.u32 %v10932_v45, 16 }
 0x312   : > { %4100 = vst.msk [vmem:[#allocation2 + $0x60] sm:$0xf] %vm4075_vm1, %v4028_v36  ;;  %v4765_v36 = vshll.u32 %v10925_v14, 16  ;;  %v4777_v49 = vrot.slane %v4775_v29, 4 }
 0x313   : > { %4548 = vrot.lane.b32.xlu0 %v10902_v56, %s11956_s3  ;;  %v4034_v41 = vpop.permute.xlu1 %4033  ;;  %v4762_v56 = vshrl.u32 %v10925_v14, 16  ;;  %v14196_v24 = vrot.slane %v4771_v27, 5 }
 0x314   : > { %4103 = vst.msk [vmem:[#allocation2 + $0x6c] sm:$0xf] %vm4075_vm1, %v4034_v41  ;;  %v4707_v41 = vrot.slane %v4706_v11, 4  ;;  %v4767_v31 = vrot.slane %v4765_v36, 5 }
 0x315   : > { %v4032_v32 = vpop.permute.xlu0 %4031  ;;  %4554 = vrot.lane.b32.xlu1 %v10905_v2, %s11956_s3  ;;  %v4778_v46 = vor.u32 %v4777_v49, %v14196_v24 }
 0x316   : > { %4102 = vst.msk [vmem:[#allocation2 + $0x68] sm:$0xf] %vm4075_vm1, %v4032_v32  ;;  %v4697_v32 = vrot.slane %v4696_v60, 4 }
 0x317   : > { %4552 = vrot.lane.b32.xlu0 %v10904_v17, %s11956_s3  ;;  %v4038_v39 = vpop.permute.xlu1 %4037  ;;  %v4711_v17 = vrot.slane %v4709_v59, 5  ;;  %v10930_v59 = vld [vmem:[%s12104_s6 + $0x11c] sm:$0x1]  ;;  %v4779_v27 = vrot.slane %v4778_v46, 4 }
 0x318   : > { %4105 = vst.msk [vmem:[#allocation2 + $0x74] sm:$0xf] %vm4075_vm1, %v4038_v39  ;;  %v10928_v39 = vld [vmem:[%s12104_s6 + $0x114] sm:$0xf]  ;;  %v4702_v58 = vsel %vm12115_vm3, %v4697_v32, %v14157_v57  ;;  %v14238_v32 = vrot.slane %v4819_v48, 5 }
 0x319   : > { %v4036_v30 = vpop.permute.xlu0 %4035  ;;  %4558 = vrot.lane.b32.xlu1 %v10907_v7, %s11956_s3  ;;  %v4757_v7 = vshll.u32 %v10924_v20, 16  ;;  %v4789_v19 = vshll.u32 %v10928_v39, 16 }
 0x31a   : > { %4104 = vst.msk [vmem:[#allocation2 + $0x70] sm:$0xf] %vm4075_vm1, %v4036_v30  ;;  %v4754_v30 = vor.u32 %v4753_v55, %v14178_v21 }
 0x31b   : > { %4556 = vrot.lane.b32.xlu0 %v10906_v40, %s11956_s3  ;;  %v4042_v26 = vpop.permute.xlu1 %4041  ;;  %v10915_v40 = vld [vmem:[%s12104_s6 + $0x19c] sm:$0xf]  ;;  %v14217_v3 = vrot.slane %v4757_v7, 5  ;;  %v4791_v14 = vrot.slane %v4789_v19, 5  ;;  %v10941_v19 = vld [vmem:[%s12104_s6 + $0x148] sm:$0xf] }
 0x31c   : > { %4107 = vst.msk [vmem:[#allocation2 + $0x7c] sm:$0xf] %vm4075_vm1, %v4042_v26  ;;  %v10927_v26 = vld [vmem:[%s12104_s6 + $0x110] sm:$0x1]  ;;  %v14220_v47 = vrot.slane %v4754_v30, 4 }
 0x31d   : > { %v4040_v35 = vpop.permute.xlu0 %4039  ;;  %4562 = vrot.lane.b32.xlu1 %v10909_v50, %s11956_s3  ;;  %v4764_v50 = vrot.slane %v4762_v56, 4  ;;  %v4781_v52 = vshll.u32 %v10927_v26, 16  ;;  %v4805_v56 = vshll.u32 %v10930_v59, 16  ;;  %v4858_v26 = vshrl.u32 %v10937_v37, 16 }
 0x31e   : > { %4106 = vst.msk [vmem:[#allocation2 + $0x78] sm:$0xf] %vm4075_vm1, %v4040_v35  ;;  %v4786_v35 = vshrl.u32 %v10928_v39, 16  ;;  %v4812_v39 = vrot.slane %v4810_v16, 4  ;;  %vm8985_vm1 = vcmask 814848  }
 0x31f   : > { %4560 = vrot.lane.b32.xlu0 %v10908_v42, %s11956_s3  ;;  %v4319_v8 = vpop.permute.xlu1 %4318  ;;  %v4795_v42 = vshll.u32 %v10929_v38, 16  ;;  %v4783_v29 = vrot.slane %v4781_v52, 5 }
 0x320   : > { %4414 = vst.msk [vmem:[#allocation2 + $0x4] sm:$0xf] %vm4412_vm2, %v4319_v8  ;;  %v4768_v8 = vor.u32 %v4767_v31, %v4764_v50  ;;  %v4788_v13 = vrot.slane %v4786_v35, 4  ;;  %v10936_v50 = vld [vmem:[%s12104_s6 + $0x134] sm:$0x1]  ;;  %v4867_v31 = vshll.u32 %v10938_v34, 16 }
 0x321   : > { %v4317_v10 = vpop.permute.xlu0 %4316  ;;  %4566 = vrot.lane.b32.xlu1 %v10911_v54, %s11956_s3  ;;  %v4712_v54 = vsel %vm12115_vm3, %v4707_v41, %v4711_v17  ;;  %v14227_v60 = vrot.slane %v4795_v42, 5  ;;  %v4784_v0 = vsel %vm12115_vm3, %v4779_v27, %v4783_v29 }
 0x322   : > { %4413 = vst.msk [vmem:[#allocation2] sm:$0xf] %vm4412_vm2, %v4317_v10  ;;  %v10934_v10 = vld [vmem:[%s12104_s6 + $0x12c] sm:$0xf]  ;;  %v4769_v41 = vrot.slane %v4768_v8, 4  ;;  %v4792_v7 = vor.u32 %v4791_v14, %v4788_v13  ;;  %v14265_v46 = vrot.slane %v4867_v31, 5 }
 0x323   : > { %4564 = vrot.lane.b32.xlu0 %v10910_v53, %s11956_s3  ;;  %v4323_v25 = vpop.permute.xlu1 %4322  ;;  %v10935_v53 = vld [vmem:[%s12104_s6 + $0x130] sm:$0xf]  ;;  %v4834_v55 = vshrl.u32 %v10934_v10, 16  ;;  %v4837_v12 = vshll.u32 %v10934_v10, 16  ;;  %v4802_v17 = vor.u32 %v4801_v1, %v14227_v60  ;;  %v4860_v8 = vrot.slane %v4858_v26, 4 }
 0x324   : > { %4416 = vst.msk [vmem:[#allocation2 + $0xc] sm:$0xf] %vm4412_vm2, %v4323_v25  ;;  %v4843_v18 = vshll.u32 %v10935_v53, 16  ;;  %v4847_v20 = vshrl.u32 %v10935_v53, 16  ;;  %v4774_v35 = vsel %vm12115_vm3, %v4769_v41, %v14196_v24  ;;  %v4853_v24 = vshll.u32 %v10936_v50, 16 }
 0x325   : > { %v4321_v2 = vpop.permute.xlu0 %4320  ;;  %4570 = vrot.lane.b32.xlu1 %v10913_v15, %s11956_s3  ;;  %v4823_v15 = vshrl.u32 %v10932_v45, 16  ;;  %v4836_v22 = vrot.slane %v4834_v55, 4  ;;  %v4891_v53 = vshll.u32 %v10941_v19, 16  ;;  %v4895_v1 = vshrl.u32 %v10941_v19, 16  ;;  %v10945_v19 = vld [vmem:[%s12104_s6 + $0x158] sm:$0x1] }
 0x326   : > { %4415 = vst.msk [vmem:[#allocation2 + $0x8] sm:$0xf] %vm4412_vm2, %v4321_v2  ;;  %v4760_v2 = vsel %vm12115_vm3, %v14220_v47, %v14217_v3  ;;  %v14246_v30 = vrot.slane %v4843_v18, 5  ;;  %v4849_v44 = vrot.slane %v4847_v20, 4  ;;  %v10940_v3 = vld [vmem:[%s12104_s6 + $0x144] sm:$0xf] }
 0x327   : > { %4568 = vrot.lane.b32.xlu0 %v10912_v9, %s11956_s3  ;;  %v4327_v23 = vpop.permute.xlu1 %4326  ;;  %v4745_v9 = vrot.slane %v4744_v4, 4  ;;  %v4825_v38 = vrot.slane %v4823_v15, 4  ;;  %v4793_v4 = vrot.slane %v4792_v7, 4  ;;  %v4882_v13 = vshrl.u32 %v10940_v3, 16 }
 0x328   : > { %4418 = vst.msk [vmem:[#allocation2 + $0x14] sm:$0xf] %vm4412_vm2, %v4327_v23  ;;  %v4839_v23 = vrot.slane %v4837_v12, 5  ;;  %v4850_v5 = vor.u32 %v4849_v44, %v14246_v30  ;;  %v4885_v48 = vshll.u32 %v10940_v3, 16  ;;  %v14279_v55 = vrot.slane %v4853_v24, 5 }
 0x329   : > { %v4325_v51 = vpop.permute.xlu0 %4324  ;;  %4574 = vrot.lane.b32.xlu1 %v10915_v40, %s11956_s3  ;;  %v4815_v40 = vrot.slane %v4813_v6, 5  ;;  %v4750_v49 = vsel %vm12115_vm3, %v4745_v9, %v14178_v21  ;;  %v4803_v21 = vrot.slane %v4802_v17, 4  ;;  %v4826_v45 = vor.u32 %v4825_v38, %v14238_v32  ;;  %v10944_v12 = vld [vmem:[%s12104_s6 + $0x154] sm:$0xf] }
 0x32a   : > { %4417 = vst.msk [vmem:[#allocation2 + $0x10] sm:$0xf] %vm4412_vm2, %v4325_v51  ;;  %v4871_v51 = vshrl.u32 %v10938_v34, 16  ;;  %v4798_v18 = vsel %vm12115_vm3, %v4793_v4, %v14227_v60  ;;  %v14277_v20 = vrot.slane %v4850_v5, 4  ;;  %v4897_v41 = vrot.slane %v4895_v1, 4 }
 0x32b   : > { %4572 = vrot.lane.b32.xlu0 %v10914_v33, %s11956_s3  ;;  %v4331_v57 = vpop.permute.xlu1 %4330  ;;  %v4827_v14 = vrot.slane %v4826_v45, 4  ;;  %v4884_v17 = vrot.slane %v4882_v13, 4  ;;  %v4887_v34 = vrot.slane %v4885_v48, 5  ;;  %v4915_v7 = vshll.u32 %v10944_v12, 16 }
 0x32c   : > { %4420 = vst.msk [vmem:[#allocation2 + $0x1c] sm:$0xf] %vm4412_vm2, %v4331_v57  ;;  %v4840_v57 = vor.u32 %v4839_v23, %v4836_v22  ;;  %v4873_v52 = vrot.slane %v4871_v51, 4  ;;  %v4919_v38 = vshrl.u32 %v10944_v12, 16  ;;  %v10947_v22 = vld [vmem:[%s12104_s6 + $0x160] sm:$0xf] }
 0x32d   : > { %v4329_v11 = vpop.permute.xlu0 %4328  ;;  %5075 = vrot.lane.b32.xlu1 %v4712_v54, %s11957_s4  ;;  %v4807_v54 = vrot.slane %v4805_v56, 5  ;;  %v10946_v51 = vld [vmem:[%s12104_s6 + $0x15c] sm:$0xf]  ;;  %v4943_v3 = vshrl.u32 %v10947_v22, 16  ;;  %v4925_v1 = vshll.u32 %v10945_v19, 16 }
 0x32e   : > { %4419 = vst.msk [vmem:[#allocation2 + $0x18] sm:$0xf] %vm4412_vm2, %v4329_v11  ;;  %v10939_v11 = vld [vmem:[%s12104_s6 + $0x140] sm:$0x1]  ;;  %v14283_v27 = vrot.slane %v4840_v57, 4  ;;  %v4874_v29 = vor.u32 %v4873_v52, %v14265_v46  ;;  %v4930_v4 = vshrl.u32 %v10946_v51, 16 }
 0x32f   : > { %5073 = vrot.lane.b32.xlu0 %v4702_v58, %s11957_s4  ;;  %v4335_v25 = vpop.permute.xlu1 %4334  ;;  %v4861_v58 = vshll.u32 %v10937_v37, 16  ;;  %v4808_v6 = vsel %vm12115_vm3, %v4803_v21, %v4807_v54  ;;  %v4877_v56 = vshll.u32 %v10939_v11, 16  ;;  %v10942_v37 = vld [vmem:[%s12104_s6 + $0x14c] sm:$0x1]  ;;  %v14315_v21 = vrot.slane %v4915_v7, 5 }
 0x330   : > { %4422 = vst.msk [vmem:[#allocation2 + $0x24] sm:$0xf] %vm4412_vm2, %v4335_v25  ;;  %v10943_v25 = vld [vmem:[%s12104_s6 + $0x150] sm:$0xf]  ;;  %v4875_v50 = vrot.slane %v4874_v29, 4  ;;  %v4933_v5 = vshll.u32 %v10946_v51, 16 }
 0x331   : > { %v4333_v36 = vpop.permute.xlu0 %4332  ;;  %5079 = vrot.lane.b32.xlu1 %v4736_v61, %s11957_s4  ;;  %v4829_v61 = vshll.u32 %v10933_v43, 16  ;;  %v4863_v59 = vrot.slane %v4861_v58, 5  ;;  %v4909_v44 = vshll.u32 %v10943_v25, 16  ;;  %v4879_v31 = vrot.slane %v4877_v56, 5  ;;  %v10950_v54 = vld [vmem:[%s12104_s6 + $0x16c] sm:$0xf] }
 0x332   : > { %4421 = vst.msk [vmem:[#allocation2 + $0x20] sm:$0xf] %vm4412_vm2, %v4333_v36  ;;  %v14286_v36 = vrot.slane %v4891_v53, 5  ;;  %v10949_v58 = vld [vmem:[%s12104_s6 + $0x168] sm:$0xf]  ;;  %v4963_v57 = vshll.u32 %v10950_v54, 16 }
 0x333   : > { %5077 = vrot.lane.b32.xlu0 %v4726_v62, %s11957_s4  ;;  %v4339_v33 = vpop.permute.xlu1 %4338  ;;  %v4816_v62 = vor.u32 %v4815_v40, %v4812_v39  ;;  %v4831_v15 = vrot.slane %v4829_v61, 5  ;;  %v4864_v60 = vor.u32 %v4863_v59, %v4860_v8  ;;  %v4906_v39 = vshrl.u32 %v10943_v25, 16 }
 0x334   : > { %4424 = vst.msk [vmem:[#allocation2 + $0x2c] sm:$0xf] %vm4412_vm2, %v4339_v33  ;;  %v4856_v33 = vsel %vm12115_vm3, %v14277_v20, %v14279_v55  ;;  %v4939_v61 = vshll.u32 %v10947_v22, 16  ;;  %v4954_v52 = vshrl.u32 %v10949_v58, 16  ;;  %v4957_v8 = vshll.u32 %v10949_v58, 16 }
 0x335   : > { %v4337_v42 = vpop.permute.xlu0 %4336  ;;  %5083 = vrot.lane.b32.xlu1 %v4760_v2, %s11957_s4  ;;  %v4817_v16 = vrot.slane %v4816_v62, 4  ;;  %v4832_v40 = vsel %vm12115_vm3, %v4827_v14, %v4831_v15  ;;  %v4865_v26 = vrot.slane %v4864_v60, 4  ;;  %v4908_v45 = vrot.slane %v4906_v39, 4  ;;  %v10951_v60 = vld [vmem:[%s12104_s6 + $0x170] sm:$0x1] }
 0x336   : > { %4423 = vst.msk [vmem:[#allocation2 + $0x28] sm:$0xf] %vm4412_vm2, %v4337_v42  ;;  %v4898_v42 = vor.u32 %v4897_v41, %v14286_v36  ;;  %v4911_v62 = vrot.slane %v4909_v44, 5  ;;  %v14327_v15 = vrot.slane %v4939_v61, 5  ;;  %v4945_v20 = vrot.slane %v4943_v3, 4 }
 0x337   : > { %5081 = vrot.lane.b32.xlu0 %v4750_v49, %s11957_s4  ;;  %v4343_v47 = vpop.permute.xlu1 %4342  ;;  %v4822_v43 = vsel %vm12115_vm3, %v4817_v16, %v14238_v32  ;;  %v4846_v49 = vsel %vm12115_vm3, %v14283_v27, %v14246_v30  ;;  %v4921_v30 = vrot.slane %v4919_v38, 4  ;;  %v4870_v13 = vsel %vm12115_vm3, %v4865_v26, %v14265_v46  ;;  %v10953_v16 = vld [vmem:[%s12104_s6 + $0x178] sm:$0xf] }
 0x338   : > { %4426 = vst.msk [vmem:[#allocation2 + $0x34] sm:$0xf] %vm4412_vm2, %v4343_v47  ;;  %v4967_v47 = vshrl.u32 %v10950_v54, 16  ;;  %v4899_v11 = vrot.slane %v4898_v42, 4  ;;  %v4932_v55 = vrot.slane %v4930_v4, 4  ;;  %v4935_v12 = vrot.slane %v4933_v5, 5 }
 0x339   : > { %v4341_v10 = vpop.permute.xlu0 %4340  ;;  %5087 = vrot.lane.b32.xlu1 %v4784_v0, %s11957_s4  ;;  %v4901_v0 = vshll.u32 %v10942_v37, 16  ;;  %v4922_v14 = vor.u32 %v4921_v30, %v14315_v21  ;;  %v14333_v27 = vrot.slane %v4963_v57, 5  ;;  %v4956_v29 = vrot.slane %v4954_v52, 4  ;;  %v10954_v54 = vld [vmem:[%s12104_s6 + $0x17c] sm:$0x1] }
 0x33a   : > { %4425 = vst.msk [vmem:[#allocation2 + $0x30] sm:$0xf] %vm4412_vm2, %v4341_v10  ;;  %v4880_v10 = vsel %vm12115_vm3, %v4875_v50, %v4879_v31  ;;  %v4969_v46 = vrot.slane %v4967_v47, 4  ;;  %v4959_v56 = vrot.slane %v4957_v8, 5  ;;  %v4987_v41 = vshll.u32 %v10953_v16, 16 }
 0x33b   : > { %5085 = vrot.lane.b32.xlu0 %v4774_v35, %s11957_s4  ;;  %v4347_v9 = vpop.permute.xlu1 %4346  ;;  %v4888_v35 = vor.u32 %v4887_v34, %v4884_v17  ;;  %v4903_v59 = vrot.slane %v4901_v0, 5  ;;  %v4991_v17 = vshrl.u32 %v10953_v16, 16  ;;  %v4927_v38 = vrot.slane %v4925_v1, 5  ;;  %v10959_v52 = vld [vmem:[%s12104_s6 + $0x190] sm:$0xf] }
 0x33c   : > { %4428 = vst.msk [vmem:[#allocation2 + $0x3c] sm:$0xf] %vm4412_vm2, %v4347_v9  ;;  %v10948_v9 = vld [vmem:[%s12104_s6 + $0x164] sm:$0x1]  ;;  %v4946_v22 = vor.u32 %v4945_v20, %v14327_v15  ;;  %v4936_v50 = vor.u32 %v4935_v12, %v4932_v55  ;;  %v4970_v31 = vor.u32 %v4969_v46, %v14333_v27  ;;  %v4973_v51 = vshll.u32 %v10951_v60, 16 }
 0x33d   : > { %v4345_v2 = vpop.permute.xlu0 %4344  ;;  %5091 = vrot.lane.b32.xlu1 %v4808_v6, %s11957_s4  ;;  %v4889_v48 = vrot.slane %v4888_v35, 4  ;;  %v10952_v6 = vld [vmem:[%s12104_s6 + $0x174] sm:$0xf]  ;;  %v4904_v37 = vsel %vm12115_vm3, %v4899_v11, %v4903_v59  ;;  %v14350_v26 = vrot.slane %v4987_v41, 5  ;;  %v4993_v42 = vrot.slane %v4991_v17, 4 }
 0x33e   : > { %4427 = vst.msk [vmem:[#allocation2 + $0x38] sm:$0xf] %vm4412_vm2, %v4345_v2  ;;  %v4978_v34 = vshrl.u32 %v10952_v6, 16  ;;  %v4981_v39 = vshll.u32 %v10952_v6, 16  ;;  %v4971_v57 = vrot.slane %v4970_v31, 4  ;;  %v4975_v47 = vrot.slane %v4973_v51, 5 }
 0x33f   : > { %5089 = vrot.lane.b32.xlu0 %v4798_v18, %s11957_s4  ;;  %v4351_v23 = vpop.permute.xlu1 %4350  ;;  %v4912_v18 = vor.u32 %v4911_v62, %v4908_v45  ;;  %v4894_v7 = vsel %vm12115_vm3, %v4889_v48, %v14286_v36  ;;  %v4947_v62 = vrot.slane %v4946_v22, 4  ;;  %v4997_v11 = vshll.u32 %v10954_v54, 16  ;;  %v10958_v1 = vld [vmem:[%s12104_s6 + $0x18c] sm:$0xf]  ;;  %v10957_v6 = vld [vmem:[%s12104_s6 + $0x188] sm:$0x1] }
 0x340   : > { %4430 = vst.msk [vmem:[#allocation2 + $0x44] sm:$0xf] %vm4412_vm2, %v4351_v23  ;;  %v4949_v23 = vshll.u32 %v10948_v9, 16  ;;  %v4980_v0 = vrot.slane %v4978_v34, 4  ;;  %v4983_v58 = vrot.slane %v4981_v39, 5  ;;  %v5039_v20 = vshrl.u32 %v10959_v52, 16 }
 0x341   : > { %v4349_v32 = vpop.permute.xlu0 %4348  ;;  %5095 = vrot.lane.b32.xlu1 %v4832_v40, %s11957_s4  ;;  %v10956_v40 = vld [vmem:[%s12104_s6 + $0x184] sm:$0xf]  ;;  %v4913_v44 = vrot.slane %v4912_v18, 4  ;;  %v5035_v18 = vshll.u32 %v10959_v52, 16  ;;  %v5029_v9 = vshll.u32 %v10958_v1, 16  ;;  %v4999_v41 = vrot.slane %v4997_v11, 5 }
 0x342   : > { %4429 = vst.msk [vmem:[#allocation2 + $0x40] sm:$0xf] %vm4412_vm2, %v4349_v32  ;;  %v4960_v32 = vor.u32 %v4959_v56, %v4956_v29  ;;  %v5011_v35 = vshll.u32 %v10956_v40, 16  ;;  %v5015_v19 = vshrl.u32 %v10956_v40, 16  ;;  %v4951_v3 = vrot.slane %v4949_v23, 5 }
 0x343   : > { %5093 = vrot.lane.b32.xlu0 %v4822_v43, %s11957_s4  ;;  %v4355_v24 = vpop.permute.xlu1 %4354  ;;  %v4923_v43 = vrot.slane %v4922_v14, 4  ;;  %v4918_v5 = vsel %vm12115_vm3, %v4913_v44, %v14315_v21  ;;  %v4984_v21 = vor.u32 %v4983_v58, %v4980_v0  ;;  %v10962_v46 = vld [vmem:[%s12104_s6 + $0x19c] sm:$0xf]  ;;  %v4976_v56 = vsel %vm12115_vm3, %v4971_v57, %v4975_v47  ;;  %v10961_v17 = vld [vmem:[%s12104_s6 + $0x198] sm:$0xf] }
 0x344   : > { %4432 = vst.msk [vmem:[#allocation2 + $0x4c] sm:$0xf] %vm4412_vm2, %v4355_v24  ;;  %v4937_v24 = vrot.slane %v4936_v50, 4  ;;  %v14364_v59 = vrot.slane %v5011_v35, 5  ;;  %v4952_v16 = vsel %vm12115_vm3, %v4947_v62, %v4951_v3  ;;  %v5041_v39 = vrot.slane %v5039_v20, 4 }
 0x345   : > { %v4353_v53 = vpop.permute.xlu0 %4352  ;;  %5099 = vrot.lane.b32.xlu1 %v4856_v33, %s11957_s4  ;;  %v10955_v33 = vld [vmem:[%s12104_s6 + $0x180] sm:$0xf]  ;;  %v4928_v61 = vsel %vm12115_vm3, %v4923_v43, %v4927_v38  ;;  %v14388_v38 = vrot.slane %v5035_v18, 5  ;;  %v5059_v40 = vshll.u32 %v10962_v46, 16  ;;  %v10960_v44 = vld [vmem:[%s12104_s6 + $0x194] sm:$0x1] }
 0x346   : > { %4431 = vst.msk [vmem:[#allocation2 + $0x48] sm:$0xf] %vm4412_vm2, %v4353_v53  ;;  %v5002_v30 = vshrl.u32 %v10955_v33, 16  ;;  %v5005_v45 = vshll.u32 %v10955_v33, 16  ;;  %v4961_v53 = vrot.slane %v4960_v32, 4  ;;  %v4942_v12 = vsel %vm12115_vm3, %v4937_v24, %v14327_v15 }
 0x347   : > { %5097 = vrot.lane.b32.xlu0 %v4846_v49, %s11957_s4  ;;  %v4359_v25 = vpop.permute.xlu1 %4358  ;;  %v4985_v15 = vrot.slane %v4984_v21, 4  ;;  %v5031_v23 = vrot.slane %v5029_v9, 5  ;;  %v5050_v33 = vshrl.u32 %v10961_v17, 16  ;;  %v5045_v0 = vshll.u32 %v10960_v44, 16  ;;  %v10968_v18 = vld [vmem:[%s12104_s6 + $0xf4] sm:$0xf] }
 0x348   : > { %4434 = vst.msk [vmem:[#allocation2 + $0x54] sm:$0xf] %vm4412_vm2, %v4359_v25  ;;  %v5004_v48 = vrot.slane %v5002_v30, 4  ;;  %v5007_v14 = vrot.slane %v5005_v45, 5  ;;  %v5026_v25 = vshrl.u32 %v10958_v1, 16  ;;  %v5061_v35 = vrot.slane %v5059_v40, 5 }
 0x349   : > { %v4357_v2 = vpop.permute.xlu0 %4356  ;;  %5103 = vrot.lane.b32.xlu1 %v4880_v10, %s11957_s4  ;;  %v4994_v10 = vor.u32 %v4993_v42, %v14350_v26  ;;  %v4990_v51 = vsel %vm12115_vm3, %v4985_v15, %v14350_v26  ;;  %v5042_v42 = vor.u32 %v5041_v39, %v14388_v38  ;;  %v10963_v45 = vld [vmem:[%s12104_s6 + $0x1a0] sm:$0x1]  ;;  %v10967_v15 = vld [vmem:[%s12104_s6 + $0xf0] sm:$0xe]  ;;  %v10974_v44 = vld [vmem:[%s12104_s6 + $0x10c] sm:$0xf] }
 0x34a   : > { %4433 = vst.msk [vmem:[#allocation2 + $0x50] sm:$0xf] %vm4412_vm2, %v4357_v2  ;;  %v4966_v2 = vsel %vm12115_vm3, %v4961_v53, %v14333_v27  ;;  %v5063_v27 = vshrl.u32 %v10962_v46, 16  ;;  %v5028_v22 = vrot.slane %v5026_v25, 4  ;;  %v5069_v57 = vshll.u32 %v10963_v45, 16 }
 0x34b   : > { %5101 = vrot.lane.b32.xlu0 %v4870_v13, %s11957_s4  ;;  %v4363_v49 = vpop.permute.xlu1 %4362  ;;  %v5017_v13 = vrot.slane %v5015_v19, 4  ;;  %v4995_v60 = vrot.slane %v4994_v10, 4  ;;  %v10965_v10 = vld [vmem:[%s12104_s6 + $0xe8] sm:$0xf]  ;;  %v5307_v46 = vrot.slane %v10968_v18, 5 }
 0x34c   : > { %4436 = vst.msk [vmem:[#allocation2 + $0x5c] sm:$0xf] %vm4412_vm2, %v4363_v49  ;;  %v5053_v49 = vshll.u32 %v10961_v17, 16  ;;  %v5065_v54 = vrot.slane %v5063_v27, 4  ;;  %v5032_v30 = vor.u32 %v5031_v23, %v5028_v22  ;;  %v11013_v27 = vrot.slane %v10967_v15, 9 }
 0x34d   : > { %v4361_v36 = vpop.permute.xlu0 %4360  ;;  %5107 = vrot.lane.b32.xlu1 %v4904_v37, %s11957_s4  ;;  %v5018_v34 = vor.u32 %v5017_v13, %v14364_v59  ;;  %v5021_v37 = vshll.u32 %v10957_v6, 16  ;;  %v5000_v31 = vsel %vm12115_vm3, %v4995_v60, %v4999_v41  ;;  %v5300_v13 = vrot.slane %v10965_v10, 5  ;;  %v10966_v6 = vld [vmem:[%s12104_s6 + $0xec] sm:$0x1]  ;;  %v10969_v60 = vld [vmem:[%s12104_s6 + $0xf8] sm:$0x1] }
 0x34e   : > { %4435 = vst.msk [vmem:[#allocation2 + $0x58] sm:$0xf] %vm4412_vm2, %v4361_v36  ;;  %v5055_v62 = vrot.slane %v5053_v49, 5  ;;  %v5066_v24 = vor.u32 %v5065_v54, %v5061_v35  ;;  %v5303_v9 = vrot.slane %v10966_v6, 5  ;;  %v10971_v41 = vld [vmem:[%s12104_s6 + $0x100] sm:$0xf] }
 0x34f   : > { %5105 = vrot.lane.b32.xlu0 %v4894_v7, %s11957_s4  ;;  %v4367_v4 = vpop.permute.xlu1 %4366  ;;  %v5008_v7 = vor.u32 %v5007_v14, %v5004_v48  ;;  %v5019_v32 = vrot.slane %v5018_v34, 4  ;;  %v5023_v36 = vrot.slane %v5021_v37, 5  ;;  %v5302_v25 = vrot.slane %v5300_v13, 4  ;;  %v10970_v23 = vld [vmem:[%s12104_s6 + $0xfc] sm:$0xe] }
 0x350   : > { %4438 = vst.msk [vmem:[#allocation2 + $0x64] sm:$0xf] %vm4412_vm2, %v4367_v4  ;;  %v5043_v4 = vrot.slane %v5042_v42, 4  ;;  %v5067_v21 = vrot.slane %v5066_v24, 4  ;;  %v5309_v37 = vrot.slane %v5307_v46, 4 }
 0x351   : > { %v4365_v8 = vpop.permute.xlu0 %4364  ;;  %5111 = vrot.lane.b32.xlu1 %v4928_v61, %s11957_s4  ;;  %v5009_v19 = vrot.slane %v5008_v7, 4  ;;  %v5052_v61 = vrot.slane %v5050_v33, 4  ;;  %v5024_v26 = vsel %vm12115_vm3, %v5019_v32, %v5023_v36  ;;  %v5304_v34 = vsel %vm12259_vm7, %v5302_v25, %v5303_v9  ;;  %v10975_v42 = vld [vmem:[%s12104_s6 + $0x110] sm:$0x1]  ;;  %v10973_v54 = vld [vmem:[%s12104_s6 + $0x108] sm:$0xe] }
 0x352   : > { %4437 = vst.msk [vmem:[#allocation2 + $0x60] sm:$0xf] %vm4412_vm2, %v4365_v8  ;;  %v5033_v8 = vrot.slane %v5032_v30, 4  ;;  %v5310_v7 = vrot.slane %v10969_v60, 5  ;;  %v5308_v32 = vsel %vm12259_vm7, %v11013_v27, %v5307_v46  ;;  %v11014_v36 = vrot.slane %v10970_v23, 9 }
 0x353   : > { %5109 = vrot.lane.b32.xlu0 %v4918_v5, %s11957_s4  ;;  %v4371_v55 = vpop.permute.xlu1 %4370  ;;  %v5047_v5 = vrot.slane %v5045_v0, 5  ;;  %v5014_v52 = vsel %vm12115_vm3, %v5009_v19, %v14364_v59  ;;  %v5056_v53 = vor.u32 %v5055_v62, %v5052_v61  ;;  %v5071_v59 = vrot.slane %v5069_v57, 5  ;;  %v10977_v0 = vld [vmem:[%s12104_s6 + $0x118] sm:$0xf]  ;;  %v10976_v24 = vld [vmem:[%s12104_s6 + $0x114] sm:$0xe] }
 0x354   : > { %4440 = vst.msk [vmem:[#allocation2 + $0x6c] sm:$0xf] %vm4412_vm2, %v4371_v55  ;;  %v5038_v14 = vsel %vm12115_vm3, %v5033_v8, %v14388_v38  ;;  %v10964_v55 = vld [vmem:[%s12104_s6 + $0xe4] sm:$0xe]  ;;  %v5314_v38 = vrot.slane %v10971_v41, 5  ;;  %v5311_v33 = vsel %vm12259_vm7, %v5309_v37, %v5310_v7  ;;  %v5324_v30 = vrot.slane %v10975_v42, 5 }
 0x355   : > { %v4369_v29 = vpop.permute.xlu0 %4368  ;;  %5115 = vrot.lane.b32.xlu1 %v4952_v16, %s11957_s4  ;;  %v5048_v1 = vsel %vm12115_vm3, %v5043_v4, %v5047_v5  ;;  %v5057_v16 = vrot.slane %v5056_v53, 4  ;;  %v5328_v45 = vrot.slane %v10977_v0, 5  ;;  %v10980_v4 = vld [vmem:[%s12104_s6 + $0x124] sm:$0xf]  ;;  %v10986_v25 = vld [vmem:[%s12104_s6 + $0x13c] sm:$0xf] }
 0x356   : > { %4439 = vst.msk [vmem:[#allocation2 + $0x68] sm:$0xf] %vm4412_vm2, %v4369_v29  ;;  %v5316_v49 = vrot.slane %v5314_v38, 4  ;;  %v5315_v62 = vsel %vm12259_vm7, %v11014_v36, %v5314_v38  ;;  %v5335_v8 = vrot.slane %v10980_v4, 5  ;;  %v10982_v46 = vld [vmem:[%s12104_s6 + $0x12c] sm:$0xe] }
 0x357   : > { %5113 = vrot.lane.b32.xlu0 %v4942_v12, %s11957_s4  ;;  %v4375_v43 = vpop.permute.xlu1 %4374  ;;  %v5072_v12 = vsel %vm12115_vm3, %v5067_v21, %v5071_v59  ;;  %v10983_v21 = vld [vmem:[%s12104_s6 + $0x130] sm:$0xf]  ;;  %v5349_v60 = vrot.slane %v10986_v25, 5  ;;  %v11018_v15 = vrot.slane %v10982_v46, 9  ;;  %v10989_v37 = vld [vmem:[%s12104_s6 + $0x148] sm:$0xf] }
 0x358   : > { %4442 = vst.msk [vmem:[#allocation2 + $0x74] sm:$0xf] %vm4412_vm2, %v4375_v43  ;;  %v10972_v43 = vld [vmem:[%s12104_s6 + $0x104] sm:$0x1]  ;;  %v5342_v6 = vrot.slane %v10983_v21, 5 }
 0x359   : > { %v4373_v50 = vpop.permute.xlu0 %4372  ;;  %5119 = vrot.lane.b32.xlu1 %v4976_v56, %s11957_s4  ;;  %v5062_v56 = vsel %vm12115_vm3, %v5057_v16, %v5061_v35  ;;  %v10985_v38 = vld [vmem:[%s12104_s6 + $0x138] sm:$0xe] }
 0x35a   : > { %4441 = vst.msk [vmem:[#allocation2 + $0x70] sm:$0xf] %vm4412_vm2, %v4373_v50  ;;  %v5317_v50 = vrot.slane %v10972_v43, 5  ;;  %v5356_v43 = vrot.slane %v10989_v37, 5  ;;  %v11019_v23 = vrot.slane %v10985_v38, 9 }
 0x35b   : > { %5117 = vrot.lane.b32.xlu0 %v4966_v2, %s11957_s4  ;;  %v4379_v58 = vpop.permute.xlu1 %4378  ;;  %v11012_v2 = vrot.slane %v10964_v55, 9 }
 0x35c   : > { %4444 = vst.msk [vmem:[#allocation2 + $0x7c] sm:$0xf] %vm4412_vm2, %v4379_v58  ;;  %v5318_v58 = vsel %vm12259_vm7, %v5316_v49, %v5317_v50  ;;  %v10992_v49 = vld [vmem:[%s12104_s6 + $0x154] sm:$0xf] }
 0x35d   : > { %v4377_v3 = vpop.permute.xlu0 %4376  ;;  %5123 = vrot.lane.b32.xlu1 %v5000_v31, %s11957_s4  ;;  %v5301_v40 = vsel %vm12259_vm7, %v11012_v2, %v5300_v13  ;;  %v5321_v31 = vrot.slane %v10974_v44, 5  ;;  %v10979_v13 = vld [vmem:[%s12104_s6 + $0x120] sm:$0xe]  ;;  %v5363_v42 = vrot.slane %v10992_v49, 5 }
 0x35e   : > { %4443 = vst.msk [vmem:[#allocation2 + $0x78] sm:$0xf] %vm4412_vm2, %v4377_v3  ;;  %v11015_v3 = vrot.slane %v10973_v54, 9  ;;  %v11017_v55 = vrot.slane %v10979_v13, 9  ;;  %vm9546_vm2 = vcmask 847648  }
 0x35f   : > { %5121 = vrot.lane.b32.xlu0 %v4990_v51, %s11957_s4  ;;  %v4515_v47 = vpop.permute.xlu1 %4514  ;;  %v5323_v19 = vrot.slane %v5321_v31, 4 }
 0x360   : > { %4610 = vst.msk [vmem:[#allocation2 + $0x4] sm:$0xf] %vm4608_vm4, %v4515_v47  ;;  %v5330_v47 = vrot.slane %v5328_v45, 4  ;;  %v5322_v10 = vsel %vm12259_vm7, %v11015_v3, %v5321_v31  ;;  %v10988_v31 = vld [vmem:[%s12104_s6 + $0x144] sm:$0xe] }
 0x361   : > { %v4513_v11 = vpop.permute.xlu0 %4512  ;;  %5127 = vrot.lane.b32.xlu1 %v5024_v26, %s11957_s4  ;;  %v10978_v26 = vld [vmem:[%s12104_s6 + $0x11c] sm:$0x1]  ;;  %v5325_v57 = vsel %vm12259_vm7, %v5323_v19, %v5324_v30  ;;  %v11020_v54 = vrot.slane %v10988_v31, 9  ;;  %v10995_v19 = vld [vmem:[%s12104_s6 + $0x160] sm:$0xf] }
 0x362   : > { %4609 = vst.msk [vmem:[#allocation2] sm:$0xf] %vm4608_vm4, %v4513_v11  ;;  %v11016_v11 = vrot.slane %v10976_v24, 9 }
 0x363   : > { %5125 = vrot.lane.b32.xlu0 %v5014_v52, %s11957_s4  ;;  %v4519_v48 = vpop.permute.xlu1 %4518  ;;  %v5331_v52 = vrot.slane %v10978_v26, 5  ;;  %v5370_v26 = vrot.slane %v10995_v19, 5 }
 0x364   : > { %4612 = vst.msk [vmem:[#allocation2 + $0xc] sm:$0xf] %vm4608_vm4, %v4519_v48 }
 0x365   : > { %v4517_v20 = vpop.permute.xlu0 %4516  ;;  %5131 = vrot.lane.b32.xlu1 %v5048_v1, %s11957_s4  ;;  %v10981_v1 = vld [vmem:[%s12104_s6 + $0x128] sm:$0x1]  ;;  %v5332_v48 = vsel %vm12259_vm7, %v5330_v47, %v5331_v52  ;;  %v10998_v47 = vld [vmem:[%s12104_s6 + $0x16c] sm:$0xf] }
 0x366   : > { %4611 = vst.msk [vmem:[#allocation2 + $0x8] sm:$0xf] %vm4608_vm4, %v4517_v20  ;;  %v5338_v16 = vrot.slane %v10981_v1, 5  ;;  %v5329_v20 = vsel %vm12259_vm7, %v11016_v11, %v5328_v45  ;;  %v10991_v45 = vld [vmem:[%s12104_s6 + $0x150] sm:$0xe]  ;;  %v5377_v1 = vrot.slane %v10998_v47, 5 }
 0x367   : > { %5129 = vrot.lane.b32.xlu0 %v5038_v14, %s11957_s4  ;;  %v4523_v29 = vpop.permute.xlu1 %4522  ;;  %v5337_v14 = vrot.slane %v5335_v8, 4  ;;  %v11021_v24 = vrot.slane %v10991_v45, 9 }
 0x368   : > { %4614 = vst.msk [vmem:[#allocation2 + $0x14] sm:$0xf] %vm4608_vm4, %v4523_v29 }
 0x369   : > { %v4521_v17 = vpop.permute.xlu0 %4520  ;;  %5135 = vrot.lane.b32.xlu1 %v5072_v12, %s11957_s4  ;;  %v10984_v12 = vld [vmem:[%s12104_s6 + $0x134] sm:$0x1]  ;;  %v5339_v29 = vsel %vm12259_vm7, %v5337_v14, %v5338_v16  ;;  %v11001_v14 = vld [vmem:[%s12104_s6 + $0x178] sm:$0xf] }
 0x36a   : > { %4613 = vst.msk [vmem:[#allocation2 + $0x10] sm:$0xf] %vm4608_vm4, %v4521_v17  ;;  %v5345_v2 = vrot.slane %v10984_v12, 5  ;;  %v5336_v17 = vsel %vm12259_vm7, %v11017_v55, %v5335_v8  ;;  %v10994_v8 = vld [vmem:[%s12104_s6 + $0x15c] sm:$0xe]  ;;  %v5384_v12 = vrot.slane %v11001_v14, 5 }
 0x36b   : > { %5133 = vrot.lane.b32.xlu0 %v5062_v56, %s11957_s4  ;;  %v4527_v39 = vpop.permute.xlu1 %4526  ;;  %v5344_v56 = vrot.slane %v5342_v6, 4  ;;  %v11022_v13 = vrot.slane %v10994_v8, 9 }
 0x36c   : > { %4616 = vst.msk [vmem:[#allocation2 + $0x1c] sm:$0xf] %vm4608_vm4, %v4527_v39 }
 0x36d   : > { %v4525_v22 = vpop.permute.xlu0 %4524  ;;  %5412 = vrot.lane.b32.xlu1 %v5304_v34, %s11958_s5  ;;  %v10987_v34 = vld [vmem:[%s12104_s6 + $0x140] sm:$0x1]  ;;  %v5346_v39 = vsel %vm12259_vm7, %v5344_v56, %v5345_v2  ;;  %v11004_v56 = vld [vmem:[%s12104_s6 + $0x184] sm:$0xf] }
 0x36e   : > { %4615 = vst.msk [vmem:[#allocation2 + $0x18] sm:$0xf] %vm4608_vm4, %v4525_v22  ;;  %v5352_v27 = vrot.slane %v10987_v34, 5  ;;  %v5343_v22 = vsel %vm12259_vm7, %v11018_v15, %v5342_v6  ;;  %v10997_v6 = vld [vmem:[%s12104_s6 + $0x168] sm:$0xe]  ;;  %v5391_v34 = vrot.slane %v11004_v56, 5 }
 0x36f   : > { %5410 = vrot.lane.b32.xlu0 %v5301_v40, %s11958_s5  ;;  %v4531_v51 = vpop.permute.xlu1 %4530  ;;  %v5351_v40 = vrot.slane %v5349_v60, 4  ;;  %v11023_v46 = vrot.slane %v10997_v6, 9  ;;  %v11038_v56 = vld [vmem:[%s12104_s6 + $0x124] sm:$0xf] }
 0x370   : > { %4618 = vst.msk [vmem:[#allocation2 + $0x24] sm:$0xf] %vm4608_vm4, %v4531_v51 }
 0x371   : > { %v4529_v35 = vpop.permute.xlu0 %4528  ;;  %5416 = vrot.lane.b32.xlu1 %v5311_v33, %s11958_s5  ;;  %v10990_v33 = vld [vmem:[%s12104_s6 + $0x14c] sm:$0x1]  ;;  %v5353_v51 = vsel %vm12259_vm7, %v5351_v40, %v5352_v27  ;;  %v11007_v40 = vld [vmem:[%s12104_s6 + $0x190] sm:$0xf] }
 0x372   : > { %4617 = vst.msk [vmem:[#allocation2 + $0x20] sm:$0xf] %vm4608_vm4, %v4529_v35  ;;  %v5359_v36 = vrot.slane %v10990_v33, 5  ;;  %v5350_v35 = vsel %vm12259_vm7, %v11019_v23, %v5349_v60  ;;  %v11000_v60 = vld [vmem:[%s12104_s6 + $0x174] sm:$0xe]  ;;  %v5398_v33 = vrot.slane %v11007_v40, 5 }
 0x373   : > { %5414 = vrot.lane.b32.xlu0 %v5308_v32, %s11958_s5  ;;  %v4535_v61 = vpop.permute.xlu1 %4534  ;;  %v5358_v32 = vrot.slane %v5356_v43, 4  ;;  %v11024_v38 = vrot.slane %v11000_v60, 9  ;;  %v11037_v60 = vld [vmem:[%s12104_s6 + $0x120] sm:$0xf] }
 0x374   : > { %4620 = vst.msk [vmem:[#allocation2 + $0x2c] sm:$0xf] %vm4608_vm4, %v4535_v61 }
 0x375   : > { %v4533_v5 = vpop.permute.xlu0 %4532  ;;  %5420 = vrot.lane.b32.xlu1 %v5318_v58, %s11958_s5  ;;  %v10993_v58 = vld [vmem:[%s12104_s6 + $0x158] sm:$0x1]  ;;  %v5360_v61 = vsel %vm12259_vm7, %v5358_v32, %v5359_v36  ;;  %v11010_v32 = vld [vmem:[%s12104_s6 + $0x19c] sm:$0xf] }
 0x376   : > { %4619 = vst.msk [vmem:[#allocation2 + $0x28] sm:$0xf] %vm4608_vm4, %v4533_v5  ;;  %v5366_v3 = vrot.slane %v10993_v58, 5  ;;  %v5357_v5 = vsel %vm12259_vm7, %v11020_v54, %v5356_v43  ;;  %v11003_v43 = vld [vmem:[%s12104_s6 + $0x180] sm:$0xe]  ;;  %v5405_v58 = vrot.slane %v11010_v32, 5 }
 0x377   : > { %5418 = vrot.lane.b32.xlu0 %v5315_v62, %s11958_s5  ;;  %v4539_v53 = vpop.permute.xlu1 %4538  ;;  %v5365_v62 = vrot.slane %v5363_v42, 4  ;;  %v11025_v31 = vrot.slane %v11003_v43, 9  ;;  %v11047_v32 = vld [vmem:[%s12104_s6 + $0x15c] sm:$0xf] }
 0x378   : > { %4622 = vst.msk [vmem:[#allocation2 + $0x34] sm:$0xf] %vm4608_vm4, %v4539_v53 }
 0x379   : > { %v4537_v59 = vpop.permute.xlu0 %4536  ;;  %5424 = vrot.lane.b32.xlu1 %v5325_v57, %s11958_s5  ;;  %v10996_v57 = vld [vmem:[%s12104_s6 + $0x164] sm:$0x1]  ;;  %v5367_v53 = vsel %vm12259_vm7, %v5365_v62, %v5366_v3  ;;  %v11009_v3 = vld [vmem:[%s12104_s6 + $0x198] sm:$0xe] }
 0x37a   : > { %4621 = vst.msk [vmem:[#allocation2 + $0x30] sm:$0xf] %vm4608_vm4, %v4537_v59  ;;  %v5373_v11 = vrot.slane %v10996_v57, 5  ;;  %v5364_v59 = vsel %vm12259_vm7, %v11021_v24, %v5363_v42  ;;  %v11006_v42 = vld [vmem:[%s12104_s6 + $0x18c] sm:$0xe]  ;;  %v11027_v47 = vrot.slane %v11009_v3, 9 }
 0x37b   : > { %5422 = vrot.lane.b32.xlu0 %v5322_v10, %s11958_s5  ;;  %v4543_v18 = vpop.permute.xlu1 %4542  ;;  %v5372_v10 = vrot.slane %v5370_v26, 4  ;;  %v11026_v45 = vrot.slane %v11006_v42, 9  ;;  %v11050_v42 = vld [vmem:[%s12104_s6 + $0x16c] sm:$0xf]  ;;  %v11064_v3 = vld [vmem:[%s12104_s6 + $0xfc] sm:$0xf] }
 0x37c   : > { %4624 = vst.msk [vmem:[#allocation2 + $0x3c] sm:$0xf] %vm4608_vm4, %v4543_v18 }
 0x37d   : > { %v4541_v9 = vpop.permute.xlu0 %4540  ;;  %5428 = vrot.lane.b32.xlu1 %v5332_v48, %s11958_s5  ;;  %v10999_v48 = vld [vmem:[%s12104_s6 + $0x170] sm:$0x1]  ;;  %v5374_v18 = vsel %vm12259_vm7, %v5372_v10, %v5373_v11  ;;  %v5399_v57 = vsel %vm12259_vm7, %v11026_v45, %v5398_v33  ;;  %v5406_v10 = vsel %vm12259_vm7, %v11027_v47, %v5405_v58  ;;  %v11065_v45 = vld [vmem:[%s12104_s6 + $0x100] sm:$0xf] }
 0x37e   : > { %4623 = vst.msk [vmem:[#allocation2 + $0x38] sm:$0xf] %vm4608_vm4, %v4541_v9  ;;  %v5380_v55 = vrot.slane %v10999_v48, 5  ;;  %v5371_v9 = vsel %vm12259_vm7, %v11022_v13, %v5370_v26  ;;  %v11032_v48 = vld [vmem:[%s12104_s6 + $0x100] sm:$0xf]  ;;  %v5817_v47 = vshll.u32 %v11065_v45, 16 }
 0x37f   : > { %5426 = vrot.lane.b32.xlu0 %v5329_v20, %s11958_s5  ;;  %v4547_v41 = vpop.permute.xlu1 %4546  ;;  %v5379_v20 = vrot.slane %v5377_v1, 4 }
 0x380   : > { %4626 = vst.msk [vmem:[#allocation2 + $0x44] sm:$0xf] %vm4608_vm4, %v4547_v41 }
 0x381   : > { %v4545_v7 = vpop.permute.xlu0 %4544  ;;  %5432 = vrot.lane.b32.xlu1 %v5339_v29, %s11958_s5  ;;  %v11002_v29 = vld [vmem:[%s12104_s6 + $0x17c] sm:$0x1]  ;;  %v5381_v41 = vsel %vm12259_vm7, %v5379_v20, %v5380_v55  ;;  %v11033_v55 = vld [vmem:[%s12104_s6 + $0x108] sm:$0xf] }
 0x382   : > { %4625 = vst.msk [vmem:[#allocation2 + $0x40] sm:$0xf] %vm4608_vm4, %v4545_v7  ;;  %v5387_v15 = vrot.slane %v11002_v29, 5  ;;  %v5378_v7 = vsel %vm12259_vm7, %v11023_v46, %v5377_v1  ;;  %v11030_v1 = vld [vmem:[%s12104_s6 + $0xf4] sm:$0xf] }
 0x383   : > { %5430 = vrot.lane.b32.xlu0 %v5336_v17, %s11958_s5  ;;  %v4551_v44 = vpop.permute.xlu1 %4550  ;;  %v5386_v17 = vrot.slane %v5384_v12, 4  ;;  %v11035_v46 = vld [vmem:[%s12104_s6 + $0x114] sm:$0xf] }
 0x384   : > { %4628 = vst.msk [vmem:[#allocation2 + $0x4c] sm:$0xf] %vm4608_vm4, %v4551_v44 }
 0x385   : > { %v4549_v50 = vpop.permute.xlu0 %4548  ;;  %5436 = vrot.lane.b32.xlu1 %v5346_v39, %s11958_s5  ;;  %v11005_v39 = vld [vmem:[%s12104_s6 + $0x188] sm:$0x1]  ;;  %v5388_v44 = vsel %vm12259_vm7, %v5386_v17, %v5387_v15  ;;  %v11040_v17 = vld [vmem:[%s12104_s6 + $0x130] sm:$0xf] }
 0x386   : > { %4627 = vst.msk [vmem:[#allocation2 + $0x48] sm:$0xf] %vm4608_vm4, %v4549_v50  ;;  %v5394_v23 = vrot.slane %v11005_v39, 5  ;;  %v5385_v50 = vsel %vm12259_vm7, %v11024_v38, %v5384_v12  ;;  %v11041_v39 = vld [vmem:[%s12104_s6 + $0x138] sm:$0xf] }
 0x387   : > { %5434 = vrot.lane.b32.xlu0 %v5343_v22, %s11958_s5  ;;  %v4555_v0 = vpop.permute.xlu1 %4554  ;;  %v5393_v22 = vrot.slane %v5391_v34, 4 }
 0x388   : > { %4630 = vst.msk [vmem:[#allocation2 + $0x54] sm:$0xf] %vm4608_vm4, %v4555_v0 }
 0x389   : > { %v4553_v30 = vpop.permute.xlu0 %4552  ;;  %5440 = vrot.lane.b32.xlu1 %v5353_v51, %s11958_s5  ;;  %v11008_v51 = vld [vmem:[%s12104_s6 + $0x194] sm:$0x1]  ;;  %v5395_v0 = vsel %vm12259_vm7, %v5393_v22, %v5394_v23 }
 0x38a   : > { %4629 = vst.msk [vmem:[#allocation2 + $0x50] sm:$0xf] %vm4608_vm4, %v4553_v30  ;;  %v5401_v54 = vrot.slane %v11008_v51, 5  ;;  %v5392_v30 = vsel %vm12259_vm7, %v11025_v31, %v5391_v34  ;;  %v11039_v34 = vld [vmem:[%s12104_s6 + $0x12c] sm:$0xf] }
 0x38b   : > { %5438 = vrot.lane.b32.xlu0 %v5350_v35, %s11958_s5  ;;  %v4559_v4 = vpop.permute.xlu1 %4558  ;;  %v5400_v35 = vrot.slane %v5398_v33, 4  ;;  %v11046_v23 = vld [vmem:[%s12104_s6 + $0x154] sm:$0xf]  ;;  %v11048_v31 = vld [vmem:[%s12104_s6 + $0x160] sm:$0xf] }
 0x38c   : > { %4632 = vst.msk [vmem:[#allocation2 + $0x5c] sm:$0xf] %vm4608_vm4, %v4559_v4  ;;  %v5407_v4 = vrot.slane %v5405_v58, 4  ;;  %v11062_v58 = vld [vmem:[%s12104_s6 + $0xf4] sm:$0xf] }
 0x38d   : > { %v4557_v52 = vpop.permute.xlu0 %4556  ;;  %5444 = vrot.lane.b32.xlu1 %v5360_v61, %s11958_s5  ;;  %v11011_v61 = vld [vmem:[%s12104_s6 + $0x1a0] sm:$0x1]  ;;  %v5402_v26 = vsel %vm12259_vm7, %v5400_v35, %v5401_v54  ;;  %v11049_v35 = vld [vmem:[%s12104_s6 + $0x168] sm:$0xf] }
 0x38e   : > { %4631 = vst.msk [vmem:[#allocation2 + $0x58] sm:$0xf] %vm4608_vm4, %v4557_v52 }
 0x38f   : > { %5442 = vrot.lane.b32.xlu0 %v5357_v5, %s11958_s5  ;;  %v4563_v21 = vpop.permute.xlu1 %4562  ;;  %v5408_v5 = vrot.slane %v11011_v61, 5 }
 0x390   : > { %4634 = vst.msk [vmem:[#allocation2 + $0x64] sm:$0xf] %vm4608_vm4, %v4563_v21 }
 0x391   : > { %v4561_v16 = vpop.permute.xlu0 %4560  ;;  %5448 = vrot.lane.b32.xlu1 %v5367_v53, %s11958_s5  ;;  %v5409_v8 = vsel %vm12259_vm7, %v5407_v4, %v5408_v5  ;;  %v5793_v4 = vshll.u32 %v11062_v58, 16  ;;  %v5797_v5 = vshrl.u32 %v11062_v58, 16 }
 0x392   : > { %4633 = vst.msk [vmem:[#allocation2 + $0x60] sm:$0xf] %vm4608_vm4, %v4561_v16  ;;  %v11031_v16 = vld [vmem:[%s12104_s6 + $0xfc] sm:$0xf] }
 0x393   : > { %5446 = vrot.lane.b32.xlu0 %v5364_v59, %s11958_s5  ;;  %v4567_v25 = vpop.permute.xlu1 %4566  ;;  %v11029_v59 = vld [vmem:[%s12104_s6 + $0xf0] sm:$0xf] }
 0x394   : > { %4636 = vst.msk [vmem:[#allocation2 + $0x6c] sm:$0xf] %vm4608_vm4, %v4567_v25  ;;  %v11036_v25 = vld [vmem:[%s12104_s6 + $0x118] sm:$0xf] }
 0x395   : > { %v4565_v2 = vpop.permute.xlu0 %4564  ;;  %5452 = vrot.lane.b32.xlu1 %v5374_v18, %s11958_s5  ;;  %v11034_v18 = vld [vmem:[%s12104_s6 + $0x10c] sm:$0xf] }
 0x396   : > { %4635 = vst.msk [vmem:[#allocation2 + $0x68] sm:$0xf] %vm4608_vm4, %v4565_v2 }
 0x397   : > { %5450 = vrot.lane.b32.xlu0 %v5371_v9, %s11958_s5  ;;  %v4571_v37 = vpop.permute.xlu1 %4570 }
 0x398   : > { %4638 = vst.msk [vmem:[#allocation2 + $0x74] sm:$0xf] %vm4608_vm4, %v4571_v37 }
 0x399   : > { %v4569_v27 = vpop.permute.xlu0 %4568  ;;  %5456 = vrot.lane.b32.xlu1 %v5381_v41, %s11958_s5 }
 0x39a   : > { %4637 = vst.msk [vmem:[#allocation2 + $0x70] sm:$0xf] %vm4608_vm4, %v4569_v27  ;;  %v11044_v27 = vld [vmem:[%s12104_s6 + $0x148] sm:$0xf] }
 0x39b   : > { %5454 = vrot.lane.b32.xlu0 %v5378_v7, %s11958_s5  ;;  %v4575_v49 = vpop.permute.xlu1 %4574  ;;  %v11042_v7 = vld [vmem:[%s12104_s6 + $0x13c] sm:$0xf] }
 0x39c   : > { %4640 = vst.msk [vmem:[#allocation2 + $0x7c] sm:$0xf] %vm4608_vm4, %v4575_v49  ;;  %v11045_v49 = vld [vmem:[%s12104_s6 + $0x150] sm:$0xf] }
 0x39d   : > { %v4573_v36 = vpop.permute.xlu0 %4572  ;;  %5460 = vrot.lane.b32.xlu1 %v5388_v44, %s11958_s5  ;;  %v11043_v44 = vld [vmem:[%s12104_s6 + $0x144] sm:$0xf] }
 0x39e   : > { %4639 = vst.msk [vmem:[#allocation2 + $0x78] sm:$0xf] %vm4608_vm4, %v4573_v36  ;;  %vm9883_vm4 = vcmask 880448  }
 0x39f   : > { %5458 = vrot.lane.b32.xlu0 %v5385_v50, %s11958_s5  ;;  %v5076_v19 = vpop.permute.xlu1 %5075 }
 0x3a0   : > { %5171 = vst.msk [vmem:[#allocation2 + $0x4] sm:$0xf] %vm5169_vm5, %v5076_v19  ;;  %v11061_v19 = vld [vmem:[%s12104_s6 + $0xf0] sm:$0xf] }
 0x3a1   : > { %v5074_v62 = vpop.permute.xlu0 %5073  ;;  %5464 = vrot.lane.b32.xlu1 %v5395_v0, %s11958_s5 }
 0x3a2   : > { %5170 = vst.msk [vmem:[#allocation2] sm:$0xf] %vm5169_vm5, %v5074_v62  ;;  %v11051_v62 = vld [vmem:[%s12104_s6 + $0x174] sm:$0xf] }
 0x3a3   : > { %5462 = vrot.lane.b32.xlu0 %v5392_v30, %s11958_s5  ;;  %v5080_v24 = vpop.permute.xlu1 %5079  ;;  %v11052_v30 = vld [vmem:[%s12104_s6 + $0x178] sm:$0xf] }
 0x3a4   : > { %5173 = vst.msk [vmem:[#allocation2 + $0xc] sm:$0xf] %vm5169_vm5, %v5080_v24  ;;  %v5784_v24 = vshrl.u32 %v11061_v19, 16 }
 0x3a5   : > { %v5078_v52 = vpop.permute.xlu0 %5077  ;;  %5468 = vrot.lane.b32.xlu1 %v5402_v26, %s11958_s5 }
 0x3a6   : > { %5172 = vst.msk [vmem:[#allocation2 + $0x8] sm:$0xf] %vm5169_vm5, %v5078_v52  ;;  %v5821_v52 = vshrl.u32 %v11065_v45, 16  ;;  %v11074_v45 = vld [vmem:[%s12104_s6 + $0x124] sm:$0xf] }
 0x3a7   : > { %5466 = vrot.lane.b32.xlu0 %v5399_v57, %s11958_s5  ;;  %v5084_v53 = vpop.permute.xlu1 %5083  ;;  %v5787_v57 = vshll.u32 %v11061_v19, 16 }
 0x3a8   : > { %5175 = vst.msk [vmem:[#allocation2 + $0x14] sm:$0xf] %vm5169_vm5, %v5084_v53  ;;  %v5808_v53 = vshrl.u32 %v11064_v3, 16 }
 0x3a9   : > { %v5082_v11 = vpop.permute.xlu0 %5081  ;;  %5472 = vrot.lane.b32.xlu1 %v5409_v8, %s11958_s5  ;;  %v11054_v8 = vld [vmem:[%s12104_s6 + $0x184] sm:$0xf] }
 0x3aa   : > { %5174 = vst.msk [vmem:[#allocation2 + $0x10] sm:$0xf] %vm5169_vm5, %v5082_v11 }
 0x3ab   : > { %5470 = vrot.lane.b32.xlu0 %v5406_v10, %s11958_s5  ;;  %v5088_v21 = vpop.permute.xlu1 %5087  ;;  %v5811_v10 = vshll.u32 %v11064_v3, 16 }
 0x3ac   : > { %5177 = vst.msk [vmem:[#allocation2 + $0x1c] sm:$0xf] %vm5169_vm5, %v5088_v21  ;;  %v11068_v21 = vld [vmem:[%s12104_s6 + $0x10c] sm:$0xf] }
 0x3ad   : > { %v5086_v13 = vpop.permute.xlu0 %5085  ;;  %5608 = vrot.lane.b32.xlu1 %v11030_v1, %s11959_s7  ;;  %v11053_v1 = vld [vmem:[%s12104_s6 + $0x180] sm:$0xf] }
 0x3ae   : > { %5176 = vst.msk [vmem:[#allocation2 + $0x18] sm:$0xf] %vm5169_vm5, %v5086_v13  ;;  %v11056_v13 = vld [vmem:[%s12104_s6 + $0x190] sm:$0xf] }
 0x3af   : > { %5606 = vrot.lane.b32.xlu0 %v11029_v59, %s11959_s7  ;;  %v5092_v14 = vpop.permute.xlu1 %5091 }
 0x3b0   : > { %5179 = vst.msk [vmem:[#allocation2 + $0x24] sm:$0xf] %vm5169_vm5, %v5092_v14  ;;  %v5799_v14 = vrot.slane %v5797_v5, 4 }
 0x3b1   : > { %v5090_v6 = vpop.permute.xlu0 %5089  ;;  %5612 = vrot.lane.b32.xlu1 %v11032_v48, %s11959_s7  ;;  %v14689_v48 = vrot.slane %v5793_v4, 5 }
 0x3b2   : > { %5178 = vst.msk [vmem:[#allocation2 + $0x20] sm:$0xf] %vm5169_vm5, %v5090_v6  ;;  %v5789_v6 = vrot.slane %v5787_v57, 5  ;;  %v11059_v57 = vld [vmem:[%s12104_s6 + $0x1a4] sm:$0xf] }
 0x3b3   : > { %5610 = vrot.lane.b32.xlu0 %v11031_v16, %s11959_s7  ;;  %v5096_v20 = vpop.permute.xlu1 %5095  ;;  %v5786_v16 = vrot.slane %v5784_v24, 4 }
 0x3b4   : > { %5181 = vst.msk [vmem:[#allocation2 + $0x2c] sm:$0xf] %vm5169_vm5, %v5096_v20  ;;  %v11066_v20 = vld [vmem:[%s12104_s6 + $0x104] sm:$0x1] }
 0x3b5   : > { %v5094_v12 = vpop.permute.xlu0 %5093  ;;  %5616 = vrot.lane.b32.xlu1 %v11034_v18, %s11959_s7  ;;  %v11063_v18 = vld [vmem:[%s12104_s6 + $0xf8] sm:$0x1] }
 0x3b6   : > { %5180 = vst.msk [vmem:[#allocation2 + $0x28] sm:$0xf] %vm5169_vm5, %v5094_v12  ;;  %v5823_v12 = vrot.slane %v5821_v52, 4 }
 0x3b7   : > { %5614 = vrot.lane.b32.xlu0 %v11033_v55, %s11959_s7  ;;  %v5100_v9 = vpop.permute.xlu1 %5099  ;;  %v14695_v55 = vrot.slane %v5817_v47, 5 }
 0x3b8   : > { %5183 = vst.msk [vmem:[#allocation2 + $0x34] sm:$0xf] %vm5169_vm5, %v5100_v9  ;;  %v5813_v9 = vrot.slane %v5811_v10, 5 }
 0x3b9   : > { %v5098_v29 = vpop.permute.xlu0 %5097  ;;  %5620 = vrot.lane.b32.xlu1 %v11036_v25, %s11959_s7  ;;  %v5810_v25 = vrot.slane %v5808_v53, 4 }
 0x3ba   : > { %5182 = vst.msk [vmem:[#allocation2 + $0x30] sm:$0xf] %vm5169_vm5, %v5098_v29  ;;  %v5845_v29 = vshrl.u32 %v11068_v21, 16 }
 0x3bb   : > { %5618 = vrot.lane.b32.xlu0 %v11035_v46, %s11959_s7  ;;  %v5104_v2 = vpop.permute.xlu1 %5103  ;;  %v5841_v46 = vshll.u32 %v11068_v21, 16  ;;  %v5893_v21 = vshrl.u32 %v11074_v45, 16 }
 0x3bc   : > { %5185 = vst.msk [vmem:[#allocation2 + $0x3c] sm:$0xf] %vm5169_vm5, %v5104_v2 }
 0x3bd   : > { %v5102_v41 = vpop.permute.xlu0 %5101  ;;  %5624 = vrot.lane.b32.xlu1 %v11038_v56, %s11959_s7  ;;  %v11067_v56 = vld [vmem:[%s12104_s6 + $0x108] sm:$0xf] }
 0x3be   : > { %5184 = vst.msk [vmem:[#allocation2 + $0x38] sm:$0xf] %vm5169_vm5, %v5102_v41 }
 0x3bf   : > { %5622 = vrot.lane.b32.xlu0 %v11037_v60, %s11959_s7  ;;  %v5108_v15 = vpop.permute.xlu1 %5107  ;;  %v11055_v60 = vld [vmem:[%s12104_s6 + $0x18c] sm:$0xf] }
 0x3c0   : > { %5187 = vst.msk [vmem:[#allocation2 + $0x44] sm:$0xf] %vm5169_vm5, %v5108_v15  ;;  %v5803_v15 = vshll.u32 %v11063_v18, 16 }
 0x3c1   : > { %v5106_v37 = vpop.permute.xlu0 %5105  ;;  %5628 = vrot.lane.b32.xlu1 %v11040_v17, %s11959_s7  ;;  %v5800_v17 = vor.u32 %v5799_v14, %v14689_v48 }
 0x3c2   : > { %5186 = vst.msk [vmem:[#allocation2 + $0x40] sm:$0xf] %vm5169_vm5, %v5106_v37  ;;  %v5827_v37 = vshll.u32 %v11066_v20, 16 }
 0x3c3   : > { %5626 = vrot.lane.b32.xlu0 %v11039_v34, %s11959_s7  ;;  %v5112_v38 = vpop.permute.xlu1 %5111  ;;  %v5790_v34 = vor.u32 %v5789_v6, %v5786_v16  ;;  %v11077_v6 = vld [vmem:[%s12104_s6 + $0x130] sm:$0xf] }
 0x3c4   : > { %5189 = vst.msk [vmem:[#allocation2 + $0x4c] sm:$0xf] %vm5169_vm5, %v5112_v38  ;;  %v11070_v38 = vld [vmem:[%s12104_s6 + $0x114] sm:$0xf]  ;;  %v14714_v58 = vrot.slane %v5827_v37, 5 }
 0x3c5   : > { %v5110_v40 = vpop.permute.xlu0 %5109  ;;  %5632 = vrot.lane.b32.xlu1 %v11042_v7, %s11959_s7  ;;  %v11071_v7 = vld [vmem:[%s12104_s6 + $0x118] sm:$0xf] }
 0x3c6   : > { %5188 = vst.msk [vmem:[#allocation2 + $0x48] sm:$0xf] %vm5169_vm5, %v5110_v40  ;;  %v5824_v40 = vor.u32 %v5823_v12, %v14695_v55 }
 0x3c7   : > { %5630 = vrot.lane.b32.xlu0 %v11041_v39, %s11959_s7  ;;  %v5116_v43 = vpop.permute.xlu1 %5115  ;;  %v11058_v39 = vld [vmem:[%s12104_s6 + $0x19c] sm:$0xf] }
 0x3c8   : > { %5191 = vst.msk [vmem:[#allocation2 + $0x54] sm:$0xf] %vm5169_vm5, %v5116_v43  ;;  %v5814_v43 = vor.u32 %v5813_v9, %v5810_v25  ;;  %v14718_v19 = vrot.slane %v5824_v40, 4  ;;  %v11076_v9 = vld [vmem:[%s12104_s6 + $0x12c] sm:$0xf] }
 0x3c9   : > { %v5114_v22 = vpop.permute.xlu0 %5113  ;;  %5636 = vrot.lane.b32.xlu1 %v11044_v27, %s11959_s7  ;;  %v5832_v27 = vshrl.u32 %v11067_v56, 16  ;;  %v5904_v40 = vshrl.u32 %v11076_v9, 16 }
 0x3ca   : > { %5190 = vst.msk [vmem:[#allocation2 + $0x50] sm:$0xf] %vm5169_vm5, %v5114_v22  ;;  %v14710_v22 = vrot.slane %v5841_v46, 5  ;;  %v14724_v3 = vrot.slane %v5814_v43, 4  ;;  %v5830_v18 = vsel %vm12115_vm3, %v14718_v19, %v14714_v58  ;;  %v11083_v58 = vld [vmem:[%s12104_s6 + $0x148] sm:$0xf] }
 0x3cb   : > { %5634 = vrot.lane.b32.xlu0 %v11043_v44, %s11959_s7  ;;  %v5120_v33 = vpop.permute.xlu1 %5119  ;;  %v11069_v44 = vld [vmem:[%s12104_s6 + $0x110] sm:$0x1]  ;;  %v5834_v4 = vrot.slane %v5832_v27, 4  ;;  %v5907_v27 = vshll.u32 %v11076_v9, 16  ;;  %v11082_v19 = vld [vmem:[%s12104_s6 + $0x144] sm:$0xf] }
 0x3cc   : > { %5193 = vst.msk [vmem:[#allocation2 + $0x5c] sm:$0xf] %vm5169_vm5, %v5120_v33  ;;  %v5835_v33 = vshll.u32 %v11067_v56, 16  ;;  %v5820_v20 = vsel %vm12115_vm3, %v14724_v3, %v14695_v55  ;;  %v5895_v55 = vrot.slane %v5893_v21, 4  ;;  %v11078_v3 = vld [vmem:[%s12104_s6 + $0x134] sm:$0x1] }
 0x3cd   : > { %v5118_v50 = vpop.permute.xlu0 %5117  ;;  %5640 = vrot.lane.b32.xlu1 %v11046_v23, %s11959_s7  ;;  %v5847_v23 = vrot.slane %v5845_v29, 4 }
 0x3ce   : > { %5192 = vst.msk [vmem:[#allocation2 + $0x58] sm:$0xf] %vm5169_vm5, %v5118_v50  ;;  %v11057_v50 = vld [vmem:[%s12104_s6 + $0x198] sm:$0xf]  ;;  %v5837_v5 = vrot.slane %v5835_v33, 5 }
 0x3cf   : > { %5638 = vrot.lane.b32.xlu0 %v11045_v49, %s11959_s7  ;;  %v5124_v51 = vpop.permute.xlu1 %5123 }
 0x3d0   : > { %5195 = vst.msk [vmem:[#allocation2 + $0x64] sm:$0xf] %vm5169_vm5, %v5124_v51  ;;  %v5869_v51 = vshrl.u32 %v11071_v7, 16  ;;  %v5838_v25 = vor.u32 %v5837_v5, %v5834_v4 }
 0x3d1   : > { %v5122_v36 = vpop.permute.xlu0 %5121  ;;  %5644 = vrot.lane.b32.xlu1 %v11048_v31, %s11959_s7  ;;  %v5865_v31 = vshll.u32 %v11071_v7, 16  ;;  %v5913_v7 = vshll.u32 %v11077_v6, 16 }
 0x3d2   : > { %5194 = vst.msk [vmem:[#allocation2 + $0x60] sm:$0xf] %vm5169_vm5, %v5122_v36  ;;  %v5859_v36 = vshll.u32 %v11070_v38, 16  ;;  %v5871_v52 = vrot.slane %v5869_v51, 4 }
 0x3d3   : > { %5642 = vrot.lane.b32.xlu0 %v11047_v32, %s11959_s7  ;;  %v5128_v0 = vpop.permute.xlu1 %5127  ;;  %v5856_v32 = vshrl.u32 %v11070_v38, 16  ;;  %v14728_v47 = vrot.slane %v5865_v31, 5 }
 0x3d4   : > { %5197 = vst.msk [vmem:[#allocation2 + $0x6c] sm:$0xf] %vm5169_vm5, %v5128_v0  ;;  %v5801_v0 = vrot.slane %v5800_v17, 4  ;;  %v5861_v53 = vrot.slane %v5859_v36, 5 }
 0x3d5   : > { %v5126_v54 = vpop.permute.xlu0 %5125  ;;  %5648 = vrot.lane.b32.xlu1 %v11050_v42, %s11959_s7  ;;  %v5872_v29 = vor.u32 %v5871_v52, %v14728_v47 }
 0x3d6   : > { %5196 = vst.msk [vmem:[#allocation2 + $0x68] sm:$0xf] %vm5169_vm5, %v5126_v54  ;;  %v5791_v54 = vrot.slane %v5790_v34, 4 }
 0x3d7   : > { %5646 = vrot.lane.b32.xlu0 %v11049_v35, %s11959_s7  ;;  %v5132_v61 = vpop.permute.xlu1 %5131  ;;  %v5805_v35 = vrot.slane %v5803_v15, 5  ;;  %v11075_v15 = vld [vmem:[%s12104_s6 + $0x128] sm:$0x1]  ;;  %v5873_v31 = vrot.slane %v5872_v29, 4 }
 0x3d8   : > { %5199 = vst.msk [vmem:[#allocation2 + $0x74] sm:$0xf] %vm5169_vm5, %v5132_v61  ;;  %v11073_v61 = vld [vmem:[%s12104_s6 + $0x120] sm:$0xf]  ;;  %v5796_v14 = vsel %vm12115_vm3, %v5791_v54, %v14689_v48  ;;  %v14770_v54 = vrot.slane %v5913_v7, 5 }
 0x3d9   : > { %v5130_v26 = vpop.permute.xlu0 %5129  ;;  %5652 = vrot.lane.b32.xlu1 %v11052_v30, %s11959_s7  ;;  %v5851_v30 = vshll.u32 %v11069_v44, 16  ;;  %v5883_v16 = vshll.u32 %v11073_v61, 16 }
 0x3da   : > { %5198 = vst.msk [vmem:[#allocation2 + $0x70] sm:$0xf] %vm5169_vm5, %v5130_v26  ;;  %v5848_v26 = vor.u32 %v5847_v23, %v14710_v22 }
 0x3db   : > { %5650 = vrot.lane.b32.xlu0 %v11051_v62, %s11959_s7  ;;  %v5136_v11 = vpop.permute.xlu1 %5135  ;;  %v11060_v62 = vld [vmem:[%s12104_s6 + $0x1a8] sm:$0xf]  ;;  %v14749_v12 = vrot.slane %v5851_v30, 5  ;;  %v5885_v38 = vrot.slane %v5883_v16, 5  ;;  %v11086_v16 = vld [vmem:[%s12104_s6 + $0x154] sm:$0xf] }
 0x3dc   : > { %5201 = vst.msk [vmem:[#allocation2 + $0x7c] sm:$0xf] %vm5169_vm5, %v5136_v11  ;;  %v11072_v11 = vld [vmem:[%s12104_s6 + $0x11c] sm:$0x1]  ;;  %v14752_v46 = vrot.slane %v5848_v26, 4 }
 0x3dd   : > { %v5134_v59 = vpop.permute.xlu0 %5133  ;;  %5656 = vrot.lane.b32.xlu1 %v11054_v8, %s11959_s7  ;;  %v5858_v8 = vrot.slane %v5856_v32, 4  ;;  %v5875_v56 = vshll.u32 %v11072_v11, 16  ;;  %v5899_v32 = vshll.u32 %v11075_v15, 16  ;;  %v5952_v11 = vshrl.u32 %v11082_v19, 16 }
 0x3de   : > { %5200 = vst.msk [vmem:[#allocation2 + $0x78] sm:$0xf] %vm5169_vm5, %v5134_v59  ;;  %v5880_v59 = vshrl.u32 %v11073_v61, 16  ;;  %v5906_v61 = vrot.slane %v5904_v40, 4 }
 0x3df   : > { %5654 = vrot.lane.b32.xlu0 %v11053_v1, %s11959_s7  ;;  %v5413_v2 = vpop.permute.xlu1 %5412  ;;  %v5889_v1 = vshll.u32 %v11074_v45, 16  ;;  %v5877_v51 = vrot.slane %v5875_v56, 5 }
 0x3e0   : > { %5508 = vst.msk [vmem:[#allocation2 + $0x4] sm:$0xf] %vm5506_vm6, %v5413_v2  ;;  %v5862_v2 = vor.u32 %v5861_v53, %v5858_v8  ;;  %v5882_v37 = vrot.slane %v5880_v59, 4  ;;  %v11081_v8 = vld [vmem:[%s12104_s6 + $0x140] sm:$0x1]  ;;  %v5961_v53 = vshll.u32 %v11083_v58, 16 }
 0x3e1   : > { %v5411_v41 = vpop.permute.xlu0 %5410  ;;  %5660 = vrot.lane.b32.xlu1 %v11056_v13, %s11959_s7  ;;  %v5806_v13 = vsel %vm12115_vm3, %v5801_v0, %v5805_v35  ;;  %v14759_v34 = vrot.slane %v5889_v1, 5  ;;  %v5878_v21 = vsel %vm12115_vm3, %v5873_v31, %v5877_v51 }
 0x3e2   : > { %5507 = vst.msk [vmem:[#allocation2] sm:$0xf] %vm5506_vm6, %v5411_v41  ;;  %v11079_v41 = vld [vmem:[%s12104_s6 + $0x138] sm:$0xf]  ;;  %v5863_v0 = vrot.slane %v5862_v2, 4  ;;  %v5886_v30 = vor.u32 %v5885_v38, %v5882_v37  ;;  %v14797_v29 = vrot.slane %v5961_v53, 5 }
 0x3e3   : > { %5658 = vrot.lane.b32.xlu0 %v11055_v60, %s11959_s7  ;;  %v5417_v49 = vpop.permute.xlu1 %5416  ;;  %v11080_v60 = vld [vmem:[%s12104_s6 + $0x13c] sm:$0xf]  ;;  %v5928_v23 = vshrl.u32 %v11079_v41, 16  ;;  %v5931_v33 = vshll.u32 %v11079_v41, 16  ;;  %v5896_v35 = vor.u32 %v5895_v55, %v14759_v34  ;;  %v5954_v2 = vrot.slane %v5952_v11, 4 }
 0x3e4   : > { %5510 = vst.msk [vmem:[#allocation2 + $0xc] sm:$0xf] %vm5506_vm6, %v5417_v49  ;;  %v5937_v43 = vshll.u32 %v11080_v60, 16  ;;  %v5941_v44 = vshrl.u32 %v11080_v60, 16  ;;  %v5868_v59 = vsel %vm12115_vm3, %v5863_v0, %v14728_v47  ;;  %v5947_v47 = vshll.u32 %v11081_v8, 16 }
 0x3e5   : > { %v5415_v42 = vpop.permute.xlu0 %5414  ;;  %5664 = vrot.lane.b32.xlu1 %v11058_v39, %s11959_s7  ;;  %v5917_v39 = vshrl.u32 %v11077_v6, 16  ;;  %v5930_v5 = vrot.slane %v5928_v23, 4  ;;  %v5985_v60 = vshll.u32 %v11086_v16, 16  ;;  %v5989_v55 = vshrl.u32 %v11086_v16, 16  ;;  %v11090_v16 = vld [vmem:[%s12104_s6 + $0x164] sm:$0x1] }
 0x3e6   : > { %5509 = vst.msk [vmem:[#allocation2 + $0x8] sm:$0xf] %vm5506_vm6, %v5415_v42  ;;  %v5854_v42 = vsel %vm12115_vm3, %v14752_v46, %v14749_v12  ;;  %v14778_v26 = vrot.slane %v5937_v43, 5  ;;  %v5943_v4 = vrot.slane %v5941_v44, 4  ;;  %v11085_v12 = vld [vmem:[%s12104_s6 + $0x150] sm:$0xf] }
 0x3e7   : > { %5662 = vrot.lane.b32.xlu0 %v11057_v50, %s11959_s7  ;;  %v5421_v24 = vpop.permute.xlu1 %5420  ;;  %v5839_v50 = vrot.slane %v5838_v25, 4  ;;  %v5919_v45 = vrot.slane %v5917_v39, 4  ;;  %v5887_v25 = vrot.slane %v5886_v30, 4  ;;  %v5976_v37 = vshrl.u32 %v11085_v12, 16 }
 0x3e8   : > { %5512 = vst.msk [vmem:[#allocation2 + $0x14] sm:$0xf] %vm5506_vm6, %v5421_v24  ;;  %v5933_v24 = vrot.slane %v5931_v33, 5  ;;  %v5944_v9 = vor.u32 %v5943_v4, %v14778_v26  ;;  %v5979_v7 = vshll.u32 %v11085_v12, 16  ;;  %v14811_v23 = vrot.slane %v5947_v47, 5 }
 0x3e9   : > { %v5419_v10 = vpop.permute.xlu0 %5418  ;;  %5668 = vrot.lane.b32.xlu1 %v11060_v62, %s11959_s7  ;;  %v5909_v62 = vrot.slane %v5907_v27, 5  ;;  %v5844_v52 = vsel %vm12115_vm3, %v5839_v50, %v14710_v22  ;;  %v5897_v22 = vrot.slane %v5896_v35, 4  ;;  %v5920_v6 = vor.u32 %v5919_v45, %v14770_v54  ;;  %v11089_v33 = vld [vmem:[%s12104_s6 + $0x160] sm:$0xf] }
 0x3ea   : > { %5511 = vst.msk [vmem:[#allocation2 + $0x10] sm:$0xf] %vm5506_vm6, %v5419_v10  ;;  %v5965_v10 = vshrl.u32 %v11083_v58, 16  ;;  %v5892_v43 = vsel %vm12115_vm3, %v5887_v25, %v14759_v34  ;;  %v14809_v44 = vrot.slane %v5944_v9, 4  ;;  %v5991_v0 = vrot.slane %v5989_v55, 4 }
 0x3eb   : > { %5666 = vrot.lane.b32.xlu0 %v11059_v57, %s11959_s7  ;;  %v5425_v48 = vpop.permute.xlu1 %5424  ;;  %v5921_v38 = vrot.slane %v5920_v6, 4  ;;  %v5978_v35 = vrot.slane %v5976_v37, 4  ;;  %v5981_v58 = vrot.slane %v5979_v7, 5  ;;  %v6009_v30 = vshll.u32 %v11089_v33, 16 }
 0x3ec   : > { %5514 = vst.msk [vmem:[#allocation2 + $0x1c] sm:$0xf] %vm5506_vm6, %v5425_v48  ;;  %v5934_v48 = vor.u32 %v5933_v24, %v5930_v5  ;;  %v5967_v56 = vrot.slane %v5965_v10, 4  ;;  %v6013_v45 = vshrl.u32 %v11089_v33, 16  ;;  %v11092_v5 = vld [vmem:[%s12104_s6 + $0x16c] sm:$0xf] }
 0x3ed   : > { %v5423_v17 = vpop.permute.xlu0 %5422  ;;  %6169 = vrot.lane.b32.xlu1 %v5806_v13, %s11960_s17  ;;  %v5901_v13 = vrot.slane %v5899_v32, 5  ;;  %v11091_v10 = vld [vmem:[%s12104_s6 + $0x168] sm:$0xf]  ;;  %v6037_v12 = vshrl.u32 %v11092_v5, 16  ;;  %v6019_v55 = vshll.u32 %v11090_v16, 16 }
 0x3ee   : > { %5513 = vst.msk [vmem:[#allocation2 + $0x18] sm:$0xf] %vm5506_vm6, %v5423_v17  ;;  %v11084_v17 = vld [vmem:[%s12104_s6 + $0x14c] sm:$0x1]  ;;  %v14815_v31 = vrot.slane %v5934_v48, 4  ;;  %v5968_v51 = vor.u32 %v5967_v56, %v14797_v29  ;;  %v6024_v25 = vshrl.u32 %v11091_v10, 16 }
 0x3ef   : > { %6167 = vrot.lane.b32.xlu0 %v5796_v14, %s11960_s17  ;;  %v5429_v49 = vpop.permute.xlu1 %5428  ;;  %v5955_v14 = vshll.u32 %v11082_v19, 16  ;;  %v5902_v27 = vsel %vm12115_vm3, %v5897_v22, %v5901_v13  ;;  %v5971_v32 = vshll.u32 %v11084_v17, 16  ;;  %v11087_v19 = vld [vmem:[%s12104_s6 + $0x158] sm:$0x1]  ;;  %v14847_v22 = vrot.slane %v6009_v30, 5 }
 0x3f0   : > { %5516 = vst.msk [vmem:[#allocation2 + $0x24] sm:$0xf] %vm5506_vm6, %v5429_v49  ;;  %v11088_v49 = vld [vmem:[%s12104_s6 + $0x15c] sm:$0xf]  ;;  %v5969_v8 = vrot.slane %v5968_v51, 4  ;;  %v6027_v9 = vshll.u32 %v11091_v10, 16 }
 0x3f1   : > { %v5427_v36 = vpop.permute.xlu0 %5426  ;;  %6173 = vrot.lane.b32.xlu1 %v5830_v18, %s11960_s17  ;;  %v5923_v18 = vshll.u32 %v11078_v3, 16  ;;  %v5957_v15 = vrot.slane %v5955_v14, 5  ;;  %v6003_v4 = vshll.u32 %v11088_v49, 16  ;;  %v5973_v53 = vrot.slane %v5971_v32, 5  ;;  %v11095_v13 = vld [vmem:[%s12104_s6 + $0x178] sm:$0xf] }
 0x3f2   : > { %5515 = vst.msk [vmem:[#allocation2 + $0x20] sm:$0xf] %vm5506_vm6, %v5427_v36  ;;  %v14818_v36 = vrot.slane %v5985_v60, 5  ;;  %v11094_v14 = vld [vmem:[%s12104_s6 + $0x174] sm:$0xf]  ;;  %v6057_v48 = vshll.u32 %v11095_v13, 16 }
 0x3f3   : > { %6171 = vrot.lane.b32.xlu0 %v5820_v20, %s11960_s17  ;;  %v5433_v57 = vpop.permute.xlu1 %5432  ;;  %v5910_v20 = vor.u32 %v5909_v62, %v5906_v61  ;;  %v5925_v39 = vrot.slane %v5923_v18, 5  ;;  %v5958_v34 = vor.u32 %v5957_v15, %v5954_v2  ;;  %v6000_v61 = vshrl.u32 %v11088_v49, 16 }
 0x3f4   : > { %5518 = vst.msk [vmem:[#allocation2 + $0x2c] sm:$0xf] %vm5506_vm6, %v5433_v57  ;;  %v5950_v57 = vsel %vm12115_vm3, %v14809_v44, %v14811_v23  ;;  %v6033_v18 = vshll.u32 %v11092_v5, 16  ;;  %v6048_v56 = vshrl.u32 %v11094_v14, 16  ;;  %v6051_v2 = vshll.u32 %v11094_v14, 16 }
 0x3f5   : > { %v5431_v1 = vpop.permute.xlu0 %5430  ;;  %6177 = vrot.lane.b32.xlu1 %v5854_v42, %s11960_s17  ;;  %v5911_v40 = vrot.slane %v5910_v20, 4  ;;  %v5926_v62 = vsel %vm12115_vm3, %v5921_v38, %v5925_v39  ;;  %v5959_v11 = vrot.slane %v5958_v34, 4  ;;  %v6002_v6 = vrot.slane %v6000_v61, 4  ;;  %v11096_v34 = vld [vmem:[%s12104_s6 + $0x17c] sm:$0x1] }
 0x3f6   : > { %5517 = vst.msk [vmem:[#allocation2 + $0x28] sm:$0xf] %vm5506_vm6, %v5431_v1  ;;  %v5992_v1 = vor.u32 %v5991_v0, %v14818_v36  ;;  %v6005_v20 = vrot.slane %v6003_v4, 5  ;;  %v14859_v39 = vrot.slane %v6033_v18, 5  ;;  %v6039_v44 = vrot.slane %v6037_v12, 4 }
 0x3f7   : > { %6175 = vrot.lane.b32.xlu0 %v5844_v52, %s11960_s17  ;;  %v5437_v46 = vpop.permute.xlu1 %5436  ;;  %v5916_v3 = vsel %vm12115_vm3, %v5911_v40, %v14770_v54  ;;  %v5940_v52 = vsel %vm12115_vm3, %v14815_v31, %v14778_v26  ;;  %v6015_v26 = vrot.slane %v6013_v45, 4  ;;  %v5964_v37 = vsel %vm12115_vm3, %v5959_v11, %v14797_v29  ;;  %v11098_v40 = vld [vmem:[%s12104_s6 + $0x184] sm:$0xf] }
 0x3f8   : > { %5520 = vst.msk [vmem:[#allocation2 + $0x34] sm:$0xf] %vm5506_vm6, %v5437_v46  ;;  %v6061_v46 = vshrl.u32 %v11095_v13, 16  ;;  %v5993_v17 = vrot.slane %v5992_v1, 4  ;;  %v6026_v23 = vrot.slane %v6024_v25, 4  ;;  %v6029_v33 = vrot.slane %v6027_v9, 5 }
 0x3f9   : > { %v5435_v41 = vpop.permute.xlu0 %5434  ;;  %6181 = vrot.lane.b32.xlu1 %v5878_v21, %s11960_s17  ;;  %v5995_v21 = vshll.u32 %v11087_v19, 16  ;;  %v6016_v38 = vor.u32 %v6015_v26, %v14847_v22  ;;  %v14865_v31 = vrot.slane %v6057_v48, 5  ;;  %v6050_v51 = vrot.slane %v6048_v56, 4  ;;  %v11099_v13 = vld [vmem:[%s12104_s6 + $0x188] sm:$0x1] }
 0x3fa   : > { %5519 = vst.msk [vmem:[#allocation2 + $0x30] sm:$0xf] %vm5506_vm6, %v5435_v41  ;;  %v5974_v41 = vsel %vm12115_vm3, %v5969_v8, %v5973_v53  ;;  %v6063_v29 = vrot.slane %v6061_v46, 4  ;;  %v6053_v32 = vrot.slane %v6051_v2, 5  ;;  %v6081_v0 = vshll.u32 %v11098_v40, 16 }
 0x3fb   : > { %6179 = vrot.lane.b32.xlu0 %v5868_v59, %s11960_s17  ;;  %v5441_v50 = vpop.permute.xlu1 %5440  ;;  %v5982_v59 = vor.u32 %v5981_v58, %v5978_v35  ;;  %v5997_v15 = vrot.slane %v5995_v21, 5  ;;  %v6085_v35 = vshrl.u32 %v11098_v40, 16  ;;  %v6021_v45 = vrot.slane %v6019_v55, 5  ;;  %v11104_v56 = vld [vmem:[%s12104_s6 + $0x19c] sm:$0xf] }
 0x3fc   : > { %5522 = vst.msk [vmem:[#allocation2 + $0x3c] sm:$0xf] %vm5506_vm6, %v5441_v50  ;;  %v11093_v50 = vld [vmem:[%s12104_s6 + $0x170] sm:$0x1]  ;;  %v6040_v5 = vor.u32 %v6039_v44, %v14859_v39  ;;  %v6030_v8 = vor.u32 %v6029_v33, %v6026_v23  ;;  %v6064_v53 = vor.u32 %v6063_v29, %v14865_v31  ;;  %v6067_v10 = vshll.u32 %v11096_v34, 16 }
 0x3fd   : > { %v5439_v42 = vpop.permute.xlu0 %5438  ;;  %6185 = vrot.lane.b32.xlu1 %v5902_v27, %s11960_s17  ;;  %v5983_v7 = vrot.slane %v5982_v59, 4  ;;  %v11097_v27 = vld [vmem:[%s12104_s6 + $0x180] sm:$0xf]  ;;  %v5998_v19 = vsel %vm12115_vm3, %v5993_v17, %v5997_v15  ;;  %v14882_v11 = vrot.slane %v6081_v0, 5  ;;  %v6087_v1 = vrot.slane %v6085_v35, 4 }
 0x3fe   : > { %5521 = vst.msk [vmem:[#allocation2 + $0x38] sm:$0xf] %vm5506_vm6, %v5439_v42  ;;  %v6072_v58 = vshrl.u32 %v11097_v27, 16  ;;  %v6075_v61 = vshll.u32 %v11097_v27, 16  ;;  %v6065_v48 = vrot.slane %v6064_v53, 4  ;;  %v6069_v46 = vrot.slane %v6067_v10, 5 }
 0x3ff   : > { %6183 = vrot.lane.b32.xlu0 %v5892_v43, %s11960_s17  ;;  %v5445_v24 = vpop.permute.xlu1 %5444  ;;  %v6006_v43 = vor.u32 %v6005_v20, %v6002_v6  ;;  %v5988_v30 = vsel %vm12115_vm3, %v5983_v7, %v14818_v36  ;;  %v6041_v20 = vrot.slane %v6040_v5, 4  ;;  %v6091_v17 = vshll.u32 %v11099_v13, 16  ;;  %v11103_v55 = vld [vmem:[%s12104_s6 + $0x198] sm:$0xf]  ;;  %v11102_v27 = vld [vmem:[%s12104_s6 + $0x194] sm:$0x1] }
 0x400   : > { %5524 = vst.msk [vmem:[#allocation2 + $0x44] sm:$0xf] %vm5506_vm6, %v5445_v24  ;;  %v6043_v24 = vshll.u32 %v11093_v50, 16  ;;  %v6074_v21 = vrot.slane %v6072_v58, 4  ;;  %v6077_v14 = vrot.slane %v6075_v61, 5  ;;  %v6133_v44 = vshrl.u32 %v11104_v56, 16 }
 0x401   : > { %v5443_v54 = vpop.permute.xlu0 %5442  ;;  %6189 = vrot.lane.b32.xlu1 %v5926_v62, %s11960_s17  ;;  %v11101_v62 = vld [vmem:[%s12104_s6 + $0x190] sm:$0xf]  ;;  %v6007_v4 = vrot.slane %v6006_v43, 4  ;;  %v6129_v43 = vshll.u32 %v11104_v56, 16  ;;  %v6123_v50 = vshll.u32 %v11103_v55, 16  ;;  %v6093_v0 = vrot.slane %v6091_v17, 5 }
 0x402   : > { %5523 = vst.msk [vmem:[#allocation2 + $0x40] sm:$0xf] %vm5506_vm6, %v5443_v54  ;;  %v6054_v54 = vor.u32 %v6053_v32, %v6050_v51  ;;  %v6105_v59 = vshll.u32 %v11101_v62, 16  ;;  %v6109_v16 = vshrl.u32 %v11101_v62, 16  ;;  %v6045_v12 = vrot.slane %v6043_v24, 5 }
 0x403   : > { %6187 = vrot.lane.b32.xlu0 %v5916_v3, %s11960_s17  ;;  %v5449_v47 = vpop.permute.xlu1 %5448  ;;  %v6017_v3 = vrot.slane %v6016_v38, 4  ;;  %v6012_v9 = vsel %vm12115_vm3, %v6007_v4, %v14847_v22  ;;  %v6078_v22 = vor.u32 %v6077_v14, %v6074_v21  ;;  %v11107_v29 = vld [vmem:[%s12104_s6 + $0x1a8] sm:$0xf]  ;;  %v6070_v32 = vsel %vm12115_vm3, %v6065_v48, %v6069_v46  ;;  %v11106_v35 = vld [vmem:[%s12104_s6 + $0x1a4] sm:$0xf] }
 0x404   : > { %5526 = vst.msk [vmem:[#allocation2 + $0x4c] sm:$0xf] %vm5506_vm6, %v5449_v47  ;;  %v6031_v47 = vrot.slane %v6030_v8, 4  ;;  %v14896_v15 = vrot.slane %v6105_v59, 5  ;;  %v6046_v40 = vsel %vm12115_vm3, %v6041_v20, %v6045_v12  ;;  %v6135_v61 = vrot.slane %v6133_v44, 4 }
 0x405   : > { %v5447_v60 = vpop.permute.xlu0 %5446  ;;  %6193 = vrot.lane.b32.xlu1 %v5950_v57, %s11960_s17  ;;  %v11100_v57 = vld [vmem:[%s12104_s6 + $0x18c] sm:$0xf]  ;;  %v6022_v18 = vsel %vm12115_vm3, %v6017_v3, %v6021_v45  ;;  %v14920_v45 = vrot.slane %v6129_v43, 5  ;;  %v6153_v62 = vshll.u32 %v11107_v29, 16  ;;  %v11105_v4 = vld [vmem:[%s12104_s6 + $0x1a0] sm:$0x1] }
 0x406   : > { %5525 = vst.msk [vmem:[#allocation2 + $0x48] sm:$0xf] %vm5506_vm6, %v5447_v60  ;;  %v6096_v26 = vshrl.u32 %v11100_v57, 16  ;;  %v6099_v6 = vshll.u32 %v11100_v57, 16  ;;  %v6055_v60 = vrot.slane %v6054_v54, 4  ;;  %v6036_v33 = vsel %vm12115_vm3, %v6031_v47, %v14859_v39 }
 0x407   : > { %6191 = vrot.lane.b32.xlu0 %v5940_v52, %s11960_s17  ;;  %v5453_v49 = vpop.permute.xlu1 %5452  ;;  %v6079_v39 = vrot.slane %v6078_v22, 4  ;;  %v6125_v24 = vrot.slane %v6123_v50, 5  ;;  %v6144_v57 = vshrl.u32 %v11106_v35, 16  ;;  %v6139_v21 = vshll.u32 %v11105_v4, 16  ;;  %v11113_v43 = vld [vmem:[%s12104_s6 + $0x100] sm:$0xf] }
 0x408   : > { %5528 = vst.msk [vmem:[#allocation2 + $0x54] sm:$0xf] %vm5506_vm6, %v5453_v49  ;;  %v6098_v7 = vrot.slane %v6096_v26, 4  ;;  %v6101_v38 = vrot.slane %v6099_v6, 5  ;;  %v6120_v49 = vshrl.u32 %v11103_v55, 16  ;;  %v6155_v59 = vrot.slane %v6153_v62, 5 }
 0x409   : > { %v5451_v42 = vpop.permute.xlu0 %5450  ;;  %6197 = vrot.lane.b32.xlu1 %v5974_v41, %s11960_s17  ;;  %v6088_v41 = vor.u32 %v6087_v1, %v14882_v11  ;;  %v6084_v10 = vsel %vm12115_vm3, %v6079_v39, %v14882_v11  ;;  %v6136_v1 = vor.u32 %v6135_v61, %v14920_v45  ;;  %v11108_v6 = vld [vmem:[%s12104_s6 + $0x1ac] sm:$0x1]  ;;  %v11112_v39 = vld [vmem:[%s12104_s6 + $0xfc] sm:$0xe]  ;;  %v11119_v4 = vld [vmem:[%s12104_s6 + $0x118] sm:$0xf] }
 0x40a   : > { %5527 = vst.msk [vmem:[#allocation2 + $0x50] sm:$0xf] %vm5506_vm6, %v5451_v42  ;;  %v6060_v42 = vsel %vm12115_vm3, %v6055_v60, %v14865_v31  ;;  %v6157_v31 = vshrl.u32 %v11107_v29, 16  ;;  %v6122_v5 = vrot.slane %v6120_v49, 4  ;;  %v6163_v48 = vshll.u32 %v11108_v6, 16 }
 0x40b   : > { %6195 = vrot.lane.b32.xlu0 %v5964_v37, %s11960_s17  ;;  %v5457_v52 = vpop.permute.xlu1 %5456  ;;  %v6111_v37 = vrot.slane %v6109_v16, 4  ;;  %v6089_v34 = vrot.slane %v6088_v41, 4  ;;  %v11110_v41 = vld [vmem:[%s12104_s6 + $0xf4] sm:$0xf]  ;;  %v6401_v29 = vrot.slane %v11113_v43, 5 }
 0x40c   : > { %5530 = vst.msk [vmem:[#allocation2 + $0x5c] sm:$0xf] %vm5506_vm6, %v5457_v52  ;;  %v6147_v52 = vshll.u32 %v11106_v35, 16  ;;  %v6159_v13 = vrot.slane %v6157_v31, 4  ;;  %v6126_v26 = vor.u32 %v6125_v24, %v6122_v5  ;;  %v11158_v31 = vrot.slane %v11112_v39, 9 }
 0x40d   : > { %v5455_v36 = vpop.permute.xlu0 %5454  ;;  %6201 = vrot.lane.b32.xlu1 %v5998_v19, %s11960_s17  ;;  %v6112_v58 = vor.u32 %v6111_v37, %v14896_v15  ;;  %v6115_v19 = vshll.u32 %v11102_v27, 16  ;;  %v6094_v53 = vsel %vm12115_vm3, %v6089_v34, %v6093_v0  ;;  %v6394_v37 = vrot.slane %v11110_v41, 5  ;;  %v11111_v27 = vld [vmem:[%s12104_s6 + $0xf8] sm:$0x1]  ;;  %v11114_v34 = vld [vmem:[%s12104_s6 + $0x104] sm:$0x1] }
 0x40e   : > { %5529 = vst.msk [vmem:[#allocation2 + $0x58] sm:$0xf] %vm5506_vm6, %v5455_v36  ;;  %v6149_v20 = vrot.slane %v6147_v52, 5  ;;  %v6160_v47 = vor.u32 %v6159_v13, %v6155_v59  ;;  %v6397_v50 = vrot.slane %v11111_v27, 5  ;;  %v11116_v0 = vld [vmem:[%s12104_s6 + $0x10c] sm:$0xf] }
 0x40f   : > { %6199 = vrot.lane.b32.xlu0 %v5988_v30, %s11960_s17  ;;  %v5461_v25 = vpop.permute.xlu1 %5460  ;;  %v6102_v30 = vor.u32 %v6101_v38, %v6098_v7  ;;  %v6113_v54 = vrot.slane %v6112_v58, 4  ;;  %v6117_v36 = vrot.slane %v6115_v19, 5  ;;  %v6396_v49 = vrot.slane %v6394_v37, 4  ;;  %v11115_v24 = vld [vmem:[%s12104_s6 + $0x108] sm:$0xe] }
 0x410   : > { %5532 = vst.msk [vmem:[#allocation2 + $0x64] sm:$0xf] %vm5506_vm6, %v5461_v25  ;;  %v6137_v25 = vrot.slane %v6136_v1, 4  ;;  %v6161_v22 = vrot.slane %v6160_v47, 4  ;;  %v6403_v19 = vrot.slane %v6401_v29, 4 }
 0x411   : > { %v5459_v2 = vpop.permute.xlu0 %5458  ;;  %6205 = vrot.lane.b32.xlu1 %v6022_v18, %s11960_s17  ;;  %v6103_v16 = vrot.slane %v6102_v30, 4  ;;  %v6146_v18 = vrot.slane %v6144_v57, 4  ;;  %v6118_v11 = vsel %vm12115_vm3, %v6113_v54, %v6117_v36  ;;  %v6398_v58 = vsel %vm12259_vm7, %v6396_v49, %v6397_v50  ;;  %v11120_v1 = vld [vmem:[%s12104_s6 + $0x11c] sm:$0x1]  ;;  %v11118_v13 = vld [vmem:[%s12104_s6 + $0x114] sm:$0xe] }
 0x412   : > { %5531 = vst.msk [vmem:[#allocation2 + $0x60] sm:$0xf] %vm5506_vm6, %v5459_v2  ;;  %v6127_v2 = vrot.slane %v6126_v26, 4  ;;  %v6404_v30 = vrot.slane %v11114_v34, 5  ;;  %v6402_v54 = vsel %vm12259_vm7, %v11158_v31, %v6401_v29  ;;  %v11159_v36 = vrot.slane %v11115_v24, 9 }
 0x413   : > { %6203 = vrot.lane.b32.xlu0 %v6012_v9, %s11960_s17  ;;  %v5465_v23 = vpop.permute.xlu1 %5464  ;;  %v6141_v9 = vrot.slane %v6139_v21, 5  ;;  %v6108_v56 = vsel %vm12115_vm3, %v6103_v16, %v14896_v15  ;;  %v6150_v60 = vor.u32 %v6149_v20, %v6146_v18  ;;  %v6165_v15 = vrot.slane %v6163_v48, 5  ;;  %v11122_v21 = vld [vmem:[%s12104_s6 + $0x124] sm:$0xf]  ;;  %v11121_v47 = vld [vmem:[%s12104_s6 + $0x120] sm:$0xe] }
 0x414   : > { %5534 = vst.msk [vmem:[#allocation2 + $0x6c] sm:$0xf] %vm5506_vm6, %v5465_v23  ;;  %v6132_v38 = vsel %vm12115_vm3, %v6127_v2, %v14920_v45  ;;  %v11109_v23 = vld [vmem:[%s12104_s6 + $0xf0] sm:$0xe]  ;;  %v6408_v45 = vrot.slane %v11116_v0, 5  ;;  %v6405_v57 = vsel %vm12259_vm7, %v6403_v19, %v6404_v30  ;;  %v6418_v26 = vrot.slane %v11120_v1, 5 }
 0x415   : > { %v5463_v51 = vpop.permute.xlu0 %5462  ;;  %6209 = vrot.lane.b32.xlu1 %v6046_v40, %s11960_s17  ;;  %v6142_v55 = vsel %vm12115_vm3, %v6137_v25, %v6141_v9  ;;  %v6151_v40 = vrot.slane %v6150_v60, 4  ;;  %v6422_v6 = vrot.slane %v11122_v21, 5  ;;  %v11125_v25 = vld [vmem:[%s12104_s6 + $0x130] sm:$0xf]  ;;  %v11131_v49 = vld [vmem:[%s12104_s6 + $0x148] sm:$0xf] }
 0x416   : > { %5533 = vst.msk [vmem:[#allocation2 + $0x68] sm:$0xf] %vm5506_vm6, %v5463_v51  ;;  %v6410_v52 = vrot.slane %v6408_v45, 4  ;;  %v6409_v20 = vsel %vm12259_vm7, %v11159_v36, %v6408_v45  ;;  %v6429_v2 = vrot.slane %v11125_v25, 5  ;;  %v11127_v29 = vld [vmem:[%s12104_s6 + $0x138] sm:$0xe] }
 0x417   : > { %6207 = vrot.lane.b32.xlu0 %v6036_v33, %s11960_s17  ;;  %v5469_v3 = vpop.permute.xlu1 %5468  ;;  %v6166_v33 = vsel %vm12115_vm3, %v6161_v22, %v6165_v15  ;;  %v11128_v22 = vld [vmem:[%s12104_s6 + $0x13c] sm:$0xf]  ;;  %v6443_v34 = vrot.slane %v11131_v49, 5  ;;  %v11163_v39 = vrot.slane %v11127_v29, 9  ;;  %v11134_v19 = vld [vmem:[%s12104_s6 + $0x154] sm:$0xf] }
 0x418   : > { %5536 = vst.msk [vmem:[#allocation2 + $0x74] sm:$0xf] %vm5506_vm6, %v5469_v3  ;;  %v11117_v3 = vld [vmem:[%s12104_s6 + $0x110] sm:$0x1]  ;;  %v6436_v27 = vrot.slane %v11128_v22, 5 }
 0x419   : > { %v5467_v8 = vpop.permute.xlu0 %5466  ;;  %6213 = vrot.lane.b32.xlu1 %v6070_v32, %s11960_s17  ;;  %v6156_v32 = vsel %vm12115_vm3, %v6151_v40, %v6155_v59  ;;  %v11130_v45 = vld [vmem:[%s12104_s6 + $0x144] sm:$0xe] }
 0x41a   : > { %5535 = vst.msk [vmem:[#allocation2 + $0x70] sm:$0xf] %vm5506_vm6, %v5467_v8  ;;  %v6411_v8 = vrot.slane %v11117_v3, 5  ;;  %v6450_v3 = vrot.slane %v11134_v19, 5  ;;  %v11164_v24 = vrot.slane %v11130_v45, 9 }
 0x41b   : > { %6211 = vrot.lane.b32.xlu0 %v6060_v42, %s11960_s17  ;;  %v5473_v14 = vpop.permute.xlu1 %5472  ;;  %v11157_v42 = vrot.slane %v11109_v23, 9 }
 0x41c   : > { %5538 = vst.msk [vmem:[#allocation2 + $0x7c] sm:$0xf] %vm5506_vm6, %v5473_v14  ;;  %v6412_v14 = vsel %vm12259_vm7, %v6410_v52, %v6411_v8  ;;  %v11137_v52 = vld [vmem:[%s12104_s6 + $0x160] sm:$0xf] }
 0x41d   : > { %v5471_v12 = vpop.permute.xlu0 %5470  ;;  %6217 = vrot.lane.b32.xlu1 %v6094_v53, %s11960_s17  ;;  %v6395_v62 = vsel %vm12259_vm7, %v11157_v42, %v6394_v37  ;;  %v6415_v53 = vrot.slane %v11119_v4, 5  ;;  %v11124_v37 = vld [vmem:[%s12104_s6 + $0x12c] sm:$0xe]  ;;  %v6457_v1 = vrot.slane %v11137_v52, 5 }
 0x41e   : > { %5537 = vst.msk [vmem:[#allocation2 + $0x78] sm:$0xf] %vm5506_vm6, %v5471_v12  ;;  %v11160_v12 = vrot.slane %v11118_v13, 9  ;;  %v11162_v23 = vrot.slane %v11124_v37, 9 }
 0x41f   : > { %6215 = vrot.lane.b32.xlu0 %v6084_v10, %s11960_s17  ;;  %v5609_v46 = vpop.permute.xlu1 %5608  ;;  %v6417_v16 = vrot.slane %v6415_v53, 4 }
 0x420   : > { %5704 = vst.msk [vmem:[#allocation2 + $0x4] sm:$0xf] %vm5702_vm8, %v5609_v46  ;;  %v6424_v46 = vrot.slane %v6422_v6, 4  ;;  %v6416_v41 = vsel %vm12259_vm7, %v11160_v12, %v6415_v53  ;;  %v11133_v53 = vld [vmem:[%s12104_s6 + $0x150] sm:$0xe] }
 0x421   : > { %v5607_v17 = vpop.permute.xlu0 %5606  ;;  %6221 = vrot.lane.b32.xlu1 %v6118_v11, %s11960_s17  ;;  %v11123_v11 = vld [vmem:[%s12104_s6 + $0x128] sm:$0x1]  ;;  %v6419_v48 = vsel %vm12259_vm7, %v6417_v16, %v6418_v26  ;;  %v11165_v13 = vrot.slane %v11133_v53, 9  ;;  %v11140_v16 = vld [vmem:[%s12104_s6 + $0x16c] sm:$0xf] }
 0x422   : > { %5703 = vst.msk [vmem:[#allocation2] sm:$0xf] %vm5702_vm8, %v5607_v17  ;;  %v11161_v17 = vrot.slane %v11121_v47, 9 }
 0x423   : > { %6219 = vrot.lane.b32.xlu0 %v6108_v56, %s11960_s17  ;;  %v5613_v7 = vpop.permute.xlu1 %5612  ;;  %v6425_v56 = vrot.slane %v11123_v11, 5  ;;  %v6464_v11 = vrot.slane %v11140_v16, 5 }
 0x424   : > { %5706 = vst.msk [vmem:[#allocation2 + $0xc] sm:$0xf] %vm5702_vm8, %v5613_v7 }
 0x425   : > { %v5611_v44 = vpop.permute.xlu0 %5610  ;;  %6225 = vrot.lane.b32.xlu1 %v6142_v55, %s11960_s17  ;;  %v11126_v55 = vld [vmem:[%s12104_s6 + $0x134] sm:$0x1]  ;;  %v6426_v7 = vsel %vm12259_vm7, %v6424_v46, %v6425_v56  ;;  %v11143_v46 = vld [vmem:[%s12104_s6 + $0x178] sm:$0xf] }
 0x426   : > { %5705 = vst.msk [vmem:[#allocation2 + $0x8] sm:$0xf] %vm5702_vm8, %v5611_v44  ;;  %v6432_v40 = vrot.slane %v11126_v55, 5  ;;  %v6423_v44 = vsel %vm12259_vm7, %v11161_v17, %v6422_v6  ;;  %v11136_v6 = vld [vmem:[%s12104_s6 + $0x15c] sm:$0xe]  ;;  %v6471_v55 = vrot.slane %v11143_v46, 5 }
 0x427   : > { %6223 = vrot.lane.b32.xlu0 %v6132_v38, %s11960_s17  ;;  %v5617_v51 = vpop.permute.xlu1 %5616  ;;  %v6431_v38 = vrot.slane %v6429_v2, 4  ;;  %v11166_v47 = vrot.slane %v11136_v6, 9 }
 0x428   : > { %5708 = vst.msk [vmem:[#allocation2 + $0x14] sm:$0xf] %vm5702_vm8, %v5617_v51 }
 0x429   : > { %v5615_v35 = vpop.permute.xlu0 %5614  ;;  %6229 = vrot.lane.b32.xlu1 %v6166_v33, %s11960_s17  ;;  %v11129_v33 = vld [vmem:[%s12104_s6 + $0x140] sm:$0x1]  ;;  %v6433_v51 = vsel %vm12259_vm7, %v6431_v38, %v6432_v40  ;;  %v11146_v38 = vld [vmem:[%s12104_s6 + $0x184] sm:$0xf] }
 0x42a   : > { %5707 = vst.msk [vmem:[#allocation2 + $0x10] sm:$0xf] %vm5702_vm8, %v5615_v35  ;;  %v6439_v42 = vrot.slane %v11129_v33, 5  ;;  %v6430_v35 = vsel %vm12259_vm7, %v11162_v23, %v6429_v2  ;;  %v11139_v2 = vld [vmem:[%s12104_s6 + $0x168] sm:$0xe]  ;;  %v6478_v33 = vrot.slane %v11146_v38, 5 }
 0x42b   : > { %6227 = vrot.lane.b32.xlu0 %v6156_v32, %s11960_s17  ;;  %v5621_v61 = vpop.permute.xlu1 %5620  ;;  %v6438_v32 = vrot.slane %v6436_v27, 4  ;;  %v11167_v37 = vrot.slane %v11139_v2, 9 }
 0x42c   : > { %5710 = vst.msk [vmem:[#allocation2 + $0x1c] sm:$0xf] %vm5702_vm8, %v5621_v61 }
 0x42d   : > { %v5619_v5 = vpop.permute.xlu0 %5618  ;;  %6506 = vrot.lane.b32.xlu1 %v6398_v58, %s11961_s18  ;;  %v11132_v58 = vld [vmem:[%s12104_s6 + $0x14c] sm:$0x1]  ;;  %v6440_v61 = vsel %vm12259_vm7, %v6438_v32, %v6439_v42  ;;  %v11149_v32 = vld [vmem:[%s12104_s6 + $0x190] sm:$0xf] }
 0x42e   : > { %5709 = vst.msk [vmem:[#allocation2 + $0x18] sm:$0xf] %vm5702_vm8, %v5619_v5  ;;  %v6446_v31 = vrot.slane %v11132_v58, 5  ;;  %v6437_v5 = vsel %vm12259_vm7, %v11163_v39, %v6436_v27  ;;  %v11142_v27 = vld [vmem:[%s12104_s6 + $0x174] sm:$0xe]  ;;  %v6485_v58 = vrot.slane %v11149_v32, 5 }
 0x42f   : > { %6504 = vrot.lane.b32.xlu0 %v6395_v62, %s11961_s18  ;;  %v5625_v10 = vpop.permute.xlu1 %5624  ;;  %v6445_v62 = vrot.slane %v6443_v34, 4  ;;  %v11168_v29 = vrot.slane %v11142_v27, 9  ;;  %v11182_v32 = vld [vmem:[%s12104_s6 + $0x1e4] sm:$0xf] }
 0x430   : > { %5712 = vst.msk [vmem:[#allocation2 + $0x24] sm:$0xf] %vm5702_vm8, %v5625_v10 }
 0x431   : > { %v5623_v59 = vpop.permute.xlu0 %5622  ;;  %6510 = vrot.lane.b32.xlu1 %v6405_v57, %s11961_s18  ;;  %v11135_v57 = vld [vmem:[%s12104_s6 + $0x158] sm:$0x1]  ;;  %v6447_v10 = vsel %vm12259_vm7, %v6445_v62, %v6446_v31  ;;  %v11152_v62 = vld [vmem:[%s12104_s6 + $0x19c] sm:$0xf] }
 0x432   : > { %5711 = vst.msk [vmem:[#allocation2 + $0x20] sm:$0xf] %vm5702_vm8, %v5623_v59  ;;  %v6453_v36 = vrot.slane %v11135_v57, 5  ;;  %v6444_v59 = vsel %vm12259_vm7, %v11164_v24, %v6443_v34  ;;  %v11145_v34 = vld [vmem:[%s12104_s6 + $0x180] sm:$0xe]  ;;  %v6492_v57 = vrot.slane %v11152_v62, 5 }
 0x433   : > { %6508 = vrot.lane.b32.xlu0 %v6402_v54, %s11961_s18  ;;  %v5629_v18 = vpop.permute.xlu1 %5628  ;;  %v6452_v54 = vrot.slane %v6450_v3, 4  ;;  %v11169_v45 = vrot.slane %v11145_v34, 9  ;;  %v11181_v34 = vld [vmem:[%s12104_s6 + $0x1e0] sm:$0xf] }
 0x434   : > { %5714 = vst.msk [vmem:[#allocation2 + $0x2c] sm:$0xf] %vm5702_vm8, %v5629_v18 }
 0x435   : > { %v5627_v9 = vpop.permute.xlu0 %5626  ;;  %6514 = vrot.lane.b32.xlu1 %v6412_v14, %s11961_s18  ;;  %v11138_v14 = vld [vmem:[%s12104_s6 + $0x164] sm:$0x1]  ;;  %v6454_v18 = vsel %vm12259_vm7, %v6452_v54, %v6453_v36  ;;  %v11155_v54 = vld [vmem:[%s12104_s6 + $0x1a8] sm:$0xf] }
 0x436   : > { %5713 = vst.msk [vmem:[#allocation2 + $0x28] sm:$0xf] %vm5702_vm8, %v5627_v9  ;;  %v6460_v12 = vrot.slane %v11138_v14, 5  ;;  %v6451_v9 = vsel %vm12259_vm7, %v11165_v13, %v6450_v3  ;;  %v11148_v3 = vld [vmem:[%s12104_s6 + $0x18c] sm:$0xe]  ;;  %v6499_v14 = vrot.slane %v11155_v54, 5 }
 0x437   : > { %6512 = vrot.lane.b32.xlu0 %v6409_v20, %s11961_s18  ;;  %v5633_v60 = vpop.permute.xlu1 %5632  ;;  %v6459_v20 = vrot.slane %v6457_v1, 4  ;;  %v11170_v53 = vrot.slane %v11148_v3, 9  ;;  %v11191_v54 = vld [vmem:[%s12104_s6 + $0x21c] sm:$0xf] }
 0x438   : > { %5716 = vst.msk [vmem:[#allocation2 + $0x34] sm:$0xf] %vm5702_vm8, %v5633_v60 }
 0x439   : > { %v5631_v15 = vpop.permute.xlu0 %5630  ;;  %6518 = vrot.lane.b32.xlu1 %v6419_v48, %s11961_s18  ;;  %v11141_v48 = vld [vmem:[%s12104_s6 + $0x170] sm:$0x1]  ;;  %v6461_v60 = vsel %vm12259_vm7, %v6459_v20, %v6460_v12  ;;  %v11154_v12 = vld [vmem:[%s12104_s6 + $0x1a4] sm:$0xe] }
 0x43a   : > { %5715 = vst.msk [vmem:[#allocation2 + $0x30] sm:$0xf] %vm5702_vm8, %v5631_v15  ;;  %v6467_v17 = vrot.slane %v11141_v48, 5  ;;  %v6458_v15 = vsel %vm12259_vm7, %v11166_v47, %v6457_v1  ;;  %v11151_v1 = vld [vmem:[%s12104_s6 + $0x198] sm:$0xe]  ;;  %v11172_v46 = vrot.slane %v11154_v12, 9 }
 0x43b   : > { %6516 = vrot.lane.b32.xlu0 %v6416_v41, %s11961_s18  ;;  %v5637_v43 = vpop.permute.xlu1 %5636  ;;  %v6466_v41 = vrot.slane %v6464_v11, 4  ;;  %v11171_v6 = vrot.slane %v11151_v1, 9  ;;  %v11194_v1 = vld [vmem:[%s12104_s6 + $0x22c] sm:$0xf]  ;;  %v11208_v12 = vld [vmem:[%s12104_s6 + $0x1bc] sm:$0xf] }
 0x43c   : > { %5718 = vst.msk [vmem:[#allocation2 + $0x3c] sm:$0xf] %vm5702_vm8, %v5637_v43 }
 0x43d   : > { %v5635_v50 = vpop.permute.xlu0 %5634  ;;  %6522 = vrot.lane.b32.xlu1 %v6426_v7, %s11961_s18  ;;  %v11144_v7 = vld [vmem:[%s12104_s6 + $0x17c] sm:$0x1]  ;;  %v6468_v43 = vsel %vm12259_vm7, %v6466_v41, %v6467_v17  ;;  %v6493_v48 = vsel %vm12259_vm7, %v11171_v6, %v6492_v57  ;;  %v6500_v41 = vsel %vm12259_vm7, %v11172_v46, %v6499_v14  ;;  %v11209_v6 = vld [vmem:[%s12104_s6 + $0x1c0] sm:$0xf] }
 0x43e   : > { %5717 = vst.msk [vmem:[#allocation2 + $0x38] sm:$0xf] %vm5702_vm8, %v5635_v50  ;;  %v6474_v23 = vrot.slane %v11144_v7, 5  ;;  %v6465_v50 = vsel %vm12259_vm7, %v11167_v37, %v6464_v11  ;;  %v11176_v7 = vld [vmem:[%s12104_s6 + $0x1c0] sm:$0xf]  ;;  %v6912_v46 = vshll.u32 %v11209_v6, 16 }
 0x43f   : > { %6520 = vrot.lane.b32.xlu0 %v6423_v44, %s11961_s18  ;;  %v5641_v0 = vpop.permute.xlu1 %5640  ;;  %v6473_v44 = vrot.slane %v6471_v55, 4 }
 0x440   : > { %5720 = vst.msk [vmem:[#allocation2 + $0x44] sm:$0xf] %vm5702_vm8, %v5641_v0 }
 0x441   : > { %v5639_v30 = vpop.permute.xlu0 %5638  ;;  %6526 = vrot.lane.b32.xlu1 %v6433_v51, %s11961_s18  ;;  %v11147_v51 = vld [vmem:[%s12104_s6 + $0x188] sm:$0x1]  ;;  %v6475_v0 = vsel %vm12259_vm7, %v6473_v44, %v6474_v23 }
 0x442   : > { %5719 = vst.msk [vmem:[#allocation2 + $0x40] sm:$0xf] %vm5702_vm8, %v5639_v30  ;;  %v6481_v39 = vrot.slane %v11147_v51, 5  ;;  %v6472_v30 = vsel %vm12259_vm7, %v11168_v29, %v6471_v55  ;;  %v11174_v55 = vld [vmem:[%s12104_s6 + $0x1b4] sm:$0xf] }
 0x443   : > { %6524 = vrot.lane.b32.xlu0 %v6430_v35, %s11961_s18  ;;  %v5645_v4 = vpop.permute.xlu1 %5644  ;;  %v6480_v35 = vrot.slane %v6478_v33, 4  ;;  %v11177_v23 = vld [vmem:[%s12104_s6 + $0x1c8] sm:$0xf]  ;;  %v11179_v29 = vld [vmem:[%s12104_s6 + $0x1d4] sm:$0xf] }
 0x444   : > { %5722 = vst.msk [vmem:[#allocation2 + $0x4c] sm:$0xf] %vm5702_vm8, %v5645_v4 }
 0x445   : > { %v5643_v8 = vpop.permute.xlu0 %5642  ;;  %6530 = vrot.lane.b32.xlu1 %v6440_v61, %s11961_s18  ;;  %v11150_v61 = vld [vmem:[%s12104_s6 + $0x194] sm:$0x1]  ;;  %v6482_v4 = vsel %vm12259_vm7, %v6480_v35, %v6481_v39  ;;  %v11184_v35 = vld [vmem:[%s12104_s6 + $0x1f0] sm:$0xf] }
 0x446   : > { %5721 = vst.msk [vmem:[#allocation2 + $0x48] sm:$0xf] %vm5702_vm8, %v5643_v8  ;;  %v6488_v24 = vrot.slane %v11150_v61, 5  ;;  %v6479_v8 = vsel %vm12259_vm7, %v11169_v45, %v6478_v33  ;;  %v11185_v61 = vld [vmem:[%s12104_s6 + $0x1f8] sm:$0xf] }
 0x447   : > { %6528 = vrot.lane.b32.xlu0 %v6437_v5, %s11961_s18  ;;  %v5649_v21 = vpop.permute.xlu1 %5648  ;;  %v6487_v5 = vrot.slane %v6485_v58, 4 }
 0x448   : > { %5724 = vst.msk [vmem:[#allocation2 + $0x54] sm:$0xf] %vm5702_vm8, %v5649_v21 }
 0x449   : > { %v5647_v26 = vpop.permute.xlu0 %5646  ;;  %6534 = vrot.lane.b32.xlu1 %v6447_v10, %s11961_s18  ;;  %v11153_v10 = vld [vmem:[%s12104_s6 + $0x1a0] sm:$0x1]  ;;  %v6489_v21 = vsel %vm12259_vm7, %v6487_v5, %v6488_v24  ;;  %v11190_v24 = vld [vmem:[%s12104_s6 + $0x214] sm:$0xf] }
 0x44a   : > { %5723 = vst.msk [vmem:[#allocation2 + $0x50] sm:$0xf] %vm5702_vm8, %v5647_v26  ;;  %v6495_v13 = vrot.slane %v11153_v10, 5  ;;  %v6486_v26 = vsel %vm12259_vm7, %v11170_v53, %v6485_v58  ;;  %v11183_v58 = vld [vmem:[%s12104_s6 + $0x1ec] sm:$0xf] }
 0x44b   : > { %6532 = vrot.lane.b32.xlu0 %v6444_v59, %s11961_s18  ;;  %v5653_v25 = vpop.permute.xlu1 %5652  ;;  %v6494_v59 = vrot.slane %v6492_v57, 4  ;;  %v11192_v53 = vld [vmem:[%s12104_s6 + $0x220] sm:$0xf] }
 0x44c   : > { %5726 = vst.msk [vmem:[#allocation2 + $0x5c] sm:$0xf] %vm5702_vm8, %v5653_v25  ;;  %v6501_v25 = vrot.slane %v6499_v14, 4  ;;  %v11206_v14 = vld [vmem:[%s12104_s6 + $0x1b4] sm:$0xf] }
 0x44d   : > { %v5651_v56 = vpop.permute.xlu0 %5650  ;;  %6538 = vrot.lane.b32.xlu1 %v6454_v18, %s11961_s18  ;;  %v11156_v18 = vld [vmem:[%s12104_s6 + $0x1ac] sm:$0x1]  ;;  %v6496_v11 = vsel %vm12259_vm7, %v6494_v59, %v6495_v13  ;;  %v11193_v59 = vld [vmem:[%s12104_s6 + $0x228] sm:$0xf] }
 0x44e   : > { %5725 = vst.msk [vmem:[#allocation2 + $0x58] sm:$0xf] %vm5702_vm8, %v5651_v56 }
 0x44f   : > { %6536 = vrot.lane.b32.xlu0 %v6451_v9, %s11961_s18  ;;  %v5657_v22 = vpop.permute.xlu1 %5656  ;;  %v6502_v9 = vrot.slane %v11156_v18, 5 }
 0x450   : > { %5728 = vst.msk [vmem:[#allocation2 + $0x64] sm:$0xf] %vm5702_vm8, %v5657_v22 }
 0x451   : > { %v5655_v40 = vpop.permute.xlu0 %5654  ;;  %6542 = vrot.lane.b32.xlu1 %v6461_v60, %s11961_s18  ;;  %v6503_v2 = vsel %vm12259_vm7, %v6501_v25, %v6502_v9  ;;  %v6888_v25 = vshll.u32 %v11206_v14, 16  ;;  %v6892_v9 = vshrl.u32 %v11206_v14, 16 }
 0x452   : > { %5727 = vst.msk [vmem:[#allocation2 + $0x60] sm:$0xf] %vm5702_vm8, %v5655_v40  ;;  %v11175_v40 = vld [vmem:[%s12104_s6 + $0x1bc] sm:$0xf] }
 0x453   : > { %6540 = vrot.lane.b32.xlu0 %v6458_v15, %s11961_s18  ;;  %v5661_v49 = vpop.permute.xlu1 %5660  ;;  %v11173_v15 = vld [vmem:[%s12104_s6 + $0x1b0] sm:$0xf] }
 0x454   : > { %5730 = vst.msk [vmem:[#allocation2 + $0x6c] sm:$0xf] %vm5702_vm8, %v5661_v49  ;;  %v11180_v49 = vld [vmem:[%s12104_s6 + $0x1d8] sm:$0xf] }
 0x455   : > { %v5659_v42 = vpop.permute.xlu0 %5658  ;;  %6546 = vrot.lane.b32.xlu1 %v6468_v43, %s11961_s18  ;;  %v11178_v43 = vld [vmem:[%s12104_s6 + $0x1cc] sm:$0xf] }
 0x456   : > { %5729 = vst.msk [vmem:[#allocation2 + $0x68] sm:$0xf] %vm5702_vm8, %v5659_v42 }
 0x457   : > { %6544 = vrot.lane.b32.xlu0 %v6465_v50, %s11961_s18  ;;  %v5665_v19 = vpop.permute.xlu1 %5664 }
 0x458   : > { %5732 = vst.msk [vmem:[#allocation2 + $0x74] sm:$0xf] %vm5702_vm8, %v5665_v19 }
 0x459   : > { %v5663_v31 = vpop.permute.xlu0 %5662  ;;  %6550 = vrot.lane.b32.xlu1 %v6475_v0, %s11961_s18 }
 0x45a   : > { %5731 = vst.msk [vmem:[#allocation2 + $0x70] sm:$0xf] %vm5702_vm8, %v5663_v31  ;;  %v11188_v31 = vld [vmem:[%s12104_s6 + $0x208] sm:$0xf] }
 0x45b   : > { %6548 = vrot.lane.b32.xlu0 %v6472_v30, %s11961_s18  ;;  %v5669_v52 = vpop.permute.xlu1 %5668  ;;  %v11186_v30 = vld [vmem:[%s12104_s6 + $0x1fc] sm:$0xf] }
 0x45c   : > { %5734 = vst.msk [vmem:[#allocation2 + $0x7c] sm:$0xf] %vm5702_vm8, %v5669_v52  ;;  %v11189_v52 = vld [vmem:[%s12104_s6 + $0x210] sm:$0xf] }
 0x45d   : > { %v5667_v36 = vpop.permute.xlu0 %5666  ;;  %6554 = vrot.lane.b32.xlu1 %v6482_v4, %s11961_s18  ;;  %v11187_v4 = vld [vmem:[%s12104_s6 + $0x204] sm:$0xf] }
 0x45e   : > { %5733 = vst.msk [vmem:[#allocation2 + $0x78] sm:$0xf] %vm5702_vm8, %v5667_v36 }
 0x45f   : > { %6552 = vrot.lane.b32.xlu0 %v6479_v8, %s11961_s18  ;;  %v6170_v16 = vpop.permute.xlu1 %6169 }
 0x460   : > { %6265 = vst.msk [vmem:[#allocation2 + $0x4] sm:$0xf] %vm6263_vm9, %v6170_v16  ;;  %v11205_v16 = vld [vmem:[%s12104_s6 + $0x1b0] sm:$0xf] }
 0x461   : > { %v6168_v20 = vpop.permute.xlu0 %6167  ;;  %6558 = vrot.lane.b32.xlu1 %v6489_v21, %s11961_s18 }
 0x462   : > { %6264 = vst.msk [vmem:[#allocation2] sm:$0xf] %vm6263_vm9, %v6168_v20  ;;  %v11195_v20 = vld [vmem:[%s12104_s6 + $0x234] sm:$0xf] }
 0x463   : > { %6556 = vrot.lane.b32.xlu0 %v6486_v26, %s11961_s18  ;;  %v6174_v47 = vpop.permute.xlu1 %6173  ;;  %v11196_v26 = vld [vmem:[%s12104_s6 + $0x238] sm:$0xf] }
 0x464   : > { %6267 = vst.msk [vmem:[#allocation2 + $0xc] sm:$0xf] %vm6263_vm9, %v6174_v47  ;;  %v6879_v47 = vshrl.u32 %v11205_v16, 16 }
 0x465   : > { %v6172_v56 = vpop.permute.xlu0 %6171  ;;  %6562 = vrot.lane.b32.xlu1 %v6496_v11, %s11961_s18 }
 0x466   : > { %6266 = vst.msk [vmem:[#allocation2 + $0x8] sm:$0xf] %vm6263_vm9, %v6172_v56  ;;  %v6916_v56 = vshrl.u32 %v11209_v6, 16  ;;  %v11218_v6 = vld [vmem:[%s12104_s6 + $0x1e4] sm:$0xf] }
 0x467   : > { %6560 = vrot.lane.b32.xlu0 %v6493_v48, %s11961_s18  ;;  %v6178_v60 = vpop.permute.xlu1 %6177  ;;  %v6882_v48 = vshll.u32 %v11205_v16, 16 }
 0x468   : > { %6269 = vst.msk [vmem:[#allocation2 + $0x14] sm:$0xf] %vm6263_vm9, %v6178_v60  ;;  %v6903_v60 = vshrl.u32 %v11208_v12, 16 }
 0x469   : > { %v6176_v17 = vpop.permute.xlu0 %6175  ;;  %6566 = vrot.lane.b32.xlu1 %v6503_v2, %s11961_s18  ;;  %v11198_v2 = vld [vmem:[%s12104_s6 + $0x244] sm:$0xf] }
 0x46a   : > { %6268 = vst.msk [vmem:[#allocation2 + $0x10] sm:$0xf] %vm6263_vm9, %v6176_v17 }
 0x46b   : > { %6564 = vrot.lane.b32.xlu0 %v6500_v41, %s11961_s18  ;;  %v6182_v22 = vpop.permute.xlu1 %6181  ;;  %v6906_v41 = vshll.u32 %v11208_v12, 16  ;;  %s11971_s18 = smov [#allocation3]  }
 0x46c   : > { %6271 = vst.msk [vmem:[#allocation2 + $0x1c] sm:$0xf] %vm6263_vm9, %v6182_v22  ;;  %v11212_v22 = vld [vmem:[%s12104_s6 + $0x1cc] sm:$0xf] }
 0x46d   : > { %v6180_v37 = vpop.permute.xlu0 %6179  ;;  %6703 = vrot.lane.b32.xlu1 %v11174_v55, %s11962_s21  ;;  %v11197_v55 = vld [vmem:[%s12104_s6 + $0x240] sm:$0xf] }
 0x46e   : > { %6270 = vst.msk [vmem:[#allocation2 + $0x18] sm:$0xf] %vm6263_vm9, %v6180_v37  ;;  %v11200_v37 = vld [vmem:[%s12104_s6 + $0x250] sm:$0xf] }
 0x46f   : > { %6701 = vrot.lane.b32.xlu0 %v11173_v15, %s11962_s21  ;;  %v6186_v38 = vpop.permute.xlu1 %6185 }
 0x470   : > { %6273 = vst.msk [vmem:[#allocation2 + $0x24] sm:$0xf] %vm6263_vm9, %v6186_v38  ;;  %v6894_v38 = vrot.slane %v6892_v9, 4 }
 0x471   : > { %v6184_v27 = vpop.permute.xlu0 %6183  ;;  %6707 = vrot.lane.b32.xlu1 %v11176_v7, %s11962_s21  ;;  %v15221_v7 = vrot.slane %v6888_v25, 5 }
 0x472   : > { %6272 = vst.msk [vmem:[#allocation2 + $0x20] sm:$0xf] %vm6263_vm9, %v6184_v27  ;;  %v6884_v27 = vrot.slane %v6882_v48, 5  ;;  %v11203_v48 = vld [vmem:[%s12104_s6 + $0x264] sm:$0xf] }
 0x473   : > { %6705 = vrot.lane.b32.xlu0 %v11175_v40, %s11962_s21  ;;  %v6190_v44 = vpop.permute.xlu1 %6189  ;;  %v6881_v40 = vrot.slane %v6879_v47, 4 }
 0x474   : > { %6275 = vst.msk [vmem:[#allocation2 + $0x2c] sm:$0xf] %vm6263_vm9, %v6190_v44  ;;  %v11210_v44 = vld [vmem:[%s12104_s6 + $0x1c4] sm:$0x1] }
 0x475   : > { %v6188_v33 = vpop.permute.xlu0 %6187  ;;  %6711 = vrot.lane.b32.xlu1 %v11178_v43, %s11962_s21  ;;  %v11207_v43 = vld [vmem:[%s12104_s6 + $0x1b8] sm:$0x1] }
 0x476   : > { %6274 = vst.msk [vmem:[#allocation2 + $0x28] sm:$0xf] %vm6263_vm9, %v6188_v33  ;;  %v6918_v33 = vrot.slane %v6916_v56, 4 }
 0x477   : > { %6709 = vrot.lane.b32.xlu0 %v11177_v23, %s11962_s21  ;;  %v6194_v50 = vpop.permute.xlu1 %6193  ;;  %v15227_v23 = vrot.slane %v6912_v46, 5 }
 0x478   : > { %6277 = vst.msk [vmem:[#allocation2 + $0x34] sm:$0xf] %vm6263_vm9, %v6194_v50  ;;  %v6908_v50 = vrot.slane %v6906_v41, 5 }
 0x479   : > { %v6192_v51 = vpop.permute.xlu0 %6191  ;;  %6715 = vrot.lane.b32.xlu1 %v11180_v49, %s11962_s21  ;;  %v6905_v49 = vrot.slane %v6903_v60, 4 }
 0x47a   : > { %6276 = vst.msk [vmem:[#allocation2 + $0x30] sm:$0xf] %vm6263_vm9, %v6192_v51  ;;  %v6940_v51 = vshrl.u32 %v11212_v22, 16 }
 0x47b   : > { %6713 = vrot.lane.b32.xlu0 %v11179_v29, %s11962_s21  ;;  %v6198_v42 = vpop.permute.xlu1 %6197  ;;  %v6936_v29 = vshll.u32 %v11212_v22, 16  ;;  %v6988_v22 = vshrl.u32 %v11218_v6, 16 }
 0x47c   : > { %6279 = vst.msk [vmem:[#allocation2 + $0x3c] sm:$0xf] %vm6263_vm9, %v6198_v42 }
 0x47d   : > { %v6196_v0 = vpop.permute.xlu0 %6195  ;;  %6719 = vrot.lane.b32.xlu1 %v11182_v32, %s11962_s21  ;;  %v11211_v32 = vld [vmem:[%s12104_s6 + $0x1c8] sm:$0xf] }
 0x47e   : > { %6278 = vst.msk [vmem:[#allocation2 + $0x38] sm:$0xf] %vm6263_vm9, %v6196_v0 }
 0x47f   : > { %6717 = vrot.lane.b32.xlu0 %v11181_v34, %s11962_s21  ;;  %v6202_v39 = vpop.permute.xlu1 %6201  ;;  %v11199_v34 = vld [vmem:[%s12104_s6 + $0x24c] sm:$0xf] }
 0x480   : > { %6281 = vst.msk [vmem:[#allocation2 + $0x44] sm:$0xf] %vm6263_vm9, %v6202_v39  ;;  %v6898_v39 = vshll.u32 %v11207_v43, 16 }
 0x481   : > { %v6200_v19 = vpop.permute.xlu0 %6199  ;;  %6723 = vrot.lane.b32.xlu1 %v11184_v35, %s11962_s21  ;;  %v6895_v35 = vor.u32 %v6894_v38, %v15221_v7 }
 0x482   : > { %6280 = vst.msk [vmem:[#allocation2 + $0x40] sm:$0xf] %vm6263_vm9, %v6200_v19  ;;  %v6922_v19 = vshll.u32 %v11210_v44, 16 }
 0x483   : > { %6721 = vrot.lane.b32.xlu0 %v11183_v58, %s11962_s21  ;;  %v6206_v45 = vpop.permute.xlu1 %6205  ;;  %v6885_v58 = vor.u32 %v6884_v27, %v6881_v40  ;;  %v11221_v27 = vld [vmem:[%s12104_s6 + $0x1f0] sm:$0xf] }
 0x484   : > { %6283 = vst.msk [vmem:[#allocation2 + $0x4c] sm:$0xf] %vm6263_vm9, %v6206_v45  ;;  %v11214_v45 = vld [vmem:[%s12104_s6 + $0x1d4] sm:$0xf]  ;;  %v15246_v14 = vrot.slane %v6922_v19, 5 }
 0x485   : > { %v6204_v62 = vpop.permute.xlu0 %6203  ;;  %6727 = vrot.lane.b32.xlu1 %v11186_v30, %s11962_s21  ;;  %v11215_v30 = vld [vmem:[%s12104_s6 + $0x1d8] sm:$0xf] }
 0x486   : > { %6282 = vst.msk [vmem:[#allocation2 + $0x48] sm:$0xf] %vm6263_vm9, %v6204_v62  ;;  %v6919_v62 = vor.u32 %v6918_v33, %v15227_v23 }
 0x487   : > { %6725 = vrot.lane.b32.xlu0 %v11185_v61, %s11962_s21  ;;  %v6210_v3 = vpop.permute.xlu1 %6209  ;;  %v11202_v61 = vld [vmem:[%s12104_s6 + $0x25c] sm:$0xf] }
 0x488   : > { %6285 = vst.msk [vmem:[#allocation2 + $0x54] sm:$0xf] %vm6263_vm9, %v6210_v3  ;;  %v6909_v3 = vor.u32 %v6908_v50, %v6905_v49  ;;  %v15250_v16 = vrot.slane %v6919_v62, 4  ;;  %v11220_v50 = vld [vmem:[%s12104_s6 + $0x1ec] sm:$0xf] }
 0x489   : > { %v6208_v5 = vpop.permute.xlu0 %6207  ;;  %6731 = vrot.lane.b32.xlu1 %v11188_v31, %s11962_s21  ;;  %v6927_v31 = vshrl.u32 %v11211_v32, 16  ;;  %v6999_v62 = vshrl.u32 %v11220_v50, 16 }
 0x48a   : > { %6284 = vst.msk [vmem:[#allocation2 + $0x50] sm:$0xf] %vm6263_vm9, %v6208_v5  ;;  %v15242_v5 = vrot.slane %v6936_v29, 5  ;;  %v15256_v12 = vrot.slane %v6909_v3, 4  ;;  %v6925_v43 = vsel %vm12115_vm3, %v15250_v16, %v15246_v14  ;;  %v11227_v14 = vld [vmem:[%s12104_s6 + $0x208] sm:$0xf] }
 0x48b   : > { %6729 = vrot.lane.b32.xlu0 %v11187_v4, %s11962_s21  ;;  %v6214_v57 = vpop.permute.xlu1 %6213  ;;  %v11213_v4 = vld [vmem:[%s12104_s6 + $0x1d0] sm:$0x1]  ;;  %v6929_v25 = vrot.slane %v6927_v31, 4  ;;  %v7002_v31 = vshll.u32 %v11220_v50, 16  ;;  %v11226_v16 = vld [vmem:[%s12104_s6 + $0x204] sm:$0xf] }
 0x48c   : > { %6287 = vst.msk [vmem:[#allocation2 + $0x5c] sm:$0xf] %vm6263_vm9, %v6214_v57  ;;  %v6930_v57 = vshll.u32 %v11211_v32, 16  ;;  %v6915_v44 = vsel %vm12115_vm3, %v15256_v12, %v15227_v23  ;;  %v6990_v23 = vrot.slane %v6988_v22, 4  ;;  %v11222_v12 = vld [vmem:[%s12104_s6 + $0x1f4] sm:$0x1] }
 0x48d   : > { %v6212_v8 = vpop.permute.xlu0 %6211  ;;  %6735 = vrot.lane.b32.xlu1 %v11190_v24, %s11962_s21  ;;  %v6942_v24 = vrot.slane %v6940_v51, 4 }
 0x48e   : > { %6286 = vst.msk [vmem:[#allocation2 + $0x58] sm:$0xf] %vm6263_vm9, %v6212_v8  ;;  %v11201_v8 = vld [vmem:[%s12104_s6 + $0x258] sm:$0xf]  ;;  %v6932_v9 = vrot.slane %v6930_v57, 5 }
 0x48f   : > { %6733 = vrot.lane.b32.xlu0 %v11189_v52, %s11962_s21  ;;  %v6218_v10 = vpop.permute.xlu1 %6217 }
 0x490   : > { %6289 = vst.msk [vmem:[#allocation2 + $0x64] sm:$0xf] %vm6263_vm9, %v6218_v10  ;;  %v6964_v10 = vshrl.u32 %v11215_v30, 16  ;;  %v6933_v49 = vor.u32 %v6932_v9, %v6929_v25 }
 0x491   : > { %v6216_v36 = vpop.permute.xlu0 %6215  ;;  %6739 = vrot.lane.b32.xlu1 %v11192_v53, %s11962_s21  ;;  %v6960_v53 = vshll.u32 %v11215_v30, 16  ;;  %v7008_v30 = vshll.u32 %v11221_v27, 16 }
 0x492   : > { %6288 = vst.msk [vmem:[#allocation2 + $0x60] sm:$0xf] %vm6263_vm9, %v6216_v36  ;;  %v6954_v36 = vshll.u32 %v11214_v45, 16  ;;  %v6966_v56 = vrot.slane %v6964_v10, 4 }
 0x493   : > { %6737 = vrot.lane.b32.xlu0 %v11191_v54, %s11962_s21  ;;  %v6222_v21 = vpop.permute.xlu1 %6221  ;;  %v6951_v54 = vshrl.u32 %v11214_v45, 16  ;;  %v15260_v46 = vrot.slane %v6960_v53, 5 }
 0x494   : > { %6291 = vst.msk [vmem:[#allocation2 + $0x6c] sm:$0xf] %vm6263_vm9, %v6222_v21  ;;  %v6896_v21 = vrot.slane %v6895_v35, 4  ;;  %v6956_v60 = vrot.slane %v6954_v36, 5 }
 0x495   : > { %v6220_v13 = vpop.permute.xlu0 %6219  ;;  %6743 = vrot.lane.b32.xlu1 %v11194_v1, %s11962_s21  ;;  %v6967_v51 = vor.u32 %v6966_v56, %v15260_v46 }
 0x496   : > { %6290 = vst.msk [vmem:[#allocation2 + $0x68] sm:$0xf] %vm6263_vm9, %v6220_v13  ;;  %v6886_v13 = vrot.slane %v6885_v58, 4 }
 0x497   : > { %6741 = vrot.lane.b32.xlu0 %v11193_v59, %s11962_s21  ;;  %v6226_v18 = vpop.permute.xlu1 %6225  ;;  %v6900_v59 = vrot.slane %v6898_v39, 5  ;;  %v11219_v39 = vld [vmem:[%s12104_s6 + $0x1e8] sm:$0x1]  ;;  %v6968_v53 = vrot.slane %v6967_v51, 4 }
 0x498   : > { %6293 = vst.msk [vmem:[#allocation2 + $0x74] sm:$0xf] %vm6263_vm9, %v6226_v18  ;;  %v11217_v18 = vld [vmem:[%s12104_s6 + $0x1e0] sm:$0xf]  ;;  %v6891_v38 = vsel %vm12115_vm3, %v6886_v13, %v15221_v7  ;;  %v15302_v13 = vrot.slane %v7008_v30, 5 }
 0x499   : > { %v6224_v11 = vpop.permute.xlu0 %6223  ;;  %6747 = vrot.lane.b32.xlu1 %v11196_v26, %s11962_s21  ;;  %v6946_v26 = vshll.u32 %v11213_v4, 16  ;;  %v6978_v40 = vshll.u32 %v11217_v18, 16 }
 0x49a   : > { %6292 = vst.msk [vmem:[#allocation2 + $0x70] sm:$0xf] %vm6263_vm9, %v6224_v11  ;;  %v6943_v11 = vor.u32 %v6942_v24, %v15242_v5 }
 0x49b   : > { %6745 = vrot.lane.b32.xlu0 %v11195_v20, %s11962_s21  ;;  %v6230_v17 = vpop.permute.xlu1 %6229  ;;  %v11204_v20 = vld [vmem:[%s12104_s6 + $0x268] sm:$0xf]  ;;  %v15281_v33 = vrot.slane %v6946_v26, 5  ;;  %v6980_v45 = vrot.slane %v6978_v40, 5  ;;  %v11230_v40 = vld [vmem:[%s12104_s6 + $0x214] sm:$0xf] }
 0x49c   : > { %6295 = vst.msk [vmem:[#allocation2 + $0x7c] sm:$0xf] %vm6263_vm9, %v6230_v17  ;;  %v11216_v17 = vld [vmem:[%s12104_s6 + $0x1dc] sm:$0x1]  ;;  %v15284_v29 = vrot.slane %v6943_v11, 4 }
 0x49d   : > { %v6228_v15 = vpop.permute.xlu0 %6227  ;;  %6751 = vrot.lane.b32.xlu1 %v11198_v2, %s11962_s21  ;;  %v6953_v2 = vrot.slane %v6951_v54, 4  ;;  %v6970_v32 = vshll.u32 %v11216_v17, 16  ;;  %v6994_v54 = vshll.u32 %v11219_v39, 16  ;;  %v7047_v17 = vshrl.u32 %v11226_v16, 16 }
 0x49e   : > { %6294 = vst.msk [vmem:[#allocation2 + $0x78] sm:$0xf] %vm6263_vm9, %v6228_v15  ;;  %v6975_v15 = vshrl.u32 %v11217_v18, 16  ;;  %v7001_v18 = vrot.slane %v6999_v62, 4 }
 0x49f   : > { %6749 = vrot.lane.b32.xlu0 %v11197_v55, %s11962_s21  ;;  %v6507_v42 = vpop.permute.xlu1 %6506  ;;  %v6984_v55 = vshll.u32 %v11218_v6, 16  ;;  %v6972_v10 = vrot.slane %v6970_v32, 5 }
 0x4a0   : > { %6602 = vst.msk [vmem:[#allocation2 + $0x4] sm:$0xf] %vm6600_vm10, %v6507_v42  ;;  %v6957_v42 = vor.u32 %v6956_v60, %v6953_v2  ;;  %v6977_v19 = vrot.slane %v6975_v15, 4  ;;  %v11225_v2 = vld [vmem:[%s12104_s6 + $0x200] sm:$0x1]  ;;  %v7056_v60 = vshll.u32 %v11227_v14, 16 }
 0x4a1   : > { %v6505_v0 = vpop.permute.xlu0 %6504  ;;  %6755 = vrot.lane.b32.xlu1 %v11200_v37, %s11962_s21  ;;  %v6901_v37 = vsel %vm12115_vm3, %v6896_v21, %v6900_v59  ;;  %v15291_v58 = vrot.slane %v6984_v55, 5  ;;  %v6973_v22 = vsel %vm12115_vm3, %v6968_v53, %v6972_v10 }
 0x4a2   : > { %6601 = vst.msk [vmem:[#allocation2] sm:$0xf] %vm6600_vm10, %v6505_v0  ;;  %v11223_v0 = vld [vmem:[%s12104_s6 + $0x1f8] sm:$0xf]  ;;  %v6958_v21 = vrot.slane %v6957_v42, 4  ;;  %v6981_v26 = vor.u32 %v6980_v45, %v6977_v19  ;;  %v15329_v51 = vrot.slane %v7056_v60, 5 }
 0x4a3   : > { %6753 = vrot.lane.b32.xlu0 %v11199_v34, %s11962_s21  ;;  %v6511_v52 = vpop.permute.xlu1 %6510  ;;  %v11224_v34 = vld [vmem:[%s12104_s6 + $0x1fc] sm:$0xf]  ;;  %v7023_v24 = vshrl.u32 %v11223_v0, 16  ;;  %v7026_v57 = vshll.u32 %v11223_v0, 16  ;;  %v6991_v59 = vor.u32 %v6990_v23, %v15291_v58  ;;  %v7049_v42 = vrot.slane %v7047_v17, 4 }
 0x4a4   : > { %6604 = vst.msk [vmem:[#allocation2 + $0xc] sm:$0xf] %vm6600_vm10, %v6511_v52  ;;  %v7032_v3 = vshll.u32 %v11224_v34, 16  ;;  %v7036_v4 = vshrl.u32 %v11224_v34, 16  ;;  %v6963_v15 = vsel %vm12115_vm3, %v6958_v21, %v15260_v46  ;;  %v7042_v46 = vshll.u32 %v11225_v2, 16 }
 0x4a5   : > { %v6509_v1 = vpop.permute.xlu0 %6508  ;;  %6759 = vrot.lane.b32.xlu1 %v11202_v61, %s11962_s21  ;;  %v7012_v61 = vshrl.u32 %v11221_v27, 16  ;;  %v7025_v9 = vrot.slane %v7023_v24, 4  ;;  %v7080_v34 = vshll.u32 %v11230_v40, 16  ;;  %v7084_v23 = vshrl.u32 %v11230_v40, 16  ;;  %v11234_v40 = vld [vmem:[%s12104_s6 + $0x224] sm:$0x1] }
 0x4a6   : > { %6603 = vst.msk [vmem:[#allocation2 + $0x8] sm:$0xf] %vm6600_vm10, %v6509_v1  ;;  %v6949_v1 = vsel %vm12115_vm3, %v15284_v29, %v15281_v33  ;;  %v15310_v11 = vrot.slane %v7032_v3, 5  ;;  %v7038_v25 = vrot.slane %v7036_v4, 4  ;;  %v11229_v33 = vld [vmem:[%s12104_s6 + $0x210] sm:$0xf] }
 0x4a7   : > { %6757 = vrot.lane.b32.xlu0 %v11201_v8, %s11962_s21  ;;  %v6515_v47 = vpop.permute.xlu1 %6514  ;;  %v6934_v8 = vrot.slane %v6933_v49, 4  ;;  %v7014_v6 = vrot.slane %v7012_v61, 4  ;;  %v6982_v49 = vrot.slane %v6981_v26, 4  ;;  %v7071_v19 = vshrl.u32 %v11229_v33, 16 }
 0x4a8   : > { %6606 = vst.msk [vmem:[#allocation2 + $0x14] sm:$0xf] %vm6600_vm10, %v6515_v47  ;;  %v7028_v47 = vrot.slane %v7026_v57, 5  ;;  %v7039_v50 = vor.u32 %v7038_v25, %v15310_v11  ;;  %v7074_v30 = vshll.u32 %v11229_v33, 16  ;;  %v15343_v24 = vrot.slane %v7042_v46, 5 }
 0x4a9   : > { %v6513_v41 = vpop.permute.xlu0 %6512  ;;  %6763 = vrot.lane.b32.xlu1 %v11204_v20, %s11962_s21  ;;  %v7004_v20 = vrot.slane %v7002_v31, 5  ;;  %v6939_v56 = vsel %vm12115_vm3, %v6934_v8, %v15242_v5  ;;  %v6992_v5 = vrot.slane %v6991_v59, 4  ;;  %v7015_v27 = vor.u32 %v7014_v6, %v15302_v13  ;;  %v11233_v57 = vld [vmem:[%s12104_s6 + $0x220] sm:$0xf] }
 0x4aa   : > { %6605 = vst.msk [vmem:[#allocation2 + $0x10] sm:$0xf] %vm6600_vm10, %v6513_v41  ;;  %v7060_v41 = vshrl.u32 %v11227_v14, 16  ;;  %v6987_v3 = vsel %vm12115_vm3, %v6982_v49, %v15291_v58  ;;  %v15341_v4 = vrot.slane %v7039_v50, 4  ;;  %v7086_v21 = vrot.slane %v7084_v23, 4 }
 0x4ab   : > { %6761 = vrot.lane.b32.xlu0 %v11203_v48, %s11962_s21  ;;  %v6519_v7 = vpop.permute.xlu1 %6518  ;;  %v7016_v45 = vrot.slane %v7015_v27, 4  ;;  %v7073_v59 = vrot.slane %v7071_v19, 4  ;;  %v7076_v14 = vrot.slane %v7074_v30, 5  ;;  %v7104_v26 = vshll.u32 %v11233_v57, 16  ;;  %s11854_s21 = sshll.u32 %s11971_s18, 4  ;;  %s11855_s21 = int_to_ptr.vmem [resolvable:$false] %s11854_s21 }
 0x4ac   : > { %6608 = vst.msk [vmem:[#allocation2 + $0x1c] sm:$0xf] %vm6600_vm10, %v6519_v7  ;;  %v7029_v7 = vor.u32 %v7028_v47, %v7025_v9  ;;  %v7062_v32 = vrot.slane %v7060_v41, 4  ;;  %v7108_v6 = vshrl.u32 %v11233_v57, 16  ;;  %v11236_v9 = vld [vmem:[%s12104_s6 + $0x22c] sm:$0xf] }
 0x4ad   : > { %v6517_v35 = vpop.permute.xlu0 %6516  ;;  %7264 = vrot.lane.b32.xlu1 %v6901_v37, %s11963_s24  ;;  %v6996_v37 = vrot.slane %v6994_v54, 5  ;;  %v11235_v41 = vld [vmem:[%s12104_s6 + $0x228] sm:$0xf]  ;;  %v7132_v33 = vshrl.u32 %v11236_v9, 16  ;;  %v7114_v23 = vshll.u32 %v11234_v40, 16 }
 0x4ae   : > { %6607 = vst.msk [vmem:[#allocation2 + $0x18] sm:$0xf] %vm6600_vm10, %v6517_v35  ;;  %v11228_v35 = vld [vmem:[%s12104_s6 + $0x20c] sm:$0x1]  ;;  %v15347_v53 = vrot.slane %v7029_v7, 4  ;;  %v7063_v10 = vor.u32 %v7062_v32, %v15329_v51  ;;  %v7119_v49 = vshrl.u32 %v11235_v41, 16 }
 0x4af   : > { %7262 = vrot.lane.b32.xlu0 %v6891_v38, %s11963_s24  ;;  %v6523_v52 = vpop.permute.xlu1 %6522  ;;  %v7050_v38 = vshll.u32 %v11226_v16, 16  ;;  %v6997_v31 = vsel %vm12115_vm3, %v6992_v5, %v6996_v37  ;;  %v7066_v54 = vshll.u32 %v11228_v35, 16  ;;  %v11231_v16 = vld [vmem:[%s12104_s6 + $0x218] sm:$0x1]  ;;  %v15379_v5 = vrot.slane %v7104_v26, 5 }
 0x4b0   : > { %6610 = vst.msk [vmem:[#allocation2 + $0x24] sm:$0xf] %vm6600_vm10, %v6523_v52  ;;  %v11232_v52 = vld [vmem:[%s12104_s6 + $0x21c] sm:$0xf]  ;;  %v7064_v2 = vrot.slane %v7063_v10, 4  ;;  %v7122_v50 = vshll.u32 %v11235_v41, 16 }
 0x4b1   : > { %v6521_v36 = vpop.permute.xlu0 %6520  ;;  %7268 = vrot.lane.b32.xlu1 %v6925_v43, %s11963_s24  ;;  %v7018_v43 = vshll.u32 %v11222_v12, 16  ;;  %v7052_v39 = vrot.slane %v7050_v38, 5  ;;  %v7098_v25 = vshll.u32 %v11232_v52, 16  ;;  %v7068_v60 = vrot.slane %v7066_v54, 5  ;;  %v11239_v37 = vld [vmem:[%s12104_s6 + $0x238] sm:$0xf] }
 0x4b2   : > { %6609 = vst.msk [vmem:[#allocation2 + $0x20] sm:$0xf] %vm6600_vm10, %v6521_v36  ;;  %v15350_v36 = vrot.slane %v7080_v34, 5  ;;  %v11238_v38 = vld [vmem:[%s12104_s6 + $0x234] sm:$0xf]  ;;  %v7152_v7 = vshll.u32 %v11239_v37, 16 }
 0x4b3   : > { %7266 = vrot.lane.b32.xlu0 %v6915_v44, %s11963_s24  ;;  %v6527_v48 = vpop.permute.xlu1 %6526  ;;  %v7005_v44 = vor.u32 %v7004_v20, %v7001_v18  ;;  %v7020_v61 = vrot.slane %v7018_v43, 5  ;;  %v7053_v58 = vor.u32 %v7052_v39, %v7049_v42  ;;  %v7095_v18 = vshrl.u32 %v11232_v52, 16 }
 0x4b4   : > { %6612 = vst.msk [vmem:[#allocation2 + $0x2c] sm:$0xf] %vm6600_vm10, %v6527_v48  ;;  %v7045_v48 = vsel %vm12115_vm3, %v15341_v4, %v15343_v24  ;;  %v7128_v43 = vshll.u32 %v11236_v9, 16  ;;  %v7143_v32 = vshrl.u32 %v11238_v38, 16  ;;  %v7146_v42 = vshll.u32 %v11238_v38, 16 }
 0x4b5   : > { %v6525_v55 = vpop.permute.xlu0 %6524  ;;  %7272 = vrot.lane.b32.xlu1 %v6949_v1, %s11963_s24  ;;  %v7006_v62 = vrot.slane %v7005_v44, 4  ;;  %v7021_v20 = vsel %vm12115_vm3, %v7016_v45, %v7020_v61  ;;  %v7054_v17 = vrot.slane %v7053_v58, 4  ;;  %v7097_v27 = vrot.slane %v7095_v18, 4  ;;  %v11240_v58 = vld [vmem:[%s12104_s6 + $0x23c] sm:$0x1] }
 0x4b6   : > { %6611 = vst.msk [vmem:[#allocation2 + $0x28] sm:$0xf] %vm6600_vm10, %v6525_v55  ;;  %v7087_v55 = vor.u32 %v7086_v21, %v15350_v36  ;;  %v7100_v44 = vrot.slane %v7098_v25, 5  ;;  %v15391_v61 = vrot.slane %v7128_v43, 5  ;;  %v7134_v4 = vrot.slane %v7132_v33, 4 }
 0x4b7   : > { %7270 = vrot.lane.b32.xlu0 %v6939_v56, %s11963_s24  ;;  %v6531_v29 = vpop.permute.xlu1 %6530  ;;  %v7011_v12 = vsel %vm12115_vm3, %v7006_v62, %v15302_v13  ;;  %v7035_v56 = vsel %vm12115_vm3, %v15347_v53, %v15310_v11  ;;  %v7110_v11 = vrot.slane %v7108_v6, 4  ;;  %v7059_v19 = vsel %vm12115_vm3, %v7054_v17, %v15329_v51  ;;  %v11242_v62 = vld [vmem:[%s12104_s6 + $0x244] sm:$0xf] }
 0x4b8   : > { %6614 = vst.msk [vmem:[#allocation2 + $0x34] sm:$0xf] %vm6600_vm10, %v6531_v29  ;;  %v7156_v29 = vshrl.u32 %v11239_v37, 16  ;;  %v7088_v35 = vrot.slane %v7087_v55, 4  ;;  %v7121_v24 = vrot.slane %v7119_v49, 4  ;;  %v7124_v57 = vrot.slane %v7122_v50, 5 }
 0x4b9   : > { %v6529_v0 = vpop.permute.xlu0 %6528  ;;  %7276 = vrot.lane.b32.xlu1 %v6973_v22, %s11963_s24  ;;  %v7090_v22 = vshll.u32 %v11231_v16, 16  ;;  %v7111_v45 = vor.u32 %v7110_v11, %v15379_v5  ;;  %v15397_v53 = vrot.slane %v7152_v7, 5  ;;  %v7145_v10 = vrot.slane %v7143_v32, 4  ;;  %v11243_v37 = vld [vmem:[%s12104_s6 + $0x248] sm:$0x1] }
 0x4ba   : > { %6613 = vst.msk [vmem:[#allocation2 + $0x30] sm:$0xf] %vm6600_vm10, %v6529_v0  ;;  %v7069_v0 = vsel %vm12115_vm3, %v7064_v2, %v7068_v60  ;;  %v7158_v51 = vrot.slane %v7156_v29, 4  ;;  %v7148_v54 = vrot.slane %v7146_v42, 5  ;;  %v7176_v21 = vshll.u32 %v11242_v62, 16 }
 0x4bb   : > { %7274 = vrot.lane.b32.xlu0 %v6963_v15, %s11963_s24  ;;  %v6535_v8 = vpop.permute.xlu1 %6534  ;;  %v7077_v15 = vor.u32 %v7076_v14, %v7073_v59  ;;  %v7092_v39 = vrot.slane %v7090_v22, 5  ;;  %v7180_v59 = vshrl.u32 %v11242_v62, 16  ;;  %v7116_v6 = vrot.slane %v7114_v23, 5  ;;  %v11248_v32 = vld [vmem:[%s12104_s6 + $0x25c] sm:$0xf] }
 0x4bc   : > { %6616 = vst.msk [vmem:[#allocation2 + $0x3c] sm:$0xf] %vm6600_vm10, %v6535_v8  ;;  %v11237_v8 = vld [vmem:[%s12104_s6 + $0x230] sm:$0x1]  ;;  %v7135_v9 = vor.u32 %v7134_v4, %v15391_v61  ;;  %v7125_v2 = vor.u32 %v7124_v57, %v7121_v24  ;;  %v7159_v60 = vor.u32 %v7158_v51, %v15397_v53  ;;  %v7162_v41 = vshll.u32 %v11240_v58, 16 }
 0x4bd   : > { %v6533_v1 = vpop.permute.xlu0 %6532  ;;  %7280 = vrot.lane.b32.xlu1 %v6997_v31, %s11963_s24  ;;  %v7078_v30 = vrot.slane %v7077_v15, 4  ;;  %v11241_v31 = vld [vmem:[%s12104_s6 + $0x240] sm:$0xf]  ;;  %v7093_v16 = vsel %vm12115_vm3, %v7088_v35, %v7092_v39  ;;  %v15414_v17 = vrot.slane %v7176_v21, 5  ;;  %v7182_v55 = vrot.slane %v7180_v59, 4 }
 0x4be   : > { %6615 = vst.msk [vmem:[#allocation2 + $0x38] sm:$0xf] %vm6600_vm10, %v6533_v1  ;;  %v7167_v14 = vshrl.u32 %v11241_v31, 16  ;;  %v7170_v18 = vshll.u32 %v11241_v31, 16  ;;  %v7160_v7 = vrot.slane %v7159_v60, 4  ;;  %v7164_v29 = vrot.slane %v7162_v41, 5 }
 0x4bf   : > { %7278 = vrot.lane.b32.xlu0 %v6987_v3, %s11963_s24  ;;  %v6539_v47 = vpop.permute.xlu1 %6538  ;;  %v7101_v3 = vor.u32 %v7100_v44, %v7097_v27  ;;  %v7083_v26 = vsel %vm12115_vm3, %v7078_v30, %v15350_v36  ;;  %v7136_v44 = vrot.slane %v7135_v9, 4  ;;  %v7186_v35 = vshll.u32 %v11243_v37, 16  ;;  %v11247_v23 = vld [vmem:[%s12104_s6 + $0x258] sm:$0xf]  ;;  %v11246_v31 = vld [vmem:[%s12104_s6 + $0x254] sm:$0x1] }
 0x4c0   : > { %6618 = vst.msk [vmem:[#allocation2 + $0x44] sm:$0xf] %vm6600_vm10, %v6539_v47  ;;  %v7138_v47 = vshll.u32 %v11237_v8, 16  ;;  %v7169_v22 = vrot.slane %v7167_v14, 4  ;;  %v7172_v38 = vrot.slane %v7170_v18, 5  ;;  %v7228_v4 = vshrl.u32 %v11248_v32, 16 }
 0x4c1   : > { %v6537_v13 = vpop.permute.xlu0 %6536  ;;  %7284 = vrot.lane.b32.xlu1 %v7021_v20, %s11963_s24  ;;  %v11245_v20 = vld [vmem:[%s12104_s6 + $0x250] sm:$0xf]  ;;  %v7102_v25 = vrot.slane %v7101_v3, 4  ;;  %v7224_v3 = vshll.u32 %v11248_v32, 16  ;;  %v7218_v8 = vshll.u32 %v11247_v23, 16  ;;  %v7188_v21 = vrot.slane %v7186_v35, 5 }
 0x4c2   : > { %6617 = vst.msk [vmem:[#allocation2 + $0x40] sm:$0xf] %vm6600_vm10, %v6537_v13  ;;  %v7149_v13 = vor.u32 %v7148_v54, %v7145_v10  ;;  %v7200_v15 = vshll.u32 %v11245_v20, 16  ;;  %v7204_v40 = vshrl.u32 %v11245_v20, 16  ;;  %v7140_v33 = vrot.slane %v7138_v47, 5 }
 0x4c3   : > { %7282 = vrot.lane.b32.xlu0 %v7011_v12, %s11963_s24  ;;  %v6543_v46 = vpop.permute.xlu1 %6542  ;;  %v7112_v12 = vrot.slane %v7111_v45, 4  ;;  %v7107_v50 = vsel %vm12115_vm3, %v7102_v25, %v15379_v5  ;;  %v7173_v5 = vor.u32 %v7172_v38, %v7169_v22  ;;  %v11251_v51 = vld [vmem:[%s12104_s6 + $0x268] sm:$0xf]  ;;  %v7165_v54 = vsel %vm12115_vm3, %v7160_v7, %v7164_v29  ;;  %v11250_v59 = vld [vmem:[%s12104_s6 + $0x264] sm:$0xf] }
 0x4c4   : > { %6620 = vst.msk [vmem:[#allocation2 + $0x4c] sm:$0xf] %vm6600_vm10, %v6543_v46  ;;  %v7126_v46 = vrot.slane %v7125_v2, 4  ;;  %v15428_v39 = vrot.slane %v7200_v15, 5  ;;  %v7141_v62 = vsel %vm12115_vm3, %v7136_v44, %v7140_v33  ;;  %v7230_v18 = vrot.slane %v7228_v4, 4 }
 0x4c5   : > { %v6541_v34 = vpop.permute.xlu0 %6540  ;;  %7288 = vrot.lane.b32.xlu1 %v7045_v48, %s11963_s24  ;;  %v11244_v48 = vld [vmem:[%s12104_s6 + $0x24c] sm:$0xf]  ;;  %v7117_v43 = vsel %vm12115_vm3, %v7112_v12, %v7116_v6  ;;  %v15452_v6 = vrot.slane %v7224_v3, 5  ;;  %v7248_v20 = vshll.u32 %v11251_v51, 16  ;;  %v11249_v25 = vld [vmem:[%s12104_s6 + $0x260] sm:$0x1] }
 0x4c6   : > { %6619 = vst.msk [vmem:[#allocation2 + $0x48] sm:$0xf] %vm6600_vm10, %v6541_v34  ;;  %v7191_v11 = vshrl.u32 %v11244_v48, 16  ;;  %v7194_v27 = vshll.u32 %v11244_v48, 16  ;;  %v7150_v34 = vrot.slane %v7149_v13, 4  ;;  %v7131_v57 = vsel %vm12115_vm3, %v7126_v46, %v15391_v61 }
 0x4c7   : > { %7286 = vrot.lane.b32.xlu0 %v7035_v56, %s11963_s24  ;;  %v6547_v52 = vpop.permute.xlu1 %6546  ;;  %v7174_v61 = vrot.slane %v7173_v5, 4  ;;  %v7220_v47 = vrot.slane %v7218_v8, 5  ;;  %v7239_v48 = vshrl.u32 %v11250_v59, 16  ;;  %v7234_v22 = vshll.u32 %v11249_v25, 16  ;;  %v11257_v3 = vld [vmem:[%s12104_s6 + $0x1c0] sm:$0xf] }
 0x4c8   : > { %6622 = vst.msk [vmem:[#allocation2 + $0x54] sm:$0xf] %vm6600_vm10, %v6547_v52  ;;  %v7193_v30 = vrot.slane %v7191_v11, 4  ;;  %v7196_v45 = vrot.slane %v7194_v27, 5  ;;  %v7215_v52 = vshrl.u32 %v11247_v23, 16  ;;  %v7250_v15 = vrot.slane %v7248_v20, 5 }
 0x4c9   : > { %v6545_v1 = vpop.permute.xlu0 %6544  ;;  %7292 = vrot.lane.b32.xlu1 %v7069_v0, %s11963_s24  ;;  %v7183_v0 = vor.u32 %v7182_v55, %v15414_v17  ;;  %v7179_v41 = vsel %vm12115_vm3, %v7174_v61, %v15414_v17  ;;  %v7231_v55 = vor.u32 %v7230_v18, %v15452_v6  ;;  %v11252_v27 = vld [vmem:[%s12104_s6 + $0x26c] sm:$0x1]  ;;  %v11256_v61 = vld [vmem:[%s12104_s6 + $0x1bc] sm:$0xe]  ;;  %v11263_v25 = vld [vmem:[%s12104_s6 + $0x1d8] sm:$0xf] }
 0x4ca   : > { %6621 = vst.msk [vmem:[#allocation2 + $0x50] sm:$0xf] %vm6600_vm10, %v6545_v1  ;;  %v7155_v1 = vsel %vm12115_vm3, %v7150_v34, %v15397_v53  ;;  %v7252_v53 = vshrl.u32 %v11251_v51, 16  ;;  %v7217_v9 = vrot.slane %v7215_v52, 4  ;;  %v7258_v7 = vshll.u32 %v11252_v27, 16 }
 0x4cb   : > { %7290 = vrot.lane.b32.xlu0 %v7059_v19, %s11963_s24  ;;  %v6551_v56 = vpop.permute.xlu1 %6550  ;;  %v7206_v19 = vrot.slane %v7204_v40, 4  ;;  %v7184_v58 = vrot.slane %v7183_v0, 4  ;;  %v11254_v0 = vld [vmem:[%s12104_s6 + $0x1b4] sm:$0xf]  ;;  %v7496_v51 = vrot.slane %v11257_v3, 5 }
 0x4cc   : > { %6624 = vst.msk [vmem:[#allocation2 + $0x5c] sm:$0xf] %vm6600_vm10, %v6551_v56  ;;  %v7242_v56 = vshll.u32 %v11250_v59, 16  ;;  %v7254_v37 = vrot.slane %v7252_v53, 4  ;;  %v7221_v11 = vor.u32 %v7220_v47, %v7217_v9  ;;  %v11302_v53 = vrot.slane %v11256_v61, 9 }
 0x4cd   : > { %v6549_v36 = vpop.permute.xlu0 %6548  ;;  %7296 = vrot.lane.b32.xlu1 %v7093_v16, %s11963_s24  ;;  %v7207_v14 = vor.u32 %v7206_v19, %v15428_v39  ;;  %v7210_v16 = vshll.u32 %v11246_v31, 16  ;;  %v7189_v60 = vsel %vm12115_vm3, %v7184_v58, %v7188_v21  ;;  %v7489_v19 = vrot.slane %v11254_v0, 5  ;;  %v11255_v31 = vld [vmem:[%s12104_s6 + $0x1b8] sm:$0x1]  ;;  %v11258_v58 = vld [vmem:[%s12104_s6 + $0x1c4] sm:$0x1] }
 0x4ce   : > { %6623 = vst.msk [vmem:[#allocation2 + $0x58] sm:$0xf] %vm6600_vm10, %v6549_v36  ;;  %v7244_v44 = vrot.slane %v7242_v56, 5  ;;  %v7255_v46 = vor.u32 %v7254_v37, %v7250_v15  ;;  %v7492_v8 = vrot.slane %v11255_v31, 5  ;;  %v11260_v21 = vld [vmem:[%s12104_s6 + $0x1cc] sm:$0xf] }
 0x4cf   : > { %7294 = vrot.lane.b32.xlu0 %v7083_v26, %s11963_s24  ;;  %v6555_v49 = vpop.permute.xlu1 %6554  ;;  %v7197_v26 = vor.u32 %v7196_v45, %v7193_v30  ;;  %v7208_v13 = vrot.slane %v7207_v14, 4  ;;  %v7212_v36 = vrot.slane %v7210_v16, 5  ;;  %v7491_v52 = vrot.slane %v7489_v19, 4  ;;  %v11259_v47 = vld [vmem:[%s12104_s6 + $0x1c8] sm:$0xe] }
 0x4d0   : > { %6626 = vst.msk [vmem:[#allocation2 + $0x64] sm:$0xf] %vm6600_vm10, %v6555_v49  ;;  %v7232_v49 = vrot.slane %v7231_v55, 4  ;;  %v7256_v5 = vrot.slane %v7255_v46, 4  ;;  %v7498_v16 = vrot.slane %v7496_v51, 4 }
 0x4d1   : > { %v6553_v42 = vpop.permute.xlu0 %6552  ;;  %7300 = vrot.lane.b32.xlu1 %v7117_v43, %s11963_s24  ;;  %v7198_v40 = vrot.slane %v7197_v26, 4  ;;  %v7241_v43 = vrot.slane %v7239_v48, 4  ;;  %v7213_v17 = vsel %vm12115_vm3, %v7208_v13, %v7212_v36  ;;  %v7493_v14 = vsel %vm12259_vm7, %v7491_v52, %v7492_v8  ;;  %v11264_v55 = vld [vmem:[%s12104_s6 + $0x1dc] sm:$0x1]  ;;  %v11262_v37 = vld [vmem:[%s12104_s6 + $0x1d4] sm:$0xe] }
 0x4d2   : > { %6625 = vst.msk [vmem:[#allocation2 + $0x60] sm:$0xf] %vm6600_vm10, %v6553_v42  ;;  %v7222_v42 = vrot.slane %v7221_v11, 4  ;;  %v7499_v26 = vrot.slane %v11258_v58, 5  ;;  %v7497_v13 = vsel %vm12259_vm7, %v11302_v53, %v7496_v51  ;;  %v11303_v36 = vrot.slane %v11259_v47, 9 }
 0x4d3   : > { %7298 = vrot.lane.b32.xlu0 %v7107_v50, %s11963_s24  ;;  %v6559_v24 = vpop.permute.xlu1 %6558  ;;  %v7236_v50 = vrot.slane %v7234_v22, 5  ;;  %v7203_v32 = vsel %vm12115_vm3, %v7198_v40, %v15428_v39  ;;  %v7245_v34 = vor.u32 %v7244_v44, %v7241_v43  ;;  %v7260_v39 = vrot.slane %v7258_v7, 5  ;;  %v11266_v22 = vld [vmem:[%s12104_s6 + $0x1e4] sm:$0xf]  ;;  %v11265_v46 = vld [vmem:[%s12104_s6 + $0x1e0] sm:$0xe] }
 0x4d4   : > { %6628 = vst.msk [vmem:[#allocation2 + $0x6c] sm:$0xf] %vm6600_vm10, %v6559_v24  ;;  %v7227_v45 = vsel %vm12115_vm3, %v7222_v42, %v15452_v6  ;;  %v11253_v24 = vld [vmem:[%s12104_s6 + $0x1b0] sm:$0xe]  ;;  %v7503_v6 = vrot.slane %v11260_v21, 5  ;;  %v7500_v48 = vsel %vm12259_vm7, %v7498_v16, %v7499_v26  ;;  %v7513_v11 = vrot.slane %v11264_v55, 5 }
 0x4d5   : > { %v6557_v10 = vpop.permute.xlu0 %6556  ;;  %7304 = vrot.lane.b32.xlu1 %v7141_v62, %s11963_s24  ;;  %v7237_v23 = vsel %vm12115_vm3, %v7232_v49, %v7236_v50  ;;  %v7246_v62 = vrot.slane %v7245_v34, 4  ;;  %v7517_v27 = vrot.slane %v11266_v22, 5  ;;  %v11269_v49 = vld [vmem:[%s12104_s6 + $0x1f0] sm:$0xf]  ;;  %v11275_v52 = vld [vmem:[%s12104_s6 + $0x208] sm:$0xf] }
 0x4d6   : > { %6627 = vst.msk [vmem:[#allocation2 + $0x68] sm:$0xf] %vm6600_vm10, %v6557_v10  ;;  %v7505_v56 = vrot.slane %v7503_v6, 4  ;;  %v7504_v44 = vsel %vm12259_vm7, %v11303_v36, %v7503_v6  ;;  %v7524_v42 = vrot.slane %v11269_v49, 5  ;;  %v11271_v51 = vld [vmem:[%s12104_s6 + $0x1f8] sm:$0xe] }
 0x4d7   : > { %7302 = vrot.lane.b32.xlu0 %v7131_v57, %s11963_s24  ;;  %v6563_v12 = vpop.permute.xlu1 %6562  ;;  %v7261_v57 = vsel %vm12115_vm3, %v7256_v5, %v7260_v39  ;;  %v11272_v5 = vld [vmem:[%s12104_s6 + $0x1fc] sm:$0xf]  ;;  %v7538_v58 = vrot.slane %v11275_v52, 5  ;;  %v11307_v61 = vrot.slane %v11271_v51, 9  ;;  %v11278_v16 = vld [vmem:[%s12104_s6 + $0x214] sm:$0xf] }
 0x4d8   : > { %6630 = vst.msk [vmem:[#allocation2 + $0x74] sm:$0xf] %vm6600_vm10, %v6563_v12  ;;  %v11261_v12 = vld [vmem:[%s12104_s6 + $0x1d0] sm:$0x1]  ;;  %v7531_v31 = vrot.slane %v11272_v5, 5 }
 0x4d9   : > { %v6561_v2 = vpop.permute.xlu0 %6560  ;;  %7308 = vrot.lane.b32.xlu1 %v7165_v54, %s11963_s24  ;;  %v7251_v54 = vsel %vm12115_vm3, %v7246_v62, %v7250_v15  ;;  %v11274_v6 = vld [vmem:[%s12104_s6 + $0x204] sm:$0xe] }
 0x4da   : > { %6629 = vst.msk [vmem:[#allocation2 + $0x70] sm:$0xf] %vm6600_vm10, %v6561_v2  ;;  %v7506_v2 = vrot.slane %v11261_v12, 5  ;;  %v7545_v12 = vrot.slane %v11278_v16, 5  ;;  %v11308_v47 = vrot.slane %v11274_v6, 9 }
 0x4db   : > { %7306 = vrot.lane.b32.xlu0 %v7155_v1, %s11963_s24  ;;  %v6567_v38 = vpop.permute.xlu1 %6566  ;;  %v11301_v1 = vrot.slane %v11253_v24, 9 }
 0x4dc   : > { %6632 = vst.msk [vmem:[#allocation2 + $0x7c] sm:$0xf] %vm6600_vm10, %v6567_v38  ;;  %v7507_v38 = vsel %vm12259_vm7, %v7505_v56, %v7506_v2  ;;  %v11281_v56 = vld [vmem:[%s12104_s6 + $0x220] sm:$0xf] }
 0x4dd   : > { %v6565_v33 = vpop.permute.xlu0 %6564  ;;  %7312 = vrot.lane.b32.xlu1 %v7189_v60, %s11963_s24  ;;  %v7490_v20 = vsel %vm12259_vm7, %v11301_v1, %v7489_v19  ;;  %v7510_v60 = vrot.slane %v11263_v25, 5  ;;  %v11268_v19 = vld [vmem:[%s12104_s6 + $0x1ec] sm:$0xe]  ;;  %v7552_v55 = vrot.slane %v11281_v56, 5 }
 0x4de   : > { %6631 = vst.msk [vmem:[#allocation2 + $0x78] sm:$0xf] %vm6600_vm10, %v6565_v33  ;;  %v11304_v33 = vrot.slane %v11262_v37, 9  ;;  %v11306_v24 = vrot.slane %v11268_v19, 9 }
 0x4df   : > { %7310 = vrot.lane.b32.xlu0 %v7179_v41, %s11963_s24  ;;  %v6704_v29 = vpop.permute.xlu1 %6703  ;;  %v7512_v40 = vrot.slane %v7510_v60, 4 }
 0x4e0   : > { %6799 = vst.msk [vmem:[#allocation2 + $0x4] sm:$0xf] %vm6797_vm11, %v6704_v29  ;;  %v7519_v29 = vrot.slane %v7517_v27, 4  ;;  %v7511_v0 = vsel %vm12259_vm7, %v11304_v33, %v7510_v60  ;;  %v11277_v60 = vld [vmem:[%s12104_s6 + $0x210] sm:$0xe] }
 0x4e1   : > { %v6702_v35 = vpop.permute.xlu0 %6701  ;;  %7316 = vrot.lane.b32.xlu1 %v7213_v17, %s11963_s24  ;;  %v11267_v17 = vld [vmem:[%s12104_s6 + $0x1e8] sm:$0x1]  ;;  %v7514_v7 = vsel %vm12259_vm7, %v7512_v40, %v7513_v11  ;;  %v11309_v37 = vrot.slane %v11277_v60, 9  ;;  %v11284_v40 = vld [vmem:[%s12104_s6 + $0x22c] sm:$0xf] }
 0x4e2   : > { %6798 = vst.msk [vmem:[#allocation2] sm:$0xf] %vm6797_vm11, %v6702_v35  ;;  %v11305_v35 = vrot.slane %v11265_v46, 9 }
 0x4e3   : > { %7314 = vrot.lane.b32.xlu0 %v7203_v32, %s11963_s24  ;;  %v6708_v30 = vpop.permute.xlu1 %6707  ;;  %v7520_v32 = vrot.slane %v11267_v17, 5  ;;  %v7559_v17 = vrot.slane %v11284_v40, 5 }
 0x4e4   : > { %6801 = vst.msk [vmem:[#allocation2 + $0xc] sm:$0xf] %vm6797_vm11, %v6708_v30 }
 0x4e5   : > { %v6706_v4 = vpop.permute.xlu0 %6705  ;;  %7320 = vrot.lane.b32.xlu1 %v7237_v23, %s11963_s24  ;;  %v11270_v23 = vld [vmem:[%s12104_s6 + $0x1f4] sm:$0x1]  ;;  %v7521_v30 = vsel %vm12259_vm7, %v7519_v29, %v7520_v32  ;;  %v11287_v29 = vld [vmem:[%s12104_s6 + $0x238] sm:$0xf] }
 0x4e6   : > { %6800 = vst.msk [vmem:[#allocation2 + $0x8] sm:$0xf] %vm6797_vm11, %v6706_v4  ;;  %v7527_v62 = vrot.slane %v11270_v23, 5  ;;  %v7518_v4 = vsel %vm12259_vm7, %v11305_v35, %v7517_v27  ;;  %v11280_v27 = vld [vmem:[%s12104_s6 + $0x21c] sm:$0xe]  ;;  %v7566_v23 = vrot.slane %v11287_v29, 5 }
 0x4e7   : > { %7318 = vrot.lane.b32.xlu0 %v7227_v45, %s11963_s24  ;;  %v6712_v10 = vpop.permute.xlu1 %6711  ;;  %v7526_v45 = vrot.slane %v7524_v42, 4  ;;  %v11310_v46 = vrot.slane %v11280_v27, 9 }
 0x4e8   : > { %6803 = vst.msk [vmem:[#allocation2 + $0x14] sm:$0xf] %vm6797_vm11, %v6712_v10 }
 0x4e9   : > { %v6710_v59 = vpop.permute.xlu0 %6709  ;;  %7324 = vrot.lane.b32.xlu1 %v7261_v57, %s11963_s24  ;;  %v11273_v57 = vld [vmem:[%s12104_s6 + $0x200] sm:$0x1]  ;;  %v7528_v10 = vsel %vm12259_vm7, %v7526_v45, %v7527_v62  ;;  %v11290_v45 = vld [vmem:[%s12104_s6 + $0x244] sm:$0xf] }
 0x4ea   : > { %6802 = vst.msk [vmem:[#allocation2 + $0x10] sm:$0xf] %vm6797_vm11, %v6710_v59  ;;  %v7534_v1 = vrot.slane %v11273_v57, 5  ;;  %v7525_v59 = vsel %vm12259_vm7, %v11306_v24, %v7524_v42  ;;  %v11283_v42 = vld [vmem:[%s12104_s6 + $0x228] sm:$0xe]  ;;  %v7573_v57 = vrot.slane %v11290_v45, 5 }
 0x4eb   : > { %7322 = vrot.lane.b32.xlu0 %v7251_v54, %s11963_s24  ;;  %v6716_v18 = vpop.permute.xlu1 %6715  ;;  %v7533_v54 = vrot.slane %v7531_v31, 4  ;;  %v11311_v19 = vrot.slane %v11283_v42, 9  ;;  %s11970_s24 = smov 104  }
 0x4ec   : > { %6805 = vst.msk [vmem:[#allocation2 + $0x1c] sm:$0xf] %vm6797_vm11, %v6716_v18 }
 0x4ed   : > { %v6714_v9 = vpop.permute.xlu0 %6713  ;;  %7601 = vrot.lane.b32.xlu1 %v7493_v14, %s11964_s25  ;;  %v11276_v14 = vld [vmem:[%s12104_s6 + $0x20c] sm:$0x1]  ;;  %v7535_v18 = vsel %vm12259_vm7, %v7533_v54, %v7534_v1  ;;  %v11293_v54 = vld [vmem:[%s12104_s6 + $0x250] sm:$0xf] }
 0x4ee   : > { %6804 = vst.msk [vmem:[#allocation2 + $0x18] sm:$0xf] %vm6797_vm11, %v6714_v9  ;;  %v7541_v53 = vrot.slane %v11276_v14, 5  ;;  %v7532_v9 = vsel %vm12259_vm7, %v11307_v61, %v7531_v31  ;;  %v11286_v31 = vld [vmem:[%s12104_s6 + $0x234] sm:$0xe]  ;;  %v7580_v14 = vrot.slane %v11293_v54, 5 }
 0x4ef   : > { %7599 = vrot.lane.b32.xlu0 %v7490_v20, %s11964_s25  ;;  %v6720_v41 = vpop.permute.xlu1 %6719  ;;  %v7540_v20 = vrot.slane %v7538_v58, 4  ;;  %v11312_v51 = vrot.slane %v11286_v31, 9  ;;  %v11327_v54 = vld [vmem:[%s12104_s6 + $0x1f0] sm:$0xf] }
 0x4f0   : > { %6807 = vst.msk [vmem:[#allocation2 + $0x24] sm:$0xf] %vm6797_vm11, %v6720_v41 }
 0x4f1   : > { %v6718_v15 = vpop.permute.xlu0 %6717  ;;  %7605 = vrot.lane.b32.xlu1 %v7500_v48, %s11964_s25  ;;  %v11279_v48 = vld [vmem:[%s12104_s6 + $0x218] sm:$0x1]  ;;  %v7542_v41 = vsel %vm12259_vm7, %v7540_v20, %v7541_v53  ;;  %v11296_v20 = vld [vmem:[%s12104_s6 + $0x25c] sm:$0xf] }
 0x4f2   : > { %6806 = vst.msk [vmem:[#allocation2 + $0x20] sm:$0xf] %vm6797_vm11, %v6718_v15  ;;  %v7548_v36 = vrot.slane %v11279_v48, 5  ;;  %v7539_v15 = vsel %vm12259_vm7, %v11308_v47, %v7538_v58  ;;  %v11289_v58 = vld [vmem:[%s12104_s6 + $0x240] sm:$0xe]  ;;  %v7587_v48 = vrot.slane %v11296_v20, 5 }
 0x4f3   : > { %7603 = vrot.lane.b32.xlu0 %v7497_v13, %s11964_s25  ;;  %v6724_v43 = vpop.permute.xlu1 %6723  ;;  %v7547_v13 = vrot.slane %v7545_v12, 4  ;;  %v11313_v6 = vrot.slane %v11289_v58, 9  ;;  %v11326_v58 = vld [vmem:[%s12104_s6 + $0x1ec] sm:$0xf] }
 0x4f4   : > { %6809 = vst.msk [vmem:[#allocation2 + $0x2c] sm:$0xf] %vm6797_vm11, %v6724_v43 }
 0x4f5   : > { %v6722_v50 = vpop.permute.xlu0 %6721  ;;  %7609 = vrot.lane.b32.xlu1 %v7507_v38, %s11964_s25  ;;  %v11282_v38 = vld [vmem:[%s12104_s6 + $0x224] sm:$0x1]  ;;  %v7549_v43 = vsel %vm12259_vm7, %v7547_v13, %v7548_v36  ;;  %v11299_v13 = vld [vmem:[%s12104_s6 + $0x268] sm:$0xf] }
 0x4f6   : > { %6808 = vst.msk [vmem:[#allocation2 + $0x28] sm:$0xf] %vm6797_vm11, %v6722_v50  ;;  %v7555_v33 = vrot.slane %v11282_v38, 5  ;;  %v7546_v50 = vsel %vm12259_vm7, %v11309_v37, %v7545_v12  ;;  %v11292_v12 = vld [vmem:[%s12104_s6 + $0x24c] sm:$0xe]  ;;  %v7594_v38 = vrot.slane %v11299_v13, 5 }
 0x4f7   : > { %7607 = vrot.lane.b32.xlu0 %v7504_v44, %s11964_s25  ;;  %v6728_v34 = vpop.permute.xlu1 %6727  ;;  %v7554_v44 = vrot.slane %v7552_v55, 4  ;;  %v11314_v60 = vrot.slane %v11292_v12, 9  ;;  %v11336_v13 = vld [vmem:[%s12104_s6 + $0x228] sm:$0xf] }
 0x4f8   : > { %6811 = vst.msk [vmem:[#allocation2 + $0x34] sm:$0xf] %vm6797_vm11, %v6728_v34 }
 0x4f9   : > { %v6726_v39 = vpop.permute.xlu0 %6725  ;;  %7613 = vrot.lane.b32.xlu1 %v7514_v7, %s11964_s25  ;;  %v11285_v7 = vld [vmem:[%s12104_s6 + $0x230] sm:$0x1]  ;;  %v7556_v34 = vsel %vm12259_vm7, %v7554_v44, %v7555_v33  ;;  %v11298_v33 = vld [vmem:[%s12104_s6 + $0x264] sm:$0xe] }
 0x4fa   : > { %6810 = vst.msk [vmem:[#allocation2 + $0x30] sm:$0xf] %vm6797_vm11, %v6726_v39  ;;  %v7562_v35 = vrot.slane %v11285_v7, 5  ;;  %v7553_v39 = vsel %vm12259_vm7, %v11310_v46, %v7552_v55  ;;  %v11295_v55 = vld [vmem:[%s12104_s6 + $0x258] sm:$0xe]  ;;  %v11316_v29 = vrot.slane %v11298_v33, 9 }
 0x4fb   : > { %7611 = vrot.lane.b32.xlu0 %v7511_v0, %s11964_s25  ;;  %v6732_v3 = vpop.permute.xlu1 %6731  ;;  %v7561_v0 = vrot.slane %v7559_v17, 4  ;;  %v11315_v27 = vrot.slane %v11295_v55, 9  ;;  %v11339_v55 = vld [vmem:[%s12104_s6 + $0x238] sm:$0xf] }
 0x4fc   : > { %6813 = vst.msk [vmem:[#allocation2 + $0x3c] sm:$0xf] %vm6797_vm11, %v6732_v3 }
 0x4fd   : > { %v6730_v8 = vpop.permute.xlu0 %6729  ;;  %7617 = vrot.lane.b32.xlu1 %v7521_v30, %s11964_s25  ;;  %v11288_v30 = vld [vmem:[%s12104_s6 + $0x23c] sm:$0x1]  ;;  %v7563_v3 = vsel %vm12259_vm7, %v7561_v0, %v7562_v35  ;;  %v7588_v7 = vsel %vm12259_vm7, %v11315_v27, %v7587_v48  ;;  %v7595_v0 = vsel %vm12259_vm7, %v11316_v29, %v7594_v38  ;;  %v11353_v29 = vld [vmem:[%s12104_s6 + $0x1c8] sm:$0xf] }
 0x4fe   : > { %6812 = vst.msk [vmem:[#allocation2 + $0x38] sm:$0xf] %vm6797_vm11, %v6730_v8  ;;  %v7569_v24 = vrot.slane %v11288_v30, 5  ;;  %v7560_v8 = vsel %vm12259_vm7, %v11311_v19, %v7559_v17  ;;  %v11321_v30 = vld [vmem:[%s12104_s6 + $0x1cc] sm:$0xf] }
 0x4ff   : > { %7615 = vrot.lane.b32.xlu0 %v7518_v4, %s11964_s25  ;;  %v6736_v21 = vpop.permute.xlu1 %6735  ;;  %v7568_v4 = vrot.slane %v7566_v23, 4 }
 0x500   : > { %6815 = vst.msk [vmem:[#allocation2 + $0x44] sm:$0xf] %vm6797_vm11, %v6736_v21 }
 0x501   : > { %v6734_v26 = vpop.permute.xlu0 %6733  ;;  %7621 = vrot.lane.b32.xlu1 %v7528_v10, %s11964_s25  ;;  %v11291_v10 = vld [vmem:[%s12104_s6 + $0x248] sm:$0x1]  ;;  %v7570_v21 = vsel %vm12259_vm7, %v7568_v4, %v7569_v24  ;;  %v11322_v24 = vld [vmem:[%s12104_s6 + $0x1d4] sm:$0xf] }
 0x502   : > { %6814 = vst.msk [vmem:[#allocation2 + $0x40] sm:$0xf] %vm6797_vm11, %v6734_v26  ;;  %v7576_v61 = vrot.slane %v11291_v10, 5  ;;  %v7567_v26 = vsel %vm12259_vm7, %v11312_v51, %v7566_v23  ;;  %v11319_v23 = vld [vmem:[%s12104_s6 + $0x1c0] sm:$0xf] }
 0x503   : > { %7619 = vrot.lane.b32.xlu0 %v7525_v59, %s11964_s25  ;;  %v6740_v25 = vpop.permute.xlu1 %6739  ;;  %v7575_v59 = vrot.slane %v7573_v57, 4  ;;  %v11324_v51 = vld [vmem:[%s12104_s6 + $0x1e0] sm:$0xf] }
 0x504   : > { %6817 = vst.msk [vmem:[#allocation2 + $0x4c] sm:$0xf] %vm6797_vm11, %v6740_v25 }
 0x505   : > { %v6738_v2 = vpop.permute.xlu0 %6737  ;;  %7625 = vrot.lane.b32.xlu1 %v7535_v18, %s11964_s25  ;;  %v11294_v18 = vld [vmem:[%s12104_s6 + $0x254] sm:$0x1]  ;;  %v7577_v25 = vsel %vm12259_vm7, %v7575_v59, %v7576_v61  ;;  %v11329_v59 = vld [vmem:[%s12104_s6 + $0x1fc] sm:$0xf] }
 0x506   : > { %6816 = vst.msk [vmem:[#allocation2 + $0x48] sm:$0xf] %vm6797_vm11, %v6738_v2  ;;  %v7583_v47 = vrot.slane %v11294_v18, 5  ;;  %v7574_v2 = vsel %vm12259_vm7, %v11313_v6, %v7573_v57  ;;  %v11330_v18 = vld [vmem:[%s12104_s6 + $0x204] sm:$0xf] }
 0x507   : > { %7623 = vrot.lane.b32.xlu0 %v7532_v9, %s11964_s25  ;;  %v6744_v22 = vpop.permute.xlu1 %6743  ;;  %v7582_v9 = vrot.slane %v7580_v14, 4 }
 0x508   : > { %6819 = vst.msk [vmem:[#allocation2 + $0x54] sm:$0xf] %vm6797_vm11, %v6744_v22 }
 0x509   : > { %v6742_v11 = vpop.permute.xlu0 %6741  ;;  %7629 = vrot.lane.b32.xlu1 %v7542_v41, %s11964_s25  ;;  %v11297_v41 = vld [vmem:[%s12104_s6 + $0x260] sm:$0x1]  ;;  %v7584_v22 = vsel %vm12259_vm7, %v7582_v9, %v7583_v47 }
 0x50a   : > { %6818 = vst.msk [vmem:[#allocation2 + $0x50] sm:$0xf] %vm6797_vm11, %v6742_v11  ;;  %v7590_v37 = vrot.slane %v11297_v41, 5  ;;  %v7581_v11 = vsel %vm12259_vm7, %v11314_v60, %v7580_v14  ;;  %v11328_v14 = vld [vmem:[%s12104_s6 + $0x1f8] sm:$0xf] }
 0x50b   : > { %7627 = vrot.lane.b32.xlu0 %v7539_v15, %s11964_s25  ;;  %v6748_v49 = vpop.permute.xlu1 %6747  ;;  %v7589_v15 = vrot.slane %v7587_v48, 4  ;;  %v11335_v47 = vld [vmem:[%s12104_s6 + $0x220] sm:$0xf]  ;;  %v11337_v60 = vld [vmem:[%s12104_s6 + $0x22c] sm:$0xf] }
 0x50c   : > { %6821 = vst.msk [vmem:[#allocation2 + $0x5c] sm:$0xf] %vm6797_vm11, %v6748_v49  ;;  %v7596_v49 = vrot.slane %v7594_v38, 4  ;;  %v11351_v38 = vld [vmem:[%s12104_s6 + $0x1c0] sm:$0xf] }
 0x50d   : > { %v6746_v32 = vpop.permute.xlu0 %6745  ;;  %7633 = vrot.lane.b32.xlu1 %v7549_v43, %s11964_s25  ;;  %v11300_v43 = vld [vmem:[%s12104_s6 + $0x26c] sm:$0x1]  ;;  %v7591_v17 = vsel %vm12259_vm7, %v7589_v15, %v7590_v37  ;;  %v11338_v15 = vld [vmem:[%s12104_s6 + $0x234] sm:$0xf]  ;;  %v7982_v33 = vshll.u32 %v11351_v38, 16 }
 0x50e   : > { %6820 = vst.msk [vmem:[#allocation2 + $0x58] sm:$0xf] %vm6797_vm11, %v6746_v32 }
 0x50f   : > { %7631 = vrot.lane.b32.xlu0 %v7546_v50, %s11964_s25  ;;  %v6752_v5 = vpop.permute.xlu1 %6751  ;;  %v7597_v50 = vrot.slane %v11300_v43, 5  ;;  %v11340_v43 = vld [vmem:[%s12104_s6 + $0x240] sm:$0xf] }
 0x510   : > { %6823 = vst.msk [vmem:[#allocation2 + $0x64] sm:$0xf] %vm6797_vm11, %v6752_v5 }
 0x511   : > { %v6750_v62 = vpop.permute.xlu0 %6749  ;;  %7637 = vrot.lane.b32.xlu1 %v7556_v34, %s11964_s25  ;;  %v7598_v42 = vsel %vm12259_vm7, %v7596_v49, %v7597_v50 }
 0x512   : > { %6822 = vst.msk [vmem:[#allocation2 + $0x60] sm:$0xf] %vm6797_vm11, %v6750_v62  ;;  %v11320_v62 = vld [vmem:[%s12104_s6 + $0x1c8] sm:$0xf] }
 0x513   : > { %7635 = vrot.lane.b32.xlu0 %v7553_v39, %s11964_s25  ;;  %v6756_v52 = vpop.permute.xlu1 %6755  ;;  %v11318_v39 = vld [vmem:[%s12104_s6 + $0x1bc] sm:$0xf] }
 0x514   : > { %6825 = vst.msk [vmem:[#allocation2 + $0x6c] sm:$0xf] %vm6797_vm11, %v6756_v52  ;;  %v11325_v52 = vld [vmem:[%s12104_s6 + $0x1e4] sm:$0xf] }
 0x515   : > { %v6754_v1 = vpop.permute.xlu0 %6753  ;;  %7641 = vrot.lane.b32.xlu1 %v7563_v3, %s11964_s25  ;;  %v11323_v3 = vld [vmem:[%s12104_s6 + $0x1d8] sm:$0xf] }
 0x516   : > { %6824 = vst.msk [vmem:[#allocation2 + $0x68] sm:$0xf] %vm6797_vm11, %v6754_v1 }
 0x517   : > { %7639 = vrot.lane.b32.xlu0 %v7560_v8, %s11964_s25  ;;  %v6760_v16 = vpop.permute.xlu1 %6759 }
 0x518   : > { %6827 = vst.msk [vmem:[#allocation2 + $0x74] sm:$0xf] %vm6797_vm11, %v6760_v16 }
 0x519   : > { %v6758_v53 = vpop.permute.xlu0 %6757  ;;  %7645 = vrot.lane.b32.xlu1 %v7570_v21, %s11964_s25 }
 0x51a   : > { %6826 = vst.msk [vmem:[#allocation2 + $0x70] sm:$0xf] %vm6797_vm11, %v6758_v53  ;;  %v11333_v53 = vld [vmem:[%s12104_s6 + $0x214] sm:$0xf] }
 0x51b   : > { %7643 = vrot.lane.b32.xlu0 %v7567_v26, %s11964_s25  ;;  %v6764_v56 = vpop.permute.xlu1 %6763  ;;  %v11331_v26 = vld [vmem:[%s12104_s6 + $0x208] sm:$0xf] }
 0x51c   : > { %6829 = vst.msk [vmem:[#allocation2 + $0x7c] sm:$0xf] %vm6797_vm11, %v6764_v56  ;;  %v11334_v56 = vld [vmem:[%s12104_s6 + $0x21c] sm:$0xf] }
 0x51d   : > { %v6762_v36 = vpop.permute.xlu0 %6761  ;;  %7649 = vrot.lane.b32.xlu1 %v7577_v25, %s11964_s25  ;;  %v11332_v25 = vld [vmem:[%s12104_s6 + $0x210] sm:$0xf] }
 0x51e   : > { %6828 = vst.msk [vmem:[#allocation2 + $0x78] sm:$0xf] %vm6797_vm11, %v6762_v36 }
 0x51f   : > { %7647 = vrot.lane.b32.xlu0 %v7574_v2, %s11964_s25  ;;  %v7265_v40 = vpop.permute.xlu1 %7264 }
 0x520   : > { %7360 = vst.msk [vmem:[#allocation2 + $0x4] sm:$0xf] %vm7358_vm12, %v7265_v40  ;;  %v11350_v40 = vld [vmem:[%s12104_s6 + $0x1bc] sm:$0xf] }
 0x521   : > { %v7263_v44 = vpop.permute.xlu0 %7262  ;;  %7653 = vrot.lane.b32.xlu1 %v7584_v22, %s11964_s25  ;;  %v7973_v49 = vshrl.u32 %v11350_v40, 16  ;;  %v7976_v50 = vshll.u32 %v11350_v40, 16 }
 0x522   : > { %7359 = vst.msk [vmem:[#allocation2] sm:$0xf] %vm7358_vm12, %v7263_v44 }
 0x523   : > { %7651 = vrot.lane.b32.xlu0 %v7581_v11, %s11964_s25  ;;  %v7269_v46 = vpop.permute.xlu1 %7268  ;;  %v11341_v11 = vld [vmem:[%s12104_s6 + $0x244] sm:$0xf] }
 0x524   : > { %7362 = vst.msk [vmem:[#allocation2 + $0xc] sm:$0xf] %vm7358_vm12, %v7269_v46  ;;  %v11343_v46 = vld [vmem:[%s12104_s6 + $0x250] sm:$0xf] }
 0x525   : > { %v7267_v32 = vpop.permute.xlu0 %7266  ;;  %7657 = vrot.lane.b32.xlu1 %v7591_v17, %s11964_s25  ;;  %v7986_v17 = vshrl.u32 %v11351_v38, 16  ;;  %v11348_v38 = vld [vmem:[%s12104_s6 + $0x270] sm:$0xf] }
 0x526   : > { %7361 = vst.msk [vmem:[#allocation2 + $0x8] sm:$0xf] %vm7358_vm12, %v7267_v32 }
 0x527   : > { %7655 = vrot.lane.b32.xlu0 %v7588_v7, %s11964_s25  ;;  %v7273_v34 = vpop.permute.xlu1 %7272  ;;  %v11354_v7 = vld [vmem:[%s12104_s6 + $0x1cc] sm:$0xf] }
 0x528   : > { %7364 = vst.msk [vmem:[#allocation2 + $0x14] sm:$0xf] %vm7358_vm12, %v7273_v34 }
 0x529   : > { %v7271_v35 = vpop.permute.xlu0 %7270  ;;  %7661 = vrot.lane.b32.xlu1 %v7598_v42, %s11964_s25  ;;  %v11342_v42 = vld [vmem:[%s12104_s6 + $0x24c] sm:$0xf] }
 0x52a   : > { %7363 = vst.msk [vmem:[#allocation2 + $0x10] sm:$0xf] %vm7358_vm12, %v7271_v35  ;;  %v7988_v35 = vrot.slane %v7986_v17, 4 }
 0x52b   : > { %7659 = vrot.lane.b32.xlu0 %v7595_v0, %s11964_s25  ;;  %v7277_v5 = vpop.permute.xlu1 %7276  ;;  %v15751_v0 = vrot.slane %v7982_v33, 5  ;;  %v11358_v33 = vld [vmem:[%s12104_s6 + $0x1dc] sm:$0x1]  ;;  %s11969_s25 = smov 100  }
 0x52c   : > { %7366 = vst.msk [vmem:[#allocation2 + $0x1c] sm:$0xf] %vm7358_vm12, %v7277_v5  ;;  %v7978_v5 = vrot.slane %v7976_v50, 5 }
 0x52d   : > { %v7275_v19 = vpop.permute.xlu0 %7274  ;;  %7797 = vrot.lane.b32.xlu1 %v11319_v23, %s11965_s26  ;;  %v7975_v23 = vrot.slane %v7973_v49, 4 }
 0x52e   : > { %7365 = vst.msk [vmem:[#allocation2 + $0x18] sm:$0xf] %vm7358_vm12, %v7275_v19  ;;  %v8006_v19 = vshll.u32 %v11354_v7, 16 }
 0x52f   : > { %7795 = vrot.lane.b32.xlu0 %v11318_v39, %s11965_s26  ;;  %v7281_v45 = vpop.permute.xlu1 %7280  ;;  %v11352_v39 = vld [vmem:[%s12104_s6 + $0x1c4] sm:$0x1] }
 0x530   : > { %7368 = vst.msk [vmem:[#allocation2 + $0x24] sm:$0xf] %vm7358_vm12, %v7281_v45  ;;  %v7997_v45 = vshrl.u32 %v11353_v29, 16 }
 0x531   : > { %v7279_v31 = vpop.permute.xlu0 %7278  ;;  %7801 = vrot.lane.b32.xlu1 %v11321_v30, %s11965_s26  ;;  %v8010_v30 = vshrl.u32 %v11354_v7, 16 }
 0x532   : > { %7367 = vst.msk [vmem:[#allocation2 + $0x20] sm:$0xf] %vm7358_vm12, %v7279_v31  ;;  %v11345_v31 = vld [vmem:[%s12104_s6 + $0x25c] sm:$0xf] }
 0x533   : > { %7799 = vrot.lane.b32.xlu0 %v11320_v62, %s11965_s26  ;;  %v7285_v4 = vpop.permute.xlu1 %7284  ;;  %v8000_v62 = vshll.u32 %v11353_v29, 16  ;;  %v11361_v29 = vld [vmem:[%s12104_s6 + $0x1e8] sm:$0x1] }
 0x534   : > { %7370 = vst.msk [vmem:[#allocation2 + $0x2c] sm:$0xf] %vm7358_vm12, %v7285_v4  ;;  %v11344_v4 = vld [vmem:[%s12104_s6 + $0x258] sm:$0xf] }
 0x535   : > { %v7283_v57 = vpop.permute.xlu0 %7282  ;;  %7805 = vrot.lane.b32.xlu1 %v11323_v3, %s11965_s26 }
 0x536   : > { %7369 = vst.msk [vmem:[#allocation2 + $0x28] sm:$0xf] %vm7358_vm12, %v7283_v57  ;;  %v11356_v57 = vld [vmem:[%s12104_s6 + $0x1d4] sm:$0xf] }
 0x537   : > { %7803 = vrot.lane.b32.xlu0 %v11322_v24, %s11965_s26  ;;  %v7289_v8 = vpop.permute.xlu1 %7288  ;;  %v11357_v24 = vld [vmem:[%s12104_s6 + $0x1d8] sm:$0xf] }
 0x538   : > { %7372 = vst.msk [vmem:[#allocation2 + $0x34] sm:$0xf] %vm7358_vm12, %v7289_v8  ;;  %v7989_v8 = vor.u32 %v7988_v35, %v15751_v0 }
 0x539   : > { %v7287_v10 = vpop.permute.xlu0 %7286  ;;  %7809 = vrot.lane.b32.xlu1 %v11325_v52, %s11965_s26 }
 0x53a   : > { %7371 = vst.msk [vmem:[#allocation2 + $0x30] sm:$0xf] %vm7358_vm12, %v7287_v10  ;;  %v7979_v10 = vor.u32 %v7978_v5, %v7975_v23 }
 0x53b   : > { %7807 = vrot.lane.b32.xlu0 %v11324_v51, %s11965_s26  ;;  %v7293_v1 = vpop.permute.xlu1 %7292  ;;  %v7992_v51 = vshll.u32 %v11352_v39, 16 }
 0x53c   : > { %7374 = vst.msk [vmem:[#allocation2 + $0x3c] sm:$0xf] %vm7358_vm12, %v7293_v1  ;;  %v11359_v1 = vld [vmem:[%s12104_s6 + $0x1e0] sm:$0xf] }
 0x53d   : > { %v7291_v21 = vpop.permute.xlu0 %7290  ;;  %7813 = vrot.lane.b32.xlu1 %v11327_v54, %s11965_s26  ;;  %v11360_v54 = vld [vmem:[%s12104_s6 + $0x1e4] sm:$0xf] }
 0x53e   : > { %7373 = vst.msk [vmem:[#allocation2 + $0x38] sm:$0xf] %vm7358_vm12, %v7291_v21  ;;  %v15768_v21 = vrot.slane %v8006_v19, 5  ;;  %v11366_v19 = vld [vmem:[%s12104_s6 + $0x1fc] sm:$0xf] }
 0x53f   : > { %7811 = vrot.lane.b32.xlu0 %v11326_v58, %s11965_s26  ;;  %v7297_v61 = vpop.permute.xlu1 %7296  ;;  %v11347_v58 = vld [vmem:[%s12104_s6 + $0x268] sm:$0xf] }
 0x540   : > { %7376 = vst.msk [vmem:[#allocation2 + $0x44] sm:$0xf] %vm7358_vm12, %v7297_v61  ;;  %v7999_v61 = vrot.slane %v7997_v45, 4 }
 0x541   : > { %v7295_v16 = vpop.permute.xlu0 %7294  ;;  %7817 = vrot.lane.b32.xlu1 %v11329_v59, %s11965_s26  ;;  %v8012_v59 = vrot.slane %v8010_v30, 4 }
 0x542   : > { %7375 = vst.msk [vmem:[#allocation2 + $0x40] sm:$0xf] %vm7358_vm12, %v7295_v16  ;;  %v11355_v16 = vld [vmem:[%s12104_s6 + $0x1d0] sm:$0x1] }
 0x543   : > { %7815 = vrot.lane.b32.xlu0 %v11328_v14, %s11965_s26  ;;  %v7301_v6 = vpop.permute.xlu1 %7300  ;;  %v8002_v14 = vrot.slane %v8000_v62, 5 }
 0x544   : > { %7378 = vst.msk [vmem:[#allocation2 + $0x4c] sm:$0xf] %vm7358_vm12, %v7301_v6  ;;  %v8034_v6 = vshrl.u32 %v11357_v24, 16 }
 0x545   : > { %v7299_v20 = vpop.permute.xlu0 %7298  ;;  %7821 = vrot.lane.b32.xlu1 %v11331_v26, %s11965_s26  ;;  %v8030_v26 = vshll.u32 %v11357_v24, 16 }
 0x546   : > { %7377 = vst.msk [vmem:[#allocation2 + $0x48] sm:$0xf] %vm7358_vm12, %v7299_v20  ;;  %v8024_v20 = vshll.u32 %v11356_v57, 16 }
 0x547   : > { %7819 = vrot.lane.b32.xlu0 %v11330_v18, %s11965_s26  ;;  %v7305_v12 = vpop.permute.xlu1 %7304  ;;  %v8021_v18 = vshrl.u32 %v11356_v57, 16  ;;  %v15782_v40 = vrot.slane %v8030_v26, 5 }
 0x548   : > { %7380 = vst.msk [vmem:[#allocation2 + $0x54] sm:$0xf] %vm7358_vm12, %v7305_v12  ;;  %v11346_v12 = vld [vmem:[%s12104_s6 + $0x264] sm:$0xf] }
 0x549   : > { %v7303_v9 = vpop.permute.xlu0 %7302  ;;  %7825 = vrot.lane.b32.xlu1 %v11333_v53, %s11965_s26 }
 0x54a   : > { %7379 = vst.msk [vmem:[#allocation2 + $0x50] sm:$0xf] %vm7358_vm12, %v7303_v9  ;;  %v8058_v9 = vshrl.u32 %v11360_v54, 16 }
 0x54b   : > { %7823 = vrot.lane.b32.xlu0 %v11332_v25, %s11965_s26  ;;  %v7309_v48 = vpop.permute.xlu1 %7308  ;;  %v8054_v25 = vshll.u32 %v11360_v54, 16 }
 0x54c   : > { %7382 = vst.msk [vmem:[#allocation2 + $0x5c] sm:$0xf] %vm7358_vm12, %v7309_v48  ;;  %v8048_v48 = vshll.u32 %v11359_v1, 16  ;;  %v8060_v49 = vrot.slane %v8058_v9, 4 }
 0x54d   : > { %v7307_v2 = vpop.permute.xlu0 %7306  ;;  %7829 = vrot.lane.b32.xlu1 %v11335_v47, %s11965_s26  ;;  %v8045_v47 = vshrl.u32 %v11359_v1, 16  ;;  %v15785_v17 = vrot.slane %v8054_v25, 5  ;;  %v8102_v1 = vshll.u32 %v11366_v19, 16 }
 0x54e   : > { %7381 = vst.msk [vmem:[#allocation2 + $0x58] sm:$0xf] %vm7358_vm12, %v7307_v2  ;;  %v11349_v2 = vld [vmem:[%s12104_s6 + $0x274] sm:$0xf] }
 0x54f   : > { %7827 = vrot.lane.b32.xlu0 %v11334_v56, %s11965_s26  ;;  %v7313_v41 = vpop.permute.xlu1 %7312  ;;  %v8047_v50 = vrot.slane %v8045_v47, 4  ;;  %v8061_v57 = vor.u32 %v8060_v49, %v15785_v17  ;;  %v11375_v47 = vld [vmem:[%s12104_s6 + $0x220] sm:$0xf]  ;;  %v11378_v49 = vld [vmem:[%s12104_s6 + $0x22c] sm:$0xf] }
 0x550   : > { %7384 = vst.msk [vmem:[#allocation2 + $0x64] sm:$0xf] %vm7358_vm12, %v7313_v41  ;;  %v7994_v41 = vrot.slane %v7992_v51, 5 }
 0x551   : > { %v7311_v36 = vpop.permute.xlu0 %7310  ;;  %7833 = vrot.lane.b32.xlu1 %v11337_v60, %s11965_s26  ;;  %v7990_v60 = vrot.slane %v7989_v8, 4  ;;  %v8062_v25 = vrot.slane %v8061_v57, 4 }
 0x552   : > { %7383 = vst.msk [vmem:[#allocation2 + $0x60] sm:$0xf] %vm7358_vm12, %v7311_v36  ;;  %v8013_v36 = vor.u32 %v8012_v59, %v15768_v21 }
 0x553   : > { %7831 = vrot.lane.b32.xlu0 %v11336_v13, %s11965_s26  ;;  %v7317_v22 = vpop.permute.xlu1 %7316  ;;  %v7980_v13 = vrot.slane %v7979_v10, 4  ;;  %v7995_v35 = vsel %vm12115_vm3, %v7990_v60, %v7994_v41  ;;  %v15816_v41 = vrot.slane %v8102_v1, 5 }
 0x554   : > { %7386 = vst.msk [vmem:[#allocation2 + $0x6c] sm:$0xf] %vm7358_vm12, %v7317_v22  ;;  %v8003_v22 = vor.u32 %v8002_v14, %v7999_v61  ;;  %v8014_v30 = vrot.slane %v8013_v36, 4  ;;  %v8106_v61 = vshrl.u32 %v11366_v19, 16  ;;  %v8198_v19 = vshll.u32 %v11378_v49, 16 }
 0x555   : > { %v7315_v37 = vpop.permute.xlu0 %7314  ;;  %7837 = vrot.lane.b32.xlu1 %v11339_v55, %s11965_s26  ;;  %v8016_v55 = vshll.u32 %v11355_v16, 16  ;;  %v7985_v23 = vsel %vm12115_vm3, %v7980_v13, %v15751_v0  ;;  %v11374_v13 = vld [vmem:[%s12104_s6 + $0x21c] sm:$0xf] }
 0x556   : > { %7385 = vst.msk [vmem:[#allocation2 + $0x68] sm:$0xf] %vm7358_vm12, %v7315_v37  ;;  %v11362_v37 = vld [vmem:[%s12104_s6 + $0x1ec] sm:$0xf]  ;;  %v8004_v45 = vrot.slane %v8003_v22, 4  ;;  %v8108_v36 = vrot.slane %v8106_v61, 4 }
 0x557   : > { %7835 = vrot.lane.b32.xlu0 %v11338_v15, %s11965_s26  ;;  %v7321_v27 = vpop.permute.xlu1 %7320  ;;  %v11363_v15 = vld [vmem:[%s12104_s6 + $0x1f0] sm:$0xf]  ;;  %v8018_v5 = vrot.slane %v8016_v55, 5  ;;  %v8072_v39 = vshll.u32 %v11362_v37, 16  ;;  %v8200_v1 = vrot.slane %v8198_v19, 5 }
 0x558   : > { %7388 = vst.msk [vmem:[#allocation2 + $0x74] sm:$0xf] %vm7358_vm12, %v7321_v27  ;;  %v8023_v27 = vrot.slane %v8021_v18, 4 }
 0x559   : > { %v7319_v44 = vpop.permute.xlu0 %7318  ;;  %7841 = vrot.lane.b32.xlu1 %v11341_v11, %s11965_s26  ;;  %v8036_v11 = vrot.slane %v8034_v6, 4  ;;  %v8074_v59 = vrot.slane %v8072_v39, 5  ;;  %v8019_v26 = vsel %vm12115_vm3, %v8014_v30, %v8018_v5 }
 0x55a   : > { %7387 = vst.msk [vmem:[#allocation2 + $0x70] sm:$0xf] %vm7358_vm12, %v7319_v44 }
 0x55b   : > { %7839 = vrot.lane.b32.xlu0 %v11340_v43, %s11965_s26  ;;  %v7325_v32 = vpop.permute.xlu1 %7324  ;;  %v8026_v43 = vrot.slane %v8024_v20, 5  ;;  %v8037_v62 = vor.u32 %v8036_v11, %v15782_v40  ;;  %v8178_v11 = vshrl.u32 %v11375_v47, 16 }
 0x55c   : > { %7390 = vst.msk [vmem:[#allocation2 + $0x7c] sm:$0xf] %vm7358_vm12, %v7325_v32  ;;  %v8078_v32 = vshll.u32 %v11363_v15, 16 }
 0x55d   : > { %v7323_v34 = vpop.permute.xlu0 %7322  ;;  %7845 = vrot.lane.b32.xlu1 %v11343_v46, %s11965_s26  ;;  %v8050_v46 = vrot.slane %v8048_v48, 5  ;;  %v8027_v24 = vor.u32 %v8026_v43, %v8023_v27  ;;  %v8038_v6 = vrot.slane %v8037_v62, 4  ;;  %v8180_v39 = vrot.slane %v8178_v11, 4 }
 0x55e   : > { %7389 = vst.msk [vmem:[#allocation2 + $0x78] sm:$0xf] %vm7358_vm12, %v7323_v34  ;;  %v8069_v34 = vshrl.u32 %v11362_v37, 16  ;;  %v15802_v51 = vrot.slane %v8078_v32, 5  ;;  %v11367_v37 = vld [vmem:[%s12104_s6 + $0x200] sm:$0x1] }
 0x55f   : > { %7843 = vrot.lane.b32.xlu0 %v11342_v42, %s11965_s26  ;;  %v7602_v3 = vpop.permute.xlu1 %7601  ;;  %v8082_v42 = vshrl.u32 %v11363_v15, 16  ;;  %v8051_v8 = vor.u32 %v8050_v46, %v8047_v50 }
 0x560   : > { %7697 = vst.msk [vmem:[#allocation2 + $0x4] sm:$0xf] %vm7695_vm13, %v7602_v3  ;;  %v11365_v3 = vld [vmem:[%s12104_s6 + $0x1f8] sm:$0xf]  ;;  %v8071_v54 = vrot.slane %v8069_v34, 4  ;;  %v8109_v34 = vor.u32 %v8108_v36, %v15816_v41 }
 0x561   : > { %v7600_v52 = vpop.permute.xlu0 %7599  ;;  %7849 = vrot.lane.b32.xlu1 %v11345_v31, %s11965_s26  ;;  %v8040_v31 = vshll.u32 %v11358_v33, 16  ;;  %v8084_v10 = vrot.slane %v8082_v42, 4  ;;  %v8093_v14 = vshrl.u32 %v11365_v3, 16  ;;  %v8096_v16 = vshll.u32 %v11365_v3, 16  ;;  %v11377_v42 = vld [vmem:[%s12104_s6 + $0x228] sm:$0xf] }
 0x562   : > { %7696 = vst.msk [vmem:[#allocation2] sm:$0xf] %vm7695_vm13, %v7600_v52  ;;  %v8064_v52 = vshll.u32 %v11361_v29, 16  ;;  %v8168_v33 = vshll.u32 %v11374_v13, 16  ;;  %v8189_v3 = vshrl.u32 %v11377_v42, 16 }
 0x563   : > { %7847 = vrot.lane.b32.xlu0 %v11344_v4, %s11965_s26  ;;  %v7606_v53 = vpop.permute.xlu1 %7605  ;;  %v8042_v18 = vrot.slane %v8040_v31, 5  ;;  %v8095_v55 = vrot.slane %v8093_v14, 4  ;;  %v8098_v22 = vrot.slane %v8096_v16, 5  ;;  %v11379_v16 = vld [vmem:[%s12104_s6 + $0x230] sm:$0x1] }
 0x564   : > { %7699 = vst.msk [vmem:[#allocation2 + $0xc] sm:$0xf] %vm7695_vm13, %v7606_v53  ;;  %v8009_v53 = vsel %vm12115_vm3, %v8004_v45, %v15768_v21  ;;  %v8066_v9 = vrot.slane %v8064_v52, 5  ;;  %v8075_v21 = vor.u32 %v8074_v59, %v8071_v54  ;;  %v11376_v45 = vld [vmem:[%s12104_s6 + $0x224] sm:$0x1]  ;;  %v8170_v31 = vrot.slane %v8168_v33, 5 }
 0x565   : > { %v7604_v56 = vpop.permute.xlu0 %7603  ;;  %7853 = vrot.lane.b32.xlu1 %v11347_v58, %s11965_s26  ;;  %v11364_v58 = vld [vmem:[%s12104_s6 + $0x1f4] sm:$0x1]  ;;  %v8043_v15 = vsel %vm12115_vm3, %v8038_v6, %v8042_v18  ;;  %v8184_v54 = vshll.u32 %v11376_v45, 16  ;;  %v11426_v45 = vld [vmem:[%s12104_s6 + $0x22c] sm:$0xf] }
 0x566   : > { %7698 = vst.msk [vmem:[#allocation2 + $0x8] sm:$0xf] %vm7695_vm13, %v7604_v56  ;;  %v8052_v56 = vrot.slane %v8051_v8, 4  ;;  %v8088_v60 = vshll.u32 %v11364_v58, 16  ;;  %v8067_v46 = vsel %vm12115_vm3, %v8062_v25, %v8066_v9  ;;  %v8110_v8 = vrot.slane %v8109_v34, 4 }
 0x567   : > { %7851 = vrot.lane.b32.xlu0 %v11346_v12, %s11965_s26  ;;  %v7610_v44 = vpop.permute.xlu1 %7609  ;;  %v8028_v12 = vrot.slane %v8027_v24, 4  ;;  %v8208_v25 = vshll.u32 %v11379_v16, 16 }
 0x568   : > { %7701 = vst.msk [vmem:[#allocation2 + $0x14] sm:$0xf] %vm7695_vm13, %v7610_v44  ;;  %v8165_v44 = vshrl.u32 %v11374_v13, 16  ;;  %v8090_v32 = vrot.slane %v8088_v60, 5 }
 0x569   : > { %v7608_v7 = vpop.permute.xlu0 %7607  ;;  %7857 = vrot.lane.b32.xlu1 %v11349_v2, %s11965_s26  ;;  %v8085_v2 = vor.u32 %v8084_v10, %v15802_v51  ;;  %v8033_v43 = vsel %vm12115_vm3, %v8028_v12, %v15782_v40  ;;  %v8076_v40 = vrot.slane %v8075_v21, 4 }
 0x56a   : > { %7700 = vst.msk [vmem:[#allocation2 + $0x10] sm:$0xf] %vm7695_vm13, %v7608_v7  ;;  %v8057_v7 = vsel %vm12115_vm3, %v8052_v56, %v15785_v17  ;;  %v8202_v17 = vshrl.u32 %v11378_v49, 16  ;;  %v8167_v62 = vrot.slane %v8165_v44, 4 }
 0x56b   : > { %7855 = vrot.lane.b32.xlu0 %v11348_v38, %s11965_s26  ;;  %v7614_v4 = vpop.permute.xlu1 %7613  ;;  %v8174_v38 = vshll.u32 %v11375_v47, 16  ;;  %v8086_v29 = vrot.slane %v8085_v2, 4  ;;  %v8081_v52 = vsel %vm12115_vm3, %v8076_v40, %v15802_v51  ;;  %v11399_v2 = vld [vmem:[%s12104_s6 + $0x1c0] sm:$0xf]  ;;  %v11422_v40 = vld [vmem:[%s12104_s6 + $0x21c] sm:$0xe] }
 0x56c   : > { %7703 = vst.msk [vmem:[#allocation2 + $0x1c] sm:$0xf] %vm7695_vm13, %v7614_v4  ;;  %v8192_v4 = vshll.u32 %v11377_v42, 16  ;;  %v8204_v58 = vrot.slane %v8202_v17, 4  ;;  %v8171_v14 = vor.u32 %v8170_v31, %v8167_v62  ;;  %v8583_v36 = vrot.slane %v11399_v2, 5 }
 0x56d   : > { %v7612_v0 = vpop.permute.xlu0 %7611  ;;  %8358 = vrot.lane.b32.xlu1 %v7995_v35, %s11966_s28  ;;  %v8112_v35 = vshll.u32 %v11367_v37, 16  ;;  %v15840_v5 = vrot.slane %v8174_v38, 5  ;;  %v8091_v57 = vsel %vm12115_vm3, %v8086_v29, %v8090_v32  ;;  %v11400_v37 = vld [vmem:[%s12104_s6 + $0x1c4] sm:$0x1]  ;;  %v11423_v38 = vld [vmem:[%s12104_s6 + $0x220] sm:$0xf] }
 0x56e   : > { %7702 = vst.msk [vmem:[#allocation2 + $0x18] sm:$0xf] %vm7695_vm13, %v7612_v0  ;;  %v8194_v6 = vrot.slane %v8192_v4, 5  ;;  %v8205_v12 = vor.u32 %v8204_v58, %v8200_v1  ;;  %v8585_v44 = vrot.slane %v8583_v36, 4  ;;  %v8586_v33 = vrot.slane %v11400_v37, 5 }
 0x56f   : > { %8356 = vrot.lane.b32.xlu0 %v7985_v23, %s11966_s28  ;;  %v7618_v20 = vpop.permute.xlu1 %7617  ;;  %v8099_v23 = vor.u32 %v8098_v22, %v8095_v55  ;;  %v8114_v0 = vrot.slane %v8112_v35, 5  ;;  %v8181_v10 = vor.u32 %v8180_v39, %v15840_v5  ;;  %v8639_v49 = vrot.slane %v11423_v38, 5  ;;  %v11424_v29 = vld [vmem:[%s12104_s6 + $0x224] sm:$0x1]  ;;  %v11402_v32 = vld [vmem:[%s12104_s6 + $0x1cc] sm:$0xf] }
 0x570   : > { %7705 = vst.msk [vmem:[#allocation2 + $0x24] sm:$0xf] %vm7695_vm13, %v7618_v20  ;;  %v8206_v21 = vrot.slane %v8205_v12, 4  ;;  %v8587_v34 = vsel %vm12259_vm7, %v8585_v44, %v8586_v33  ;;  %v11454_v17 = vrot.slane %v11422_v40, 9  ;;  %v11401_v31 = vld [vmem:[%s12104_s6 + $0x1c8] sm:$0xe] }
 0x571   : > { %v7616_v48 = vpop.permute.xlu0 %7615  ;;  %8362 = vrot.lane.b32.xlu1 %v8019_v26, %s11966_s28  ;;  %v8100_v61 = vrot.slane %v8099_v23, 4  ;;  %v8191_v26 = vrot.slane %v8189_v3, 4  ;;  %v8115_v51 = vsel %vm12115_vm3, %v8110_v8, %v8114_v0  ;;  %v8182_v20 = vrot.slane %v8181_v10, 4  ;;  %v11427_v10 = vld [vmem:[%s12104_s6 + $0x230] sm:$0x1] }
 0x572   : > { %7704 = vst.msk [vmem:[#allocation2 + $0x20] sm:$0xf] %vm7695_vm13, %v7616_v48  ;;  %v8172_v48 = vrot.slane %v8171_v14, 4  ;;  %v8641_v35 = vrot.slane %v8639_v49, 4  ;;  %v8642_v23 = vrot.slane %v11424_v29, 5  ;;  %v8640_v8 = vsel %vm12259_vm7, %v11454_v17, %v8639_v49 }
 0x573   : > { %8360 = vrot.lane.b32.xlu0 %v8009_v53, %s11966_s28  ;;  %v7622_v27 = vpop.permute.xlu1 %7621  ;;  %v8186_v53 = vrot.slane %v8184_v54, 5  ;;  %v8105_v47 = vsel %vm12115_vm3, %v8100_v61, %v15816_v41  ;;  %v8195_v56 = vor.u32 %v8194_v6, %v8191_v26  ;;  %v8210_v41 = vrot.slane %v8208_v25, 5  ;;  %v11464_v2 = vld [vmem:[%s12104_s6 + $0x1cc] sm:$0xf]  ;;  %v11497_v38 = vld [vmem:[%s12104_s6 + $0x1d0] sm:$0x1] }
 0x574   : > { %7707 = vst.msk [vmem:[#allocation2 + $0x2c] sm:$0xf] %vm7695_vm13, %v7622_v27  ;;  %v8177_v22 = vsel %vm12115_vm3, %v8172_v48, %v15840_v5  ;;  %v11398_v27 = vld [vmem:[%s12104_s6 + $0x1bc] sm:$0xe]  ;;  %v8590_v5 = vrot.slane %v11402_v32, 5  ;;  %v8643_v3 = vsel %vm12259_vm7, %v8641_v35, %v8642_v23  ;;  %v11447_v0 = vrot.slane %v11401_v31, 9 }
 0x575   : > { %v7620_v50 = vpop.permute.xlu0 %7619  ;;  %8366 = vrot.lane.b32.xlu1 %v8043_v15, %s11966_s28  ;;  %v8187_v13 = vsel %vm12115_vm3, %v8182_v20, %v8186_v53  ;;  %v8196_v15 = vrot.slane %v8195_v56, 4  ;;  %v8649_v61 = vrot.slane %v11427_v10, 5  ;;  %v11480_v33 = vld [vmem:[%s12104_s6 + $0x22c] sm:$0xf]  ;;  %v9086_v32 = vshll.u32 %v11497_v38, 16  ;;  %v11827_v10 = vld [vmem:[%s16884_s1 + $0x30] sm:$0xff]  }
 0x576   : > { %7706 = vst.msk [vmem:[#allocation2 + $0x28] sm:$0xf] %vm7695_vm13, %v7620_v50  ;;  %v8592_v4 = vrot.slane %v8590_v5, 4  ;;  %v8591_v16 = vsel %vm12259_vm7, %v11447_v0, %v8590_v5  ;;  %v11498_v40 = vld [vmem:[%s12104_s6 + $0x1d4] sm:$0xf] }
 0x577   : > { %8364 = vrot.lane.b32.xlu0 %v8033_v43, %s11966_s28  ;;  %v7626_v30 = vpop.permute.xlu1 %7625  ;;  %v8211_v43 = vsel %vm12115_vm3, %v8206_v21, %v8210_v41  ;;  %v11463_v41 = vld [vmem:[%s12104_s6 + $0x1c8] sm:$0xf]  ;;  %v11521_v17 = vld [vmem:[%s12104_s6 + $0x230] sm:$0x1]  ;;  %v11465_v31 = vld [vmem:[%s12104_s6 + $0x1d4] sm:$0xf] }
 0x578   : > { %7709 = vst.msk [vmem:[#allocation2 + $0x34] sm:$0xf] %vm7695_vm13, %v7626_v30  ;;  %v11403_v30 = vld [vmem:[%s12104_s6 + $0x1d0] sm:$0x1]  ;;  %v11522_v0 = vld [vmem:[%s12104_s6 + $0x234] sm:$0xf] }
 0x579   : > { %v7624_v24 = vpop.permute.xlu0 %7623  ;;  %8370 = vrot.lane.b32.xlu1 %v8067_v46, %s11966_s28  ;;  %v8201_v46 = vsel %vm12115_vm3, %v8196_v15, %v8200_v1  ;;  %v11425_v1 = vld [vmem:[%s12104_s6 + $0x228] sm:$0xe] }
 0x57a   : > { %7708 = vst.msk [vmem:[#allocation2 + $0x30] sm:$0xf] %vm7695_vm13, %v7624_v24  ;;  %v8593_v24 = vrot.slane %v11403_v30, 5  ;;  %v11455_v26 = vrot.slane %v11425_v1, 9 }
 0x57b   : > { %8368 = vrot.lane.b32.xlu0 %v8057_v7, %s11966_s28  ;;  %v7630_v59 = vpop.permute.xlu1 %7629  ;;  %v11446_v7 = vrot.slane %v11398_v27, 9 }
 0x57c   : > { %7711 = vst.msk [vmem:[#allocation2 + $0x3c] sm:$0xf] %vm7695_vm13, %v7630_v59  ;;  %v8594_v58 = vsel %vm12259_vm7, %v8592_v4, %v8593_v24  ;;  %v9094_v4 = vshll.u32 %v11498_v40, 16  ;;  %v11523_v24 = vld [vmem:[%s12104_s6 + $0x238] sm:$0xf] }
 0x57d   : > { %v7628_v18 = vpop.permute.xlu0 %7627  ;;  %8374 = vrot.lane.b32.xlu1 %v8091_v57, %s11966_s28  ;;  %v8584_v19 = vsel %vm12259_vm7, %v11446_v7, %v8583_v36  ;;  %v8646_v57 = vrot.slane %v11426_v45, 5 }
 0x57e   : > { %7710 = vst.msk [vmem:[#allocation2 + $0x38] sm:$0xf] %vm7695_vm13, %v7628_v18  ;;  %v11496_v18 = vld [vmem:[%s12104_s6 + $0x1cc] sm:$0xf] }
 0x57f   : > { %8372 = vrot.lane.b32.xlu0 %v8081_v52, %s11966_s28  ;;  %v7634_v9 = vpop.permute.xlu1 %7633  ;;  %v8648_v59 = vrot.slane %v8646_v57, 4  ;;  %v8647_v12 = vsel %vm12259_vm7, %v11455_v26, %v8646_v57 }
 0x580   : > { %7713 = vst.msk [vmem:[#allocation2 + $0x44] sm:$0xf] %vm7695_vm13, %v7634_v9  ;;  %v9076_v9 = vshll.u32 %v11496_v18, 16 }
 0x581   : > { %v7632_v60 = vpop.permute.xlu0 %7631  ;;  %8378 = vrot.lane.b32.xlu1 %v8115_v51, %s11966_s28  ;;  %v11495_v51 = vld [vmem:[%s12104_s6 + $0x1c8] sm:$0xf]  ;;  %v8650_v20 = vsel %vm12259_vm7, %v8648_v59, %v8649_v61  ;;  %v9278_v59 = vshll.u32 %v11521_v17, 16 }
 0x582   : > { %7712 = vst.msk [vmem:[#allocation2 + $0x40] sm:$0xf] %vm7695_vm13, %v7632_v60  ;;  %v9067_v48 = vshrl.u32 %v11495_v51, 16  ;;  %v9070_v56 = vshll.u32 %v11495_v51, 16  ;;  %v11520_v60 = vld [vmem:[%s12104_s6 + $0x22c] sm:$0xf] }
 0x583   : > { %8376 = vrot.lane.b32.xlu0 %v8105_v47, %s11966_s28  ;;  %v7638_v55 = vpop.permute.xlu1 %7637  ;;  %v9080_v47 = vshrl.u32 %v11496_v18, 16  ;;  %v9272_v27 = vshrl.u32 %v11520_v60, 16  ;;  %v9296_v18 = vshrl.u32 %v11523_v24, 16 }
 0x584   : > { %7715 = vst.msk [vmem:[#allocation2 + $0x4c] sm:$0xf] %vm7695_vm13, %v7638_v55  ;;  %v15935_v55 = vrot.slane %v9076_v9, 5  ;;  %v9069_v15 = vrot.slane %v9067_v48, 4  ;;  %v9072_v37 = vrot.slane %v9070_v56, 5  ;;  %v9286_v9 = vshll.u32 %v11522_v0, 16 }
 0x585   : > { %v7636_v11 = vpop.permute.xlu0 %7635  ;;  %8390 = vrot.lane.b32.xlu1 %v8187_v13, %s11966_s28  ;;  %v11519_v13 = vld [vmem:[%s12104_s6 + $0x228] sm:$0xf]  ;;  %v9274_v23 = vrot.slane %v9272_v27, 4 }
 0x586   : > { %7714 = vst.msk [vmem:[#allocation2 + $0x48] sm:$0xf] %vm7695_vm13, %v7636_v11  ;;  %v9268_v11 = vshll.u32 %v11520_v60, 16  ;;  %v9262_v44 = vshll.u32 %v11519_v13, 16  ;;  %v11828_v48 = vld [vmem:[%s16884_s1 + $0x28] sm:$0xff]  }
 0x587   : > { %8388 = vrot.lane.b32.xlu0 %v8177_v22, %s11966_s28  ;;  %v7642_v50 = vpop.permute.xlu1 %7641  ;;  %v9082_v22 = vrot.slane %v9080_v47, 4 }
 0x588   : > { %7717 = vst.msk [vmem:[#allocation2 + $0x54] sm:$0xf] %vm7695_vm13, %v7642_v50  ;;  %v11479_v50 = vld [vmem:[%s12104_s6 + $0x228] sm:$0xf]  ;;  %v15952_v35 = vrot.slane %v9268_v11, 5 }
 0x589   : > { %v7640_v42 = vpop.permute.xlu0 %7639  ;;  %8394 = vrot.lane.b32.xlu1 %v8211_v43, %s11966_s28  ;;  %v9259_v43 = vshrl.u32 %v11519_v13, 16  ;;  %v9083_v29 = vor.u32 %v9082_v22, %v15935_v55  ;;  %v9280_v13 = vrot.slane %v9278_v59, 5  ;;  %v9298_v22 = vrot.slane %v9296_v18, 4  ;;  %v11524_v11 = vld [vmem:[%s12104_s6 + $0x23c] sm:$0x1] }
 0x58a   : > { %7716 = vst.msk [vmem:[#allocation2 + $0x50] sm:$0xf] %vm7695_vm13, %v7640_v42  ;;  %v9073_v42 = vor.u32 %v9072_v37, %v9069_v15 }
 0x58b   : > { %8392 = vrot.lane.b32.xlu0 %v8201_v46, %s11966_s28  ;;  %v7646_v39 = vpop.permute.xlu1 %7645  ;;  %v11499_v46 = vld [vmem:[%s12104_s6 + $0x1d8] sm:$0xf]  ;;  %v9261_v5 = vrot.slane %v9259_v43, 4  ;;  %v9288_v43 = vrot.slane %v9286_v9, 5 }
 0x58c   : > { %7719 = vst.msk [vmem:[#allocation2 + $0x5c] sm:$0xf] %vm7695_vm13, %v7646_v39  ;;  %v9264_v39 = vrot.slane %v9262_v44, 5  ;;  %v9100_v30 = vshll.u32 %v11499_v46, 16  ;;  %v9104_v45 = vshrl.u32 %v11499_v46, 16  ;;  %v9074_v1 = vrot.slane %v9073_v42, 4 }
 0x58d   : > { %v7644_v62 = vpop.permute.xlu0 %7643  ;;  %8695 = vrot.lane.b32.xlu1 %v8587_v34, %s11967_s29  ;;  %v11826_v34 = vld [vmem:[%s16884_s1 + $0x38] sm:$0xff]   ;;  %v11829_v44 = vld [vmem:[%s16884_s1 + $0x20] sm:$0xff]  }
 0x58e   : > { %7718 = vst.msk [vmem:[#allocation2 + $0x58] sm:$0xf] %vm7695_vm13, %v7644_v62  ;;  %11662 = vmatprep.subr.bf16.mxu0 %v11826_v34  ;;  %11710 = vmatprep.subr.bf16.mxu1 %v11826_v34  ;;  %v9265_v61 = vor.u32 %v9264_v39, %v9261_v5  ;;  %v9106_v26 = vrot.slane %v9104_v45, 4  ;;  %v11830_v5 = vld [vmem:[%s16884_s1 + $0x18] sm:$0xff]  }
 0x58f   : > { %8693 = vrot.lane.b32.xlu0 %v8584_v19, %s11967_s29  ;;  %v7650_v52 = vpop.permute.xlu1 %7649  ;;  %v11466_v19 = vld [vmem:[%s12104_s6 + $0x1d8] sm:$0xf]  ;;  %11663 = vmatpush3.bf16.msra.mxu0 %v11826_v34 }
 0x590   : > { %7721 = vst.msk [vmem:[#allocation2 + $0x64] sm:$0xf] %vm7695_vm13, %v7650_v52  ;;  %v9084_v52 = vrot.slane %v9083_v29, 4  ;;  %11718 = vmatpush3.bf16.msra.mxu1 %v11826_v34  ;;  %11664 = vmatprep.subr.bf16.mxu0 %v11827_v10  ;;  %v9266_v37 = vrot.slane %v9265_v61, 4  ;;  %v16003_v34 = vld [vmem:[%s12104_s6 + $0x1cc] sm:$0xf] }
 0x591   : > { %v7648_v54 = vpop.permute.xlu0 %7647  ;;  %8727 = vrot.lane.b32.xlu1 %v8643_v3, %s11967_s29  ;;  %v9091_v3 = vshrl.u32 %v11498_v40, 16  ;;  %11711 = vmatprep.subr.bf16.mxu1 %v11827_v10 }
 0x592   : > { %7720 = vst.msk [vmem:[#allocation2 + $0x60] sm:$0xf] %vm7695_vm13, %v7648_v54  ;;  %v11482_v54 = vld [vmem:[%s12104_s6 + $0x238] sm:$0xf] }
 0x593   : > { %8725 = vrot.lane.b32.xlu0 %v8640_v8, %s11967_s29  ;;  %v7654_v14 = vpop.permute.xlu1 %7653  ;;  %v9088_v8 = vrot.slane %v9086_v32, 5  ;;  %11665 = vmatpush3.bf16.msra.mxu0 %v11827_v10  ;;  %v9271_v32 = vsel %vm12115_vm3, %v9266_v37, %v15952_v35 }
 0x594   : > { %7723 = vst.msk [vmem:[#allocation2 + $0x6c] sm:$0xf] %vm7695_vm13, %v7654_v14  ;;  %v11481_v14 = vld [vmem:[%s12104_s6 + $0x234] sm:$0xf]  ;;  %11719 = vmatpush3.bf16.msra.mxu1 %v11827_v10  ;;  %11666 = vmatprep.subr.bf16.mxu0 %v11828_v48 }
 0x595   : > { %v7652_v6 = vpop.permute.xlu0 %7651  ;;  %8699 = vrot.lane.b32.xlu1 %v8594_v58, %s11967_s29  ;;  %v9275_v58 = vor.u32 %v9274_v23, %v15952_v35  ;;  %v9089_v56 = vsel %vm12115_vm3, %v9084_v52, %v9088_v8  ;;  %11712 = vmatprep.subr.bf16.mxu1 %v11828_v48  ;;  %v16012_v35 = vld [vmem:[%s12104_s6 + $0x22c] sm:$0xf]  ;;  %v11831_v52 = vld [vmem:[%s16884_s1 + $0x10] sm:$0xff]  }
 0x596   : > { %7722 = vst.msk [vmem:[#allocation2 + $0x68] sm:$0xf] %vm7695_vm13, %v7652_v6  ;;  %v9292_v6 = vshll.u32 %v11523_v24, 16  ;;  %v11543_v24 = vld [vmem:[%s12104_s6 + $0x1c8] sm:$0xe] }
 0x597   : > { %8697 = vrot.lane.b32.xlu0 %v8591_v16, %s11967_s29  ;;  %v7658_v53 = vpop.permute.xlu1 %7657  ;;  %v15970_v16 = vrot.slane %v9100_v30, 5  ;;  %v9276_v60 = vrot.slane %v9275_v58, 4  ;;  %11667 = vmatpush3.bf16.msra.mxu0 %v11828_v48  ;;  %v9677_v30 = vrot.slane %v16003_v34, 5  ;;  %v11569_v8 = vld [vmem:[%s12104_s6 + $0x230] sm:$0x1] }
 0x598   : > { %7725 = vst.msk [vmem:[#allocation2 + $0x74] sm:$0xf] %vm7695_vm13, %v7658_v53  ;;  %v9093_v53 = vrot.slane %v9091_v3, 4  ;;  %11720 = vmatpush3.bf16.msra.mxu1 %v11828_v48  ;;  %11668 = vmatprep.subr.bf16.mxu0 %v11829_v44  ;;  %v11545_v3 = vld [vmem:[%s12104_s6 + $0x1d0] sm:$0x1]  ;;  %v9736_v18 = vrot.slane %v11569_v8, 5 }
 0x599   : > { %v7656_v25 = vpop.permute.xlu0 %7655  ;;  %8731 = vrot.lane.b32.xlu1 %v8650_v20, %s11967_s29  ;;  %v11500_v20 = vld [vmem:[%s12104_s6 + $0x1dc] sm:$0x1]  ;;  %11713 = vmatprep.subr.bf16.mxu1 %v11829_v44  ;;  %v16036_v58 = vld [vmem:[%s12104_s6 + $0x1d8] sm:$0xf] }
 0x59a   : > { %7724 = vst.msk [vmem:[#allocation2 + $0x70] sm:$0xf] %vm7695_vm13, %v7656_v25  ;;  %v9283_v25 = vshrl.u32 %v11522_v0, 16  ;;  %v11567_v0 = vld [vmem:[%s12104_s6 + $0x228] sm:$0xe] }
 0x59b   : > { %8729 = vrot.lane.b32.xlu0 %v8647_v12, %s11967_s29  ;;  %v7662_v21 = vpop.permute.xlu1 %7661  ;;  %v9096_v12 = vrot.slane %v9094_v4, 5  ;;  %11669 = vmatpush3.bf16.msra.mxu0 %v11829_v44  ;;  %v16056_v48 = vld [vmem:[%s12104_s6 + $0x238] sm:$0xf] }
 0x59c   : > { %7727 = vst.msk [vmem:[#allocation2 + $0x7c] sm:$0xf] %vm7695_vm13, %v7662_v21  ;;  %v9107_v21 = vor.u32 %v9106_v26, %v15970_v16  ;;  %v9285_v27 = vrot.slane %v9283_v25, 4  ;;  %11721 = vmatpush3.bf16.msra.mxu1 %v11829_v44  ;;  %11670 = vmatprep.subr.bf16.mxu0 %v11830_v5  ;;  %v9684_v25 = vrot.slane %v16036_v58, 5  ;;  %v9740_v44 = vrot.slane %v16056_v48, 5 }
 0x59d   : > { %v7660_v36 = vpop.permute.xlu0 %7659  ;;  %8891 = vrot.lane.b32.xlu1 %v11464_v2, %s11968_s30  ;;  %v9079_v2 = vsel %vm12115_vm3, %v9074_v1, %v15935_v55  ;;  %v9097_v38 = vor.u32 %v9096_v12, %v9093_v53  ;;  %11714 = vmatprep.subr.bf16.mxu1 %v11830_v5  ;;  %v9680_v1 = vrot.slane %v11545_v3, 5  ;;  %v11832_v53 = vld [vmem:[%s16884_s1 + $0x8] sm:$0xff]   ;;  %v11548_v12 = vld [vmem:[%s12104_s6 + $0x1dc] sm:$0x1] }
 0x59e   : > { %7726 = vst.msk [vmem:[#allocation2 + $0x78] sm:$0xf] %vm7695_vm13, %v7660_v36  ;;  %v15986_v36 = vrot.slane %v9292_v6, 5  ;;  %v9289_v40 = vor.u32 %v9288_v43, %v9285_v27  ;;  %v9686_v27 = vrot.slane %v9684_v25, 4  ;;  %v9687_v43 = vrot.slane %v11548_v12, 5 }
 0x59f   : > { %8889 = vrot.lane.b32.xlu0 %v11463_v41, %s11968_s30  ;;  %v7798_v49 = vpop.permute.xlu1 %7797  ;;  %v9110_v41 = vshll.u32 %v11500_v20, 16  ;;  %v9098_v42 = vrot.slane %v9097_v38, 4  ;;  %11671 = vmatpush3.bf16.msra.mxu0 %v11830_v5  ;;  %v11380_v20 = vld [vmem:[%s12104_s6 + $0x234] sm:$0xf]  ;;  %v11383_v38 = vld [vmem:[%s12104_s6 + $0x240] sm:$0xf] }
 0x5a0   : > { %7893 = vst.msk [vmem:[#allocation2 + $0x4] sm:$0xf] %vm7891_vm14, %v7798_v49  ;;  %v9108_v49 = vrot.slane %v9107_v21, 4  ;;  %v9299_v46 = vor.u32 %v9298_v22, %v15986_v36  ;;  %11722 = vmatpush3.bf16.msra.mxu1 %v11830_v5  ;;  %11672 = vmatprep.subr.bf16.mxu0 %v11831_v52  ;;  %v8213_v21 = vshrl.u32 %v11380_v20, 16  ;;  %v8237_v34 = vshrl.u32 %v11383_v38, 16 }
 0x5a1   : > { %v7796_v7 = vpop.permute.xlu0 %7795  ;;  %8923 = vrot.lane.b32.xlu1 %v11480_v33, %s11968_s30  ;;  %v9281_v33 = vsel %vm12115_vm3, %v9276_v60, %v9280_v13  ;;  %11715 = vmatprep.subr.bf16.mxu1 %v11831_v52 }
 0x5a2   : > { %7892 = vst.msk [vmem:[#allocation2] sm:$0xf] %vm7891_vm14, %v7796_v7  ;;  %v9302_v7 = vshll.u32 %v11524_v11, 16  ;;  %v11834_v11 = vld [vmem:[%s16884_s1] sm:$0xff]   ;;  %v8239_v8 = vrot.slane %v8237_v34, 4 }
 0x5a3   : > { %8921 = vrot.lane.b32.xlu0 %v11479_v50, %s11968_s30  ;;  %v7802_v62 = vpop.permute.xlu1 %7801  ;;  %v9112_v50 = vrot.slane %v9110_v41, 5  ;;  %11673 = vmatpush3.bf16.msra.mxu0 %v11831_v52  ;;  %v8216_v41 = vshll.u32 %v11380_v20, 16  ;;  %v11407_v34 = vld [vmem:[%s12104_s6 + $0x1e0] sm:$0xe] }
 0x5a4   : > { %7895 = vst.msk [vmem:[#allocation2 + $0xc] sm:$0xf] %vm7891_vm14, %v7802_v62  ;;  %v9304_v17 = vrot.slane %v9302_v7, 5  ;;  %v9103_v62 = vsel %vm12115_vm3, %v9098_v42, %v15970_v16  ;;  %v11381_v16 = vld [vmem:[%s12104_s6 + $0x238] sm:$0xf]  ;;  %11723 = vmatpush3.bf16.msra.mxu1 %v11831_v52  ;;  %11674 = vmatprep.subr.bf16.mxu0 %v11832_v53  ;;  %v8215_v42 = vrot.slane %v8213_v21, 4 }
 0x5a5   : > { %v7800_v57 = vpop.permute.xlu0 %7799  ;;  %8895 = vrot.lane.b32.xlu1 %v11466_v19, %s11968_s30  ;;  %v9113_v39 = vsel %vm12115_vm3, %v9108_v49, %v9112_v50  ;;  %v9300_v19 = vrot.slane %v9299_v46, 4  ;;  %11716 = vmatprep.subr.bf16.mxu1 %v11832_v53  ;;  %v11385_v52 = vld [vmem:[%s12104_s6 + $0x248] sm:$0x1] }
 0x5a6   : > { %7894 = vst.msk [vmem:[#allocation2 + $0x8] sm:$0xf] %vm7891_vm14, %v7800_v57  ;;  %v9733_v57 = vrot.slane %v16012_v35, 5  ;;  %v11570_v35 = vld [vmem:[%s12104_s6 + $0x234] sm:$0xe] }
 0x5a7   : > { %8893 = vrot.lane.b32.xlu0 %v11465_v31, %s11968_s30  ;;  %v7806_v51 = vpop.permute.xlu1 %7805  ;;  %v9290_v31 = vrot.slane %v9289_v40, 4  ;;  %v9305_v10 = vsel %vm12115_vm3, %v9300_v19, %v9304_v17  ;;  %11675 = vmatpush3.bf16.msra.mxu0 %v11832_v53  ;;  %v8218_v40 = vrot.slane %v8216_v41, 5  ;;  %v9742_v17 = vrot.slane %v9740_v44, 4 }
 0x5a8   : > { %7897 = vst.msk [vmem:[#allocation2 + $0x14] sm:$0xf] %vm7891_vm14, %v7806_v51  ;;  %v9735_v6 = vrot.slane %v9733_v57, 4  ;;  %v11599_v51 = vrot.slane %v11567_v0, 9  ;;  %11724 = vmatpush3.bf16.msra.mxu1 %v11832_v53  ;;  %11676 = vmatprep.subr.bf16.mxu0 %v11834_v11 }
 0x5a9   : > { %v7804_v47 = vpop.permute.xlu0 %7803  ;;  %8927 = vrot.lane.b32.xlu1 %v11482_v54, %s11968_s30  ;;  %v9679_v54 = vrot.slane %v9677_v30, 4  ;;  %v9295_v61 = vsel %vm12115_vm3, %v9290_v31, %v15986_v36  ;;  %v11384_v36 = vld [vmem:[%s12104_s6 + $0x244] sm:$0xf]  ;;  %11717 = vmatprep.subr.bf16.mxu1 %v11834_v11 }
 0x5aa   : > { %7896 = vst.msk [vmem:[#allocation2 + $0x10] sm:$0xf] %vm7891_vm14, %v7804_v47  ;;  %v11546_v47 = vld [vmem:[%s12104_s6 + $0x1d4] sm:$0xe]  ;;  %v9734_v37 = vsel %vm12259_vm7, %v11599_v51, %v9733_v57  ;;  %v8246_v46 = vshll.u32 %v11384_v36, 16  ;;  %v8250_v7 = vshrl.u32 %v11384_v36, 16  ;;  %v8219_v57 = vor.u32 %v8218_v40, %v8215_v42 }
 0x5ab   : > { %8925 = vrot.lane.b32.xlu0 %v11481_v14, %s11968_s30  ;;  %v7810_v15 = vpop.permute.xlu1 %7809  ;;  %v11591_v14 = vrot.slane %v11543_v24, 9  ;;  %v9681_v9 = vsel %vm12259_vm7, %v9679_v54, %v9680_v1  ;;  %11677 = vmatpush3.bf16.msra.mxu0 %v11834_v11  ;;  %v11600_v24 = vrot.slane %v11570_v35, 9  ;;  %v11432_v42 = vld [vmem:[%s12104_s6 + $0x244] sm:$0xf] }
 0x5ac   : > { %7899 = vst.msk [vmem:[#allocation2 + $0x1c] sm:$0xf] %vm7891_vm14, %v7810_v15  ;;  %v9737_v15 = vsel %vm12259_vm7, %v9735_v6, %v9736_v18  ;;  %11725 = vmatpush3.bf16.msra.mxu1 %v11834_v11  ;;  %v8248_v31 = vrot.slane %v8246_v46, 5  ;;  %v8252_v3 = vrot.slane %v8250_v7, 4  ;;  %v11405_v18 = vld [vmem:[%s12104_s6 + $0x1d8] sm:$0xf] }
 0x5ad   : > { %v7808_v55 = vpop.permute.xlu0 %7807  ;;  %9452 = vrot.lane.b32.xlu1 %v9089_v56, %s11969_s25  ;;  %v8222_v56 = vshll.u32 %v11381_v16, 16  ;;  %v9678_v13 = vsel %vm12259_vm7, %v11591_v14, %v9677_v30  ;;  %v11430_v11 = vld [vmem:[%s12104_s6 + $0x23c] sm:$0x1] }
 0x5ae   : > { %7898 = vst.msk [vmem:[#allocation2 + $0x18] sm:$0xf] %vm7891_vm14, %v7808_v55  ;;  %v11592_v55 = vrot.slane %v11546_v47, 9 }
 0x5af   : > { %9450 = vrot.lane.b32.xlu0 %v9079_v2, %s11969_s25  ;;  %v7814_v29 = vpop.permute.xlu1 %7813  ;;  %v8226_v2 = vshrl.u32 %v11381_v16, 16  ;;  %v16075_v49 = vrot.slane %v8222_v56, 5  ;;  %v9741_v16 = vsel %vm12259_vm7, %v11600_v24, %v9740_v44  ;;  %v11406_v56 = vld [vmem:[%s12104_s6 + $0x1dc] sm:$0x1] }
 0x5b0   : > { %7901 = vst.msk [vmem:[#allocation2 + $0x24] sm:$0xf] %vm7891_vm14, %v7814_v29  ;;  %v9685_v19 = vsel %vm12259_vm7, %v11592_v55, %v9684_v25  ;;  %v8597_v25 = vrot.slane %v11405_v18, 5  ;;  %v8600_v36 = vrot.slane %v11406_v56, 5  ;;  %v11428_v55 = vld [vmem:[%s12104_s6 + $0x234] sm:$0xe] }
 0x5b1   : > { %v7812_v23 = vpop.permute.xlu0 %7811  ;;  %9484 = vrot.lane.b32.xlu1 %v9281_v33, %s11969_s25  ;;  %v11572_v33 = vld [vmem:[%s12104_s6 + $0x23c] sm:$0x1]  ;;  %v8228_v50 = vrot.slane %v8226_v2, 4  ;;  %v11429_v2 = vld [vmem:[%s12104_s6 + $0x238] sm:$0xf] }
 0x5b2   : > { %7900 = vst.msk [vmem:[#allocation2 + $0x20] sm:$0xf] %vm7891_vm14, %v7812_v23  ;;  %v8240_v23 = vshll.u32 %v11383_v38, 16  ;;  %v9743_v30 = vrot.slane %v11572_v33, 5  ;;  %v8599_v41 = vrot.slane %v8597_v25, 4 }
 0x5b3   : > { %9482 = vrot.lane.b32.xlu0 %v9271_v32, %s11969_s25  ;;  %v7818_v45 = vpop.permute.xlu1 %7817  ;;  %v11382_v32 = vld [vmem:[%s12104_s6 + $0x23c] sm:$0x1]  ;;  %v11468_v18 = vld [vmem:[%s12104_s6 + $0x1e4] sm:$0xf] }
 0x5b4   : > { %7903 = vst.msk [vmem:[#allocation2 + $0x2c] sm:$0xf] %vm7891_vm14, %v7818_v45  ;;  %v8229_v45 = vor.u32 %v8228_v50, %v16075_v49  ;;  %v8242_v0 = vrot.slane %v8240_v23, 5  ;;  %v9744_v54 = vsel %vm12259_vm7, %v9742_v17, %v9743_v30  ;;  %v8601_v44 = vsel %vm12259_vm7, %v8599_v41, %v8600_v36  ;;  %v11484_v36 = vld [vmem:[%s12104_s6 + $0x244] sm:$0xf] }
 0x5b5   : > { %v7816_v4 = vpop.permute.xlu0 %7815  ;;  %9456 = vrot.lane.b32.xlu1 %v9113_v39, %s11969_s25  ;;  %v9688_v39 = vsel %vm12259_vm7, %v9686_v27, %v9687_v43  ;;  %v11408_v27 = vld [vmem:[%s12104_s6 + $0x1e4] sm:$0xf]  ;;  %v11449_v30 = vrot.slane %v11407_v34, 9 }
 0x5b6   : > { %7902 = vst.msk [vmem:[#allocation2 + $0x28] sm:$0xf] %vm7891_vm14, %v7816_v4  ;;  %v8230_v1 = vrot.slane %v8229_v45, 4  ;;  %v8243_v6 = vor.u32 %v8242_v0, %v8239_v8  ;;  %v8604_v50 = vrot.slane %v11408_v27, 5  ;;  %v11433_v45 = vld [vmem:[%s12104_s6 + $0x248] sm:$0x1] }
 0x5b7   : > { %9454 = vrot.lane.b32.xlu0 %v9103_v62, %s11969_s25  ;;  %v7822_v59 = vpop.permute.xlu1 %7821  ;;  %v8232_v62 = vshll.u32 %v11382_v32, 16  ;;  %v11409_v32 = vld [vmem:[%s12104_s6 + $0x1e8] sm:$0x1]  ;;  %v8663_v24 = vrot.slane %v11433_v45, 5 }
 0x5b8   : > { %7905 = vst.msk [vmem:[#allocation2 + $0x34] sm:$0xf] %vm7891_vm14, %v7822_v59  ;;  %v8253_v59 = vor.u32 %v8252_v3, %v8248_v31  ;;  %v8244_v48 = vrot.slane %v8243_v6, 4  ;;  %v8607_v35 = vrot.slane %v11409_v32, 5 }
 0x5b9   : > { %v7820_v26 = vpop.permute.xlu0 %7819  ;;  %9488 = vrot.lane.b32.xlu1 %v9305_v10, %s11969_s25  ;;  %v8234_v58 = vrot.slane %v8232_v62, 5 }
 0x5ba   : > { %7904 = vst.msk [vmem:[#allocation2 + $0x30] sm:$0xf] %vm7891_vm14, %v7820_v26  ;;  %v8220_v26 = vrot.slane %v8219_v57, 4  ;;  %v8254_v53 = vrot.slane %v8253_v59, 4 }
 0x5bb   : > { %9486 = vrot.lane.b32.xlu0 %v9295_v61, %s11969_s25  ;;  %v7826_v60 = vpop.permute.xlu1 %7825  ;;  %v8256_v61 = vshll.u32 %v11385_v52, 16  ;;  %v8235_v20 = vsel %vm12115_vm3, %v8230_v1, %v8234_v58  ;;  %v8605_v52 = vsel %vm12259_vm7, %v11449_v30, %v8604_v50  ;;  %v11486_v30 = vld [vmem:[%s12104_s6 + $0x250] sm:$0xf] }
 0x5bc   : > { %7907 = vst.msk [vmem:[#allocation2 + $0x3c] sm:$0xf] %vm7891_vm14, %v7826_v60  ;;  %v8225_v47 = vsel %vm12115_vm3, %v8220_v26, %v16075_v49  ;;  %v8656_v49 = vrot.slane %v11430_v11, 5 }
 0x5bd   : > { %v7824_v22 = vpop.permute.xlu0 %7823  ;;  %9789 = vrot.lane.b32.xlu1 %v9681_v9, %s11970_s24  ;;  %v8258_v12 = vrot.slane %v8256_v61, 5 }
 0x5be   : > { %7906 = vst.msk [vmem:[#allocation2 + $0x38] sm:$0xf] %vm7891_vm14, %v7824_v22  ;;  %v8653_v22 = vrot.slane %v11429_v2, 5  ;;  %v11503_v2 = vld [vmem:[%s12104_s6 + $0x1e8] sm:$0x1] }
 0x5bf   : > { %9787 = vrot.lane.b32.xlu0 %v9678_v13, %s11970_s24  ;;  %v7830_v29 = vpop.permute.xlu1 %7829  ;;  %v11404_v13 = vld [vmem:[%s12104_s6 + $0x1d4] sm:$0xe]  ;;  %v8259_v21 = vsel %vm12115_vm3, %v8254_v53, %v8258_v12  ;;  %v11467_v12 = vld [vmem:[%s12104_s6 + $0x1e0] sm:$0xf]  ;;  %v9134_v27 = vshll.u32 %v11503_v2, 16 }
 0x5c0   : > { %7909 = vst.msk [vmem:[#allocation2 + $0x44] sm:$0xf] %vm7891_vm14, %v7830_v29  ;;  %v11448_v38 = vrot.slane %v11404_v13, 9  ;;  %v8655_v33 = vrot.slane %v8653_v22, 4  ;;  %v11456_v29 = vrot.slane %v11428_v55, 9 }
 0x5c1   : > { %v7828_v5 = vpop.permute.xlu0 %7827  ;;  %9821 = vrot.lane.b32.xlu1 %v9737_v15, %s11970_s24  ;;  %v11504_v55 = vld [vmem:[%s12104_s6 + $0x1ec] sm:$0xf] }
 0x5c2   : > { %7908 = vst.msk [vmem:[#allocation2 + $0x40] sm:$0xf] %vm7891_vm14, %v7828_v5  ;;  %v8598_v7 = vsel %vm12259_vm7, %v11448_v38, %v8597_v25  ;;  %v8657_v23 = vsel %vm12259_vm7, %v8655_v33, %v8656_v49  ;;  %v8606_v5 = vrot.slane %v8604_v50, 4  ;;  %v8654_v17 = vsel %vm12259_vm7, %v11456_v29, %v8653_v22 }
 0x5c3   : > { %9819 = vrot.lane.b32.xlu0 %v9734_v37, %s11970_s24  ;;  %v7834_v4 = vpop.permute.xlu1 %7833  ;;  %v8249_v37 = vsel %vm12115_vm3, %v8244_v48, %v8248_v31  ;;  %v11431_v31 = vld [vmem:[%s12104_s6 + $0x240] sm:$0xe]  ;;  %v9139_v34 = vshrl.u32 %v11504_v55, 16 }
 0x5c4   : > { %7911 = vst.msk [vmem:[#allocation2 + $0x4c] sm:$0xf] %vm7891_vm14, %v7834_v4  ;;  %v8608_v3 = vsel %vm12259_vm7, %v8606_v5, %v8607_v35  ;;  %v11457_v8 = vrot.slane %v11431_v31, 9  ;;  %v11529_v5 = vld [vmem:[%s12104_s6 + $0x250] sm:$0xf] }
 0x5c5   : > { %v7832_v10 = vpop.permute.xlu0 %7831  ;;  %9793 = vrot.lane.b32.xlu1 %v9688_v39, %s11970_s24  ;;  %v8660_v39 = vrot.slane %v11432_v42, 5 }
 0x5c6   : > { %7910 = vst.msk [vmem:[#allocation2 + $0x48] sm:$0xf] %vm7891_vm14, %v7832_v10  ;;  %v11502_v10 = vld [vmem:[%s12104_s6 + $0x1e4] sm:$0xf] }
 0x5c7   : > { %9791 = vrot.lane.b32.xlu0 %v9685_v19, %s11970_s24  ;;  %v7838_v14 = vpop.permute.xlu1 %7837  ;;  %v8662_v4 = vrot.slane %v8660_v39, 4  ;;  %v8661_v59 = vsel %vm12259_vm7, %v11457_v8, %v8660_v39  ;;  %v9344_v8 = vshrl.u32 %v11529_v5, 16 }
 0x5c8   : > { %7913 = vst.msk [vmem:[#allocation2 + $0x54] sm:$0xf] %vm7891_vm14, %v7838_v14  ;;  %v9124_v14 = vshll.u32 %v11502_v10, 16 }
 0x5c9   : > { %v7836_v51 = vpop.permute.xlu0 %7835  ;;  %9825 = vrot.lane.b32.xlu1 %v9744_v54, %s11970_s24  ;;  %v11501_v54 = vld [vmem:[%s12104_s6 + $0x1e0] sm:$0xf]  ;;  %v8664_v1 = vsel %vm12259_vm7, %v8662_v4, %v8663_v24  ;;  %v11485_v4 = vld [vmem:[%s12104_s6 + $0x24c] sm:$0xf] }
 0x5ca   : > { %7912 = vst.msk [vmem:[#allocation2 + $0x50] sm:$0xf] %vm7891_vm14, %v7836_v51  ;;  %v9115_v26 = vshrl.u32 %v11501_v54, 16  ;;  %v9118_v6 = vshll.u32 %v11501_v54, 16  ;;  %v11526_v51 = vld [vmem:[%s12104_s6 + $0x244] sm:$0xf] }
 0x5cb   : > { %9823 = vrot.lane.b32.xlu0 %v9741_v16, %s11970_s24  ;;  %v7842_v9 = vpop.permute.xlu1 %7841  ;;  %v9128_v16 = vshrl.u32 %v11502_v10, 16  ;;  %v9320_v13 = vshrl.u32 %v11526_v51, 16  ;;  %v11506_v10 = vld [vmem:[%s12104_s6 + $0x1f4] sm:$0x1]  ;;  %v9141_v54 = vrot.slane %v9139_v34, 4 }
 0x5cc   : > { %7915 = vst.msk [vmem:[#allocation2 + $0x5c] sm:$0xf] %vm7891_vm14, %v7842_v9  ;;  %v16169_v9 = vrot.slane %v9124_v14, 5  ;;  %v9117_v48 = vrot.slane %v9115_v26, 4  ;;  %v9120_v56 = vrot.slane %v9118_v6, 5 }
 0x5cd   : > { %v7840_v60 = vpop.permute.xlu0 %7839  ;;  %8398 = vrot.lane.b32.xlu1 %v8235_v20, %s11966_s28  ;;  %v11525_v20 = vld [vmem:[%s12104_s6 + $0x240] sm:$0xf]  ;;  %v9322_v33 = vrot.slane %v9320_v13, 4  ;;  %v11575_v34 = vld [vmem:[%s12104_s6 + $0x248] sm:$0x1] }
 0x5ce   : > { %7914 = vst.msk [vmem:[#allocation2 + $0x58] sm:$0xf] %vm7891_vm14, %v7840_v60  ;;  %v9316_v60 = vshll.u32 %v11526_v51, 16  ;;  %v9310_v41 = vshll.u32 %v11525_v20, 16  ;;  %v9158_v51 = vshll.u32 %v11506_v10, 16 }
 0x5cf   : > { %8396 = vrot.lane.b32.xlu0 %v8225_v47, %s11966_s28  ;;  %v7846_v15 = vpop.permute.xlu1 %7845  ;;  %v9130_v47 = vrot.slane %v9128_v16, 4  ;;  %v11552_v10 = vld [vmem:[%s12104_s6 + $0x1ec] sm:$0xe] }
 0x5d0   : > { %7917 = vst.msk [vmem:[#allocation2 + $0x64] sm:$0xf] %vm7891_vm14, %v7846_v15  ;;  %v11483_v15 = vld [vmem:[%s12104_s6 + $0x240] sm:$0xf]  ;;  %v9312_v50 = vrot.slane %v9310_v41, 5 }
 0x5d1   : > { %v7844_v43 = vpop.permute.xlu0 %7843  ;;  %8402 = vrot.lane.b32.xlu1 %v8259_v21, %s11966_s28  ;;  %v9307_v21 = vshrl.u32 %v11525_v20, 16  ;;  %v9131_v11 = vor.u32 %v9130_v47, %v16169_v9 }
 0x5d2   : > { %7916 = vst.msk [vmem:[#allocation2 + $0x60] sm:$0xf] %vm7891_vm14, %v7844_v43  ;;  %v9121_v43 = vor.u32 %v9120_v56, %v9117_v48  ;;  %v11530_v48 = vld [vmem:[%s12104_s6 + $0x254] sm:$0x1] }
 0x5d3   : > { %8400 = vrot.lane.b32.xlu0 %v8249_v37, %s11966_s28  ;;  %v7850_v46 = vpop.permute.xlu1 %7849  ;;  %v11505_v37 = vld [vmem:[%s12104_s6 + $0x1f0] sm:$0xf]  ;;  %v9309_v49 = vrot.slane %v9307_v21, 4  ;;  %v9132_v39 = vrot.slane %v9131_v11, 4  ;;  %v9160_v21 = vrot.slane %v9158_v51, 5 }
 0x5d4   : > { %7919 = vst.msk [vmem:[#allocation2 + $0x6c] sm:$0xf] %vm7891_vm14, %v7850_v46  ;;  %v11470_v46 = vld [vmem:[%s12104_s6 + $0x1f0] sm:$0xf]  ;;  %v9148_v29 = vshll.u32 %v11505_v37, 16  ;;  %v9152_v32 = vshrl.u32 %v11505_v37, 16 }
 0x5d5   : > { %v7848_v40 = vpop.permute.xlu0 %7847  ;;  %8703 = vrot.lane.b32.xlu1 %v8601_v44, %s11967_s29  ;;  %v16183_v44 = vrot.slane %v9316_v60, 5  ;;  %v9122_v45 = vrot.slane %v9121_v43, 4  ;;  %v11550_v11 = vld [vmem:[%s12104_s6 + $0x1e4] sm:$0xf] }
 0x5d6   : > { %7918 = vst.msk [vmem:[#allocation2 + $0x68] sm:$0xf] %vm7891_vm14, %v7848_v40  ;;  %v11469_v40 = vld [vmem:[%s12104_s6 + $0x1ec] sm:$0xf]  ;;  %v16198_v24 = vrot.slane %v9148_v29, 5 }
 0x5d7   : > { %8701 = vrot.lane.b32.xlu0 %v8598_v7, %s11967_s29  ;;  %v7854_v19 = vpop.permute.xlu1 %7853  ;;  %v11527_v7 = vld [vmem:[%s12104_s6 + $0x248] sm:$0x1]  ;;  %v9127_v16 = vsel %vm12115_vm3, %v9122_v45, %v16169_v9  ;;  %v11574_v43 = vld [vmem:[%s12104_s6 + $0x244] sm:$0xf] }
 0x5d8   : > { %7921 = vst.msk [vmem:[#allocation2 + $0x74] sm:$0xf] %vm7891_vm14, %v7854_v19  ;;  %v9136_v19 = vrot.slane %v9134_v27, 5  ;;  %v9326_v31 = vshll.u32 %v11527_v7, 16  ;;  %v11551_v29 = vld [vmem:[%s12104_s6 + $0x1e8] sm:$0x1] }
 0x5d9   : > { %v7852_v62 = vpop.permute.xlu0 %7851  ;;  %8735 = vrot.lane.b32.xlu1 %v8657_v23, %s11967_s29  ;;  %v9142_v23 = vshll.u32 %v11504_v55, 16 }
 0x5da   : > { %7920 = vst.msk [vmem:[#allocation2 + $0x70] sm:$0xf] %vm7891_vm14, %v7852_v62  ;;  %v9323_v62 = vor.u32 %v9322_v33, %v16183_v44  ;;  %v9137_v14 = vsel %vm12115_vm3, %v9132_v39, %v9136_v19  ;;  %v9328_v6 = vrot.slane %v9326_v31, 5  ;;  %v9694_v39 = vrot.slane %v11551_v29, 5  ;;  %v11553_v19 = vld [vmem:[%s12104_s6 + $0x1f0] sm:$0xf] }
 0x5db   : > { %8733 = vrot.lane.b32.xlu0 %v8654_v17, %s11967_s29  ;;  %v7858_v57 = vpop.permute.xlu1 %7857  ;;  %v11528_v17 = vld [vmem:[%s12104_s6 + $0x24c] sm:$0xf] }
 0x5dc   : > { %7923 = vst.msk [vmem:[#allocation2 + $0x7c] sm:$0xf] %vm7891_vm14, %v7858_v57  ;;  %v9154_v57 = vrot.slane %v9152_v32, 4  ;;  %v9324_v26 = vrot.slane %v9323_v62, 4  ;;  %v11387_v62 = vld [vmem:[%s12104_s6 + $0x250] sm:$0xf] }
 0x5dd   : > { %v7856_v0 = vpop.permute.xlu0 %7855  ;;  %8707 = vrot.lane.b32.xlu1 %v8608_v3, %s11967_s29  ;;  %v9313_v3 = vor.u32 %v9312_v50, %v9309_v49  ;;  %v9691_v49 = vrot.slane %v11550_v11, 5 }
 0x5de   : > { %7922 = vst.msk [vmem:[#allocation2 + $0x78] sm:$0xf] %vm7891_vm14, %v7856_v0  ;;  %v9329_v60 = vsel %vm12115_vm3, %v9324_v26, %v9328_v6  ;;  %v11390_v26 = vld [vmem:[%s12104_s6 + $0x25c] sm:$0xf] }
 0x5df   : > { %8705 = vrot.lane.b32.xlu0 %v8605_v52, %s11967_s29  ;;  %v8359_v58 = vpop.permute.xlu1 %8358  ;;  %v9340_v52 = vshll.u32 %v11529_v5, 16 }
 0x5e0   : > { %8454 = vst.msk [vmem:[#allocation2 + $0x4] sm:$0xf] %vm8452_vm15, %v8359_v58  ;;  %v9331_v58 = vshrl.u32 %v11528_v17, 16 }
 0x5e1   : > { %v8357_v61 = vpop.permute.xlu0 %8356  ;;  %8739 = vrot.lane.b32.xlu1 %v8664_v1, %s11967_s29  ;;  %v9144_v1 = vrot.slane %v9142_v23, 5  ;;  %v16211_v20 = vrot.slane %v9340_v52, 5  ;;  %v11573_v23 = vld [vmem:[%s12104_s6 + $0x240] sm:$0xe]  ;;  %v11554_v52 = vld [vmem:[%s12104_s6 + $0x1f4] sm:$0x1] }
 0x5e2   : > { %8453 = vst.msk [vmem:[#allocation2] sm:$0xf] %vm8452_vm15, %v8357_v61  ;;  %v9333_v56 = vrot.slane %v9331_v58, 4  ;;  %v8274_v58 = vshrl.u32 %v11387_v62, 16 }
 0x5e3   : > { %8737 = vrot.lane.b32.xlu0 %v8661_v59, %s11967_s29  ;;  %v8363_v53 = vpop.permute.xlu1 %8362  ;;  %v9334_v59 = vshll.u32 %v11528_v17, 16  ;;  %v9145_v47 = vor.u32 %v9144_v1, %v9141_v54  ;;  %v16260_v54 = vld [vmem:[%s12104_s6 + $0x250] sm:$0xf]  ;;  %v8270_v1 = vshll.u32 %v11387_v62, 16 }
 0x5e4   : > { %8456 = vst.msk [vmem:[#allocation2 + $0xc] sm:$0xf] %vm8452_vm15, %v8363_v53  ;;  %v9346_v53 = vrot.slane %v9344_v8, 4  ;;  %v9698_v8 = vrot.slane %v11553_v19, 5 }
 0x5e5   : > { %v8361_v25 = vpop.permute.xlu0 %8360  ;;  %8899 = vrot.lane.b32.xlu1 %v11468_v18, %s11968_s30  ;;  %v9155_v18 = vor.u32 %v9154_v57, %v16198_v24  ;;  %v9336_v2 = vrot.slane %v9334_v59, 5  ;;  %v9146_v37 = vrot.slane %v9145_v47, 4  ;;  %v11386_v57 = vld [vmem:[%s12104_s6 + $0x24c] sm:$0xf]  ;;  %v9754_v47 = vrot.slane %v16260_v54, 5 }
 0x5e6   : > { %8455 = vst.msk [vmem:[#allocation2 + $0x8] sm:$0xf] %vm8452_vm15, %v8361_v25  ;;  %v9314_v25 = vrot.slane %v9313_v3, 4  ;;  %v9347_v41 = vor.u32 %v9346_v53, %v16211_v20  ;;  %v9700_v53 = vrot.slane %v9698_v8, 4  ;;  %v11412_v54 = vld [vmem:[%s12104_s6 + $0x1f4] sm:$0x1] }
 0x5e7   : > { %8897 = vrot.lane.b32.xlu0 %v11467_v12, %s11968_s30  ;;  %v8367_v22 = vpop.permute.xlu1 %8366  ;;  %v9156_v13 = vrot.slane %v9155_v18, 4 }
 0x5e8   : > { %8458 = vst.msk [vmem:[#allocation2 + $0x14] sm:$0xf] %vm8452_vm15, %v8367_v22 }
 0x5e9   : > { %v8365_v38 = vpop.permute.xlu0 %8364  ;;  %8931 = vrot.lane.b32.xlu1 %v11484_v36, %s11968_s30  ;;  %v9350_v36 = vshll.u32 %v11530_v48, 16  ;;  %v9161_v55 = vsel %vm12115_vm3, %v9156_v13, %v9160_v21  ;;  %v11578_v48 = vld [vmem:[%s12104_s6 + $0x254] sm:$0x1] }
 0x5ea   : > { %8457 = vst.msk [vmem:[#allocation2 + $0x10] sm:$0xf] %vm8452_vm15, %v8365_v38  ;;  %v9337_v38 = vor.u32 %v9336_v2, %v9333_v56  ;;  %v16276_v56 = vrot.slane %v8270_v1, 5  ;;  %v8276_v2 = vrot.slane %v8274_v58, 4  ;;  %v11388_v21 = vld [vmem:[%s12104_s6 + $0x254] sm:$0x1] }
 0x5eb   : > { %8929 = vrot.lane.b32.xlu0 %v11483_v15, %s11968_s30  ;;  %v8371_v42 = vpop.permute.xlu1 %8370  ;;  %v9319_v15 = vsel %vm12115_vm3, %v9314_v25, %v16183_v44  ;;  %v9348_v44 = vrot.slane %v9347_v41, 4  ;;  %v9352_v33 = vrot.slane %v9350_v36, 5  ;;  %v11594_v25 = vrot.slane %v11552_v10, 9  ;;  %v11435_v1 = vld [vmem:[%s12104_s6 + $0x250] sm:$0xf] }
 0x5ec   : > { %8460 = vst.msk [vmem:[#allocation2 + $0x1c] sm:$0xf] %vm8452_vm15, %v8371_v42  ;;  %v9338_v7 = vrot.slane %v9337_v38, 4  ;;  %v11549_v42 = vld [vmem:[%s12104_s6 + $0x1e0] sm:$0xe] }
 0x5ed   : > { %v8369_v35 = vpop.permute.xlu0 %8368  ;;  %8903 = vrot.lane.b32.xlu1 %v11470_v46, %s11968_s30  ;;  %v9151_v46 = vsel %vm12115_vm3, %v9146_v37, %v16198_v24  ;;  %v9353_v5 = vsel %vm12115_vm3, %v9348_v44, %v9352_v33  ;;  %v11593_v45 = vrot.slane %v11549_v42, 9  ;;  %v11601_v24 = vrot.slane %v11573_v23, 9  ;;  %v11576_v38 = vld [vmem:[%s12104_s6 + $0x24c] sm:$0xe] }
 0x5ee   : > { %8459 = vst.msk [vmem:[#allocation2 + $0x18] sm:$0xf] %vm8452_vm15, %v8369_v35  ;;  %v9693_v35 = vrot.slane %v9691_v49, 4  ;;  %v8277_v44 = vor.u32 %v8276_v2, %v16276_v56  ;;  %v8280_v33 = vshll.u32 %v11388_v21, 16  ;;  %v11415_v21 = vld [vmem:[%s12104_s6 + $0x200] sm:$0x1] }
 0x5ef   : > { %8901 = vrot.lane.b32.xlu0 %v11469_v40, %s11968_s30  ;;  %v8375_v0 = vpop.permute.xlu1 %8374  ;;  %v9747_v40 = vrot.slane %v11574_v43, 5  ;;  %v9756_v43 = vrot.slane %v9754_v47, 4 }
 0x5f0   : > { %8462 = vst.msk [vmem:[#allocation2 + $0x24] sm:$0xf] %vm8452_vm15, %v8375_v0  ;;  %v9695_v0 = vsel %vm12259_vm7, %v9693_v35, %v9694_v39  ;;  %v8282_v35 = vrot.slane %v8280_v33, 5 }
 0x5f1   : > { %v8373_v61 = vpop.permute.xlu0 %8372  ;;  %8935 = vrot.lane.b32.xlu1 %v11486_v30, %s11968_s30  ;;  %v9343_v30 = vsel %vm12115_vm3, %v9338_v7, %v16211_v20  ;;  %v9749_v3 = vrot.slane %v9747_v40, 4  ;;  %v9748_v51 = vsel %vm12259_vm7, %v11601_v24, %v9747_v40  ;;  %v11389_v20 = vld [vmem:[%s12104_s6 + $0x258] sm:$0xf]  ;;  %v11602_v7 = vrot.slane %v11576_v38, 9 }
 0x5f2   : > { %8461 = vst.msk [vmem:[#allocation2 + $0x20] sm:$0xf] %vm8452_vm15, %v8373_v61  ;;  %v9692_v61 = vsel %vm12259_vm7, %v11593_v45, %v9691_v49  ;;  %v8621_v38 = vrot.slane %v11415_v21, 5 }
 0x5f3   : > { %8933 = vrot.lane.b32.xlu0 %v11485_v4, %s11968_s30  ;;  %v8379_v12 = vpop.permute.xlu1 %8378  ;;  %v9750_v4 = vrot.slane %v11575_v34, 5 }
 0x5f4   : > { %8464 = vst.msk [vmem:[#allocation2 + $0x2c] sm:$0xf] %vm8452_vm15, %v8379_v12  ;;  %v9701_v12 = vrot.slane %v11554_v52, 5 }
 0x5f5   : > { %v8377_v9 = vpop.permute.xlu0 %8376  ;;  %9460 = vrot.lane.b32.xlu1 %v9137_v14, %s11969_s25  ;;  %v8261_v14 = vshrl.u32 %v11386_v57, 16  ;;  %v9751_v18 = vsel %vm12259_vm7, %v9749_v3, %v9750_v4 }
 0x5f6   : > { %8463 = vst.msk [vmem:[#allocation2 + $0x28] sm:$0xf] %vm8452_vm15, %v8377_v9  ;;  %v8294_v9 = vshll.u32 %v11390_v26, 16  ;;  %v9702_v11 = vsel %vm12259_vm7, %v9700_v53, %v9701_v12  ;;  %v11414_v53 = vld [vmem:[%s12104_s6 + $0x1fc] sm:$0xf] }
 0x5f7   : > { %9458 = vrot.lane.b32.xlu0 %v9127_v16, %s11969_s25  ;;  %v8391_v22 = vpop.permute.xlu1 %8390  ;;  %v8264_v16 = vshll.u32 %v11386_v57, 16  ;;  %v8263_v41 = vrot.slane %v8261_v14, 4  ;;  %v8618_v2 = vrot.slane %v11414_v53, 5 }
 0x5f8   : > { %8470 = vst.msk [vmem:[#allocation2 + $0x44] sm:$0xf] %vm8452_vm15, %v8391_v22  ;;  %v8285_v22 = vshrl.u32 %v11389_v20, 16  ;;  %v8296_v49 = vrot.slane %v8294_v9, 5 }
 0x5f9   : > { %v8389_v27 = vpop.permute.xlu0 %8388  ;;  %9492 = vrot.lane.b32.xlu1 %v9329_v60, %s11969_s25  ;;  %v8298_v60 = vshrl.u32 %v11390_v26, 16  ;;  %v8266_v36 = vrot.slane %v8264_v16, 5  ;;  %v8614_v16 = vrot.slane %v11412_v54, 5  ;;  %v8667_v26 = vrot.slane %v11435_v1, 5  ;;  %v11509_v1 = vld [vmem:[%s12104_s6 + $0x200] sm:$0x1] }
 0x5fa   : > { %8469 = vst.msk [vmem:[#allocation2 + $0x40] sm:$0xf] %vm8452_vm15, %v8389_v27  ;;  %v9699_v27 = vsel %vm12259_vm7, %v11594_v25, %v9698_v8  ;;  %v8287_v42 = vrot.slane %v8285_v22, 4  ;;  %v11434_v25 = vld [vmem:[%s12104_s6 + $0x24c] sm:$0xe]  ;;  %v9182_v53 = vshll.u32 %v11509_v1, 16 }
 0x5fb   : > { %9490 = vrot.lane.b32.xlu0 %v9319_v15, %s11969_s25  ;;  %v8395_v50 = vpop.permute.xlu1 %8394  ;;  %v8288_v15 = vshll.u32 %v11389_v20, 16  ;;  %v8267_v29 = vor.u32 %v8266_v36, %v8263_v41  ;;  %v11436_v20 = vld [vmem:[%s12104_s6 + $0x254] sm:$0x1]  ;;  %v11438_v41 = vld [vmem:[%s12104_s6 + $0x25c] sm:$0xf] }
 0x5fc   : > { %8472 = vst.msk [vmem:[#allocation2 + $0x4c] sm:$0xf] %vm8452_vm15, %v8395_v50  ;;  %v8300_v50 = vrot.slane %v8298_v60, 4  ;;  %v11413_v22 = vld [vmem:[%s12104_s6 + $0x1f8] sm:$0xe] }
 0x5fd   : > { %v8393_v32 = vpop.permute.xlu0 %8392  ;;  %9464 = vrot.lane.b32.xlu1 %v9161_v55, %s11969_s25  ;;  %v9757_v55 = vrot.slane %v11578_v48, 5  ;;  %v8290_v40 = vrot.slane %v8288_v15, 5  ;;  %v8268_v45 = vrot.slane %v8267_v29, 4  ;;  %v8669_v48 = vrot.slane %v8667_v26, 4 }
 0x5fe   : > { %8471 = vst.msk [vmem:[#allocation2 + $0x48] sm:$0xf] %vm8452_vm15, %v8393_v32  ;;  %v11391_v32 = vld [vmem:[%s12104_s6 + $0x260] sm:$0x1]  ;;  %v8301_v39 = vor.u32 %v8300_v50, %v8296_v49 }
 0x5ff   : > { %9462 = vrot.lane.b32.xlu0 %v9151_v46, %s11969_s25  ;;  %v8696_v17 = vpop.permute.xlu1 %8695  ;;  %v9758_v23 = vsel %vm12259_vm7, %v9756_v43, %v9757_v55  ;;  %v8304_v19 = vshll.u32 %v11391_v32, 16  ;;  %v8291_v62 = vor.u32 %v8290_v40, %v8287_v42  ;;  %v11451_v55 = vrot.slane %v11413_v22, 9 }
 0x600   : > { %8791 = vst.msk [vmem:[#allocation2 + $0x4] sm:$0xf] %vm8789_vm0, %v8696_v17  ;;  %v8302_v24 = vrot.slane %v8301_v39, 4 }
 0x601   : > { %v8694_v31 = vpop.permute.xlu0 %8693  ;;  %9496 = vrot.lane.b32.xlu1 %v9353_v5, %s11969_s25  ;;  %v8278_v5 = vrot.slane %v8277_v44, 4  ;;  %v8306_v57 = vrot.slane %v8304_v19, 5  ;;  %v8292_v10 = vrot.slane %v8291_v62, 4  ;;  %v11439_v44 = vld [vmem:[%s12104_s6 + $0x260] sm:$0x1]  ;;  %v8619_v32 = vsel %vm12259_vm7, %v11451_v55, %v8618_v2 }
 0x602   : > { %8790 = vst.msk [vmem:[#allocation2] sm:$0xf] %vm8789_vm0, %v8694_v31  ;;  %v11411_v31 = vld [vmem:[%s12104_s6 + $0x1f0] sm:$0xf]  ;;  %v11490_v55 = vld [vmem:[%s12104_s6 + $0x268] sm:$0xf] }
 0x603   : > { %9494 = vrot.lane.b32.xlu0 %v9343_v30, %s11969_s25  ;;  %v8728_v59 = vpop.permute.xlu1 %8727  ;;  %v9755_v30 = vsel %vm12259_vm7, %v11602_v7, %v9754_v47  ;;  %v8283_v4 = vsel %vm12115_vm3, %v8278_v5, %v8282_v35  ;;  %v8611_v52 = vrot.slane %v11411_v31, 5  ;;  %v8677_v7 = vrot.slane %v11439_v44, 5  ;;  %v11472_v31 = vld [vmem:[%s12104_s6 + $0x1fc] sm:$0xf]  ;;  %v11489_v44 = vld [vmem:[%s12104_s6 + $0x264] sm:$0xf] }
 0x604   : > { %8807 = vst.msk [vmem:[#allocation2 + $0x44] sm:$0xf] %vm8789_vm0, %v8728_v59  ;;  %v11410_v59 = vld [vmem:[%s12104_s6 + $0x1ec] sm:$0xe] }
 0x605   : > { %v8726_v6 = vpop.permute.xlu0 %8725  ;;  %9797 = vrot.lane.b32.xlu1 %v9695_v0, %s11970_s24  ;;  %v8273_v0 = vsel %vm12115_vm3, %v8268_v45, %v16276_v56  ;;  %v8613_v14 = vrot.slane %v8611_v52, 4  ;;  %v8670_v56 = vrot.slane %v11436_v20, 5 }
 0x606   : > { %8806 = vst.msk [vmem:[#allocation2 + $0x40] sm:$0xf] %vm8789_vm0, %v8726_v6 }
 0x607   : > { %9795 = vrot.lane.b32.xlu0 %v9692_v61, %s11970_s24  ;;  %v8700_v13 = vpop.permute.xlu1 %8699  ;;  %v8307_v61 = vsel %vm12115_vm3, %v8302_v24, %v8306_v57  ;;  %v8615_v47 = vsel %vm12259_vm7, %v8613_v14, %v8614_v16  ;;  %v8671_v15 = vsel %vm12259_vm7, %v8669_v48, %v8670_v56  ;;  %v11471_v57 = vld [vmem:[%s12104_s6 + $0x1f8] sm:$0xf]  ;;  %v11488_v16 = vld [vmem:[%s12104_s6 + $0x25c] sm:$0xf] }
 0x608   : > { %8793 = vst.msk [vmem:[#allocation2 + $0xc] sm:$0xf] %vm8789_vm0, %v8700_v13  ;;  %v11458_v13 = vrot.slane %v11434_v25, 9  ;;  %v11510_v25 = vld [vmem:[%s12104_s6 + $0x204] sm:$0xf] }
 0x609   : > { %v8698_v37 = vpop.permute.xlu0 %8697  ;;  %9829 = vrot.lane.b32.xlu1 %v9751_v18, %s11970_s24  ;;  %v8297_v18 = vsel %vm12115_vm3, %v8292_v10, %v8296_v49  ;;  %v11437_v49 = vld [vmem:[%s12104_s6 + $0x258] sm:$0xe]  ;;  %v9187_v22 = vshrl.u32 %v11510_v25, 16 }
 0x60a   : > { %8792 = vst.msk [vmem:[#allocation2 + $0x8] sm:$0xf] %vm8789_vm0, %v8698_v37  ;;  %v8620_v37 = vrot.slane %v8618_v2, 4  ;;  %v8668_v43 = vsel %vm12259_vm7, %v11458_v13, %v8667_v26  ;;  %v11459_v42 = vrot.slane %v11437_v49, 9 }
 0x60b   : > { %9827 = vrot.lane.b32.xlu0 %v9748_v51, %s11970_s24  ;;  %v8732_v46 = vpop.permute.xlu1 %8731  ;;  %v11450_v51 = vrot.slane %v11410_v59, 9 }
 0x60c   : > { %8809 = vst.msk [vmem:[#allocation2 + $0x4c] sm:$0xf] %vm8789_vm0, %v8732_v46  ;;  %v8622_v50 = vsel %vm12259_vm7, %v8620_v37, %v8621_v38  ;;  %v11535_v37 = vld [vmem:[%s12104_s6 + $0x268] sm:$0xf] }
 0x60d   : > { %v8730_v34 = vpop.permute.xlu0 %8729  ;;  %9801 = vrot.lane.b32.xlu1 %v9702_v11, %s11970_s24  ;;  %v8612_v60 = vsel %vm12259_vm7, %v11450_v51, %v8611_v52  ;;  %v8674_v11 = vrot.slane %v11438_v41, 5 }
 0x60e   : > { %8808 = vst.msk [vmem:[#allocation2 + $0x48] sm:$0xf] %vm8789_vm0, %v8730_v34  ;;  %v11508_v34 = vld [vmem:[%s12104_s6 + $0x1fc] sm:$0xf] }
 0x60f   : > { %9799 = vrot.lane.b32.xlu0 %v9699_v27, %s11970_s24  ;;  %v8892_v17 = vpop.permute.xlu1 %8891  ;;  %v8676_v46 = vrot.slane %v8674_v11, 4  ;;  %v8675_v39 = vsel %vm12259_vm7, %v11459_v42, %v8674_v11  ;;  %v9388_v42 = vshll.u32 %v11535_v37, 16 }
 0x610   : > { %8987 = vst.msk [vmem:[#allocation2 + $0x4] sm:$0xf] %vm8985_vm1, %v8892_v17  ;;  %v9172_v17 = vshll.u32 %v11508_v34, 16 }
 0x611   : > { %v8890_v3 = vpop.permute.xlu0 %8889  ;;  %9833 = vrot.lane.b32.xlu1 %v9758_v23, %s11970_s24  ;;  %v11507_v23 = vld [vmem:[%s12104_s6 + $0x1f8] sm:$0xf]  ;;  %v8678_v5 = vsel %vm12259_vm7, %v8676_v46, %v8677_v7  ;;  %v11512_v7 = vld [vmem:[%s12104_s6 + $0x20c] sm:$0x1] }
 0x612   : > { %8986 = vst.msk [vmem:[#allocation2] sm:$0xf] %vm8985_vm1, %v8890_v3  ;;  %v9163_v45 = vshrl.u32 %v11507_v23, 16  ;;  %v9166_v62 = vshll.u32 %v11507_v23, 16  ;;  %v11532_v3 = vld [vmem:[%s12104_s6 + $0x25c] sm:$0xf] }
 0x613   : > { %9831 = vrot.lane.b32.xlu0 %v9755_v30, %s11970_s24  ;;  %v8924_v8 = vpop.permute.xlu1 %8923  ;;  %v9176_v30 = vshrl.u32 %v11508_v34, 16  ;;  %v9368_v59 = vshrl.u32 %v11532_v3, 16  ;;  %v9189_v23 = vrot.slane %v9187_v22, 4 }
 0x614   : > { %9003 = vst.msk [vmem:[#allocation2 + $0x44] sm:$0xf] %vm8985_vm1, %v8924_v8  ;;  %v16370_v8 = vrot.slane %v9172_v17, 5  ;;  %v9165_v10 = vrot.slane %v9163_v45, 4  ;;  %v9168_v54 = vrot.slane %v9166_v62, 5 }
 0x615   : > { %v8922_v58 = vpop.permute.xlu0 %8921  ;;  %8406 = vrot.lane.b32.xlu1 %v8283_v4, %s11966_s28  ;;  %v11531_v4 = vld [vmem:[%s12104_s6 + $0x258] sm:$0xf]  ;;  %v9370_v48 = vrot.slane %v9368_v59, 4 }
 0x616   : > { %9002 = vst.msk [vmem:[#allocation2 + $0x40] sm:$0xf] %vm8985_vm1, %v8922_v58  ;;  %v9364_v58 = vshll.u32 %v11532_v3, 16  ;;  %v9358_v14 = vshll.u32 %v11531_v4, 16 }
 0x617   : > { %8404 = vrot.lane.b32.xlu0 %v8273_v0, %s11966_s28  ;;  %v8896_v6 = vpop.permute.xlu1 %8895  ;;  %v9178_v0 = vrot.slane %v9176_v30, 4 }
 0x618   : > { %8989 = vst.msk [vmem:[#allocation2 + $0xc] sm:$0xf] %vm8985_vm1, %v8896_v6  ;;  %v11487_v6 = vld [vmem:[%s12104_s6 + $0x258] sm:$0xf]  ;;  %v9360_v2 = vrot.slane %v9358_v14, 5 }
 0x619   : > { %v8894_v12 = vpop.permute.xlu0 %8893  ;;  %8410 = vrot.lane.b32.xlu1 %v8307_v61, %s11966_s28  ;;  %v9355_v61 = vshrl.u32 %v11531_v4, 16  ;;  %v9179_v20 = vor.u32 %v9178_v0, %v16370_v8 }
 0x61a   : > { %8988 = vst.msk [vmem:[#allocation2 + $0x8] sm:$0xf] %vm8985_vm1, %v8894_v12  ;;  %v9169_v12 = vor.u32 %v9168_v54, %v9165_v10  ;;  %v11536_v54 = vld [vmem:[%s12104_s6 + $0x26c] sm:$0x1] }
 0x61b   : > { %8408 = vrot.lane.b32.xlu0 %v8297_v18, %s11966_s28  ;;  %v8928_v9 = vpop.permute.xlu1 %8927  ;;  %v11511_v18 = vld [vmem:[%s12104_s6 + $0x208] sm:$0xf]  ;;  %v9357_v56 = vrot.slane %v9355_v61, 4  ;;  %v9180_v11 = vrot.slane %v9179_v20, 4 }
 0x61c   : > { %9005 = vst.msk [vmem:[#allocation2 + $0x4c] sm:$0xf] %vm8985_vm1, %v8928_v9  ;;  %v11474_v9 = vld [vmem:[%s12104_s6 + $0x208] sm:$0xf]  ;;  %v9196_v13 = vshll.u32 %v11511_v18, 16  ;;  %v9200_v21 = vshrl.u32 %v11511_v18, 16 }
 0x61d   : > { %v8926_v36 = vpop.permute.xlu0 %8925  ;;  %8711 = vrot.lane.b32.xlu1 %v8615_v47, %s11967_s29  ;;  %v16384_v47 = vrot.slane %v9364_v58, 5  ;;  %v9361_v46 = vor.u32 %v9360_v2, %v9357_v56 }
 0x61e   : > { %9004 = vst.msk [vmem:[#allocation2 + $0x48] sm:$0xf] %vm8985_vm1, %v8926_v36  ;;  %v11473_v36 = vld [vmem:[%s12104_s6 + $0x204] sm:$0xf] }
 0x61f   : > { %8709 = vrot.lane.b32.xlu0 %v8612_v60, %s11967_s29  ;;  %v9453_v27 = vpop.permute.xlu1 %9452  ;;  %v11533_v60 = vld [vmem:[%s12104_s6 + $0x260] sm:$0x1]  ;;  %v9371_v49 = vor.u32 %v9370_v48, %v16384_v47  ;;  %v9362_v3 = vrot.slane %v9361_v46, 4 }
 0x620   : > { %9548 = vst.msk [vmem:[#allocation2 + $0x4] sm:$0xf] %vm9546_vm2, %v9453_v27  ;;  %v9184_v27 = vrot.slane %v9182_v53, 5 }
 0x621   : > { %v9451_v33 = vpop.permute.xlu0 %9450  ;;  %8743 = vrot.lane.b32.xlu1 %v8671_v15, %s11967_s29  ;;  %v9190_v15 = vshll.u32 %v11510_v25, 16  ;;  %v9372_v45 = vrot.slane %v9371_v49, 4  ;;  %v16451_v49 = vld [vmem:[%s12104_s6 + $0x208] sm:$0xf] }
 0x622   : > { %9547 = vst.msk [vmem:[#allocation2] sm:$0xf] %vm9546_vm2, %v9451_v33  ;;  %v9170_v33 = vrot.slane %v9169_v12, 4  ;;  %v9185_v30 = vsel %vm12115_vm3, %v9180_v11, %v9184_v27  ;;  %v11556_v12 = vld [vmem:[%s12104_s6 + $0x1fc] sm:$0xf] }
 0x623   : > { %8741 = vrot.lane.b32.xlu0 %v8668_v43, %s11967_s29  ;;  %v9485_v29 = vpop.permute.xlu1 %9484  ;;  %v11534_v43 = vld [vmem:[%s12104_s6 + $0x264] sm:$0xf]  ;;  %v11369_v11 = vld [vmem:[%s12104_s6 + $0x208] sm:$0xf] }
 0x624   : > { %9564 = vst.msk [vmem:[#allocation2 + $0x44] sm:$0xf] %vm9546_vm2, %v9485_v29  ;;  %v16400_v29 = vrot.slane %v9196_v13, 5  ;;  %v9175_v0 = vsel %vm12115_vm3, %v9170_v33, %v16370_v8  ;;  %v11368_v27 = vld [vmem:[%s12104_s6 + $0x204] sm:$0xf] }
 0x625   : > { %v9483_v40 = vpop.permute.xlu0 %9482  ;;  %8715 = vrot.lane.b32.xlu1 %v8622_v50, %s11967_s29  ;;  %v9374_v50 = vshll.u32 %v11533_v60, 16  ;;  %v16433_v60 = vld [vmem:[%s12104_s6 + $0x25c] sm:$0xf]  ;;  %v11581_v33 = vld [vmem:[%s12104_s6 + $0x260] sm:$0x1] }
 0x626   : > { %9563 = vst.msk [vmem:[#allocation2 + $0x40] sm:$0xf] %vm9546_vm2, %v9483_v40  ;;  %v9392_v40 = vshrl.u32 %v11535_v37, 16  ;;  %v11555_v37 = vld [vmem:[%s12104_s6 + $0x1f8] sm:$0xe] }
 0x627   : > { %8713 = vrot.lane.b32.xlu0 %v8619_v32, %s11967_s29  ;;  %v9457_v35 = vpop.permute.xlu1 %9456  ;;  %v9202_v32 = vrot.slane %v9200_v21, 4  ;;  %v9376_v62 = vrot.slane %v9374_v50, 5 }
 0x628   : > { %9550 = vst.msk [vmem:[#allocation2 + $0xc] sm:$0xf] %vm9546_vm2, %v9457_v35  ;;  %v9379_v35 = vshrl.u32 %v11534_v43, 16 }
 0x629   : > { %v9455_v19 = vpop.permute.xlu0 %9454  ;;  %8747 = vrot.lane.b32.xlu1 %v8678_v5, %s11967_s29  ;;  %v9192_v5 = vrot.slane %v9190_v15, 5  ;;  %v9203_v4 = vor.u32 %v9202_v32, %v16400_v29  ;;  %v9377_v14 = vsel %vm12115_vm3, %v9372_v45, %v9376_v62  ;;  %v11393_v45 = vld [vmem:[%s12104_s6 + $0x268] sm:$0xf]  ;;  %v11392_v62 = vld [vmem:[%s12104_s6 + $0x264] sm:$0xf] }
 0x62a   : > { %9549 = vst.msk [vmem:[#allocation2 + $0x8] sm:$0xf] %vm9546_vm2, %v9455_v19  ;;  %v9381_v1 = vrot.slane %v9379_v35, 4 }
 0x62b   : > { %8745 = vrot.lane.b32.xlu0 %v8675_v39, %s11967_s29  ;;  %v9489_v24 = vpop.permute.xlu1 %9488  ;;  %v9382_v39 = vshll.u32 %v11534_v43, 16  ;;  %v9193_v10 = vor.u32 %v9192_v5, %v9189_v23  ;;  %v9204_v8 = vrot.slane %v9203_v4, 4  ;;  %v8117_v23 = vshrl.u32 %v11368_v27, 16 }
 0x62c   : > { %9566 = vst.msk [vmem:[#allocation2 + $0x4c] sm:$0xf] %vm9546_vm2, %v9489_v24  ;;  %v16409_v24 = vrot.slane %v9388_v42, 5  ;;  %v16459_v42 = vld [vmem:[%s12104_s6 + $0x268] sm:$0xf]  ;;  %v8120_v5 = vshll.u32 %v11368_v27, 16 }
 0x62d   : > { %v9487_v52 = vpop.permute.xlu0 %9486  ;;  %8907 = vrot.lane.b32.xlu1 %v11472_v31, %s11968_s30  ;;  %v9206_v31 = vshll.u32 %v11512_v7, 16  ;;  %v9384_v58 = vrot.slane %v9382_v39, 5  ;;  %v9194_v20 = vrot.slane %v9193_v10, 4  ;;  %v11595_v7 = vrot.slane %v11555_v37, 9  ;;  %v11582_v10 = vld [vmem:[%s12104_s6 + $0x264] sm:$0xe] }
 0x62e   : > { %9565 = vst.msk [vmem:[#allocation2 + $0x48] sm:$0xf] %vm9546_vm2, %v9487_v52  ;;  %v9764_v39 = vrot.slane %v11581_v33, 5 }
 0x62f   : > { %8905 = vrot.lane.b32.xlu0 %v11471_v57, %s11968_s30  ;;  %v9790_v26 = vpop.permute.xlu1 %9789  ;;  %v9394_v57 = vrot.slane %v9392_v40, 4  ;;  %v9385_v53 = vor.u32 %v9384_v58, %v9381_v1  ;;  %v9199_v21 = vsel %vm12115_vm3, %v9194_v20, %v16400_v29  ;;  %v11579_v29 = vld [vmem:[%s12104_s6 + $0x258] sm:$0xe]  ;;  %v8126_v40 = vshll.u32 %v11369_v11, 16 }
 0x630   : > { %9885 = vst.msk [vmem:[#allocation2 + $0x4] sm:$0xf] %vm9883_vm4, %v9790_v26  ;;  %v11603_v4 = vrot.slane %v11579_v29, 9  ;;  %v8119_v58 = vrot.slane %v8117_v23, 4 }
 0x631   : > { %v9788_v51 = vpop.permute.xlu0 %9787  ;;  %8939 = vrot.lane.b32.xlu1 %v11488_v16, %s11968_s30  ;;  %v9208_v16 = vrot.slane %v9206_v31, 5  ;;  %v9395_v26 = vor.u32 %v9394_v57, %v16409_v24  ;;  %v11584_v57 = vld [vmem:[%s12104_s6 + $0x26c] sm:$0x1] }
 0x632   : > { %9884 = vst.msk [vmem:[#allocation2] sm:$0xf] %vm9883_vm4, %v9788_v51  ;;  %v9367_v51 = vsel %vm12115_vm3, %v9362_v3, %v16384_v47 }
 0x633   : > { %8937 = vrot.lane.b32.xlu0 %v11487_v6, %s11968_s30  ;;  %v9822_v41 = vpop.permute.xlu1 %9821  ;;  %v9398_v6 = vshll.u32 %v11536_v54, 16  ;;  %v9209_v56 = vsel %vm12115_vm3, %v9204_v8, %v9208_v16  ;;  %v9396_v47 = vrot.slane %v9395_v26, 4  ;;  %v16477_v54 = vrot.slane %v8126_v40, 5 }
 0x634   : > { %9901 = vst.msk [vmem:[#allocation2 + $0x44] sm:$0xf] %vm9883_vm4, %v9822_v41  ;;  %v9386_v41 = vrot.slane %v9385_v53, 4  ;;  %v8322_v8 = vshrl.u32 %v11393_v45, 16  ;;  %v8309_v16 = vshrl.u32 %v11392_v62, 16  ;;  %v8312_v26 = vshll.u32 %v11392_v62, 16 }
 0x635   : > { %v9820_v38 = vpop.permute.xlu0 %9819  ;;  %8911 = vrot.lane.b32.xlu1 %v11474_v9, %s11968_s30  ;;  %v9400_v2 = vrot.slane %v9398_v6, 5  ;;  %v9705_v9 = vrot.slane %v11556_v12, 5 }
 0x636   : > { %9900 = vst.msk [vmem:[#allocation2 + $0x40] sm:$0xf] %vm9883_vm4, %v9820_v38  ;;  %v9761_v38 = vrot.slane %v16433_v60, 5  ;;  %v9391_v46 = vsel %vm12115_vm3, %v9386_v41, %v16409_v24  ;;  %v11558_v24 = vld [vmem:[%s12104_s6 + $0x204] sm:$0xe] }
 0x637   : > { %8909 = vrot.lane.b32.xlu0 %v11473_v36, %s11968_s30  ;;  %v9794_v34 = vpop.permute.xlu1 %9793  ;;  %v11557_v36 = vld [vmem:[%s12104_s6 + $0x200] sm:$0x1]  ;;  %v9401_v43 = vsel %vm12115_vm3, %v9396_v47, %v9400_v2  ;;  %v9706_v3 = vsel %vm12259_vm7, %v11595_v7, %v9705_v9  ;;  %v11596_v12 = vrot.slane %v11558_v24, 9  ;;  %v11604_v2 = vrot.slane %v11582_v10, 9 }
 0x638   : > { %9887 = vst.msk [vmem:[#allocation2 + $0xc] sm:$0xf] %vm9883_vm4, %v9794_v34  ;;  %v8130_v34 = vshrl.u32 %v11369_v11, 16  ;;  %v9763_v35 = vrot.slane %v9761_v38, 4  ;;  %v9762_v53 = vsel %vm12259_vm7, %v11603_v4, %v9761_v38  ;;  %v11394_v38 = vld [vmem:[%s12104_s6 + $0x26c] sm:$0x1] }
 0x639   : > { %v9792_v19 = vpop.permute.xlu0 %9791  ;;  %v11833_v17 = vld [vmem:[#allocation2] sm:$0xff]   ;;  %8943 = vrot.lane.b32.xlu1 %v11490_v55, %s11968_s30  ;;  %v9707_v55 = vrot.slane %v9705_v9, 4  ;;  %v8328_v23 = vshll.u32 %v11394_v38, 16  ;;  %v11418_v38 = vld [vmem:[%s12104_s6 + $0x20c] sm:$0x1] }
 0x63a   : > { %9886 = vst.msk [vmem:[#allocation2 + $0x8] sm:$0xf] %vm9883_vm4, %v9792_v19  ;;  %11678 = vmatprep.mubr.bf16.mxu0 %v11833_v17  ;;  %v9712_v19 = vrot.slane %v16451_v49, 5  ;;  %v8132_v1 = vrot.slane %v8130_v34, 4  ;;  %v9765_v6 = vsel %vm12259_vm7, %v9763_v35, %v9764_v39  ;;  %v11396_v49 = vld [vmem:[%s12104_s6 + $0x274] sm:$0xf] }
 0x63b   : > { %8941 = vrot.lane.b32.xlu0 %v11489_v44, %s11968_s30  ;;  %v9826_v52 = vpop.permute.xlu1 %9825  ;;  %v9708_v44 = vrot.slane %v11557_v36, 5  ;;  %v8324_v36 = vrot.slane %v8322_v8, 4  ;;  %v8330_v10 = vrot.slane %v8328_v23, 5 }
 0x63c   : > { %9903 = vst.msk [vmem:[#allocation2 + $0x4c] sm:$0xf] %vm9883_vm4, %v9826_v52  ;;  %v9768_v52 = vrot.slane %v16459_v42, 5  ;;  %v8133_v9 = vor.u32 %v8132_v1, %v16477_v54  ;;  %v11395_v42 = vld [vmem:[%s12104_s6 + $0x270] sm:$0xf] }
 0x63d   : > { %v9824_v59 = vpop.permute.xlu0 %9823  ;;  %v11835_v61 = vld [vmem:[#allocation2 + $0x40] sm:$0xff]   ;;  %9468 = vrot.lane.b32.xlu1 %v9185_v30, %s11969_s25  ;;  %v9709_v17 = vsel %vm12259_vm7, %v9707_v55, %v9708_v44  ;;  %v11560_v30 = vld [vmem:[%s12104_s6 + $0x20c] sm:$0x1]  ;;  %v9713_v55 = vsel %vm12259_vm7, %v11596_v12, %v9712_v19  ;;  %v8336_v4 = vshll.u32 %v11395_v42, 16 }
 0x63e   : > { %9902 = vst.msk [vmem:[#allocation2 + $0x48] sm:$0xf] %vm9883_vm4, %v9824_v59  ;;  %11694 = vmatprep.mubr.bf16.mxu1 %v11835_v61  ;;  %v8122_v59 = vrot.slane %v8120_v5, 5  ;;  %v11370_v61 = vld [vmem:[%s12104_s6 + $0x20c] sm:$0x1]  ;;  %v9769_v7 = vsel %vm12259_vm7, %v11604_v2, %v9768_v52  ;;  %v8134_v29 = vrot.slane %v8133_v9, 4 }
 0x63f   : > { %9466 = vrot.lane.b32.xlu0 %v9175_v0, %s11969_s25  ;;  %v8399_v18 = vpop.permute.xlu1 %8398  ;;  %v8136_v60 = vshll.u32 %v11370_v61, 16  ;;  %v11417_v9 = vld [vmem:[%s12104_s6 + $0x208] sm:$0xf] }
 0x640   : > { %8474 = vst.msk [vmem:[#allocation2 + $0x54] sm:$0xf] %vm8452_vm15, %v8399_v18  ;;  %v9714_v18 = vrot.slane %v9712_v19, 4  ;;  %v8342_v19 = vshll.u32 %v11396_v49, 16 }
 0x641   : > { %v8397_v25 = vpop.permute.xlu0 %8396  ;;  %v11836_v48 = vld [vmem:[#allocation2 + $0x8] sm:$0xff]   ;;  %9500 = vrot.lane.b32.xlu1 %v9377_v14, %s11969_s25  ;;  %v8318_v14 = vshll.u32 %v11393_v45, 16  ;;  %v11373_v45 = vld [vmem:[%s12104_s6 + $0x218] sm:$0x1] }
 0x642   : > { %8473 = vst.msk [vmem:[#allocation2 + $0x50] sm:$0xf] %vm8452_vm15, %v8397_v25  ;;  %11679 = vmatmul.mubr.bf16.vlgmr.msra.gmra.mxu0 %v11836_v48  ;;  %v9770_v25 = vrot.slane %v9768_v52, 4  ;;  %v9771_v48 = vrot.slane %v11584_v57, 5 }
 0x643   : > { %9498 = vrot.lane.b32.xlu0 %v9367_v51, %s11969_s25  ;;  %v8403_v13 = vpop.permute.xlu1 %8402  ;;  %v9715_v51 = vrot.slane %v11560_v30, 5  ;;  %v16493_v41 = vrot.slane %v8318_v14, 5 }
 0x644   : > { %8476 = vst.msk [vmem:[#allocation2 + $0x5c] sm:$0xf] %vm8452_vm15, %v8403_v13  ;;  %v8123_v13 = vor.u32 %v8122_v59, %v8119_v58  ;;  %v8160_v58 = vshll.u32 %v11373_v45, 16  ;;  %v8344_v59 = vrot.slane %v8342_v19, 5  ;;  %v11444_v45 = vld [vmem:[%s12104_s6 + $0x274] sm:$0xf] }
 0x645   : > { %v8401_v22 = vpop.permute.xlu0 %8400  ;;  %v11837_v15 = vld [vmem:[#allocation2 + $0x48] sm:$0xff]   ;;  %9472 = vrot.lane.b32.xlu1 %v9209_v56, %s11969_s25  ;;  %v11372_v56 = vld [vmem:[%s12104_s6 + $0x214] sm:$0xf]  ;;  %v9716_v37 = vsel %vm12259_vm7, %v9714_v18, %v9715_v51  ;;  %v8325_v34 = vor.u32 %v8324_v36, %v16493_v41  ;;  %v8338_v18 = vrot.slane %v8336_v4, 5  ;;  %v8625_v36 = vrot.slane %v11417_v9, 5 }
 0x646   : > { %8475 = vst.msk [vmem:[#allocation2 + $0x58] sm:$0xf] %vm8452_vm15, %v8401_v22  ;;  %11695 = vmatmul.mubr.bf16.vlgmr.msra.gmra.mxu1 %v11837_v15  ;;  %v8311_v22 = vrot.slane %v8309_v16, 4  ;;  %v8314_v15 = vrot.slane %v8312_v26, 5  ;;  %v8150_v11 = vshll.u32 %v11372_v56, 16  ;;  %v8154_v27 = vshrl.u32 %v11372_v56, 16 }
 0x647   : > { %9470 = vrot.lane.b32.xlu0 %v9199_v21, %s11969_s25  ;;  %v8704_v50 = vpop.permute.xlu1 %8703  ;;  %v11371_v21 = vld [vmem:[%s12104_s6 + $0x210] sm:$0xf]  ;;  %v8124_v40 = vrot.slane %v8123_v13, 4  ;;  %v11397_v26 = vld [vmem:[%s12104_s6 + $0x278] sm:$0x1] }
 0x648   : > { %8795 = vst.msk [vmem:[#allocation2 + $0x14] sm:$0xf] %vm8789_vm0, %v8704_v50  ;;  %v8141_v44 = vshrl.u32 %v11371_v21, 16  ;;  %v8144_v33 = vshll.u32 %v11371_v21, 16  ;;  %v8315_v5 = vor.u32 %v8314_v15, %v8311_v22  ;;  %v16512_v35 = vrot.slane %v8150_v11, 5 }
 0x649   : > { %v8702_v32 = vpop.permute.xlu0 %8701  ;;  %9504 = vrot.lane.b32.xlu1 %v9401_v43, %s11969_s25  ;;  %v8156_v39 = vrot.slane %v8154_v27, 4  ;;  %v8129_v52 = vsel %vm12115_vm3, %v8124_v40, %v16477_v54  ;;  %v11441_v11 = vld [vmem:[%s12104_s6 + $0x268] sm:$0xf]  ;;  %v11440_v40 = vld [vmem:[%s12104_s6 + $0x264] sm:$0xe] }
 0x64a   : > { %8794 = vst.msk [vmem:[#allocation2 + $0x10] sm:$0xf] %vm8789_vm0, %v8702_v32  ;;  %v8138_v32 = vrot.slane %v8136_v60, 5  ;;  %v8143_v62 = vrot.slane %v8141_v44, 4  ;;  %v8316_v8 = vrot.slane %v8315_v5, 4  ;;  %v8627_v44 = vrot.slane %v8625_v36, 4 }
 0x64b   : > { %9502 = vrot.lane.b32.xlu0 %v9391_v46, %s11969_s25  ;;  %v8736_v31 = vpop.permute.xlu1 %8735  ;;  %v9772_v46 = vsel %vm12259_vm7, %v9770_v25, %v9771_v48  ;;  %v8157_v1 = vor.u32 %v8156_v39, %v16512_v35  ;;  %v8352_v25 = vshll.u32 %v11397_v26, 16  ;;  %v11476_v9 = vld [vmem:[%s12104_s6 + $0x214] sm:$0xf] }
 0x64c   : > { %8811 = vst.msk [vmem:[#allocation2 + $0x54] sm:$0xf] %vm8789_vm0, %v8736_v31  ;;  %v8146_v31 = vrot.slane %v8144_v33, 5  ;;  %v8139_v57 = vsel %vm12115_vm3, %v8134_v29, %v8138_v32  ;;  %v8321_v56 = vsel %vm12115_vm3, %v8316_v8, %v16493_v41  ;;  %v8628_v33 = vrot.slane %v11418_v38, 5  ;;  %v11442_v29 = vld [vmem:[%s12104_s6 + $0x26c] sm:$0x1] }
 0x64d   : > { %v8734_v0 = vpop.permute.xlu0 %8733  ;;  %9805 = vrot.lane.b32.xlu1 %v9709_v17, %s11970_s24  ;;  %v8346_v17 = vshrl.u32 %v11396_v49, 16  ;;  %v8354_v41 = vrot.slane %v8352_v25, 5  ;;  %v8681_v49 = vrot.slane %v11441_v11, 5  ;;  %v11420_v32 = vld [vmem:[%s12104_s6 + $0x214] sm:$0xf]  ;;  %v8684_v5 = vrot.slane %v11442_v29, 5 }
 0x64e   : > { %8810 = vst.msk [vmem:[#allocation2 + $0x50] sm:$0xf] %vm8789_vm0, %v8734_v0  ;;  %v8326_v0 = vrot.slane %v8325_v34, 4  ;;  %v8147_v16 = vor.u32 %v8146_v31, %v8143_v62  ;;  %v8629_v34 = vsel %vm12259_vm7, %v8627_v44, %v8628_v33  ;;  %v11419_v31 = vld [vmem:[%s12104_s6 + $0x210] sm:$0xe] }
 0x64f   : > { %9803 = vrot.lane.b32.xlu0 %v9706_v3, %s11970_s24  ;;  %v8708_v20 = vpop.permute.xlu1 %8707  ;;  %v8333_v3 = vshrl.u32 %v11395_v42, 16  ;;  %v8348_v61 = vrot.slane %v8346_v17, 4  ;;  %v8683_v23 = vrot.slane %v8681_v49, 4  ;;  %v11460_v17 = vrot.slane %v11440_v40, 9  ;;  %v11515_v11 = vld [vmem:[%s12104_s6 + $0x218] sm:$0x1] }
 0x650   : > { %8797 = vst.msk [vmem:[#allocation2 + $0x1c] sm:$0xf] %vm8789_vm0, %v8708_v20  ;;  %v8331_v54 = vsel %vm12115_vm3, %v8326_v0, %v8330_v10  ;;  %v8158_v20 = vrot.slane %v8157_v1, 4  ;;  %v11453_v10 = vrot.slane %v11419_v31, 9  ;;  %v11445_v1 = vld [vmem:[%s12104_s6 + $0x278] sm:$0x1] }
 0x651   : > { %v8706_v47 = vpop.permute.xlu0 %8705  ;;  %9837 = vrot.lane.b32.xlu1 %v9765_v6, %s11970_s24  ;;  %v8335_v6 = vrot.slane %v8333_v3, 4  ;;  %v8349_v12 = vor.u32 %v8348_v61, %v8344_v59  ;;  %v8685_v3 = vsel %vm12259_vm7, %v8683_v23, %v8684_v5  ;;  %v8682_v0 = vsel %vm12259_vm7, %v11460_v17, %v8681_v49  ;;  %v11492_v33 = vld [vmem:[%s12104_s6 + $0x274] sm:$0xf]  ;;  %v11516_v23 = vld [vmem:[%s12104_s6 + $0x21c] sm:$0xf] }
 0x652   : > { %8796 = vst.msk [vmem:[#allocation2 + $0x18] sm:$0xf] %vm8789_vm0, %v8706_v47  ;;  %v8148_v47 = vrot.slane %v8147_v16, 4  ;;  %v8691_v8 = vrot.slane %v11445_v1, 5  ;;  %v9230_v40 = vshll.u32 %v11515_v11, 16 }
 0x653   : > { %9835 = vrot.lane.b32.xlu0 %v9762_v53, %s11970_s24  ;;  %v8740_v43 = vpop.permute.xlu1 %8739  ;;  %v8162_v53 = vrot.slane %v8160_v58, 5  ;;  %v8339_v2 = vor.u32 %v8338_v18, %v8335_v6  ;;  %v8350_v21 = vrot.slane %v8349_v12, 4  ;;  %v11514_v18 = vld [vmem:[%s12104_s6 + $0x214] sm:$0xf]  ;;  %v11477_v5 = vld [vmem:[%s12104_s6 + $0x21c] sm:$0xf] }
 0x654   : > { %8813 = vst.msk [vmem:[#allocation2 + $0x5c] sm:$0xf] %vm8789_vm0, %v8740_v43  ;;  %v8153_v15 = vsel %vm12115_vm3, %v8148_v47, %v16512_v35  ;;  %v11416_v43 = vld [vmem:[%s12104_s6 + $0x204] sm:$0xe]  ;;  %v8632_v35 = vrot.slane %v11420_v32, 5  ;;  %v9224_v12 = vshrl.u32 %v11514_v18, 16 }
 0x655   : > { %v8738_v50 = vpop.permute.xlu0 %8737  ;;  %9809 = vrot.lane.b32.xlu1 %v9716_v37, %s11970_s24  ;;  %v8163_v13 = vsel %vm12115_vm3, %v8158_v20, %v8162_v53  ;;  %v8340_v37 = vrot.slane %v8339_v2, 4  ;;  %v9220_v53 = vshll.u32 %v11514_v18, 16  ;;  %v11540_v1 = vld [vmem:[%s12104_s6 + $0x27c] sm:$0xf] }
 0x656   : > { %8812 = vst.msk [vmem:[#allocation2 + $0x58] sm:$0xf] %vm8789_vm0, %v8738_v50  ;;  %v8634_v4 = vrot.slane %v8632_v35, 4  ;;  %v8633_v26 = vsel %vm12259_vm7, %v11453_v10, %v8632_v35  ;;  %v9232_v10 = vrot.slane %v9230_v40, 5 }
 0x657   : > { %9807 = vrot.lane.b32.xlu0 %v9713_v55, %s11970_s24  ;;  %v8900_v30 = vpop.permute.xlu1 %8899  ;;  %v8355_v55 = vsel %vm12115_vm3, %v8350_v21, %v8354_v41  ;;  %v11538_v21 = vld [vmem:[%s12104_s6 + $0x274] sm:$0xf]  ;;  %v11537_v41 = vld [vmem:[%s12104_s6 + $0x270] sm:$0xf] }
 0x658   : > { %8991 = vst.msk [vmem:[#allocation2 + $0x14] sm:$0xf] %vm8985_vm1, %v8900_v30  ;;  %v11421_v30 = vld [vmem:[%s12104_s6 + $0x218] sm:$0x1]  ;;  %v9406_v44 = vshll.u32 %v11537_v41, 16 }
 0x659   : > { %v8898_v24 = vpop.permute.xlu0 %8897  ;;  %9841 = vrot.lane.b32.xlu1 %v9772_v46, %s11970_s24  ;;  %v8345_v46 = vsel %vm12115_vm3, %v8340_v37, %v8344_v59  ;;  %v11443_v59 = vld [vmem:[%s12104_s6 + $0x270] sm:$0xe] }
 0x65a   : > { %8990 = vst.msk [vmem:[#allocation2 + $0x10] sm:$0xf] %vm8985_vm1, %v8898_v24  ;;  %v8635_v24 = vrot.slane %v11421_v30, 5  ;;  %v11461_v6 = vrot.slane %v11443_v59, 9  ;;  %v9408_v17 = vrot.slane %v9406_v44, 5 }
 0x65b   : > { %9839 = vrot.lane.b32.xlu0 %v9769_v7, %s11970_s24  ;;  %v8932_v14 = vpop.permute.xlu1 %8931  ;;  %v11452_v7 = vrot.slane %v11416_v43, 9  ;;  %v9416_v43 = vshrl.u32 %v11538_v21, 16  ;;  %v11493_v59 = vld [vmem:[%s12104_s6 + $0x27c] sm:$0xf] }
 0x65c   : > { %9007 = vst.msk [vmem:[#allocation2 + $0x54] sm:$0xf] %vm8985_vm1, %v8932_v14  ;;  %v8636_v61 = vsel %vm12259_vm7, %v8634_v4, %v8635_v24  ;;  %v9235_v4 = vshrl.u32 %v11516_v23, 16  ;;  %v9238_v24 = vshll.u32 %v11516_v23, 16 }
 0x65d   : > { %v8930_v51 = vpop.permute.xlu0 %8929  ;;  %8382 = vrot.lane.b32.xlu1 %v8139_v57, %s11966_s28  ;;  %v8626_v19 = vsel %vm12259_vm7, %v11452_v7, %v8625_v36  ;;  %v8688_v57 = vrot.slane %v11444_v45, 5  ;;  %v11517_v7 = vld [vmem:[%s12104_s6 + $0x220] sm:$0xf]  ;;  %v11539_v45 = vld [vmem:[%s12104_s6 + $0x278] sm:$0x1] }
 0x65e   : > { %9006 = vst.msk [vmem:[#allocation2 + $0x50] sm:$0xf] %vm8985_vm1, %v8930_v51  ;;  %v9248_v31 = vshrl.u32 %v11517_v7, 16 }
 0x65f   : > { %8380 = vrot.lane.b32.xlu0 %v8129_v52, %s11966_s28  ;;  %v8904_v48 = vpop.permute.xlu1 %8903  ;;  %v8690_v14 = vrot.slane %v8688_v57, 4 }
 0x660   : > { %8993 = vst.msk [vmem:[#allocation2 + $0x1c] sm:$0xf] %vm8985_vm1, %v8904_v48  ;;  %v8689_v48 = vsel %vm12259_vm7, %v11461_v6, %v8688_v57  ;;  %v11541_v57 = vld [vmem:[%s12104_s6 + $0x280] sm:$0xf]  ;;  %v9250_v18 = vrot.slane %v9248_v31, 4 }
 0x661   : > { %v8902_v60 = vpop.permute.xlu0 %8901  ;;  %8414 = vrot.lane.b32.xlu1 %v8331_v54, %s11966_s28  ;;  %v11513_v54 = vld [vmem:[%s12104_s6 + $0x210] sm:$0xf]  ;;  %v8692_v20 = vsel %vm12259_vm7, %v8690_v14, %v8691_v8  ;;  %v9422_v8 = vshll.u32 %v11539_v45, 16  ;;  %v11586_v31 = vld [vmem:[%s12104_s6 + $0x274] sm:$0xf] }
 0x662   : > { %8992 = vst.msk [vmem:[#allocation2 + $0x18] sm:$0xf] %vm8985_vm1, %v8902_v60  ;;  %v9211_v47 = vshrl.u32 %v11513_v54, 16  ;;  %v9214_v2 = vshll.u32 %v11513_v54, 16  ;;  %v16603_v60 = vrot.slane %v9220_v53, 5  ;;  %v9440_v54 = vshrl.u32 %v11541_v57, 16 }
 0x663   : > { %8412 = vrot.lane.b32.xlu0 %v8321_v56, %s11966_s28  ;;  %v8936_v22 = vpop.permute.xlu1 %8935  ;;  %v9237_v53 = vrot.slane %v9235_v4, 4  ;;  %v11561_v4 = vld [vmem:[%s12104_s6 + $0x210] sm:$0xe] }
 0x664   : > { %9009 = vst.msk [vmem:[#allocation2 + $0x5c] sm:$0xf] %vm8985_vm1, %v8936_v22  ;;  %v11475_v22 = vld [vmem:[%s12104_s6 + $0x210] sm:$0xf]  ;;  %v9213_v37 = vrot.slane %v9211_v47, 4  ;;  %v9216_v38 = vrot.slane %v9214_v2, 5 }
 0x665   : > { %v8934_v27 = vpop.permute.xlu0 %8933  ;;  %8386 = vrot.lane.b32.xlu1 %v8163_v13, %s11966_s28  ;;  %v9226_v13 = vrot.slane %v9224_v12, 4  ;;  %v9240_v12 = vrot.slane %v9238_v24, 5 }
 0x666   : > { %9008 = vst.msk [vmem:[#allocation2 + $0x58] sm:$0xf] %vm8985_vm1, %v8934_v27  ;;  %v9412_v27 = vshll.u32 %v11538_v21, 16 }
 0x667   : > { %8384 = vrot.lane.b32.xlu0 %v8153_v15, %s11966_s28  ;;  %v9461_v50 = vpop.permute.xlu1 %9460  ;;  %v9227_v49 = vor.u32 %v9226_v13, %v16603_v60  ;;  %v9424_v13 = vrot.slane %v9422_v8, 5  ;;  %v9241_v11 = vor.u32 %v9240_v12, %v9237_v53  ;;  %v11585_v8 = vld [vmem:[%s12104_s6 + $0x270] sm:$0xe]  ;;  %v11589_v53 = vld [vmem:[%s12104_s6 + $0x280] sm:$0xf] }
 0x668   : > { %9552 = vst.msk [vmem:[#allocation2 + $0x14] sm:$0xf] %vm9546_vm2, %v9461_v50  ;;  %v16623_v35 = vrot.slane %v9412_v27, 5  ;;  %v11542_v27 = vld [vmem:[%s12104_s6 + $0x284] sm:$0x1] }
 0x669   : > { %v9459_v42 = vpop.permute.xlu0 %9458  ;;  %8418 = vrot.lane.b32.xlu1 %v8355_v55, %s11966_s28  ;;  %v9403_v55 = vshrl.u32 %v11537_v41, 16  ;;  %v9228_v30 = vrot.slane %v9227_v49, 4 }
 0x66a   : > { %9551 = vst.msk [vmem:[#allocation2 + $0x10] sm:$0xf] %vm9546_vm2, %v9459_v42  ;;  %v11478_v42 = vld [vmem:[%s12104_s6 + $0x220] sm:$0xf] }
 0x66b   : > { %8416 = vrot.lane.b32.xlu0 %v8345_v46, %s11966_s28  ;;  %v9493_v39 = vpop.permute.xlu1 %9492  ;;  %v11491_v46 = vld [vmem:[%s12104_s6 + $0x270] sm:$0xf]  ;;  %v9233_v2 = vsel %vm12115_vm3, %v9228_v30, %v9232_v10 }
 0x66c   : > { %9568 = vst.msk [vmem:[#allocation2 + $0x54] sm:$0xf] %vm9546_vm2, %v9493_v39  ;;  %v9418_v39 = vrot.slane %v9416_v43, 4 }
 0x66d   : > { %v9491_v62 = vpop.permute.xlu0 %9490  ;;  %8719 = vrot.lane.b32.xlu1 %v8629_v34, %s11967_s29  ;;  %v9217_v34 = vor.u32 %v9216_v38, %v9213_v37 }
 0x66e   : > { %9567 = vst.msk [vmem:[#allocation2 + $0x50] sm:$0xf] %vm9546_vm2, %v9491_v62  ;;  %v9244_v62 = vshll.u32 %v11517_v7, 16  ;;  %v9419_v14 = vor.u32 %v9418_v39, %v16623_v35  ;;  %v9446_v7 = vshll.u32 %v11542_v27, 16 }
 0x66f   : > { %8717 = vrot.lane.b32.xlu0 %v8626_v19, %s11967_s29  ;;  %v9465_v52 = vpop.permute.xlu1 %9464  ;;  %v9405_v19 = vrot.slane %v9403_v55, 4 }
 0x670   : > { %9554 = vst.msk [vmem:[#allocation2 + $0x1c] sm:$0xf] %vm9546_vm2, %v9465_v52  ;;  %v16637_v6 = vrot.slane %v9244_v62, 5  ;;  %v11563_v62 = vld [vmem:[%s12104_s6 + $0x218] sm:$0x1] }
 0x671   : > { %v9463_v58 = vpop.permute.xlu0 %9462  ;;  %8751 = vrot.lane.b32.xlu1 %v8685_v3, %s11967_s29 }
 0x672   : > { %9553 = vst.msk [vmem:[#allocation2 + $0x18] sm:$0xf] %vm9546_vm2, %v9463_v58  ;;  %v11494_v58 = vld [vmem:[%s12104_s6 + $0x280] sm:$0xf] }
 0x673   : > { %8749 = vrot.lane.b32.xlu0 %v8682_v0, %s11967_s29  ;;  %v9497_v16 = vpop.permute.xlu1 %9496 }
 0x674   : > { %9570 = vst.msk [vmem:[#allocation2 + $0x5c] sm:$0xf] %vm9546_vm2, %v9497_v16  ;;  %v9409_v16 = vor.u32 %v9408_v17, %v9405_v19 }
 0x675   : > { %v9495_v51 = vpop.permute.xlu0 %9494  ;;  %8723 = vrot.lane.b32.xlu1 %v8636_v61, %s11967_s29  ;;  %v9218_v61 = vrot.slane %v9217_v34, 4  ;;  %v11562_v34 = vld [vmem:[%s12104_s6 + $0x214] sm:$0xf] }
 0x676   : > { %9569 = vst.msk [vmem:[#allocation2 + $0x58] sm:$0xf] %vm9546_vm2, %v9495_v51  ;;  %v9436_v51 = vshll.u32 %v11541_v57, 16  ;;  %v9410_v41 = vrot.slane %v9409_v16, 4  ;;  %v9719_v19 = vrot.slane %v11562_v34, 5 }
 0x677   : > { %8721 = vrot.lane.b32.xlu0 %v8633_v26, %s11967_s29  ;;  %v9798_v25 = vpop.permute.xlu1 %9797  ;;  %v11518_v26 = vld [vmem:[%s12104_s6 + $0x224] sm:$0x1]  ;;  %v9223_v38 = vsel %vm12115_vm3, %v9218_v61, %v16603_v60  ;;  %v11565_v61 = vld [vmem:[%s12104_s6 + $0x220] sm:$0xf] }
 0x678   : > { %9889 = vst.msk [vmem:[#allocation2 + $0x14] sm:$0xf] %vm9883_vm4, %v9798_v25  ;;  %v9427_v25 = vshrl.u32 %v11540_v1, 16  ;;  %v9254_v21 = vshll.u32 %v11518_v26, 16  ;;  %v9721_v57 = vrot.slane %v9719_v19, 4 }
 0x679   : > { %v9796_v56 = vpop.permute.xlu0 %9795  ;;  %8755 = vrot.lane.b32.xlu1 %v8692_v20, %s11967_s29 }
 0x67a   : > { %9888 = vst.msk [vmem:[#allocation2 + $0x10] sm:$0xf] %vm9883_vm4, %v9796_v56  ;;  %v9429_v43 = vrot.slane %v9427_v25, 4  ;;  %v11564_v25 = vld [vmem:[%s12104_s6 + $0x21c] sm:$0xe] }
 0x67b   : > { %8753 = vrot.lane.b32.xlu0 %v8689_v48, %s11967_s29  ;;  %v9830_v36 = vpop.permute.xlu1 %9829  ;;  %v9430_v48 = vshll.u32 %v11540_v1, 16 }
 0x67c   : > { %9905 = vst.msk [vmem:[#allocation2 + $0x54] sm:$0xf] %vm9883_vm4, %v9830_v36  ;;  %v9251_v36 = vor.u32 %v9250_v18, %v16637_v6 }
 0x67d   : > { %v9828_v15 = vpop.permute.xlu0 %9827  ;;  %8915 = vrot.lane.b32.xlu1 %v11476_v9, %s11968_s30  ;;  %v9420_v9 = vrot.slane %v9419_v14, 4  ;;  %v9432_v55 = vrot.slane %v9430_v48, 5 }
 0x67e   : > { %9904 = vst.msk [vmem:[#allocation2 + $0x50] sm:$0xf] %vm9883_vm4, %v9828_v15  ;;  %v9442_v15 = vrot.slane %v9440_v54, 4  ;;  %v9252_v60 = vrot.slane %v9251_v36, 4  ;;  %v11605_v54 = vrot.slane %v11585_v8, 9 }
 0x67f   : > { %8913 = vrot.lane.b32.xlu0 %v11475_v22, %s11968_s30  ;;  %v9802_v50 = vpop.permute.xlu1 %9801  ;;  %v9438_v22 = vrot.slane %v9436_v51, 5  ;;  %v9425_v49 = vsel %vm12115_vm3, %v9420_v9, %v9424_v13  ;;  %v9433_v40 = vor.u32 %v9432_v55, %v9429_v43 }
 0x680   : > { %9891 = vst.msk [vmem:[#allocation2 + $0x1c] sm:$0xf] %vm9883_vm4, %v9802_v50  ;;  %v9256_v50 = vrot.slane %v9254_v21, 5  ;;  %v11598_v21 = vrot.slane %v11564_v25, 9 }
 0x681   : > { %v9800_v29 = vpop.permute.xlu0 %9799  ;;  %v11838_v32 = vld [vmem:[#allocation2 + $0x10] sm:$0xff]   ;;  %8947 = vrot.lane.b32.xlu1 %v11492_v33, %s11968_s30  ;;  %v9434_v45 = vrot.slane %v9433_v40, 4 }
 0x682   : > { %9890 = vst.msk [vmem:[#allocation2 + $0x18] sm:$0xf] %vm9883_vm4, %v9800_v29  ;;  %11682 = vmatprep.mubr.bf16.mxu0 %v11838_v32  ;;  %v9415_v32 = vsel %vm12115_vm3, %v9410_v41, %v16623_v35  ;;  %v9448_v35 = vrot.slane %v9446_v7, 5  ;;  %v11590_v41 = vld [vmem:[%s12104_s6 + $0x284] sm:$0x1] }
 0x683   : > { %8945 = vrot.lane.b32.xlu0 %v11491_v46, %s11968_s30  ;;  %v9834_v3 = vpop.permute.xlu1 %9833  ;;  %v9443_v46 = vor.u32 %v9442_v15, %v9438_v22  ;;  %v9439_v1 = vsel %vm12115_vm3, %v9434_v45, %v9438_v22  ;;  %v11588_v22 = vld [vmem:[%s12104_s6 + $0x27c] sm:$0xe] }
 0x684   : > { %9907 = vst.msk [vmem:[#allocation2 + $0x5c] sm:$0xf] %vm9883_vm4, %v9834_v3  ;;  %v11606_v43 = vrot.slane %v11588_v22, 9 }
 0x685   : > { %v9832_v52 = vpop.permute.xlu0 %9831  ;;  %v11839_v0 = vld [vmem:[#allocation2 + $0x50] sm:$0xff]   ;;  %8919 = vrot.lane.b32.xlu1 %v11478_v42, %s11968_s30  ;;  %v9242_v42 = vrot.slane %v9241_v11, 4  ;;  %v9444_v39 = vrot.slane %v9443_v46, 4 }
 0x686   : > { %9906 = vst.msk [vmem:[#allocation2 + $0x58] sm:$0xf] %vm9883_vm4, %v9832_v52  ;;  %11698 = vmatprep.mubr.bf16.mxu1 %v11839_v0  ;;  %v9722_v52 = vrot.slane %v11563_v62, 5  ;;  %v9775_v0 = vrot.slane %v11586_v31, 5 }
 0x687   : > { %8917 = vrot.lane.b32.xlu0 %v11477_v5, %s11968_s30  ;;  %v8407_v20 = vpop.permute.xlu1 %8406  ;;  %v9257_v5 = vsel %vm12115_vm3, %v9252_v60, %v9256_v50  ;;  %v9247_v30 = vsel %vm12115_vm3, %v9242_v42, %v16637_v6  ;;  %v9449_v24 = vsel %vm12115_vm3, %v9444_v39, %v9448_v35  ;;  %v9726_v6 = vrot.slane %v11565_v61, 5 }
 0x688   : > { %8478 = vst.msk [vmem:[#allocation2 + $0x64] sm:$0xf] %vm8452_vm15, %v8407_v20  ;;  %v9723_v28 = vsel %vm12259_vm7, %v9721_v57, %v9722_v52  ;;  %v9777_v16 = vrot.slane %v9775_v0, 4  ;;  %v11566_v20 = vld [vmem:[%s12104_s6 + $0x224] sm:$0x1]  ;;  %v9776_v13 = vsel %vm12259_vm7, %v11605_v54, %v9775_v0 }
 0x689   : > { %v8405_v56 = vpop.permute.xlu0 %8404  ;;  %v11840_v47 = vld [vmem:[#allocation2 + $0x18] sm:$0xff]   ;;  %8951 = vrot.lane.b32.xlu1 %v11494_v58, %s11968_s30  ;;  %v11597_v58 = vrot.slane %v11561_v4, 9  ;;  %v9727_v27 = vsel %vm12259_vm7, %v11598_v21, %v9726_v6 }
 0x68a   : > { %8477 = vst.msk [vmem:[#allocation2 + $0x60] sm:$0xf] %vm8452_vm15, %v8405_v56  ;;  %11683 = vmatmul.mubr.bf16.gmra.mxu0 %v11840_v47  ;;  %v9728_v56 = vrot.slane %v9726_v6, 4  ;;  %v9729_v47 = vrot.slane %v11566_v20, 5 }
 0x68b   : > { %8949 = vrot.lane.b32.xlu0 %v11493_v59, %s11968_s30  ;;  %v8411_v37 = vpop.permute.xlu1 %8410  ;;  %v11587_v59 = vld [vmem:[%s12104_s6 + $0x278] sm:$0x1]  ;;  %v9720_v51 = vsel %vm12259_vm7, %v11597_v58, %v9719_v19  ;;  %s148_s6 = sand.u32 1, %s11918_s10   ;;  %s11632_s30 = sshll.u32 %s11926_s12, 5 }
 0x68c   : > { %8480 = vst.msk [vmem:[#allocation2 + $0x6c] sm:$0xf] %vm8452_vm15, %v8411_v37  ;;  %v9778_v26 = vrot.slane %v11587_v59, 5  ;;  %v9730_v15 = vsel %vm12259_vm7, %v9728_v56, %v9729_v47  ;;  %s10430_s28 = sshll.u32 %s148_s6, 8  ;;  %s16831_s7 = scalar_lea.sflag [#allocation4], %s148_s6 }
 0x68d   : > { %v8409_v44 = vpop.permute.xlu0 %8408  ;;  %v11841_v33 = vld [vmem:[#allocation2 + $0x58] sm:$0xff]   ;;  %9476 = vrot.lane.b32.xlu1 %v9233_v2, %s11969_s25  ;;  %v9782_v2 = vrot.slane %v11589_v53, 5  ;;  %s16771_s29 = scalar_lea.vmem [#allocation3], %s10430_s28 }
 0x68e   : > { %8479 = vst.msk [vmem:[#allocation2 + $0x68] sm:$0xf] %vm8452_vm15, %v8409_v44  ;;  %11699 = vmatmul.mubr.bf16.gmra.mxu1 %v11841_v33  ;;  %v9779_v48 = vsel %vm12259_vm7, %v9777_v16, %v9778_v26  ;;  %s10317_s4 = sshll.u32 %s16771_s29, 4  ;;  %s16826_s4 = int_to_ptr.vmem [resolvable:$true] %s10317_s4 }
 0x68f   : > { %9474 = vrot.lane.b32.xlu0 %v9223_v38, %s11969_s25  ;;  %v8712_v29 = vpop.permute.xlu1 %8711  ;;  %v9784_v37 = vrot.slane %v9782_v2, 4  ;;  %v9785_v38 = vrot.slane %v11590_v41, 5  ;;  %s11850_s17 = scalar_lea.vmem %s16826_s4, 4096  ;;  %p11857_p2 = scmp.lt.s32.totalorder %s16826_s4, %s11855_s21 }
 0x690   : > { %8799 = vst.msk [vmem:[#allocation2 + $0x24] sm:$0xf] %vm8789_vm0, %v8712_v29  ;;  %p11851_p13 = scmp.ne.s32.totalorder %s16826_s4, %s11850_s17 }
 0x691   : > { %v8710_v23 = vpop.permute.xlu0 %8709  ;;  %9508 = vrot.lane.b32.xlu1 %v9425_v49, %s11969_s25  ;;  %v9786_v44 = vsel %vm12259_vm7, %v9784_v37, %v9785_v38  ;;  %v9783_v49 = vsel %vm12259_vm7, %v11606_v43, %v9782_v2 }
 0x692   : > { %8798 = vst.msk [vmem:[#allocation2 + $0x20] sm:$0xf] %vm8789_vm0, %v8710_v23  ;;  %p11852_p0 = pnand %p11851_p13, %p12039_p3 }
 0x693   : > { %9506 = vrot.lane.b32.xlu0 %v9415_v32, %s11969_s25  ;;  %v8744_v17 = vpop.permute.xlu1 %8743 }
 0x694   : > { %8815 = vst.msk [vmem:[#allocation2 + $0x64] sm:$0xf] %vm8789_vm0, %v8744_v17  ;;  %p11853_p1 = pneg %p11852_p0 }
 0x695   : > { %v8742_v3 = vpop.permute.xlu0 %8741  ;;  %9480 = vrot.lane.b32.xlu1 %v9257_v5, %s11969_s25 }
 0x696   : > { %8814 = vst.msk [vmem:[#allocation2 + $0x60] sm:$0xf] %vm8789_vm0, %v8742_v3 }
 0x697   : > { %9478 = vrot.lane.b32.xlu0 %v9247_v30, %s11969_s25  ;;  %v8716_v10 = vpop.permute.xlu1 %8715 }
 0x698   : > { %8801 = vst.msk [vmem:[#allocation2 + $0x2c] sm:$0xf] %vm8789_vm0, %v8716_v10 }
 0x699   : > { %v8714_v14 = vpop.permute.xlu0 %8713  ;;  %9512 = vrot.lane.b32.xlu1 %v9449_v24, %s11969_s25 }
 0x69a   : > { %8800 = vst.msk [vmem:[#allocation2 + $0x28] sm:$0xf] %vm8789_vm0, %v8714_v14 }
 0x69b   : > { %9510 = vrot.lane.b32.xlu0 %v9439_v1, %s11969_s25  ;;  %v8748_v18 = vpop.permute.xlu1 %8747  ;;  %s11633_s25 = sshll.u32 %s11930_s13, 8 }
 0x69c   : > { %8817 = vst.msk [vmem:[#allocation2 + $0x6c] sm:$0xf] %vm8789_vm0, %v8748_v18  ;;  %s10314_s26 = sadd.s32 %s11633_s25, %s11632_s30 }
 0x69d   : > { %v8746_v12 = vpop.permute.xlu0 %8745  ;;  %9813 = vrot.lane.b32.xlu1 %v9723_v28, %s11970_s24  ;;  %s11634_s3 = sshll.u32 %s10314_s26, 7 }
 0x69e   : > { %8816 = vst.msk [vmem:[#allocation2 + $0x68] sm:$0xf] %vm8789_vm0, %v8746_v12  ;;  %s16823_s5 = scalar_lea.hbm %s16885_s2, %s11634_s3 }
 0x69f   : > { %9811 = vrot.lane.b32.xlu0 %v9720_v51, %s11970_s24  ;;  %v8908_v9 = vpop.permute.xlu1 %8907 }
 0x6a0   : > { %8995 = vst.msk [vmem:[#allocation2 + $0x24] sm:$0xf] %vm8985_vm1, %v8908_v9 }
 0x6a1   : > { %v8906_v36 = vpop.permute.xlu0 %8905  ;;  %9845 = vrot.lane.b32.xlu1 %v9779_v48, %s11970_s24 }
 0x6a2   : > { %8994 = vst.msk [vmem:[#allocation2 + $0x20] sm:$0xf] %vm8985_vm1, %v8906_v36 }
 0x6a3   : > { %9843 = vrot.lane.b32.xlu0 %v9776_v13, %s11970_s24  ;;  %v8940_v11 = vpop.permute.xlu1 %8939 }
 0x6a4   : > { %9011 = vst.msk [vmem:[#allocation2 + $0x64] sm:$0xf] %vm8985_vm1, %v8940_v11 }
 0x6a5   : > { %v8938_v55 = vpop.permute.xlu0 %8937  ;;  %9817 = vrot.lane.b32.xlu1 %v9730_v15, %s11970_s24 }
 0x6a6   : > { %9010 = vst.msk [vmem:[#allocation2 + $0x60] sm:$0xf] %vm8985_vm1, %v8938_v55 }
 0x6a7   : > { %9815 = vrot.lane.b32.xlu0 %v9727_v27, %s11970_s24  ;;  %v8912_v33 = vpop.permute.xlu1 %8911 }
 0x6a8   : > { %8997 = vst.msk [vmem:[#allocation2 + $0x2c] sm:$0xf] %vm8985_vm1, %v8912_v33 }
 0x6a9   : > { %v8910_v60 = vpop.permute.xlu0 %8909  ;;  %9849 = vrot.lane.b32.xlu1 %v9786_v44, %s11970_s24 }
 0x6aa   : > { %8996 = vst.msk [vmem:[#allocation2 + $0x28] sm:$0xf] %vm8985_vm1, %v8910_v60 }
 0x6ab   : > { %9847 = vrot.lane.b32.xlu0 %v9783_v49, %s11970_s24  ;;  %v8944_v50 = vpop.permute.xlu1 %8943  ;;  %s11856_s24 = scalar_lea.vmem %s11855_s21, 8192 }
 0x6ac   : > { %9013 = vst.msk [vmem:[#allocation2 + $0x6c] sm:$0xf] %vm8985_vm1, %v8944_v50  ;;  %p11858_p4 = scmp.lt.s32.totalorder %s11856_s24, %s11850_s17 }
 0x6ad   : > { %v8942_v46 = vpop.permute.xlu0 %8941 }
 0x6ae   : > { %9012 = vst.msk [vmem:[#allocation2 + $0x68] sm:$0xf] %vm8985_vm1, %v8942_v46  ;;  %p11859_p5 = por %p11858_p4, %p11857_p2 }
 0x6af   : > { %v9469_v7 = vpop.permute.xlu1 %9468 }
 0x6b0   : > { %9556 = vst.msk [vmem:[#allocation2 + $0x24] sm:$0xf] %vm9546_vm2, %v9469_v7  ;;  %p11860_p6 = pnand %p11859_p5, %p11853_p1 }
 0x6b1   : > { %v9467_v63 = vpop.permute.xlu0 %9466 }
 0x6b2   : > { %9555 = vst.msk [vmem:[#allocation2 + $0x20] sm:$0xf] %vm9546_vm2, %v9467_v63 }
 0x6b3   : > { %v9501_v29 = vpop.permute.xlu1 %9500 }
 0x6b4   : > { %9572 = vst.msk [vmem:[#allocation2 + $0x64] sm:$0xf] %vm9546_vm2, %v9501_v29 }
 0x6b5   : > { %v9499_v32 = vpop.permute.xlu0 %9498 }
 0x6b6   : > { %9571 = vst.msk [vmem:[#allocation2 + $0x60] sm:$0xf] %vm9546_vm2, %v9499_v32 }
 0x6b7   : > { %v9473_v42 = vpop.permute.xlu1 %9472 }
 0x6b8   : > { %9558 = vst.msk [vmem:[#allocation2 + $0x2c] sm:$0xf] %vm9546_vm2, %v9473_v42 }
 0x6b9   : > { %v9471_v40 = vpop.permute.xlu0 %9470 }
 0x6ba   : > { %9557 = vst.msk [vmem:[#allocation2 + $0x28] sm:$0xf] %vm9546_vm2, %v9471_v40 }
 0x6bb   : > { %v9505_v34 = vpop.permute.xlu1 %9504 }
 0x6bc   : > { %9574 = vst.msk [vmem:[#allocation2 + $0x6c] sm:$0xf] %vm9546_vm2, %v9505_v34 }
 0x6bd   : > { %v9503_v23 = vpop.permute.xlu0 %9502 }
 0x6be   : > { %9573 = vst.msk [vmem:[#allocation2 + $0x68] sm:$0xf] %vm9546_vm2, %v9503_v23 }
 0x6bf   : > { %v9806_v5 = vpop.permute.xlu1 %9805 }
 0x6c0   : > { %9893 = vst.msk [vmem:[#allocation2 + $0x24] sm:$0xf] %vm9883_vm4, %v9806_v5 }
 0x6c1   : > { %v9804_v39 = vpop.permute.xlu0 %9803 }
 0x6c2   : > { %9892 = vst.msk [vmem:[#allocation2 + $0x20] sm:$0xf] %vm9883_vm4, %v9804_v39 }
 0x6c3   : > { %v9838_v35 = vpop.permute.xlu1 %9837 }
 0x6c4   : > { %9909 = vst.msk [vmem:[#allocation2 + $0x64] sm:$0xf] %vm9883_vm4, %v9838_v35 }
 0x6c5   : > { %v9836_v19 = vpop.permute.xlu0 %9835 }
 0x6c6   : > { %9908 = vst.msk [vmem:[#allocation2 + $0x60] sm:$0xf] %vm9883_vm4, %v9836_v19 }
 0x6c7   : > { %v9810_v17 = vpop.permute.xlu1 %9809 }
 0x6c8   : > { %9895 = vst.msk [vmem:[#allocation2 + $0x2c] sm:$0xf] %vm9883_vm4, %v9810_v17 }
 0x6c9   : > { %v9808_v30 = vpop.permute.xlu0 %9807  ;;  %v11842_v45 = vld [vmem:[#allocation2 + $0x20] sm:$0xff]  }
 0x6ca   : > { %9894 = vst.msk [vmem:[#allocation2 + $0x28] sm:$0xf] %vm9883_vm4, %v9808_v30  ;;  %11686 = vmatprep.mubr.bf16.mxu0 %v11842_v45 }
 0x6cb   : > { %v9842_v62 = vpop.permute.xlu1 %9841 }
 0x6cc   : > { %9911 = vst.msk [vmem:[#allocation2 + $0x6c] sm:$0xf] %vm9883_vm4, %v9842_v62 }
 0x6cd   : > { %v9840_v31 = vpop.permute.xlu0 %9839  ;;  %v11843_v3 = vld [vmem:[#allocation2 + $0x60] sm:$0xff]  }
 0x6ce   : > { %9910 = vst.msk [vmem:[#allocation2 + $0x68] sm:$0xf] %vm9883_vm4, %v9840_v31  ;;  %11702 = vmatprep.mubr.bf16.mxu1 %v11843_v3 }
 0x6cf   : > { %v8383_v4 = vpop.permute.xlu1 %8382 }
 0x6d0   : > { %8466 = vst.msk [vmem:[#allocation2 + $0x34] sm:$0xf] %vm8452_vm15, %v8383_v4 }
 0x6d1   : > { %v8381_v24 = vpop.permute.xlu0 %8380  ;;  %v11844_v57 = vld [vmem:[#allocation2 + $0x28] sm:$0xff]  }
 0x6d2   : > { %8465 = vst.msk [vmem:[#allocation2 + $0x30] sm:$0xf] %vm8452_vm15, %v8381_v24  ;;  %11687 = vmatmul.mubr.bf16.gmra.mxu0 %v11844_v57 }
 0x6d3   : > { %v8415_v52 = vpop.permute.xlu1 %8414 }
 0x6d4   : > { %8482 = vst.msk [vmem:[#allocation2 + $0x74] sm:$0xf] %vm8452_vm15, %v8415_v52 }
 0x6d5   : > { %v8413_v0 = vpop.permute.xlu0 %8412  ;;  %v11845_v10 = vld [vmem:[#allocation2 + $0x68] sm:$0xff]  }
 0x6d6   : > { %8481 = vst.msk [vmem:[#allocation2 + $0x70] sm:$0xf] %vm8452_vm15, %v8413_v0  ;;  %11703 = vmatmul.mubr.bf16.gmra.mxu1 %v11845_v10 }
 0x6d7   : > { %v8387_v1 = vpop.permute.xlu1 %8386 }
 0x6d8   : > { %8468 = vst.msk [vmem:[#allocation2 + $0x3c] sm:$0xf] %vm8452_vm15, %v8387_v1 }
 0x6d9   : > { %v8385_v58 = vpop.permute.xlu0 %8384 }
 0x6da   : > { %8467 = vst.msk [vmem:[#allocation2 + $0x38] sm:$0xf] %vm8452_vm15, %v8385_v58 }
 0x6db   : > { %v8419_v59 = vpop.permute.xlu1 %8418 }
 0x6dc   : > { %8484 = vst.msk [vmem:[#allocation2 + $0x7c] sm:$0xf] %vm8452_vm15, %v8419_v59 }
 0x6dd   : > { %v8417_v61 = vpop.permute.xlu0 %8416 }
 0x6de   : > { %8483 = vst.msk [vmem:[#allocation2 + $0x78] sm:$0xf] %vm8452_vm15, %v8417_v61 }
 0x6df   : > { %v8720_v14 = vpop.permute.xlu1 %8719 }
 0x6e0   : > { %8803 = vst.msk [vmem:[#allocation2 + $0x34] sm:$0xf] %vm8789_vm0, %v8720_v14 }
 0x6e1   : > { %v8718_v8 = vpop.permute.xlu0 %8717 }
 0x6e2   : > { %8802 = vst.msk [vmem:[#allocation2 + $0x30] sm:$0xf] %vm8789_vm0, %v8718_v8 }
 0x6e3   : > { %v8752_v28 = vpop.permute.xlu1 %8751 }
 0x6e4   : > { %8819 = vst.msk [vmem:[#allocation2 + $0x74] sm:$0xf] %vm8789_vm0, %v8752_v28 }
 0x6e5   : > { %v8750_v16 = vpop.permute.xlu0 %8749 }
 0x6e6   : > { %8818 = vst.msk [vmem:[#allocation2 + $0x70] sm:$0xf] %vm8789_vm0, %v8750_v16 }
 0x6e7   : > { %v8724_v26 = vpop.permute.xlu1 %8723 }
 0x6e8   : > { %8805 = vst.msk [vmem:[#allocation2 + $0x3c] sm:$0xf] %vm8789_vm0, %v8724_v26 }
 0x6e9   : > { %v8722_v6 = vpop.permute.xlu0 %8721 }
 0x6ea   : > { %8804 = vst.msk [vmem:[#allocation2 + $0x38] sm:$0xf] %vm8789_vm0, %v8722_v6 }
 0x6eb   : > { %v8756_v18 = vpop.permute.xlu1 %8755 }
 0x6ec   : > { %8821 = vst.msk [vmem:[#allocation2 + $0x7c] sm:$0xf] %vm8789_vm0, %v8756_v18 }
 0x6ed   : > { %v8754_v51 = vpop.permute.xlu0 %8753 }
 0x6ee   : > { %8820 = vst.msk [vmem:[#allocation2 + $0x78] sm:$0xf] %vm8789_vm0, %v8754_v51 }
 0x6ef   : > { %v8916_v54 = vpop.permute.xlu1 %8915 }
 0x6f0   : > { %8999 = vst.msk [vmem:[#allocation2 + $0x34] sm:$0xf] %vm8985_vm1, %v8916_v54 }
 0x6f1   : > { %v8914_v20 = vpop.permute.xlu0 %8913 }
 0x6f2   : > { %8998 = vst.msk [vmem:[#allocation2 + $0x30] sm:$0xf] %vm8985_vm1, %v8914_v20 }
 0x6f3   : > { %v8948_v53 = vpop.permute.xlu1 %8947 }
 0x6f4   : > { %9015 = vst.msk [vmem:[#allocation2 + $0x74] sm:$0xf] %vm8985_vm1, %v8948_v53 }
 0x6f5   : > { %v8946_v12 = vpop.permute.xlu0 %8945 }
 0x6f6   : > { %9014 = vst.msk [vmem:[#allocation2 + $0x70] sm:$0xf] %vm8985_vm1, %v8946_v12 }
 0x6f7   : > { %v8920_v25 = vpop.permute.xlu1 %8919 }
 0x6f8   : > { %9001 = vst.msk [vmem:[#allocation2 + $0x3c] sm:$0xf] %vm8985_vm1, %v8920_v25 }
 0x6f9   : > { %v8918_v48 = vpop.permute.xlu0 %8917 }
 0x6fa   : > { %9000 = vst.msk [vmem:[#allocation2 + $0x38] sm:$0xf] %vm8985_vm1, %v8918_v48 }
 0x6fb   : > { %v8952_v56 = vpop.permute.xlu1 %8951 }
 0x6fc   : > { %9017 = vst.msk [vmem:[#allocation2 + $0x7c] sm:$0xf] %vm8985_vm1, %v8952_v56 }
 0x6fd   : > { %v8950_v47 = vpop.permute.xlu0 %8949 }
 0x6fe   : > { %9016 = vst.msk [vmem:[#allocation2 + $0x78] sm:$0xf] %vm8985_vm1, %v8950_v47 }
 0x6ff   : > { %v9477_v2 = vpop.permute.xlu1 %9476 }
 0x700   : > { %9560 = vst.msk [vmem:[#allocation2 + $0x34] sm:$0xf] %vm9546_vm2, %v9477_v2 }
 0x701   : > { %v9475_v9 = vpop.permute.xlu0 %9474 }
 0x702   : > { %9559 = vst.msk [vmem:[#allocation2 + $0x30] sm:$0xf] %vm9546_vm2, %v9475_v9  ;;  %v11680_v13 = vpop.f32.mrf.mxu0 }
 0x703   : > { %10271 = vst [vmem:[%s16771_s29 + $0x10] sm:$0xff] %v11680_v13  ;;  %v9509_v21 = vpop.permute.xlu1 %9508 }
 0x704   : > { %9576 = vst.msk [vmem:[#allocation2 + $0x74] sm:$0xf] %vm9546_vm2, %v9509_v21  ;;  %v10142_v36 = vpop.f32.mrf.mxu0 }
 0x705   : > { %v9507_v41 = vpop.permute.xlu0 %9506  ;;  %10269 = vst [vmem:[%s16771_s29] sm:$0xff] %v10142_v36 }
 0x706   : > { %9575 = vst.msk [vmem:[#allocation2 + $0x70] sm:$0xf] %vm9546_vm2, %v9507_v41  ;;  %v11681_v22 = vpop.f32.mrf.mxu0  ;;  %v11696_v15 = vpop.f32.mrf.mxu1 }
 0x707   : > { %10272 = vst [vmem:[%s16771_s29 + $0x18] sm:$0xff] %v11681_v22  ;;  %10287 = vst [vmem:[%s16771_s29 + $0x90] sm:$0xff] %v11696_v15  ;;  %v9481_v37 = vpop.permute.xlu1 %9480 }
 0x708   : > { %9562 = vst.msk [vmem:[#allocation2 + $0x3c] sm:$0xf] %vm9546_vm2, %v9481_v37  ;;  %v10145_v11 = vpop.f32.mrf.mxu0  ;;  %v10206_v27 = vpop.f32.mrf.mxu1 }
 0x709   : > { %v9479_v38 = vpop.permute.xlu0 %9478  ;;  %10270 = vst [vmem:[%s16771_s29 + $0x8] sm:$0xff] %v10145_v11  ;;  %10285 = vst [vmem:[%s16771_s29 + $0x80] sm:$0xff] %v10206_v27 }
 0x70a   : > { %9561 = vst.msk [vmem:[#allocation2 + $0x38] sm:$0xf] %vm9546_vm2, %v9479_v38  ;;  %v11697_v43 = vpop.f32.mrf.mxu1 }
 0x70b   : > { %v9513_v55 = vpop.permute.xlu1 %9512  ;;  %10288 = vst [vmem:[%s16771_s29 + $0x98] sm:$0xff] %v11697_v43 }
 0x70c   : > { %9578 = vst.msk [vmem:[#allocation2 + $0x7c] sm:$0xf] %vm9546_vm2, %v9513_v55  ;;  %v10209_v33 = vpop.f32.mrf.mxu1 }
 0x70d   : > { %v9511_v44 = vpop.permute.xlu0 %9510  ;;  %10286 = vst [vmem:[%s16771_s29 + $0x88] sm:$0xff] %v10209_v33 }
 0x70e   : > { %9577 = vst.msk [vmem:[#allocation2 + $0x78] sm:$0xf] %vm9546_vm2, %v9511_v44 }
 0x70f   : > { %v9814_v49 = vpop.permute.xlu1 %9813 }
 0x710   : > { %9897 = vst.msk [vmem:[#allocation2 + $0x34] sm:$0xf] %vm9883_vm4, %v9814_v49 }
 0x711   : > { %v9812_v60 = vpop.permute.xlu0 %9811 }
 0x712   : > { %9896 = vst.msk [vmem:[#allocation2 + $0x30] sm:$0xf] %vm9883_vm4, %v9812_v60 }
 0x713   : > { %v9846_v50 = vpop.permute.xlu1 %9845 }
 0x714   : > { %9913 = vst.msk [vmem:[#allocation2 + $0x74] sm:$0xf] %vm9883_vm4, %v9846_v50 }
 0x715   : > { %v9844_v46 = vpop.permute.xlu0 %9843 }
 0x716   : > { %9912 = vst.msk [vmem:[#allocation2 + $0x70] sm:$0xf] %vm9883_vm4, %v9844_v46 }
 0x717   : > { %v9818_v7 = vpop.permute.xlu1 %9817 }
 0x718   : > { %9899 = vst.msk [vmem:[#allocation2 + $0x3c] sm:$0xf] %vm9883_vm4, %v9818_v7 }
 0x719   : > { %v9816_v63 = vpop.permute.xlu0 %9815  ;;  %v11846_v29 = vld [vmem:[#allocation2 + $0x30] sm:$0xff]  }
 0x71a   : > { %9898 = vst.msk [vmem:[#allocation2 + $0x38] sm:$0xf] %vm9883_vm4, %v9816_v63  ;;  %11690 = vmatprep.mubr.bf16.mxu0 %v11846_v29 }
 0x71b   : > { %v9850_v32 = vpop.permute.xlu1 %9849 }
 0x71c   : > { %9915 = vst.msk [vmem:[#allocation2 + $0x7c] sm:$0xf] %vm9883_vm4, %v9850_v32 }
 0x71d   : > { %v9848_v42 = vpop.permute.xlu0 %9847  ;;  %v11847_v40 = vld [vmem:[#allocation2 + $0x70] sm:$0xff]  }
 0x71e   : > { %9914 = vst.msk [vmem:[#allocation2 + $0x78] sm:$0xf] %vm9883_vm4, %v9848_v42  ;;  %11706 = vmatprep.mubr.bf16.mxu1 %v11847_v40 }
 0x721   : > { %v11848_v34 = vld [vmem:[#allocation2 + $0x38] sm:$0xff]  }
 0x722   : > { %11691 = vmatmul.mubr.bf16.gmra.mxu0 %v11848_v34 }
 0x725   : > { %v11849_v23 = vld [vmem:[#allocation2 + $0x78] sm:$0xff]  }
 0x726   : > { %11707 = vmatmul.mubr.bf16.gmra.mxu1 %v11849_v23 }
 0x74a   : > { %v11684_v5 = vpop.f32.mrf.mxu0 }
 0x74b   : > { %10275 = vst [vmem:[%s16771_s29 + $0x30] sm:$0xff] %v11684_v5 }
 0x74c   : > { %v10158_v39 = vpop.f32.mrf.mxu0 }
 0x74d   : > { %10273 = vst [vmem:[%s16771_s29 + $0x20] sm:$0xff] %v10158_v39 }
 0x74e   : > { %v11685_v35 = vpop.f32.mrf.mxu0  ;;  %v11700_v19 = vpop.f32.mrf.mxu1 }
 0x74f   : > { %10276 = vst [vmem:[%s16771_s29 + $0x38] sm:$0xff] %v11685_v35  ;;  %10291 = vst [vmem:[%s16771_s29 + $0xb0] sm:$0xff] %v11700_v19 }
 0x750   : > { %v10161_v17 = vpop.f32.mrf.mxu0  ;;  %v10222_v30 = vpop.f32.mrf.mxu1 }
 0x751   : > { %10274 = vst [vmem:[%s16771_s29 + $0x28] sm:$0xff] %v10161_v17  ;;  %10289 = vst [vmem:[%s16771_s29 + $0xa0] sm:$0xff] %v10222_v30 }
 0x752   : > { %v11701_v45 = vpop.f32.mrf.mxu1 }
 0x753   : > { %10292 = vst [vmem:[%s16771_s29 + $0xb8] sm:$0xff] %v11701_v45 }
 0x754   : > { %v10225_v62 = vpop.f32.mrf.mxu1 }
 0x755   : > { %10290 = vst [vmem:[%s16771_s29 + $0xa8] sm:$0xff] %v10225_v62 }
 0x792   : > { %v11688_v31 = vpop.f32.mrf.mxu0 }
 0x793   : > { %10279 = vst [vmem:[%s16771_s29 + $0x50] sm:$0xff] %v11688_v31 }
 0x794   : > { %v10174_v3 = vpop.f32.mrf.mxu0 }
 0x795   : > { %10277 = vst [vmem:[%s16771_s29 + $0x40] sm:$0xff] %v10174_v3 }
 0x796   : > { %v11689_v4 = vpop.f32.mrf.mxu0  ;;  %v11704_v24 = vpop.f32.mrf.mxu1 }
 0x797   : > { %10280 = vst [vmem:[%s16771_s29 + $0x58] sm:$0xff] %v11689_v4  ;;  %10295 = vst [vmem:[%s16771_s29 + $0xd0] sm:$0xff] %v11704_v24 }
 0x798   : > { %v10177_v57 = vpop.f32.mrf.mxu0  ;;  %v10238_v52 = vpop.f32.mrf.mxu1 }
 0x799   : > { %10278 = vst [vmem:[%s16771_s29 + $0x48] sm:$0xff] %v10177_v57  ;;  %10293 = vst [vmem:[%s16771_s29 + $0xc0] sm:$0xff] %v10238_v52 }
 0x79a   : > { %v11705_v0 = vpop.f32.mrf.mxu1 }
 0x79b   : > { %10296 = vst [vmem:[%s16771_s29 + $0xd8] sm:$0xff] %v11705_v0 }
 0x79c   : > { %v10241_v10 = vpop.f32.mrf.mxu1 }
 0x79d   : > { %10294 = vst [vmem:[%s16771_s29 + $0xc8] sm:$0xff] %v10241_v10 }
 0x7e2   : > { %v11692_v1 = vpop.f32.mrf.mxu0 }
 0x7e3   : > { %10283 = vst [vmem:[%s16771_s29 + $0x70] sm:$0xff] %v11692_v1 }
 0x7e4   : > { %v10190_v58 = vpop.f32.mrf.mxu0 }
 0x7e5   : > { %10281 = vst [vmem:[%s16771_s29 + $0x60] sm:$0xff] %v10190_v58 }
 0x7e6   : > { %v11693_v59 = vpop.f32.mrf.mxu0  ;;  %v11708_v61 = vpop.f32.mrf.mxu1 }
 0x7e7   : > { %10284 = vst [vmem:[%s16771_s29 + $0x78] sm:$0xff] %v11693_v59  ;;  %10299 = vst [vmem:[%s16771_s29 + $0xf0] sm:$0xff] %v11708_v61 }
 0x7e8   : > { %v10193_v14 = vpop.f32.mrf.mxu0  ;;  %v10254_v8 = vpop.f32.mrf.mxu1 }
 0x7e9   : > { %10282 = vst [vmem:[%s16771_s29 + $0x68] sm:$0xff] %v10193_v14  ;;  %10297 = vst [vmem:[%s16771_s29 + $0xe0] sm:$0xff] %v10254_v8 }
 0x7ea   : > { %v11709_v28 = vpop.f32.mrf.mxu1 }
 0x7eb   : > { %10300 = vst [vmem:[%s16771_s29 + $0xf8] sm:$0xff] %v11709_v28 }
 0x7ec   : > { %v10257_v16 = vpop.f32.mrf.mxu1 }
 0x7ed   : > { %10298 = vst [vmem:[%s16771_s29 + $0xe8] sm:$0xff] %v10257_v16 }
 0x7ee   : > { %11863 = shalt.err (!%p11860_p6)
}
 0x7ef   : > { %s11864_s6 = scalar_lea.hbm %s16823_s5, 4096  ;;  %s11868_s30 = scalar_lea.hbm %s16885_s2, 65536 }
 0x7f0   : > { %p11865_p7 = scmp.ne.s32.totalorder %s16823_s5, %s11864_s6  ;;  %p11869_p11 = scmp.lt.s32.totalorder %s16823_s5, %s16885_s2 }
 0x7f1   : > { %p11870_p12 = scmp.lt.s32.totalorder %s11868_s30, %s11864_s6 }
 0x7f2   : > { %p11866_p9 = pnand %p11865_p7, %p12039_p3 }
 0x7f3   : > { %p11871_p13 = por %p11870_p12, %p11869_p11 }
 0x7f4   : > { %p11867_p10 = pneg %p11866_p9 }
 0x7f6   : > { %p11872_p0 = pnand %p11871_p13, %p11867_p10 }
 0x7f8   : > { %11875 = shalt.err (!%p11872_p0)
}
 0x7f9   : > { %s11972_s3 = smov 128  }
 0x7fa   : > { %11727 = dma.vmem_to_hbm [thread:$0]  (%p12039_p3), %s16826_s4, 4096, %s16823_s5, %s16831_s7, %s11972_s3, %s11972_s3, %s11946_s8  }
 0x7fb PF: > { %p11733_p1 = scmp.ge.s32.totalorder %s11942_s16, 2  ;;  %s10332_s12 = sand.u32 1, %s11914_s9  }
 0x7fc   : > { %s10333_s13 = scalar_lea.sflag [#allocation4], %s10332_s12 }
 0x7fd   : > { %p11730_p2 = pnand %p11733_p1, %p12048_p8 }
 0x7ff   : > { %p11731_p4 = pneg %p11730_p2 }
 0x801   : > { %11909 = dma.done.wait (%p11731_p4), %s10333_s13, 4096  }
 0x802   : > { %11911 = vsyncadd (%p11731_p4), %s10333_s13, 4294963200  ;;  %s15_s16 = sadd.s32 1, %s11942_s16   ;;  %s16892_s9 = smov %s11918_s10 }
 0x803   : > { %p12_p5 = scmp.ge.s32.totalorder %s15_s16, 18   ;;  %s16893_s10 = smov %s11922_s11 }
 0x804   : > { %s16894_s11 = smov %s12057_s27  ;;  %s16895_s12 = smov %s11934_s14 }
 0x805   : > { %s16896_s13 = smov %s11938_s15  ;;  %s16897_s14 = smov %s16900_s19 }
 0x806   : > { %s16898_s15 = smov %s16904_s20  ;;  %14 = sbr.rel (!%p12_p5) target bundleno = 5 (0x5), region = 72 }
 0x80b   :  { %10338 = vsyncpa [#allocation4], 1 }
 0x80c   :  { %10340 = vsyncpa [#allocation4 + $0x1], 1 }

</bundles_post_ra>
